<compile_context>
chip_gen: v7x
topology: tpu7x:2x2x1
jax: 0.10.0
libtpu: 0.0.40
codegen_flags: <defaults>
</compile_context>

<pallas_src>
import numpy as np
import jax
import jax.numpy as jnp
from jax.experimental import pallas as pl
from jax.experimental.pallas import tpu as pltpu

EPS = 1e-5        # eps of nn.LayerNorm / nn.InstanceNorm1d
TILE_M = 512      # row tile for the token-parallel kernels (multiple of 8)


def _round_up(v, m):
    return (v + m - 1) // m * m


# ----------------------------- in-kernel math --------------------------------

def _erf(x):
    # Abramowitz & Stegun 7.1.26 polynomial (|err| < 1.5e-7): exact-GELU semantics
    # without relying on a lax.erf lowering inside Mosaic.
    s = jnp.where(x >= 0.0, 1.0, -1.0)
    z = jnp.abs(x)
    t = 1.0 / (1.0 + 0.3275911 * z)
    poly = t * (0.254829592 + t * (-0.284496736 + t * (1.421413741
               + t * (-1.453152027 + t * 1.061405429))))
    return s * (1.0 - poly * jnp.exp(-z * z))


def _gelu(x):  # nn.GELU() (exact / erf form)
    return 0.5 * x * (1.0 + _erf(x * np.float32(1.0 / np.sqrt(2.0))))


def _layernorm(x, g, b):
    mu = jnp.mean(x, axis=-1, keepdims=True)
    var = jnp.mean(jnp.square(x - mu), axis=-1, keepdims=True)
    return (x - mu) * jax.lax.rsqrt(var + EPS) * g + b


# ------------------------------ Pallas kernels --------------------------------

def _linear_nobias_kernel(x_ref, w_ref, o_ref):
    o_ref[...] = jnp.dot(x_ref[...].astype(jnp.bfloat16), w_ref[...],
                         preferred_element_type=jnp.float32)


def _ln_qkv_kernel(x_ref, g_ref, b_ref, w_ref, qkv_ref):
    a = _layernorm(x_ref[...], g_ref[...], b_ref[...])
    qkv_ref[...] = jnp.dot(a.astype(jnp.bfloat16), w_ref[...],
                           preferred_element_type=jnp.float32)


def _attn_ffn_kernel(attn_ref, w_out_ref, bo_ref, x_ref, g1_ref, b1_ref,
                     g2_ref, b2_ref, w1_ref, bf1_ref, w2_ref, bf2_ref, o_ref):
    # a = ln1(x) is recomputed here (cheap VPU work) so it never hits HBM.
    a = _layernorm(x_ref[...], g1_ref[...], b1_ref[...])
    h = jnp.dot(attn_ref[...].astype(jnp.bfloat16), w_out_ref[...],
                preferred_element_type=jnp.float32) + bo_ref[...] + a
    y = _layernorm(h, g2_ref[...], b2_ref[...])
    z = _gelu(jnp.dot(y.astype(jnp.bfloat16), w1_ref[...],
                      preferred_element_type=jnp.float32) + bf1_ref[...])
    o_ref[...] = jnp.dot(z.astype(jnp.bfloat16), w2_ref[...],
                         preferred_element_type=jnp.float32) + bf2_ref[...] + y


def _galerkin_attn_kernel(qkv_ref, cos_ref, sin_ref, o_ref):
    """Softmax-free (Galerkin) attention, all heads of one batch element.

    Per head: k, v get a per-token norm over dim_head (nn.InstanceNorm1d applied
    to a (b*h, n, d) tensor normalizes the trailing d axis, no affine), q and k
    get the 2-D rotary embedding (rotate_half done with lane slices/concat, not
    an MXU matmul), then out_h = q @ (k^T v) / n.  cos/sin are per-batch inputs
    shared by every head (no per-head duplication, no per-head DMA streams).
    Attention matmuls stay in f32 (they are a small fraction of total MXU work).
    """
    n = qkv_ref.shape[1]
    inner = o_ref.shape[2]
    d = cos_ref.shape[2]
    heads = inner // d
    quarter = d // 4
    inv_n = np.float32(1.0 / n)

    qkv = qkv_ref[0]                                   # (N, 3*inner) f32
    cosf = cos_ref[0]                                  # (N, d)
    sinf = sin_ref[0]

    def rot_half(t):                                   # rotate_half on each half of the head
        t1 = t[:, 0 * quarter:1 * quarter]
        t2 = t[:, 1 * quarter:2 * quarter]
        t3 = t[:, 2 * quarter:3 * quarter]
        t4 = t[:, 3 * quarter:4 * quarter]
        return jnp.concatenate([-t2, t1, -t4, t3], axis=-1)

    def tok_norm(t):                                   # InstanceNorm1d over d, no affine
        mu = jnp.mean(t, axis=-1, keepdims=True)
        var = jnp.mean(jnp.square(t - mu), axis=-1, keepdims=True)
        return (t - mu) * jax.lax.rsqrt(var + EPS)

    outs = []
    for h in range(heads):                             # static unroll over heads
        q = qkv[:, h * d:(h + 1) * d]
        k = tok_norm(qkv[:, inner + h * d:inner + (h + 1) * d])
        v = tok_norm(qkv[:, 2 * inner + h * d:2 * inner + (h + 1) * d])
        q = q * cosf + rot_half(q) * sinf
        k = k * cosf + rot_half(k) * sinf
        dots = jnp.dot(k.T, v, preferred_element_type=jnp.float32)            # (d, d)
        outs.append(jnp.dot(q, dots, preferred_element_type=jnp.float32) * inv_n)
    o_ref[0] = jnp.concatenate(outs, axis=-1)          # single lane-dense (N, inner) store


# ------------------------------ kernel wrappers --------------------------------

def _rows_call(kernel, inputs, row_flags, out_width):
    """Row-tiled pallas_call (single output).  Inputs flagged True are (M, K_i)
    activations tiled along rows; the rest (weights / biases) are broadcast blocks
    reused across the grid via index_map (0, 0) so they are DMA'd once."""
    m = next(a.shape[0] for a, f in zip(inputs, row_flags) if f)
    tile = min(TILE_M, _round_up(m, 8))
    pm = _round_up(m, tile)
    grid = (pm // tile,)

    ops, in_specs = [], []
    for a, is_row in zip(inputs, row_flags):
        if is_row:
            if pm != m:
                a = jnp.pad(a, ((0, pm - m), (0, 0)))
            in_specs.append(pl.BlockSpec((tile, a.shape[1]), lambda i: (i, 0)))
        else:
            in_specs.append(pl.BlockSpec(a.shape, lambda i: (0, 0)))
        ops.append(a)

    out = pl.pallas_call(
        kernel,
        grid=grid,
        in_specs=in_specs,
        out_specs=pl.BlockSpec((tile, out_width), lambda i: (i, 0)),
        out_shape=jax.ShapeDtypeStruct((pm, out_width), jnp.float32),
        compiler_params=pltpu.CompilerParams(dimension_semantics=("parallel",)),
    )(*ops)
    return out if pm == m else out[:m]


def linear_nobias(x, w):
    lead = x.shape[:-1]
    x2 = x.reshape(-1, x.shape[-1])
    out = _rows_call(_linear_nobias_kernel, [x2, w], [True, False], w.shape[1])
    return out.reshape(lead + (w.shape[1],))


def ln_qkv(x, g, b, w_qkv):
    B, N, C = x.shape
    qkv2 = _rows_call(
        _ln_qkv_kernel,
        [x.reshape(B * N, C), g.reshape(1, C), b.reshape(1, C), w_qkv],
        [True, False, False, False],
        w_qkv.shape[1])
    return qkv2.reshape(B, N, w_qkv.shape[1])


def attn_ffn_block(attn, x, w_out, b_out, g1, b1, g2, b2, w1, bf1, w2, bf2):
    B, N, inner = attn.shape
    C = x.shape[-1]
    y = _rows_call(
        _attn_ffn_kernel,
        [attn.reshape(B * N, inner), w_out, b_out.reshape(1, C),
         x.reshape(B * N, C), g1.reshape(1, C), b1.reshape(1, C),
         g2.reshape(1, C), b2.reshape(1, C),
         w1, bf1.reshape(1, -1), w2, bf2.reshape(1, C)],
        [True, False, False, True, False, False, False, False,
         False, False, False, False],
        C)
    return y.reshape(B, N, C)


def galerkin_attention_core(qkv, cosf, sinf):
    B, N, inner3 = qkv.shape
    inner = inner3 // 3
    d = cosf.shape[-1]
    # TODO(synk): add an N-reduction grid axis (accumulate k^T v in VMEM scratch)
    # for sequence lengths whose full-N block would not fit v7x's 64 MiB VMEM.
    return pl.pallas_call(
        _galerkin_attn_kernel,
        grid=(B,),
        in_specs=[
            pl.BlockSpec((1, N, inner3), lambda i: (i, 0, 0)),
            pl.BlockSpec((1, N, d), lambda i: (i, 0, 0)),
            pl.BlockSpec((1, N, d), lambda i: (i, 0, 0)),
        ],
        out_specs=pl.BlockSpec((1, N, inner), lambda i: (i, 0, 0)),
        out_shape=jax.ShapeDtypeStruct((B, N, inner), jnp.float32),
        compiler_params=pltpu.CompilerParams(dimension_semantics=("parallel",)),
    )(qkv, cosf, sinf)


# ------------------------- rotary embedding (glue) -----------------------------

def _rope_cos_sin(pos, dim_head, scale_over_min_freq):
    """RotaryEmbedding(dim_head//2) + apply_2d_rotary_pos_emb frequency tables:
    first half of each head rotates with the x coordinate, second half with y.
    Computed once per (batch, point) -- shared by all heads inside the kernel."""
    half = dim_head // 2
    inv_freq = jnp.asarray(
        1.0 / (10000.0 ** (np.arange(0, half, 2, dtype=np.float32) / half)))
    t = pos.astype(jnp.float32) * scale_over_min_freq      # (B, N, 2)
    fx = t[..., 0:1] * inv_freq                            # (B, N, dim_head//4)
    fy = t[..., 1:2] * inv_freq
    f = jnp.concatenate([fx, fx, fy, fy], axis=-1)         # (B, N, dim_head)
    return jnp.cos(f), jnp.sin(f)


# ------------------------------ forward pass -----------------------------------

def spatial_encoder_2d_forward(params, x, input_pos):
    # to_embedding (Linear, bias=False); nn.Dropout(emb_dropout) is an inference no-op
    x = linear_nobias(x, params["w_embed"])
    for lp in params["layers"]:
        dim_head = lp["ln1_g"].shape[0]          # TransformerCatNoCls built with dim_head = in_emb_dim
        cosf, sinf = _rope_cos_sin(input_pos, dim_head, lp["rope_scale"])
        qkv = ln_qkv(x, lp["ln1_g"], lp["ln1_b"], lp["w_qkv"])          # qkv = ln1(x) @ Wqkv
        attn = galerkin_attention_core(qkv, cosf, sinf)
        # x = ffn(ln2(attn@Wo + bo + ln1(x))) + ln2(...)   -- one fused row-tiled kernel
        x = attn_ffn_block(attn, x, lp["w_out"], lp["b_out"],
                           lp["ln1_g"], lp["ln1_b"], lp["ln2_g"], lp["ln2_b"],
                           lp["w1"], lp["b1"], lp["w2"], lp["b2"])
    return linear_nobias(x, params["w_to_out"])                         # to_out (bias=False)


# ------------------------------ parameter init ---------------------------------

def init_params(key, input_channels, in_emb_dim, out_seq_emb_dim, heads, depth, res):
    dim = in_emb_dim
    dim_head = in_emb_dim                  # SpatialEncoder2D passes dim_head = in_emb_dim
    inner = heads * dim_head               # heads > 1 => to_out projection present
    mlp = in_emb_dim                       # mlp_dim = in_emb_dim
    min_freq = 1.0 / res
    scales = [res, res // 4] + [1] * (depth - 2)

    kit = iter(jax.random.split(key, 8 * depth + 8))

    def dense(shape, scale=0.02):
        # TODO(synk): reference uses orthogonal/xavier init for attention weights;
        # Gaussian init used here (init-time only, forward semantics unchanged).
        return (scale * jax.random.normal(next(kit), shape, jnp.float32)).astype(jnp.bfloat16)

    layers = []
    for d in range(depth):
        layers.append({
            "ln1_g": jnp.ones((dim,), jnp.float32),
            "ln1_b": jnp.zeros((dim,), jnp.float32),
            "w_qkv": dense((dim, 3 * inner)),
            "rope_scale": jnp.float32(scales[d] / min_freq),
            "w_out": dense((inner, dim)),
            "b_out": jnp.zeros((dim,), jnp.float32),
            "ln2_g": jnp.ones((dim,), jnp.float32),
            "ln2_b": jnp.zeros((dim,), jnp.float32),
            "w1": dense((dim, mlp)),
            "b1": jnp.zeros((mlp,), jnp.float32),
            "w2": dense((mlp, dim)),
            "b2": jnp.zeros((dim,), jnp.float32),
        })

    return {
        "w_embed": dense((input_channels, dim)),
        "layers": layers,
        "w_to_out": dense((dim, out_seq_emb_dim)),
    }


# ----------------------------------- main ---------------------------------------

if __name__ == "__main__":
    key = jax.random.PRNGKey(0)
    batch, n_points = 2, 64
    input_channels, in_emb_dim, out_seq_emb_dim = 4, 64, 96
    heads, depth, res = 4, 2, 16

    kx, kp, kpar = jax.random.split(key, 3)
    x = jax.random.normal(kx, (batch, n_points, input_channels), jnp.float32)
    input_pos = jax.random.uniform(kp, (batch, n_points, 2), jnp.float32)

    params = init_params(kpar, input_channels, in_emb_dim, out_seq_emb_dim,
                         heads, depth, res)

    fwd = jax.jit(spatial_encoder_2d_forward)
    out = fwd(params, x, input_pos)
    jax.block_until_ready(out)

    assert out.shape == (batch, n_points, out_seq_emb_dim)
    assert bool(jnp.all(jnp.isfinite(out)))
    print("KERNEL_OK")
</pallas_src>

<mosaic_0001>
module attributes {stable_mosaic.version = 11 : i64} {
  func.func @_linear_nobias_kernel(%arg0: i32, %arg1: memref<128x4xf32, #tpu.memory_space<vmem>>, %arg2: memref<4x64xbf16, #tpu.memory_space<vmem>>, %arg3: memref<128x64xf32, #tpu.memory_space<vmem>>) attributes {dimension_semantics = [#tpu.dimension_semantics<parallel>], iteration_bounds = array<i64: 1>, scalar_prefetch = 0 : i64, scratch_operands = 0 : i64, tpu.core_type = #tpu.core_type<tc>, window_params = [{transform_indices = @transform_0, window_bounds = array<i64: 128, 4>}, {pipeline_mode = #tpu.pipeline_mode<synchronous>, transform_indices = @transform_1, window_bounds = array<i64: 4, 64>}, {transform_indices = @transform_2, window_bounds = array<i64: 128, 64>}]} {
    %c0 = arith.constant 0 : index
    %c0_0 = arith.constant 0 : index
    %0 = vector.load %arg1[%c0, %c0_0] : memref<128x4xf32, #tpu.memory_space<vmem>>, vector<128x4xf32>
    %1 = arith.truncf %0 : vector<128x4xf32> to vector<128x4xbf16>
    %c0_1 = arith.constant 0 : index
    %c0_2 = arith.constant 0 : index
    %2 = vector.load %arg2[%c0_1, %c0_2] : memref<4x64xbf16, #tpu.memory_space<vmem>>, vector<4x64xbf16>
    %cst = arith.constant dense<0.000000e+00> : vector<128x64xf32>
    %3 = tpu.matmul %1, %2, %cst {dimension_numbers = #tpu.dot_dimension_numbers<[1], [0], [0], [1], [0, 0, 1, 1], [], []>} : vector<128x4xbf16>, vector<4x64xbf16>, vector<128x64xf32> -> vector<128x64xf32>
    %c0_3 = arith.constant 0 : index
    %c0_4 = arith.constant 0 : index
    %4 = vector.load %arg3[%c0_3, %c0_4] : memref<128x64xf32, #tpu.memory_space<vmem>>, vector<128x64xf32>
    tpu.vector_store %arg3[%c0_3, %c0_4], %3 {strides = array<i32>} : memref<128x64xf32, #tpu.memory_space<vmem>>, vector<128x64xf32>,
    return
  }
  func.func @transform_0(%arg0: i32) -> (i32, i32) {
    %c0_i32 = arith.constant 0 : i32
    %c0_i32_0 = arith.constant 0 : i32
    return %arg0, %c0_i32 : i32, i32
  }
  func.func @transform_1(%arg0: i32) -> (i32, i32) {
    %c0_i32 = arith.constant 0 : i32
    %c0_i32_0 = arith.constant 0 : i32
    %c0_i32_1 = arith.constant 0 : i32
    return %c0_i32, %c0_i32_0 : i32, i32
  }
  func.func @transform_2(%arg0: i32) -> (i32, i32) {
    %c0_i32 = arith.constant 0 : i32
    %c0_i32_0 = arith.constant 0 : i32
    return %arg0, %c0_i32 : i32, i32
  }
}

module attributes {stable_mosaic.version = 11 : i64} {
  func.func @_ln_qkv_kernel(%arg0: i32, %arg1: memref<128x64xf32, #tpu.memory_space<vmem>>, %arg2: memref<1x64xf32, #tpu.memory_space<vmem>>, %arg3: memref<1x64xf32, #tpu.memory_space<vmem>>, %arg4: memref<64x768xbf16, #tpu.memory_space<vmem>>, %arg5: memref<128x768xf32, #tpu.memory_space<vmem>>) attributes {dimension_semantics = [#tpu.dimension_semantics<parallel>], iteration_bounds = array<i64: 1>, scalar_prefetch = 0 : i64, scratch_operands = 0 : i64, tpu.core_type = #tpu.core_type<tc>, window_params = [{transform_indices = @transform_0, window_bounds = array<i64: 128, 64>}, {pipeline_mode = #tpu.pipeline_mode<synchronous>, transform_indices = @transform_1, window_bounds = array<i64: 1, 64>}, {pipeline_mode = #tpu.pipeline_mode<synchronous>, transform_indices = @transform_2, window_bounds = array<i64: 1, 64>}, {pipeline_mode = #tpu.pipeline_mode<synchronous>, transform_indices = @transform_3, window_bounds = array<i64: 64, 768>}, {transform_indices = @transform_4, window_bounds = array<i64: 128, 768>}]} {
    %c0 = arith.constant 0 : index
    %c0_0 = arith.constant 0 : index
    %0 = vector.load %arg1[%c0, %c0_0] : memref<128x64xf32, #tpu.memory_space<vmem>>, vector<128x64xf32>
    %c0_1 = arith.constant 0 : index
    %c0_2 = arith.constant 0 : index
    %1 = vector.load %arg2[%c0_1, %c0_2] : memref<1x64xf32, #tpu.memory_space<vmem>>, vector<1x64xf32>
    %c0_3 = arith.constant 0 : index
    %c0_4 = arith.constant 0 : index
    %2 = vector.load %arg3[%c0_3, %c0_4] : memref<1x64xf32, #tpu.memory_space<vmem>>, vector<1x64xf32>
    %cst = arith.constant dense<0.000000e+00> : vector<128xf32>
    %3 = vector.multi_reduction <add>, %0, %cst [1] : vector<128x64xf32> to vector<128xf32>
    %4 = vector.shape_cast %3 : vector<128xf32> to vector<128x1xf32>
    %cst_5 = arith.constant 6.400000e+01 : f32
    %5 = vector.broadcast %cst_5 : f32 to vector<128x1xf32>
    %6 = arith.divf %4, %5 : vector<128x1xf32>
    %7 = vector.broadcast %6 : vector<128x1xf32> to vector<128x64xf32>
    %8 = arith.subf %0, %7 : vector<128x64xf32>
    %9 = arith.mulf %8, %8 : vector<128x64xf32>
    %cst_6 = arith.constant dense<0.000000e+00> : vector<128xf32>
    %10 = vector.multi_reduction <add>, %9, %cst_6 [1] : vector<128x64xf32> to vector<128xf32>
    %11 = vector.shape_cast %10 : vector<128xf32> to vector<128x1xf32>
    %cst_7 = arith.constant 6.400000e+01 : f32
    %12 = vector.broadcast %cst_7 : f32 to vector<128x1xf32>
    %13 = arith.divf %11, %12 : vector<128x1xf32>
    %14 = vector.broadcast %6 : vector<128x1xf32> to vector<128x64xf32>
    %15 = arith.subf %0, %14 : vector<128x64xf32>
    %cst_8 = arith.constant 9.99999974E-6 : f32
    %16 = vector.broadcast %cst_8 : f32 to vector<128x1xf32>
    %17 = arith.addf %13, %16 : vector<128x1xf32>
    %18 = math.rsqrt %17 : vector<128x1xf32>
    %19 = vector.broadcast %18 : vector<128x1xf32> to vector<128x64xf32>
    %20 = arith.mulf %15, %19 : vector<128x64xf32>
    %21 = vector.broadcast %1 : vector<1x64xf32> to vector<128x64xf32>
    %22 = arith.mulf %20, %21 : vector<128x64xf32>
    %23 = vector.broadcast %2 : vector<1x64xf32> to vector<128x64xf32>
    %24 = arith.addf %22, %23 : vector<128x64xf32>
    %25 = arith.truncf %24 : vector<128x64xf32> to vector<128x64xbf16>
    %c0_9 = arith.constant 0 : index
    %c0_10 = arith.constant 0 : index
    %26 = vector.load %arg4[%c0_9, %c0_10] : memref<64x768xbf16, #tpu.memory_space<vmem>>, vector<64x768xbf16>
    %cst_11 = arith.constant dense<0.000000e+00> : vector<128x768xf32>
    %27 = tpu.matmul %25, %26, %cst_11 {dimension_numbers = #tpu.dot_dimension_numbers<[1], [0], [0], [1], [0, 0, 1, 1], [], []>} : vector<128x64xbf16>, vector<64x768xbf16>, vector<128x768xf32> -> vector<128x768xf32>
    %c0_12 = arith.constant 0 : index
    %c0_13 = arith.constant 0 : index
    %28 = vector.load %arg5[%c0_12, %c0_13] : memref<128x768xf32, #tpu.memory_space<vmem>>, vector<128x768xf32>
    tpu.vector_store %arg5[%c0_12, %c0_13], %27 {strides = array<i32>} : memref<128x768xf32, #tpu.memory_space<vmem>>, vector<128x768xf32>,
    return
  }
  func.func @transform_0(%arg0: i32) -> (i32, i32) {
    %c0_i32 = arith.constant 0 : i32
    %c0_i32_0 = arith.constant 0 : i32
    return %arg0, %c0_i32 : i32, i32
  }
  func.func @transform_1(%arg0: i32) -> (i32, i32) {
    %c0_i32 = arith.constant 0 : i32
    %c0_i32_0 = arith.constant 0 : i32
    %c0_i32_1 = arith.constant 0 : i32
    return %c0_i32, %c0_i32_0 : i32, i32
  }
  func.func @transform_2(%arg0: i32) -> (i32, i32) {
    %c0_i32 = arith.constant 0 : i32
    %c0_i32_0 = arith.constant 0 : i32
    %c0_i32_1 = arith.constant 0 : i32
    return %c0_i32, %c0_i32_0 : i32, i32
  }
  func.func @transform_3(%arg0: i32) -> (i32, i32) {
    %c0_i32 = arith.constant 0 : i32
    %c0_i32_0 = arith.constant 0 : i32
    %c0_i32_1 = arith.constant 0 : i32
    return %c0_i32, %c0_i32_0 : i32, i32
  }
  func.func @transform_4(%arg0: i32) -> (i32, i32) {
    %c0_i32 = arith.constant 0 : i32
    %c0_i32_0 = arith.constant 0 : i32
    return %arg0, %c0_i32 : i32, i32
  }
}

module attributes {stable_mosaic.version = 11 : i64} {
  func.func @_galerkin_attn_kernel(%arg0: i32, %arg1: memref<1x64x768xf32, #tpu.memory_space<vmem>>, %arg2: memref<1x64x64xf32, #tpu.memory_space<vmem>>, %arg3: memref<1x64x64xf32, #tpu.memory_space<vmem>>, %arg4: memref<1x64x256xf32, #tpu.memory_space<vmem>>) attributes {dimension_semantics = [#tpu.dimension_semantics<parallel>], iteration_bounds = array<i64: 2>, scalar_prefetch = 0 : i64, scratch_operands = 0 : i64, tpu.core_type = #tpu.core_type<tc>, window_params = [{transform_indices = @transform_0, window_bounds = array<i64: 1, 64, 768>}, {transform_indices = @transform_1, window_bounds = array<i64: 1, 64, 64>}, {transform_indices = @transform_2, window_bounds = array<i64: 1, 64, 64>}, {transform_indices = @transform_3, window_bounds = array<i64: 1, 64, 256>}]} {
    %c0 = arith.constant 0 : index
    %c0_0 = arith.constant 0 : index
    %c0_1 = arith.constant 0 : index
    %0 = vector.load %arg1[%c0, %c0_0, %c0_1] : memref<1x64x768xf32, #tpu.memory_space<vmem>>, vector<1x64x768xf32>
    %1 = vector.shape_cast %0 : vector<1x64x768xf32> to vector<64x768xf32>
    %c0_2 = arith.constant 0 : index
    %c0_3 = arith.constant 0 : index
    %c0_4 = arith.constant 0 : index
    %2 = vector.load %arg2[%c0_2, %c0_3, %c0_4] : memref<1x64x64xf32, #tpu.memory_space<vmem>>, vector<1x64x64xf32>
    %3 = vector.shape_cast %2 : vector<1x64x64xf32> to vector<64x64xf32>
    %c0_5 = arith.constant 0 : index
    %c0_6 = arith.constant 0 : index
    %c0_7 = arith.constant 0 : index
    %4 = vector.load %arg3[%c0_5, %c0_6, %c0_7] : memref<1x64x64xf32, #tpu.memory_space<vmem>>, vector<1x64x64xf32>
    %5 = vector.shape_cast %4 : vector<1x64x64xf32> to vector<64x64xf32>
    %6 = vector.extract_strided_slice %1 {offsets = [0, 0], sizes = [64, 64], strides = [1, 1]} : vector<64x768xf32> to vector<64x64xf32>
    %7 = vector.extract_strided_slice %1 {offsets = [0, 256], sizes = [64, 64], strides = [1, 1]} : vector<64x768xf32> to vector<64x64xf32>
    %cst = arith.constant dense<0.000000e+00> : vector<64xf32>
    %8 = vector.multi_reduction <add>, %7, %cst [1] : vector<64x64xf32> to vector<64xf32>
    %9 = vector.shape_cast %8 : vector<64xf32> to vector<64x1xf32>
    %cst_8 = arith.constant 6.400000e+01 : f32
    %10 = vector.broadcast %cst_8 : f32 to vector<64x1xf32>
    %11 = arith.divf %9, %10 : vector<64x1xf32>
    %12 = vector.broadcast %11 : vector<64x1xf32> to vector<64x64xf32>
    %13 = arith.subf %7, %12 : vector<64x64xf32>
    %14 = arith.mulf %13, %13 : vector<64x64xf32>
    %cst_9 = arith.constant dense<0.000000e+00> : vector<64xf32>
    %15 = vector.multi_reduction <add>, %14, %cst_9 [1] : vector<64x64xf32> to vector<64xf32>
    %16 = vector.shape_cast %15 : vector<64xf32> to vector<64x1xf32>
    %cst_10 = arith.constant 6.400000e+01 : f32
    %17 = vector.broadcast %cst_10 : f32 to vector<64x1xf32>
    %18 = arith.divf %16, %17 : vector<64x1xf32>
    %19 = vector.broadcast %11 : vector<64x1xf32> to vector<64x64xf32>
    %20 = arith.subf %7, %19 : vector<64x64xf32>
    %cst_11 = arith.constant 9.99999974E-6 : f32
    %21 = vector.broadcast %cst_11 : f32 to vector<64x1xf32>
    %22 = arith.addf %18, %21 : vector<64x1xf32>
    %23 = math.rsqrt %22 : vector<64x1xf32>
    %24 = vector.broadcast %23 : vector<64x1xf32> to vector<64x64xf32>
    %25 = arith.mulf %20, %24 : vector<64x64xf32>
    %26 = vector.extract_strided_slice %1 {offsets = [0, 512], sizes = [64, 64], strides = [1, 1]} : vector<64x768xf32> to vector<64x64xf32>
    %cst_12 = arith.constant dense<0.000000e+00> : vector<64xf32>
    %27 = vector.multi_reduction <add>, %26, %cst_12 [1] : vector<64x64xf32> to vector<64xf32>
    %28 = vector.shape_cast %27 : vector<64xf32> to vector<64x1xf32>
    %cst_13 = arith.constant 6.400000e+01 : f32
    %29 = vector.broadcast %cst_13 : f32 to vector<64x1xf32>
    %30 = arith.divf %28, %29 : vector<64x1xf32>
    %31 = vector.broadcast %30 : vector<64x1xf32> to vector<64x64xf32>
    %32 = arith.subf %26, %31 : vector<64x64xf32>
    %33 = arith.mulf %32, %32 : vector<64x64xf32>
    %cst_14 = arith.constant dense<0.000000e+00> : vector<64xf32>
    %34 = vector.multi_reduction <add>, %33, %cst_14 [1] : vector<64x64xf32> to vector<64xf32>
    %35 = vector.shape_cast %34 : vector<64xf32> to vector<64x1xf32>
    %cst_15 = arith.constant 6.400000e+01 : f32
    %36 = vector.broadcast %cst_15 : f32 to vector<64x1xf32>
    %37 = arith.divf %35, %36 : vector<64x1xf32>
    %38 = vector.broadcast %30 : vector<64x1xf32> to vector<64x64xf32>
    %39 = arith.subf %26, %38 : vector<64x64xf32>
    %cst_16 = arith.constant 9.99999974E-6 : f32
    %40 = vector.broadcast %cst_16 : f32 to vector<64x1xf32>
    %41 = arith.addf %37, %40 : vector<64x1xf32>
    %42 = math.rsqrt %41 : vector<64x1xf32>
    %43 = vector.broadcast %42 : vector<64x1xf32> to vector<64x64xf32>
    %44 = arith.mulf %39, %43 : vector<64x64xf32>
    %45 = arith.mulf %6, %3 : vector<64x64xf32>
    %46 = vector.extract_strided_slice %6 {offsets = [0, 0], sizes = [64, 16], strides = [1, 1]} : vector<64x64xf32> to vector<64x16xf32>
    %47 = vector.extract_strided_slice %6 {offsets = [0, 16], sizes = [64, 16], strides = [1, 1]} : vector<64x64xf32> to vector<64x16xf32>
    %48 = vector.extract_strided_slice %6 {offsets = [0, 32], sizes = [64, 16], strides = [1, 1]} : vector<64x64xf32> to vector<64x16xf32>
    %49 = vector.extract_strided_slice %6 {offsets = [0, 48], sizes = [64, 16], strides = [1, 1]} : vector<64x64xf32> to vector<64x16xf32>
    %cst_17 = arith.constant 0.000000e+00 : f32
    %50 = vector.broadcast %cst_17 : f32 to vector<64x16xf32>
    %51 = arith.subf %50, %47 : vector<64x16xf32>
    %cst_18 = arith.constant 0.000000e+00 : f32
    %52 = vector.broadcast %cst_18 : f32 to vector<64x16xf32>
    %53 = arith.subf %52, %49 : vector<64x16xf32>
    %54 = tpu.concatenate %51, %46, %53, %48 in 1 : vector<64x16xf32>, vector<64x16xf32>, vector<64x16xf32>, vector<64x16xf32> -> vector<64x64xf32>
    %55 = arith.mulf %54, %5 : vector<64x64xf32>
    %56 = arith.addf %45, %55 : vector<64x64xf32>
    %57 = arith.mulf %25, %3 : vector<64x64xf32>
    %58 = vector.extract_strided_slice %25 {offsets = [0, 0], sizes = [64, 16], strides = [1, 1]} : vector<64x64xf32> to vector<64x16xf32>
    %59 = vector.extract_strided_slice %25 {offsets = [0, 16], sizes = [64, 16], strides = [1, 1]} : vector<64x64xf32> to vector<64x16xf32>
    %60 = vector.extract_strided_slice %25 {offsets = [0, 32], sizes = [64, 16], strides = [1, 1]} : vector<64x64xf32> to vector<64x16xf32>
    %61 = vector.extract_strided_slice %25 {offsets = [0, 48], sizes = [64, 16], strides = [1, 1]} : vector<64x64xf32> to vector<64x16xf32>
    %cst_19 = arith.constant 0.000000e+00 : f32
    %62 = vector.broadcast %cst_19 : f32 to vector<64x16xf32>
    %63 = arith.subf %62, %59 : vector<64x16xf32>
    %cst_20 = arith.constant 0.000000e+00 : f32
    %64 = vector.broadcast %cst_20 : f32 to vector<64x16xf32>
    %65 = arith.subf %64, %61 : vector<64x16xf32>
    %66 = tpu.concatenate %63, %58, %65, %60 in 1 : vector<64x16xf32>, vector<64x16xf32>, vector<64x16xf32>, vector<64x16xf32> -> vector<64x64xf32>
    %67 = arith.mulf %66, %5 : vector<64x64xf32>
    %68 = arith.addf %57, %67 : vector<64x64xf32>
    %69 = tpu.transpose %68, [1, 0] : vector<64x64xf32> -> vector<64x64xf32>
    %cst_21 = arith.constant dense<0.000000e+00> : vector<64x64xf32>
    %70 = tpu.matmul %69, %44, %cst_21 {dimension_numbers = #tpu.dot_dimension_numbers<[1], [0], [0], [1], [0, 0, 1, 1], [], []>} : vector<64x64xf32>, vector<64x64xf32>, vector<64x64xf32> -> vector<64x64xf32>
    %cst_22 = arith.constant dense<0.000000e+00> : vector<64x64xf32>
    %71 = tpu.matmul %56, %70, %cst_22 {dimension_numbers = #tpu.dot_dimension_numbers<[1], [0], [0], [1], [0, 0, 1, 1], [], []>} : vector<64x64xf32>, vector<64x64xf32>, vector<64x64xf32> -> vector<64x64xf32>
    %cst_23 = arith.constant 1.562500e-02 : f32
    %72 = vector.broadcast %cst_23 : f32 to vector<64x64xf32>
    %73 = arith.mulf %71, %72 : vector<64x64xf32>
    %74 = vector.extract_strided_slice %1 {offsets = [0, 64], sizes = [64, 64], strides = [1, 1]} : vector<64x768xf32> to vector<64x64xf32>
    %75 = vector.extract_strided_slice %1 {offsets = [0, 320], sizes = [64, 64], strides = [1, 1]} : vector<64x768xf32> to vector<64x64xf32>
    %cst_24 = arith.constant dense<0.000000e+00> : vector<64xf32>
    %76 = vector.multi_reduction <add>, %75, %cst_24 [1] : vector<64x64xf32> to vector<64xf32>
    %77 = vector.shape_cast %76 : vector<64xf32> to vector<64x1xf32>
    %cst_25 = arith.constant 6.400000e+01 : f32
    %78 = vector.broadcast %cst_25 : f32 to vector<64x1xf32>
    %79 = arith.divf %77, %78 : vector<64x1xf32>
    %80 = vector.broadcast %79 : vector<64x1xf32> to vector<64x64xf32>
    %81 = arith.subf %75, %80 : vector<64x64xf32>
    %82 = arith.mulf %81, %81 : vector<64x64xf32>
    %cst_26 = arith.constant dense<0.000000e+00> : vector<64xf32>
    %83 = vector.multi_reduction <add>, %82, %cst_26 [1] : vector<64x64xf32> to vector<64xf32>
    %84 = vector.shape_cast %83 : vector<64xf32> to vector<64x1xf32>
    %cst_27 = arith.constant 6.400000e+01 : f32
    %85 = vector.broadcast %cst_27 : f32 to vector<64x1xf32>
    %86 = arith.divf %84, %85 : vector<64x1xf32>
    %87 = vector.broadcast %79 : vector<64x1xf32> to vector<64x64xf32>
    %88 = arith.subf %75, %87 : vector<64x64xf32>
    %cst_28 = arith.constant 9.99999974E-6 : f32
    %89 = vector.broadcast %cst_28 : f32 to vector<64x1xf32>
    %90 = arith.addf %86, %89 : vector<64x1xf32>
    %91 = math.rsqrt %90 : vector<64x1xf32>
    %92 = vector.broadcast %91 : vector<64x1xf32> to vector<64x64xf32>
    %93 = arith.mulf %88, %92 : vector<64x64xf32>
    %94 = vector.extract_strided_slice %1 {offsets = [0, 576], sizes = [64, 64], strides = [1, 1]} : vector<64x768xf32> to vector<64x64xf32>
    %cst_29 = arith.constant dense<0.000000e+00> : vector<64xf32>
    %95 = vector.multi_reduction <add>, %94, %cst_29 [1] : vector<64x64xf32> to vector<64xf32>
    %96 = vector.shape_cast %95 : vector<64xf32> to vector<64x1xf32>
    %cst_30 = arith.constant 6.400000e+01 : f32
    %97 = vector.broadcast %cst_30 : f32 to vector<64x1xf32>
    %98 = arith.divf %96, %97 : vector<64x1xf32>
    %99 = vector.broadcast %98 : vector<64x1xf32> to vector<64x64xf32>
    %100 = arith.subf %94, %99 : vector<64x64xf32>
    %101 = arith.mulf %100, %100 : vector<64x64xf32>
    %cst_31 = arith.constant dense<0.000000e+00> : vector<64xf32>
    %102 = vector.multi_reduction <add>, %101, %cst_31 [1] : vector<64x64xf32> to vector<64xf32>
    %103 = vector.shape_cast %102 : vector<64xf32> to vector<64x1xf32>
    %cst_32 = arith.constant 6.400000e+01 : f32
    %104 = vector.broadcast %cst_32 : f32 to vector<64x1xf32>
    %105 = arith.divf %103, %104 : vector<64x1xf32>
    %106 = vector.broadcast %98 : vector<64x1xf32> to vector<64x64xf32>
    %107 = arith.subf %94, %106 : vector<64x64xf32>
    %cst_33 = arith.constant 9.99999974E-6 : f32
    %108 = vector.broadcast %cst_33 : f32 to vector<64x1xf32>
    %109 = arith.addf %105, %108 : vector<64x1xf32>
    %110 = math.rsqrt %109 : vector<64x1xf32>
    %111 = vector.broadcast %110 : vector<64x1xf32> to vector<64x64xf32>
    %112 = arith.mulf %107, %111 : vector<64x64xf32>
    %113 = arith.mulf %74, %3 : vector<64x64xf32>
    %114 = vector.extract_strided_slice %74 {offsets = [0, 0], sizes = [64, 16], strides = [1, 1]} : vector<64x64xf32> to vector<64x16xf32>
    %115 = vector.extract_strided_slice %74 {offsets = [0, 16], sizes = [64, 16], strides = [1, 1]} : vector<64x64xf32> to vector<64x16xf32>
    %116 = vector.extract_strided_slice %74 {offsets = [0, 32], sizes = [64, 16], strides = [1, 1]} : vector<64x64xf32> to vector<64x16xf32>
    %117 = vector.extract_strided_slice %74 {offsets = [0, 48], sizes = [64, 16], strides = [1, 1]} : vector<64x64xf32> to vector<64x16xf32>
    %cst_34 = arith.constant 0.000000e+00 : f32
    %118 = vector.broadcast %cst_34 : f32 to vector<64x16xf32>
    %119 = arith.subf %118, %115 : vector<64x16xf32>
    %cst_35 = arith.constant 0.000000e+00 : f32
    %120 = vector.broadcast %cst_35 : f32 to vector<64x16xf32>
    %121 = arith.subf %120, %117 : vector<64x16xf32>
    %122 = tpu.concatenate %119, %114, %121, %116 in 1 : vector<64x16xf32>, vector<64x16xf32>, vector<64x16xf32>, vector<64x16xf32> -> vector<64x64xf32>
    %123 = arith.mulf %122, %5 : vector<64x64xf32>
    %124 = arith.addf %113, %123 : vector<64x64xf32>
    %125 = arith.mulf %93, %3 : vector<64x64xf32>
    %126 = vector.extract_strided_slice %93 {offsets = [0, 0], sizes = [64, 16], strides = [1, 1]} : vector<64x64xf32> to vector<64x16xf32>
    %127 = vector.extract_strided_slice %93 {offsets = [0, 16], sizes = [64, 16], strides = [1, 1]} : vector<64x64xf32> to vector<64x16xf32>
    %128 = vector.extract_strided_slice %93 {offsets = [0, 32], sizes = [64, 16], strides = [1, 1]} : vector<64x64xf32> to vector<64x16xf32>
    %129 = vector.extract_strided_slice %93 {offsets = [0, 48], sizes = [64, 16], strides = [1, 1]} : vector<64x64xf32> to vector<64x16xf32>
    %cst_36 = arith.constant 0.000000e+00 : f32
    %130 = vector.broadcast %cst_36 : f32 to vector<64x16xf32>
    %131 = arith.subf %130, %127 : vector<64x16xf32>
    %cst_37 = arith.constant 0.000000e+00 : f32
    %132 = vector.broadcast %cst_37 : f32 to vector<64x16xf32>
    %133 = arith.subf %132, %129 : vector<64x16xf32>
    %134 = tpu.concatenate %131, %126, %133, %128 in 1 : vector<64x16xf32>, vector<64x16xf32>, vector<64x16xf32>, vector<64x16xf32> -> vector<64x64xf32>
    %135 = arith.mulf %134, %5 : vector<64x64xf32>
    %136 = arith.addf %125, %135 : vector<64x64xf32>
    %137 = tpu.transpose %136, [1, 0] : vector<64x64xf32> -> vector<64x64xf32>
    %cst_38 = arith.constant dense<0.000000e+00> : vector<64x64xf32>
    %138 = tpu.matmul %137, %112, %cst_38 {dimension_numbers = #tpu.dot_dimension_numbers<[1], [0], [0], [1], [0, 0, 1, 1], [], []>} : vector<64x64xf32>, vector<64x64xf32>, vector<64x64xf32> -> vector<64x64xf32>
    %cst_39 = arith.constant dense<0.000000e+00> : vector<64x64xf32>
    %139 = tpu.matmul %124, %138, %cst_39 {dimension_numbers = #tpu.dot_dimension_numbers<[1], [0], [0], [1], [0, 0, 1, 1], [], []>} : vector<64x64xf32>, vector<64x64xf32>, vector<64x64xf32> -> vector<64x64xf32>
    %cst_40 = arith.constant 1.562500e-02 : f32
    %140 = vector.broadcast %cst_40 : f32 to vector<64x64xf32>
    %141 = arith.mulf %139, %140 : vector<64x64xf32>
    %142 = vector.extract_strided_slice %1 {offsets = [0, 128], sizes = [64, 64], strides = [1, 1]} : vector<64x768xf32> to vector<64x64xf32>
    %143 = vector.extract_strided_slice %1 {offsets = [0, 384], sizes = [64, 64], strides = [1, 1]} : vector<64x768xf32> to vector<64x64xf32>
    %cst_41 = arith.constant dense<0.000000e+00> : vector<64xf32>
    %144 = vector.multi_reduction <add>, %143, %cst_41 [1] : vector<64x64xf32> to vector<64xf32>
    %145 = vector.shape_cast %144 : vector<64xf32> to vector<64x1xf32>
    %cst_42 = arith.constant 6.400000e+01 : f32
    %146 = vector.broadcast %cst_42 : f32 to vector<64x1xf32>
    %147 = arith.divf %145, %146 : vector<64x1xf32>
    %148 = vector.broadcast %147 : vector<64x1xf32> to vector<64x64xf32>
    %149 = arith.subf %143, %148 : vector<64x64xf32>
    %150 = arith.mulf %149, %149 : vector<64x64xf32>
    %cst_43 = arith.constant dense<0.000000e+00> : vector<64xf32>
    %151 = vector.multi_reduction <add>, %150, %cst_43 [1] : vector<64x64xf32> to vector<64xf32>
    %152 = vector.shape_cast %151 : vector<64xf32> to vector<64x1xf32>
    %cst_44 = arith.constant 6.400000e+01 : f32
    %153 = vector.broadcast %cst_44 : f32 to vector<64x1xf32>
    %154 = arith.divf %152, %153 : vector<64x1xf32>
    %155 = vector.broadcast %147 : vector<64x1xf32> to vector<64x64xf32>
    %156 = arith.subf %143, %155 : vector<64x64xf32>
    %cst_45 = arith.constant 9.99999974E-6 : f32
    %157 = vector.broadcast %cst_45 : f32 to vector<64x1xf32>
    %158 = arith.addf %154, %157 : vector<64x1xf32>
    %159 = math.rsqrt %158 : vector<64x1xf32>
    %160 = vector.broadcast %159 : vector<64x1xf32> to vector<64x64xf32>
    %161 = arith.mulf %156, %160 : vector<64x64xf32>
    %162 = vector.extract_strided_slice %1 {offsets = [0, 640], sizes = [64, 64], strides = [1, 1]} : vector<64x768xf32> to vector<64x64xf32>
    %cst_46 = arith.constant dense<0.000000e+00> : vector<64xf32>
    %163 = vector.multi_reduction <add>, %162, %cst_46 [1] : vector<64x64xf32> to vector<64xf32>
    %164 = vector.shape_cast %163 : vector<64xf32> to vector<64x1xf32>
    %cst_47 = arith.constant 6.400000e+01 : f32
    %165 = vector.broadcast %cst_47 : f32 to vector<64x1xf32>
    %166 = arith.divf %164, %165 : vector<64x1xf32>
    %167 = vector.broadcast %166 : vector<64x1xf32> to vector<64x64xf32>
    %168 = arith.subf %162, %167 : vector<64x64xf32>
    %169 = arith.mulf %168, %168 : vector<64x64xf32>
    %cst_48 = arith.constant dense<0.000000e+00> : vector<64xf32>
    %170 = vector.multi_reduction <add>, %169, %cst_48 [1] : vector<64x64xf32> to vector<64xf32>
    %171 = vector.shape_cast %170 : vector<64xf32> to vector<64x1xf32>
    %cst_49 = arith.constant 6.400000e+01 : f32
    %172 = vector.broadcast %cst_49 : f32 to vector<64x1xf32>
    %173 = arith.divf %171, %172 : vector<64x1xf32>
    %174 = vector.broadcast %166 : vector<64x1xf32> to vector<64x64xf32>
    %175 = arith.subf %162, %174 : vector<64x64xf32>
    %cst_50 = arith.constant 9.99999974E-6 : f32
    %176 = vector.broadcast %cst_50 : f32 to vector<64x1xf32>
    %177 = arith.addf %173, %176 : vector<64x1xf32>
    %178 = math.rsqrt %177 : vector<64x1xf32>
    %179 = vector.broadcast %178 : vector<64x1xf32> to vector<64x64xf32>
    %180 = arith.mulf %175, %179 : vector<64x64xf32>
    %181 = arith.mulf %142, %3 : vector<64x64xf32>
    %182 = vector.extract_strided_slice %142 {offsets = [0, 0], sizes = [64, 16], strides = [1, 1]} : vector<64x64xf32> to vector<64x16xf32>
    %183 = vector.extract_strided_slice %142 {offsets = [0, 16], sizes = [64, 16], strides = [1, 1]} : vector<64x64xf32> to vector<64x16xf32>
    %184 = vector.extract_strided_slice %142 {offsets = [0, 32], sizes = [64, 16], strides = [1, 1]} : vector<64x64xf32> to vector<64x16xf32>
    %185 = vector.extract_strided_slice %142 {offsets = [0, 48], sizes = [64, 16], strides = [1, 1]} : vector<64x64xf32> to vector<64x16xf32>
    %cst_51 = arith.constant 0.000000e+00 : f32
    %186 = vector.broadcast %cst_51 : f32 to vector<64x16xf32>
    %187 = arith.subf %186, %183 : vector<64x16xf32>
    %cst_52 = arith.constant 0.000000e+00 : f32
    %188 = vector.broadcast %cst_52 : f32 to vector<64x16xf32>
    %189 = arith.subf %188, %185 : vector<64x16xf32>
    %190 = tpu.concatenate %187, %182, %189, %184 in 1 : vector<64x16xf32>, vector<64x16xf32>, vector<64x16xf32>, vector<64x16xf32> -> vector<64x64xf32>
    %191 = arith.mulf %190, %5 : vector<64x64xf32>
    %192 = arith.addf %181, %191 : vector<64x64xf32>
    %193 = arith.mulf %161, %3 : vector<64x64xf32>
    %194 = vector.extract_strided_slice %161 {offsets = [0, 0], sizes = [64, 16], strides = [1, 1]} : vector<64x64xf32> to vector<64x16xf32>
    %195 = vector.extract_strided_slice %161 {offsets = [0, 16], sizes = [64, 16], strides = [1, 1]} : vector<64x64xf32> to vector<64x16xf32>
    %196 = vector.extract_strided_slice %161 {offsets = [0, 32], sizes = [64, 16], strides = [1, 1]} : vector<64x64xf32> to vector<64x16xf32>
    %197 = vector.extract_strided_slice %161 {offsets = [0, 48], sizes = [64, 16], strides = [1, 1]} : vector<64x64xf32> to vector<64x16xf32>
    %cst_53 = arith.constant 0.000000e+00 : f32
    %198 = vector.broadcast %cst_53 : f32 to vector<64x16xf32>
    %199 = arith.subf %198, %195 : vector<64x16xf32>
    %cst_54 = arith.constant 0.000000e+00 : f32
    %200 = vector.broadcast %cst_54 : f32 to vector<64x16xf32>
    %201 = arith.subf %200, %197 : vector<64x16xf32>
    %202 = tpu.concatenate %199, %194, %201, %196 in 1 : vector<64x16xf32>, vector<64x16xf32>, vector<64x16xf32>, vector<64x16xf32> -> vector<64x64xf32>
    %203 = arith.mulf %202, %5 : vector<64x64xf32>
    %204 = arith.addf %193, %203 : vector<64x64xf32>
    %205 = tpu.transpose %204, [1, 0] : vector<64x64xf32> -> vector<64x64xf32>
    %cst_55 = arith.constant dense<0.000000e+00> : vector<64x64xf32>
    %206 = tpu.matmul %205, %180, %cst_55 {dimension_numbers = #tpu.dot_dimension_numbers<[1], [0], [0], [1], [0, 0, 1, 1], [], []>} : vector<64x64xf32>, vector<64x64xf32>, vector<64x64xf32> -> vector<64x64xf32>
    %cst_56 = arith.constant dense<0.000000e+00> : vector<64x64xf32>
    %207 = tpu.matmul %192, %206, %cst_56 {dimension_numbers = #tpu.dot_dimension_numbers<[1], [0], [0], [1], [0, 0, 1, 1], [], []>} : vector<64x64xf32>, vector<64x64xf32>, vector<64x64xf32> -> vector<64x64xf32>
    %cst_57 = arith.constant 1.562500e-02 : f32
    %208 = vector.broadcast %cst_57 : f32 to vector<64x64xf32>
    %209 = arith.mulf %207, %208 : vector<64x64xf32>
    %210 = vector.extract_strided_slice %1 {offsets = [0, 192], sizes = [64, 64], strides = [1, 1]} : vector<64x768xf32> to vector<64x64xf32>
    %211 = vector.extract_strided_slice %1 {offsets = [0, 448], sizes = [64, 64], strides = [1, 1]} : vector<64x768xf32> to vector<64x64xf32>
    %cst_58 = arith.constant dense<0.000000e+00> : vector<64xf32>
    %212 = vector.multi_reduction <add>, %211, %cst_58 [1] : vector<64x64xf32> to vector<64xf32>
    %213 = vector.shape_cast %212 : vector<64xf32> to vector<64x1xf32>
    %cst_59 = arith.constant 6.400000e+01 : f32
    %214 = vector.broadcast %cst_59 : f32 to vector<64x1xf32>
    %215 = arith.divf %213, %214 : vector<64x1xf32>
    %216 = vector.broadcast %215 : vector<64x1xf32> to vector<64x64xf32>
    %217 = arith.subf %211, %216 : vector<64x64xf32>
    %218 = arith.mulf %217, %217 : vector<64x64xf32>
    %cst_60 = arith.constant dense<0.000000e+00> : vector<64xf32>
    %219 = vector.multi_reduction <add>, %218, %cst_60 [1] : vector<64x64xf32> to vector<64xf32>
    %220 = vector.shape_cast %219 : vector<64xf32> to vector<64x1xf32>
    %cst_61 = arith.constant 6.400000e+01 : f32
    %221 = vector.broadcast %cst_61 : f32 to vector<64x1xf32>
    %222 = arith.divf %220, %221 : vector<64x1xf32>
    %223 = vector.broadcast %215 : vector<64x1xf32> to vector<64x64xf32>
    %224 = arith.subf %211, %223 : vector<64x64xf32>
    %cst_62 = arith.constant 9.99999974E-6 : f32
    %225 = vector.broadcast %cst_62 : f32 to vector<64x1xf32>
    %226 = arith.addf %222, %225 : vector<64x1xf32>
    %227 = math.rsqrt %226 : vector<64x1xf32>
    %228 = vector.broadcast %227 : vector<64x1xf32> to vector<64x64xf32>
    %229 = arith.mulf %224, %228 : vector<64x64xf32>
    %230 = vector.extract_strided_slice %1 {offsets = [0, 704], sizes = [64, 64], strides = [1, 1]} : vector<64x768xf32> to vector<64x64xf32>
    %cst_63 = arith.constant dense<0.000000e+00> : vector<64xf32>
    %231 = vector.multi_reduction <add>, %230, %cst_63 [1] : vector<64x64xf32> to vector<64xf32>
    %232 = vector.shape_cast %231 : vector<64xf32> to vector<64x1xf32>
    %cst_64 = arith.constant 6.400000e+01 : f32
    %233 = vector.broadcast %cst_64 : f32 to vector<64x1xf32>
    %234 = arith.divf %232, %233 : vector<64x1xf32>
    %235 = vector.broadcast %234 : vector<64x1xf32> to vector<64x64xf32>
    %236 = arith.subf %230, %235 : vector<64x64xf32>
    %237 = arith.mulf %236, %236 : vector<64x64xf32>
    %cst_65 = arith.constant dense<0.000000e+00> : vector<64xf32>
    %238 = vector.multi_reduction <add>, %237, %cst_65 [1] : vector<64x64xf32> to vector<64xf32>
    %239 = vector.shape_cast %238 : vector<64xf32> to vector<64x1xf32>
    %cst_66 = arith.constant 6.400000e+01 : f32
    %240 = vector.broadcast %cst_66 : f32 to vector<64x1xf32>
    %241 = arith.divf %239, %240 : vector<64x1xf32>
    %242 = vector.broadcast %234 : vector<64x1xf32> to vector<64x64xf32>
    %243 = arith.subf %230, %242 : vector<64x64xf32>
    %cst_67 = arith.constant 9.99999974E-6 : f32
    %244 = vector.broadcast %cst_67 : f32 to vector<64x1xf32>
    %245 = arith.addf %241, %244 : vector<64x1xf32>
    %246 = math.rsqrt %245 : vector<64x1xf32>
    %247 = vector.broadcast %246 : vector<64x1xf32> to vector<64x64xf32>
    %248 = arith.mulf %243, %247 : vector<64x64xf32>
    %249 = arith.mulf %210, %3 : vector<64x64xf32>
    %250 = vector.extract_strided_slice %210 {offsets = [0, 0], sizes = [64, 16], strides = [1, 1]} : vector<64x64xf32> to vector<64x16xf32>
    %251 = vector.extract_strided_slice %210 {offsets = [0, 16], sizes = [64, 16], strides = [1, 1]} : vector<64x64xf32> to vector<64x16xf32>
    %252 = vector.extract_strided_slice %210 {offsets = [0, 32], sizes = [64, 16], strides = [1, 1]} : vector<64x64xf32> to vector<64x16xf32>
    %253 = vector.extract_strided_slice %210 {offsets = [0, 48], sizes = [64, 16], strides = [1, 1]} : vector<64x64xf32> to vector<64x16xf32>
    %cst_68 = arith.constant 0.000000e+00 : f32
    %254 = vector.broadcast %cst_68 : f32 to vector<64x16xf32>
    %255 = arith.subf %254, %251 : vector<64x16xf32>
    %cst_69 = arith.constant 0.000000e+00 : f32
    %256 = vector.broadcast %cst_69 : f32 to vector<64x16xf32>
    %257 = arith.subf %256, %253 : vector<64x16xf32>
    %258 = tpu.concatenate %255, %250, %257, %252 in 1 : vector<64x16xf32>, vector<64x16xf32>, vector<64x16xf32>, vector<64x16xf32> -> vector<64x64xf32>
    %259 = arith.mulf %258, %5 : vector<64x64xf32>
    %260 = arith.addf %249, %259 : vector<64x64xf32>
    %261 = arith.mulf %229, %3 : vector<64x64xf32>
    %262 = vector.extract_strided_slice %229 {offsets = [0, 0], sizes = [64, 16], strides = [1, 1]} : vector<64x64xf32> to vector<64x16xf32>
    %263 = vector.extract_strided_slice %229 {offsets = [0, 16], sizes = [64, 16], strides = [1, 1]} : vector<64x64xf32> to vector<64x16xf32>
    %264 = vector.extract_strided_slice %229 {offsets = [0, 32], sizes = [64, 16], strides = [1, 1]} : vector<64x64xf32> to vector<64x16xf32>
    %265 = vector.extract_strided_slice %229 {offsets = [0, 48], sizes = [64, 16], strides = [1, 1]} : vector<64x64xf32> to vector<64x16xf32>
    %cst_70 = arith.constant 0.000000e+00 : f32
    %266 = vector.broadcast %cst_70 : f32 to vector<64x16xf32>
    %267 = arith.subf %266, %263 : vector<64x16xf32>
    %cst_71 = arith.constant 0.000000e+00 : f32
    %268 = vector.broadcast %cst_71 : f32 to vector<64x16xf32>
    %269 = arith.subf %268, %265 : vector<64x16xf32>
    %270 = tpu.concatenate %267, %262, %269, %264 in 1 : vector<64x16xf32>, vector<64x16xf32>, vector<64x16xf32>, vector<64x16xf32> -> vector<64x64xf32>
    %271 = arith.mulf %270, %5 : vector<64x64xf32>
    %272 = arith.addf %261, %271 : vector<64x64xf32>
    %273 = tpu.transpose %272, [1, 0] : vector<64x64xf32> -> vector<64x64xf32>
    %cst_72 = arith.constant dense<0.000000e+00> : vector<64x64xf32>
    %274 = tpu.matmul %273, %248, %cst_72 {dimension_numbers = #tpu.dot_dimension_numbers<[1], [0], [0], [1], [0, 0, 1, 1], [], []>} : vector<64x64xf32>, vector<64x64xf32>, vector<64x64xf32> -> vector<64x64xf32>
    %cst_73 = arith.constant dense<0.000000e+00> : vector<64x64xf32>
    %275 = tpu.matmul %260, %274, %cst_73 {dimension_numbers = #tpu.dot_dimension_numbers<[1], [0], [0], [1], [0, 0, 1, 1], [], []>} : vector<64x64xf32>, vector<64x64xf32>, vector<64x64xf32> -> vector<64x64xf32>
    %cst_74 = arith.constant 1.562500e-02 : f32
    %276 = vector.broadcast %cst_74 : f32 to vector<64x64xf32>
    %277 = arith.mulf %275, %276 : vector<64x64xf32>
    %278 = tpu.concatenate %73, %141, %209, %277 in 1 : vector<64x64xf32>, vector<64x64xf32>, vector<64x64xf32>, vector<64x64xf32> -> vector<64x256xf32>
    %c0_75 = arith.constant 0 : index
    %c0_76 = arith.constant 0 : index
    %c0_77 = arith.constant 0 : index
    %279 = vector.load %arg4[%c0_75, %c0_76, %c0_77] : memref<1x64x256xf32, #tpu.memory_space<vmem>>, vector<1x64x256xf32>
    %280 = vector.shape_cast %279 : vector<1x64x256xf32> to vector<64x256xf32>
    %281 = vector.shape_cast %278 : vector<64x256xf32> to vector<1x64x256xf32>
    tpu.vector_store %arg4[%c0_75, %c0_76, %c0_77], %281 {strides = array<i32>} : memref<1x64x256xf32, #tpu.memory_space<vmem>>, vector<1x64x256xf32>,
    return
  }
  func.func @transform_0(%arg0: i32) -> (i32, i32, i32) {
    %c0_i32 = arith.constant 0 : i32
    %c0_i32_0 = arith.constant 0 : i32
    %c0_i32_1 = arith.constant 0 : i32
    return %arg0, %c0_i32, %c0_i32_0 : i32, i32, i32
  }
  func.func @transform_1(%arg0: i32) -> (i32, i32, i32) {
    %c0_i32 = arith.constant 0 : i32
    %c0_i32_0 = arith.constant 0 : i32
    %c0_i32_1 = arith.constant 0 : i32
    return %arg0, %c0_i32, %c0_i32_0 : i32, i32, i32
  }
  func.func @transform_2(%arg0: i32) -> (i32, i32, i32) {
    %c0_i32 = arith.constant 0 : i32
    %c0_i32_0 = arith.constant 0 : i32
    %c0_i32_1 = arith.constant 0 : i32
    return %arg0, %c0_i32, %c0_i32_0 : i32, i32, i32
  }
  func.func @transform_3(%arg0: i32) -> (i32, i32, i32) {
    %c0_i32 = arith.constant 0 : i32
    %c0_i32_0 = arith.constant 0 : i32
    %c0_i32_1 = arith.constant 0 : i32
    return %arg0, %c0_i32, %c0_i32_0 : i32, i32, i32
  }
}

module attributes {stable_mosaic.version = 11 : i64} {
  func.func @_attn_ffn_kernel(%arg0: i32, %arg1: memref<128x256xf32, #tpu.memory_space<vmem>>, %arg2: memref<256x64xbf16, #tpu.memory_space<vmem>>, %arg3: memref<1x64xf32, #tpu.memory_space<vmem>>, %arg4: memref<128x64xf32, #tpu.memory_space<vmem>>, %arg5: memref<1x64xf32, #tpu.memory_space<vmem>>, %arg6: memref<1x64xf32, #tpu.memory_space<vmem>>, %arg7: memref<1x64xf32, #tpu.memory_space<vmem>>, %arg8: memref<1x64xf32, #tpu.memory_space<vmem>>, %arg9: memref<64x64xbf16, #tpu.memory_space<vmem>>, %arg10: memref<1x64xf32, #tpu.memory_space<vmem>>, %arg11: memref<64x64xbf16, #tpu.memory_space<vmem>>, %arg12: memref<1x64xf32, #tpu.memory_space<vmem>>, %arg13: memref<128x64xf32, #tpu.memory_space<vmem>>) attributes {dimension_semantics = [#tpu.dimension_semantics<parallel>], iteration_bounds = array<i64: 1>, scalar_prefetch = 0 : i64, scratch_operands = 0 : i64, tpu.core_type = #tpu.core_type<tc>, window_params = [{transform_indices = @transform_0, window_bounds = array<i64: 128, 256>}, {pipeline_mode = #tpu.pipeline_mode<synchronous>, transform_indices = @transform_1, window_bounds = array<i64: 256, 64>}, {pipeline_mode = #tpu.pipeline_mode<synchronous>, transform_indices = @transform_2, window_bounds = array<i64: 1, 64>}, {transform_indices = @transform_3, window_bounds = array<i64: 128, 64>}, {pipeline_mode = #tpu.pipeline_mode<synchronous>, transform_indices = @transform_4, window_bounds = array<i64: 1, 64>}, {pipeline_mode = #tpu.pipeline_mode<synchronous>, transform_indices = @transform_5, window_bounds = array<i64: 1, 64>}, {pipeline_mode = #tpu.pipeline_mode<synchronous>, transform_indices = @transform_6, window_bounds = array<i64: 1, 64>}, {pipeline_mode = #tpu.pipeline_mode<synchronous>, transform_indices = @transform_7, window_bounds = array<i64: 1, 64>}, {pipeline_mode = #tpu.pipeline_mode<synchronous>, transform_indices = @transform_8, window_bounds = array<i64: 64, 64>}, {pipeline_mode = #tpu.pipeline_mode<synchronous>, transform_indices = @transform_9, window_bounds = array<i64: 1, 64>}, {pipeline_mode = #tpu.pipeline_mode<synchronous>, transform_indices = @transform_10, window_bounds = array<i64: 64, 64>}, {pipeline_mode = #tpu.pipeline_mode<synchronous>, transform_indices = @transform_11, window_bounds = array<i64: 1, 64>}, {transform_indices = @transform_12, window_bounds = array<i64: 128, 64>}]} {
    %c0 = arith.constant 0 : index
    %c0_0 = arith.constant 0 : index
    %0 = vector.load %arg4[%c0, %c0_0] : memref<128x64xf32, #tpu.memory_space<vmem>>, vector<128x64xf32>
    %c0_1 = arith.constant 0 : index
    %c0_2 = arith.constant 0 : index
    %1 = vector.load %arg5[%c0_1, %c0_2] : memref<1x64xf32, #tpu.memory_space<vmem>>, vector<1x64xf32>
    %c0_3 = arith.constant 0 : index
    %c0_4 = arith.constant 0 : index
    %2 = vector.load %arg6[%c0_3, %c0_4] : memref<1x64xf32, #tpu.memory_space<vmem>>, vector<1x64xf32>
    %cst = arith.constant dense<0.000000e+00> : vector<128xf32>
    %3 = vector.multi_reduction <add>, %0, %cst [1] : vector<128x64xf32> to vector<128xf32>
    %4 = vector.shape_cast %3 : vector<128xf32> to vector<128x1xf32>
    %cst_5 = arith.constant 6.400000e+01 : f32
    %5 = vector.broadcast %cst_5 : f32 to vector<128x1xf32>
    %6 = arith.divf %4, %5 : vector<128x1xf32>
    %7 = vector.broadcast %6 : vector<128x1xf32> to vector<128x64xf32>
    %8 = arith.subf %0, %7 : vector<128x64xf32>
    %9 = arith.mulf %8, %8 : vector<128x64xf32>
    %cst_6 = arith.constant dense<0.000000e+00> : vector<128xf32>
    %10 = vector.multi_reduction <add>, %9, %cst_6 [1] : vector<128x64xf32> to vector<128xf32>
    %11 = vector.shape_cast %10 : vector<128xf32> to vector<128x1xf32>
    %cst_7 = arith.constant 6.400000e+01 : f32
    %12 = vector.broadcast %cst_7 : f32 to vector<128x1xf32>
    %13 = arith.divf %11, %12 : vector<128x1xf32>
    %14 = vector.broadcast %6 : vector<128x1xf32> to vector<128x64xf32>
    %15 = arith.subf %0, %14 : vector<128x64xf32>
    %cst_8 = arith.constant 9.99999974E-6 : f32
    %16 = vector.broadcast %cst_8 : f32 to vector<128x1xf32>
    %17 = arith.addf %13, %16 : vector<128x1xf32>
    %18 = math.rsqrt %17 : vector<128x1xf32>
    %19 = vector.broadcast %18 : vector<128x1xf32> to vector<128x64xf32>
    %20 = arith.mulf %15, %19 : vector<128x64xf32>
    %21 = vector.broadcast %1 : vector<1x64xf32> to vector<128x64xf32>
    %22 = arith.mulf %20, %21 : vector<128x64xf32>
    %23 = vector.broadcast %2 : vector<1x64xf32> to vector<128x64xf32>
    %24 = arith.addf %22, %23 : vector<128x64xf32>
    %c0_9 = arith.constant 0 : index
    %c0_10 = arith.constant 0 : index
    %25 = vector.load %arg1[%c0_9, %c0_10] : memref<128x256xf32, #tpu.memory_space<vmem>>, vector<128x256xf32>
    %26 = arith.truncf %25 : vector<128x256xf32> to vector<128x256xbf16>
    %c0_11 = arith.constant 0 : index
    %c0_12 = arith.constant 0 : index
    %27 = vector.load %arg2[%c0_11, %c0_12] : memref<256x64xbf16, #tpu.memory_space<vmem>>, vector<256x64xbf16>
    %cst_13 = arith.constant dense<0.000000e+00> : vector<128x64xf32>
    %28 = tpu.matmul %26, %27, %cst_13 {dimension_numbers = #tpu.dot_dimension_numbers<[1], [0], [0], [1], [0, 0, 1, 1], [], []>} : vector<128x256xbf16>, vector<256x64xbf16>, vector<128x64xf32> -> vector<128x64xf32>
    %c0_14 = arith.constant 0 : index
    %c0_15 = arith.constant 0 : index
    %29 = vector.load %arg3[%c0_14, %c0_15] : memref<1x64xf32, #tpu.memory_space<vmem>>, vector<1x64xf32>
    %30 = vector.broadcast %29 : vector<1x64xf32> to vector<128x64xf32>
    %31 = arith.addf %28, %30 : vector<128x64xf32>
    %32 = arith.addf %31, %24 : vector<128x64xf32>
    %c0_16 = arith.constant 0 : index
    %c0_17 = arith.constant 0 : index
    %33 = vector.load %arg7[%c0_16, %c0_17] : memref<1x64xf32, #tpu.memory_space<vmem>>, vector<1x64xf32>
    %c0_18 = arith.constant 0 : index
    %c0_19 = arith.constant 0 : index
    %34 = vector.load %arg8[%c0_18, %c0_19] : memref<1x64xf32, #tpu.memory_space<vmem>>, vector<1x64xf32>
    %cst_20 = arith.constant dense<0.000000e+00> : vector<128xf32>
    %35 = vector.multi_reduction <add>, %32, %cst_20 [1] : vector<128x64xf32> to vector<128xf32>
    %36 = vector.shape_cast %35 : vector<128xf32> to vector<128x1xf32>
    %cst_21 = arith.constant 6.400000e+01 : f32
    %37 = vector.broadcast %cst_21 : f32 to vector<128x1xf32>
    %38 = arith.divf %36, %37 : vector<128x1xf32>
    %39 = vector.broadcast %38 : vector<128x1xf32> to vector<128x64xf32>
    %40 = arith.subf %32, %39 : vector<128x64xf32>
    %41 = arith.mulf %40, %40 : vector<128x64xf32>
    %cst_22 = arith.constant dense<0.000000e+00> : vector<128xf32>
    %42 = vector.multi_reduction <add>, %41, %cst_22 [1] : vector<128x64xf32> to vector<128xf32>
    %43 = vector.shape_cast %42 : vector<128xf32> to vector<128x1xf32>
    %cst_23 = arith.constant 6.400000e+01 : f32
    %44 = vector.broadcast %cst_23 : f32 to vector<128x1xf32>
    %45 = arith.divf %43, %44 : vector<128x1xf32>
    %46 = vector.broadcast %38 : vector<128x1xf32> to vector<128x64xf32>
    %47 = arith.subf %32, %46 : vector<128x64xf32>
    %cst_24 = arith.constant 9.99999974E-6 : f32
    %48 = vector.broadcast %cst_24 : f32 to vector<128x1xf32>
    %49 = arith.addf %45, %48 : vector<128x1xf32>
    %50 = math.rsqrt %49 : vector<128x1xf32>
    %51 = vector.broadcast %50 : vector<128x1xf32> to vector<128x64xf32>
    %52 = arith.mulf %47, %51 : vector<128x64xf32>
    %53 = vector.broadcast %33 : vector<1x64xf32> to vector<128x64xf32>
    %54 = arith.mulf %52, %53 : vector<128x64xf32>
    %55 = vector.broadcast %34 : vector<1x64xf32> to vector<128x64xf32>
    %56 = arith.addf %54, %55 : vector<128x64xf32>
    %57 = arith.truncf %56 : vector<128x64xf32> to vector<128x64xbf16>
    %c0_25 = arith.constant 0 : index
    %c0_26 = arith.constant 0 : index
    %58 = vector.load %arg9[%c0_25, %c0_26] : memref<64x64xbf16, #tpu.memory_space<vmem>>, vector<64x64xbf16>
    %cst_27 = arith.constant dense<0.000000e+00> : vector<128x64xf32>
    %59 = tpu.matmul %57, %58, %cst_27 {dimension_numbers = #tpu.dot_dimension_numbers<[1], [0], [0], [1], [0, 0, 1, 1], [], []>} : vector<128x64xbf16>, vector<64x64xbf16>, vector<128x64xf32> -> vector<128x64xf32>
    %c0_28 = arith.constant 0 : index
    %c0_29 = arith.constant 0 : index
    %60 = vector.load %arg10[%c0_28, %c0_29] : memref<1x64xf32, #tpu.memory_space<vmem>>, vector<1x64xf32>
    %61 = vector.broadcast %60 : vector<1x64xf32> to vector<128x64xf32>
    %62 = arith.addf %59, %61 : vector<128x64xf32>
    %cst_30 = arith.constant 5.000000e-01 : f32
    %63 = vector.broadcast %cst_30 : f32 to vector<128x64xf32>
    %64 = arith.mulf %63, %62 : vector<128x64xf32>
    %cst_31 = arith.constant 0.707106769 : f32
    %65 = vector.broadcast %cst_31 : f32 to vector<128x64xf32>
    %66 = arith.mulf %62, %65 : vector<128x64xf32>
    %cst_32 = arith.constant 0.000000e+00 : f32
    %67 = vector.broadcast %cst_32 : f32 to vector<128x64xf32>
    %68 = arith.cmpf oge, %66, %67 : vector<128x64xf32>
    %cst_33 = arith.constant 1.000000e+00 : f32
    %cst_34 = arith.constant -1.000000e+00 : f32
    %69 = vector.broadcast %cst_33 : f32 to vector<128x64xf32>
    %70 = vector.broadcast %cst_34 : f32 to vector<128x64xf32>
    %71 = arith.select %68, %69, %70 : vector<128x64xi1>, vector<128x64xf32>
    %72 = math.absf %66 : vector<128x64xf32>
    %cst_35 = arith.constant 0.327591091 : f32
    %73 = vector.broadcast %cst_35 : f32 to vector<128x64xf32>
    %74 = arith.mulf %73, %72 : vector<128x64xf32>
    %cst_36 = arith.constant 1.000000e+00 : f32
    %75 = vector.broadcast %cst_36 : f32 to vector<128x64xf32>
    %76 = arith.addf %75, %74 : vector<128x64xf32>
    %cst_37 = arith.constant 1.000000e+00 : f32
    %77 = vector.broadcast %cst_37 : f32 to vector<128x64xf32>
    %78 = arith.divf %77, %76 : vector<128x64xf32>
    %cst_38 = arith.constant 1.06140542 : f32
    %79 = vector.broadcast %cst_38 : f32 to vector<128x64xf32>
    %80 = arith.mulf %78, %79 : vector<128x64xf32>
    %cst_39 = arith.constant -1.45315206 : f32
    %81 = vector.broadcast %cst_39 : f32 to vector<128x64xf32>
    %82 = arith.addf %81, %80 : vector<128x64xf32>
    %83 = arith.mulf %78, %82 : vector<128x64xf32>
    %cst_40 = arith.constant 1.42141378 : f32
    %84 = vector.broadcast %cst_40 : f32 to vector<128x64xf32>
    %85 = arith.addf %84, %83 : vector<128x64xf32>
    %86 = arith.mulf %78, %85 : vector<128x64xf32>
    %cst_41 = arith.constant -0.284496725 : f32
    %87 = vector.broadcast %cst_41 : f32 to vector<128x64xf32>
    %88 = arith.addf %87, %86 : vector<128x64xf32>
    %89 = arith.mulf %78, %88 : vector<128x64xf32>
    %cst_42 = arith.constant 0.254829586 : f32
    %90 = vector.broadcast %cst_42 : f32 to vector<128x64xf32>
    %91 = arith.addf %90, %89 : vector<128x64xf32>
    %92 = arith.mulf %78, %91 : vector<128x64xf32>
    %cst_43 = arith.constant 0.000000e+00 : f32
    %93 = vector.broadcast %cst_43 : f32 to vector<128x64xf32>
    %94 = arith.subf %93, %72 : vector<128x64xf32>
    %95 = arith.mulf %94, %72 : vector<128x64xf32>
    %96 = math.exp %95 : vector<128x64xf32>
    %97 = arith.mulf %92, %96 : vector<128x64xf32>
    %cst_44 = arith.constant 1.000000e+00 : f32
    %98 = vector.broadcast %cst_44 : f32 to vector<128x64xf32>
    %99 = arith.subf %98, %97 : vector<128x64xf32>
    %100 = arith.mulf %71, %99 : vector<128x64xf32>
    %cst_45 = arith.constant 1.000000e+00 : f32
    %101 = vector.broadcast %cst_45 : f32 to vector<128x64xf32>
    %102 = arith.addf %101, %100 : vector<128x64xf32>
    %103 = arith.mulf %64, %102 : vector<128x64xf32>
    %104 = arith.truncf %103 : vector<128x64xf32> to vector<128x64xbf16>
    %c0_46 = arith.constant 0 : index
    %c0_47 = arith.constant 0 : index
    %105 = vector.load %arg11[%c0_46, %c0_47] : memref<64x64xbf16, #tpu.memory_space<vmem>>, vector<64x64xbf16>
    %cst_48 = arith.constant dense<0.000000e+00> : vector<128x64xf32>
    %106 = tpu.matmul %104, %105, %cst_48 {dimension_numbers = #tpu.dot_dimension_numbers<[1], [0], [0], [1], [0, 0, 1, 1], [], []>} : vector<128x64xbf16>, vector<64x64xbf16>, vector<128x64xf32> -> vector<128x64xf32>
    %c0_49 = arith.constant 0 : index
    %c0_50 = arith.constant 0 : index
    %107 = vector.load %arg12[%c0_49, %c0_50] : memref<1x64xf32, #tpu.memory_space<vmem>>, vector<1x64xf32>
    %108 = vector.broadcast %107 : vector<1x64xf32> to vector<128x64xf32>
    %109 = arith.addf %106, %108 : vector<128x64xf32>
    %110 = arith.addf %109, %56 : vector<128x64xf32>
    %c0_51 = arith.constant 0 : index
    %c0_52 = arith.constant 0 : index
    %111 = vector.load %arg13[%c0_51, %c0_52] : memref<128x64xf32, #tpu.memory_space<vmem>>, vector<128x64xf32>
    tpu.vector_store %arg13[%c0_51, %c0_52], %110 {strides = array<i32>} : memref<128x64xf32, #tpu.memory_space<vmem>>, vector<128x64xf32>,
    return
  }
  func.func @transform_0(%arg0: i32) -> (i32, i32) {
    %c0_i32 = arith.constant 0 : i32
    %c0_i32_0 = arith.constant 0 : i32
    return %arg0, %c0_i32 : i32, i32
  }
  func.func @transform_1(%arg0: i32) -> (i32, i32) {
    %c0_i32 = arith.constant 0 : i32
    %c0_i32_0 = arith.constant 0 : i32
    %c0_i32_1 = arith.constant 0 : i32
    return %c0_i32, %c0_i32_0 : i32, i32
  }
  func.func @transform_2(%arg0: i32) -> (i32, i32) {
    %c0_i32 = arith.constant 0 : i32
    %c0_i32_0 = arith.constant 0 : i32
    %c0_i32_1 = arith.constant 0 : i32
    return %c0_i32, %c0_i32_0 : i32, i32
  }
  func.func @transform_3(%arg0: i32) -> (i32, i32) {
    %c0_i32 = arith.constant 0 : i32
    %c0_i32_0 = arith.constant 0 : i32
    return %arg0, %c0_i32 : i32, i32
  }
  func.func @transform_4(%arg0: i32) -> (i32, i32) {
    %c0_i32 = arith.constant 0 : i32
    %c0_i32_0 = arith.constant 0 : i32
    %c0_i32_1 = arith.constant 0 : i32
    return %c0_i32, %c0_i32_0 : i32, i32
  }
  func.func @transform_5(%arg0: i32) -> (i32, i32) {
    %c0_i32 = arith.constant 0 : i32
    %c0_i32_0 = arith.constant 0 : i32
    %c0_i32_1 = arith.constant 0 : i32
    return %c0_i32, %c0_i32_0 : i32, i32
  }
  func.func @transform_6(%arg0: i32) -> (i32, i32) {
    %c0_i32 = arith.constant 0 : i32
    %c0_i32_0 = arith.constant 0 : i32
    %c0_i32_1 = arith.constant 0 : i32
    return %c0_i32, %c0_i32_0 : i32, i32
  }
  func.func @transform_7(%arg0: i32) -> (i32, i32) {
    %c0_i32 = arith.constant 0 : i32
    %c0_i32_0 = arith.constant 0 : i32
    %c0_i32_1 = arith.constant 0 : i32
    return %c0_i32, %c0_i32_0 : i32, i32
  }
  func.func @transform_8(%arg0: i32) -> (i32, i32) {
    %c0_i32 = arith.constant 0 : i32
    %c0_i32_0 = arith.constant 0 : i32
    %c0_i32_1 = arith.constant 0 : i32
    return %c0_i32, %c0_i32_0 : i32, i32
  }
  func.func @transform_9(%arg0: i32) -> (i32, i32) {
    %c0_i32 = arith.constant 0 : i32
    %c0_i32_0 = arith.constant 0 : i32
    %c0_i32_1 = arith.constant 0 : i32
    return %c0_i32, %c0_i32_0 : i32, i32
  }
  func.func @transform_10(%arg0: i32) -> (i32, i32) {
    %c0_i32 = arith.constant 0 : i32
    %c0_i32_0 = arith.constant 0 : i32
    %c0_i32_1 = arith.constant 0 : i32
    return %c0_i32, %c0_i32_0 : i32, i32
  }
  func.func @transform_11(%arg0: i32) -> (i32, i32) {
    %c0_i32 = arith.constant 0 : i32
    %c0_i32_0 = arith.constant 0 : i32
    %c0_i32_1 = arith.constant 0 : i32
    return %c0_i32, %c0_i32_0 : i32, i32
  }
  func.func @transform_12(%arg0: i32) -> (i32, i32) {
    %c0_i32 = arith.constant 0 : i32
    %c0_i32_0 = arith.constant 0 : i32
    return %arg0, %c0_i32 : i32, i32
  }
}

module attributes {stable_mosaic.version = 11 : i64} {
  func.func @_linear_nobias_kernel(%arg0: i32, %arg1: memref<128x64xf32, #tpu.memory_space<vmem>>, %arg2: memref<64x96xbf16, #tpu.memory_space<vmem>>, %arg3: memref<128x96xf32, #tpu.memory_space<vmem>>) attributes {dimension_semantics = [#tpu.dimension_semantics<parallel>], iteration_bounds = array<i64: 1>, scalar_prefetch = 0 : i64, scratch_operands = 0 : i64, tpu.core_type = #tpu.core_type<tc>, window_params = [{transform_indices = @transform_0, window_bounds = array<i64: 128, 64>}, {pipeline_mode = #tpu.pipeline_mode<synchronous>, transform_indices = @transform_1, window_bounds = array<i64: 64, 96>}, {transform_indices = @transform_2, window_bounds = array<i64: 128, 96>}]} {
    %c0 = arith.constant 0 : index
    %c0_0 = arith.constant 0 : index
    %0 = vector.load %arg1[%c0, %c0_0] : memref<128x64xf32, #tpu.memory_space<vmem>>, vector<128x64xf32>
    %1 = arith.truncf %0 : vector<128x64xf32> to vector<128x64xbf16>
    %c0_1 = arith.constant 0 : index
    %c0_2 = arith.constant 0 : index
    %2 = vector.load %arg2[%c0_1, %c0_2] : memref<64x96xbf16, #tpu.memory_space<vmem>>, vector<64x96xbf16>
    %cst = arith.constant dense<0.000000e+00> : vector<128x96xf32>
    %3 = tpu.matmul %1, %2, %cst {dimension_numbers = #tpu.dot_dimension_numbers<[1], [0], [0], [1], [0, 0, 1, 1], [], []>} : vector<128x64xbf16>, vector<64x96xbf16>, vector<128x96xf32> -> vector<128x96xf32>
    %c0_3 = arith.constant 0 : index
    %c0_4 = arith.constant 0 : index
    %4 = vector.load %arg3[%c0_3, %c0_4] : memref<128x96xf32, #tpu.memory_space<vmem>>, vector<128x96xf32>
    tpu.vector_store %arg3[%c0_3, %c0_4], %3 {strides = array<i32>} : memref<128x96xf32, #tpu.memory_space<vmem>>, vector<128x96xf32>,
    return
  }
  func.func @transform_0(%arg0: i32) -> (i32, i32) {
    %c0_i32 = arith.constant 0 : i32
    %c0_i32_0 = arith.constant 0 : i32
    return %arg0, %c0_i32 : i32, i32
  }
  func.func @transform_1(%arg0: i32) -> (i32, i32) {
    %c0_i32 = arith.constant 0 : i32
    %c0_i32_0 = arith.constant 0 : i32
    %c0_i32_1 = arith.constant 0 : i32
    return %c0_i32, %c0_i32_0 : i32, i32
  }
  func.func @transform_2(%arg0: i32) -> (i32, i32) {
    %c0_i32 = arith.constant 0 : i32
    %c0_i32_0 = arith.constant 0 : i32
    return %arg0, %c0_i32 : i32, i32
  }
}

</mosaic_0001>

<bundles_post_ra>
// kernel: spatial_encoder_2d_forward.8
= control target key start
LH: loop header
LB: loop body
LE: loop exit
PB: predicated region body
PF: predicated region fallthrough
CT: control target
= control target key end

     0   :  { %vm62_vm0 = vcmask 1041408   ;;  %vm37_vm1 = vcmask 31744   ;;  %vm163_vm2 = vcmask 523264   ;;  %s361_s1 = inlined_call_operand.vmem [shape: bf16[4,64], index: 1, kind: input, shape index: {}]   ;;  %s362_s0 = inlined_call_operand.vmem [shape: f32[128,4], index: 0, kind: input, shape index: {}]   ;;  %s363_s2 = inlined_call_operand.vmem [shape: f32[128,64], index: 2, kind: output, shape index: {}]  }
   0x1   :  { %v36_v0 = vld [vmem:[%s361_s1] sm:$0x3]  ;;  %v13_v2 = vld [vmem:[%s362_s0 + $0x8] sm:$0xff]  ;;  %v14_v7 = vld [vmem:[%s362_s0 + $0x10] sm:$0xff] }
   0x2   :  { %v12_v1 = vld [vmem:[%s362_s0] sm:$0xff]  ;;  %221 = vmatprep.subr.msk.bf16.mxu0 %vm62_vm0, %v36_v0  ;;  %222 = vmatprep.subr.msk.bf16.mxu1 %vm62_vm0, %v36_v0  ;;  %v64_v3 = vsel %vm62_vm0, %v36_v0, 0  ;;  %v21_v6 = vld [vmem:[%s362_s0 + $0x48] sm:$0xff]  ;;  %v15_v9 = vld [vmem:[%s362_s0 + $0x18] sm:$0xff] }
   0x3   :  { %v28_v4 = vpack.c.bf16 %v13_v2, %v12_v1  ;;  %v20_v5 = vld [vmem:[%s362_s0 + $0x40] sm:$0xff]  ;;  %202 = vmatpush3.bf16.msra.mxu0 %v64_v3  ;;  %220 = vmatpush3.bf16.msra.mxu1 %v64_v3  ;;  %v22_v10 = vld [vmem:[%s362_s0 + $0x50] sm:$0xff]  ;;  %v23_v11 = vld [vmem:[%s362_s0 + $0x58] sm:$0xff]  ;;  %v29_v12 = vpack.c.bf16 %v15_v9, %v14_v7 }
   0x4   :  { %v32_v8 = vpack.c.bf16 %v21_v6, %v20_v5  ;;  %v33_v13 = vpack.c.bf16 %v23_v11, %v22_v10  ;;  %v16_v14 = vld [vmem:[%s362_s0 + $0x20] sm:$0xff]  ;;  %v17_v15 = vld [vmem:[%s362_s0 + $0x28] sm:$0xff]  ;;  %v18_v20 = vld [vmem:[%s362_s0 + $0x30] sm:$0xff] }
   0x5   :  { %203 = vmatprep.mubr.msk.bf16.mxu0 %vm37_vm1, %v28_v4  ;;  %v24_v16 = vld [vmem:[%s362_s0 + $0x60] sm:$0xff]  ;;  %v30_v17 = vpack.c.bf16 %v17_v15, %v16_v14  ;;  %v25_v18 = vld [vmem:[%s362_s0 + $0x68] sm:$0xff]  ;;  %v19_v21 = vld [vmem:[%s362_s0 + $0x38] sm:$0xff] }
   0x6   :  { %211 = vmatprep.mubr.msk.bf16.mxu1 %vm37_vm1, %v32_v8  ;;  %204 = vmatmul.mubr.msk.bf16.vlgmr.msra.gmra.mrb[0].mxu0 %vm37_vm1, %v29_v12  ;;  %v34_v19 = vpack.c.bf16 %v25_v18, %v24_v16  ;;  %v26_v22 = vld [vmem:[%s362_s0 + $0x70] sm:$0xff]  ;;  %v27_v23 = vld [vmem:[%s362_s0 + $0x78] sm:$0xff]  ;;  %v31_v24 = vpack.c.bf16 %v19_v21, %v18_v20 }
   0x7   :  { %212 = vmatmul.mubr.msk.bf16.vlgmr.msra.gmra.mrb[0].mxu1 %vm37_vm1, %v33_v13  ;;  %207 = vmatprep.mubr.msk.bf16.mxu0 %vm37_vm1, %v30_v17  ;;  %v35_v25 = vpack.c.bf16 %v27_v23, %v26_v22 }
   0x8   :  { %215 = vmatprep.mubr.msk.bf16.mxu1 %vm37_vm1, %v34_v19 }
   0xe   :  { %208 = vmatmul.mubr.msk.bf16.gmra.mrb[4].mxu0 %vm37_vm1, %v31_v24 }
   0xf   :  { %216 = vmatmul.mubr.msk.bf16.gmra.mrb[4].mxu1 %vm37_vm1, %v35_v25 }
  0xd9   :  { %v205_v26 = vpop.f32.mrb[0].mxu0 }
  0xda   :  { %v213_v27 = vpop.f32.mrb[0].mxu1  ;;  %166 = vst.msk [vmem:[%s363_s2 + $0x10] sm:$0xff] %vm163_vm2, %v205_v26  ;;  %v100_v28 = vpop.f32.mrb[1].mxu0 }
  0xdb   :  { %174 = vst.msk [vmem:[%s363_s2 + $0x50] sm:$0xff] %vm163_vm2, %v213_v27  ;;  %v132_v29 = vpop.f32.mrb[1].mxu1  ;;  %164 = vst.msk [vmem:[%s363_s2] sm:$0xff] %vm163_vm2, %v100_v28  ;;  %v206_v30 = vpop.f32.mrb[2].mxu0 }
  0xdc   :  { %172 = vst.msk [vmem:[%s363_s2 + $0x40] sm:$0xff] %vm163_vm2, %v132_v29  ;;  %v214_v31 = vpop.f32.mrb[2].mxu1  ;;  %167 = vst.msk [vmem:[%s363_s2 + $0x18] sm:$0xff] %vm163_vm2, %v206_v30  ;;  %v103_v32 = vpop.f32.mrb[3].mxu0 }
  0xdd   :  { %175 = vst.msk [vmem:[%s363_s2 + $0x58] sm:$0xff] %vm163_vm2, %v214_v31  ;;  %v135_v33 = vpop.f32.mrb[3].mxu1  ;;  %165 = vst.msk [vmem:[%s363_s2 + $0x8] sm:$0xff] %vm163_vm2, %v103_v32 }
  0xde   :  { %173 = vst.msk [vmem:[%s363_s2 + $0x48] sm:$0xff] %vm163_vm2, %v135_v33 }
  0xe1   :  { %v209_v34 = vpop.f32.mrb[4].mxu0 }
  0xe2   :  { %v217_v35 = vpop.f32.mrb[4].mxu1  ;;  %170 = vst.msk [vmem:[%s363_s2 + $0x30] sm:$0xff] %vm163_vm2, %v209_v34  ;;  %v116_v36 = vpop.f32.mrb[5].mxu0 }
  0xe3   :  { %178 = vst.msk [vmem:[%s363_s2 + $0x70] sm:$0xff] %vm163_vm2, %v217_v35  ;;  %v148_v37 = vpop.f32.mrb[5].mxu1  ;;  %168 = vst.msk [vmem:[%s363_s2 + $0x20] sm:$0xff] %vm163_vm2, %v116_v36  ;;  %v210_v38 = vpop.f32.mrb[6].mxu0 }
  0xe4   :  { %176 = vst.msk [vmem:[%s363_s2 + $0x60] sm:$0xff] %vm163_vm2, %v148_v37  ;;  %v218_v39 = vpop.f32.mrb[6].mxu1  ;;  %171 = vst.msk [vmem:[%s363_s2 + $0x38] sm:$0xff] %vm163_vm2, %v210_v38  ;;  %v119_v40 = vpop.f32.mrb[7].mxu0 }
  0xe5   :  { %179 = vst.msk [vmem:[%s363_s2 + $0x78] sm:$0xff] %vm163_vm2, %v218_v39  ;;  %v151_v41 = vpop.f32.mrb[7].mxu1  ;;  %169 = vst.msk [vmem:[%s363_s2 + $0x28] sm:$0xff] %vm163_vm2, %v119_v40 }
  0xe6   :  { %177 = vst.msk [vmem:[%s363_s2 + $0x68] sm:$0xff] %vm163_vm2, %v151_v41 }

// kernel: spatial_encoder_2d_forward.9
= control target key start
LH: loop header
LB: loop body
LE: loop exit
PB: predicated region body
PF: predicated region fallthrough
CT: control target
= control target key end

     0   :  { %vm36_vm0 = vcmask 523264   ;;  %s1728_s0 = inlined_call_operand.vmem [shape: f32[128,64], index: 0, kind: input, shape index: {}]   ;;  %s1729_s3 = inlined_call_operand.vmem [shape: bf16[64,768], index: 3, kind: input, shape index: {}]   ;;  %s1730_s1 = inlined_call_operand.vmem [shape: f32[1,64], index: 1, kind: input, shape index: {}]   ;;  %s1731_s2 = inlined_call_operand.vmem [shape: f32[1,64], index: 2, kind: input, shape index: {}]   ;;  %s1732_s4 = inlined_call_operand.vmem [shape: f32[128,768], index: 4, kind: output, shape index: {}]  }
   0x1   :  { %v18_v0 = vld [vmem:[%s1728_s0] sm:$0xff]  ;;  %v19_v2 = vld [vmem:[%s1728_s0 + $0x8] sm:$0xff]  ;;  %v20_v8 = vld [vmem:[%s1728_s0 + $0x10] sm:$0xff] }
   0x2   :  { %v26_v1 = vld [vmem:[%s1728_s0 + $0x40] sm:$0xff]  ;;  %v37_v3 = vsel %vm36_vm0, %v18_v0, 0.0  ;;  %v27_v5 = vld [vmem:[%s1728_s0 + $0x48] sm:$0xff]  ;;  %v40_v6 = vsel %vm36_vm0, %v19_v2, 0.0  ;;  %v21_v9 = vld [vmem:[%s1728_s0 + $0x18] sm:$0xff]  ;;  %v43_v10 = vsel %vm36_vm0, %v20_v8, 0.0 }
   0x3   :  { %v61_v4 = vsel %vm36_vm0, %v26_v1, 0.0  ;;  %38 = vadd.xlane.f32.xlu0 %v37_v3  ;;  %v64_v7 = vsel %vm36_vm0, %v27_v5, 0.0  ;;  %v46_v11 = vsel %vm36_vm0, %v21_v9, 0.0  ;;  %v1085_v12 = vld [vmem:[%s1728_s0 + $0x50] sm:$0xff]  ;;  %v1090_v13 = vld [vmem:[%s1728_s0 + $0x58] sm:$0xff]  ;;  %v1099_v16 = vld [vmem:[%s1728_s0 + $0x20] sm:$0xff] }
   0x4   :  { %62 = vadd.xlane.f32.xlu1 %v61_v4  ;;  %v67_v14 = vsel %vm36_vm0, %v1085_v12, 0.0  ;;  %v70_v15 = vsel %vm36_vm0, %v1090_v13, 0.0  ;;  %v1104_v17 = vld [vmem:[%s1728_s0 + $0x28] sm:$0xff]  ;;  %v49_v18 = vsel %vm36_vm0, %v1099_v16, 0.0  ;;  %v1113_v20 = vld [vmem:[%s1728_s0 + $0x60] sm:$0xff]  ;;  %v1127_v24 = vld [vmem:[%s1728_s0 + $0x30] sm:$0xff] }
   0x5   :  { %v52_v19 = vsel %vm36_vm0, %v1104_v17, 0.0  ;;  %v1118_v21 = vld [vmem:[%s1728_s0 + $0x68] sm:$0xff]  ;;  %v73_v22 = vsel %vm36_vm0, %v1113_v20, 0.0  ;;  %v1132_v25 = vld [vmem:[%s1728_s0 + $0x38] sm:$0xff]  ;;  %v55_v26 = vsel %vm36_vm0, %v1127_v24, 0.0  ;;  %v1141_v28 = vld [vmem:[%s1728_s0 + $0x70] sm:$0xff] }
   0x6   :  { %v76_v23 = vsel %vm36_vm0, %v1118_v21, 0.0  ;;  %v58_v27 = vsel %vm36_vm0, %v1132_v25, 0.0  ;;  %v1146_v29 = vld [vmem:[%s1728_s0 + $0x78] sm:$0xff]  ;;  %v79_v30 = vsel %vm36_vm0, %v1141_v28, 0.0 }
   0x7   :  { %41 = vadd.xlane.f32.xlu0 %v40_v6  ;;  %v82_v31 = vsel %vm36_vm0, %v1146_v29, 0.0 }
   0x8   :  { %65 = vadd.xlane.f32.xlu1 %v64_v7 }
   0xb   :  { %44 = vadd.xlane.f32.xlu0 %v43_v10 }
   0xc   :  { %47 = vadd.xlane.f32.xlu1 %v46_v11 }
   0xf   :  { %68 = vadd.xlane.f32.xlu0 %v67_v14 }
  0x10   :  { %71 = vadd.xlane.f32.xlu1 %v70_v15 }
  0x13   :  { %50 = vadd.xlane.f32.xlu0 %v49_v18 }
  0x14   :  { %53 = vadd.xlane.f32.xlu1 %v52_v19 }
  0x17   :  { %74 = vadd.xlane.f32.xlu0 %v73_v22 }
  0x18   :  { %77 = vadd.xlane.f32.xlu1 %v76_v23 }
  0x1b   :  { %56 = vadd.xlane.f32.xlu0 %v55_v26 }
  0x1c   :  { %59 = vadd.xlane.f32.xlu1 %v58_v27 }
  0x1f   :  { %80 = vadd.xlane.f32.xlu0 %v79_v30 }
  0x20   :  { %83 = vadd.xlane.f32.xlu1 %v82_v31 }
  0x90   :  { %v39_v32 = vpop.xlane.xlu0 %38 }
  0x91   :  { %v63_v33 = vpop.xlane.xlu1 %62  ;;  %v86_v34 = vmul.f32 0.015625, %v39_v32 }
  0x92   :  { %v94_v35 = vmul.f32 0.015625, %v63_v33 }
  0x93   :  { %v1152_v36 = vsub.f32 %v18_v0, %v86_v34 }
  0x94   :  { %v1154_v37 = vsub.f32 %v26_v1, %v94_v35  ;;  %v42_v38 = vpop.xlane.xlu0 %41 }
  0x95   :  { %v66_v39 = vpop.xlane.xlu1 %65  ;;  %v87_v40 = vmul.f32 0.015625, %v42_v38  ;;  %v118_v42 = vmul.f32 %v1152_v36, %v1152_v36 }
  0x96   :  { %v95_v41 = vmul.f32 0.015625, %v66_v39  ;;  %v126_v43 = vmul.f32 %v1154_v37, %v1154_v37 }
  0x97   :  { %v1160_v44 = vsub.f32 %v19_v2, %v87_v40  ;;  %v134_v46 = vsel %vm36_vm0, %v118_v42, 0.0 }
  0x98   :  { %v1162_v45 = vsub.f32 %v27_v5, %v95_v41  ;;  %135 = vadd.xlane.f32.xlu0 %v134_v46  ;;  %v45_v47 = vpop.xlane.xlu0 %44  ;;  %v158_v49 = vsel %vm36_vm0, %v126_v43, 0.0 }
  0x99   :  { %v48_v48 = vpop.xlane.xlu1 %47  ;;  %v88_v50 = vmul.f32 0.015625, %v45_v47  ;;  %v119_v52 = vmul.f32 %v1160_v44, %v1160_v44 }
  0x9a   :  { %v89_v51 = vmul.f32 0.015625, %v48_v48  ;;  %v127_v53 = vmul.f32 %v1162_v45, %v1162_v45 }
  0x9b   :  { %v1170_v54 = vsub.f32 %v20_v8, %v88_v50  ;;  %v137_v56 = vsel %vm36_vm0, %v119_v52, 0.0 }
  0x9c   :  { %v1172_v55 = vsub.f32 %v21_v9, %v89_v51  ;;  %159 = vadd.xlane.f32.xlu0 %v158_v49  ;;  %138 = vadd.xlane.f32.xlu1 %v137_v56  ;;  %v69_v57 = vpop.xlane.xlu0 %68  ;;  %v161_v59 = vsel %vm36_vm0, %v127_v53, 0.0  ;;  %v964_v49 = vld [vmem:[%s1729_s3 + $0x4] ss:$24 sps:$4 sm:$0xff]   ;;  %v967_v53 = vld [vmem:[%s1729_s3 + $0x34] ss:$24 sps:$4 sm:$0xff]  }
  0x9d   :  { %v72_v58 = vpop.xlane.xlu1 %71  ;;  %v96_v60 = vmul.f32 0.015625, %v69_v57  ;;  %v120_v62 = vmul.f32 %v1170_v54, %v1170_v54  ;;  %466 = vmatprep.subr.bf16.mxu0 %v964_v49  ;;  %955 = vmatprep.subr.bf16.mxu1 %v964_v49  ;;  %v969_v57 = vld [vmem:[%s1729_s3 + $0x30] ss:$24 sps:$4 sm:$0xff]  }
  0x9e   :  { %v97_v61 = vmul.f32 0.015625, %v72_v58  ;;  %v121_v63 = vmul.f32 %v1172_v55, %v1172_v55  ;;  %v970_v58 = vld [vmem:[%s1729_s3 + $0x64] ss:$24 sps:$4 sm:$0xff]  }
  0x9f   :  { %v1181_v0 = vsub.f32 %v1085_v12, %v96_v60  ;;  %v140_v2 = vsel %vm36_vm0, %v120_v62, 0.0  ;;  %v973_v60 = vld [vmem:[%s1729_s3 + $0x94] ss:$24 sps:$4 sm:$0xff]   ;;  %v1032_v62 = vmov 0  }
  0xa0   :  { %v1184_v1 = vsub.f32 %v1090_v13, %v97_v61  ;;  %162 = vadd.xlane.f32.xlu1 %v161_v59  ;;  %141 = vadd.xlane.f32.xlu0 %v140_v2  ;;  %v51_v3 = vpop.xlane.xlu0 %50  ;;  %v143_v5 = vsel %vm36_vm0, %v121_v63, 0.0  ;;  %v972_v59 = vld [vmem:[%s1729_s3 + $0x60] ss:$24 sps:$4 sm:$0xff]   ;;  %v975_v61 = vld [vmem:[%s1729_s3 + $0x90] ss:$24 sps:$4 sm:$0xff]  }
  0xa1   :  { %v54_v4 = vpop.xlane.xlu1 %53  ;;  %v90_v6 = vmul.f32 0.015625, %v51_v3  ;;  %v128_v8 = vmul.f32 %v1181_v0, %v1181_v0  ;;  %498 = vmatprep.mubr.bf16.mxu0 %v1032_v62  ;;  %538 = vmatprep.mubr.bf16.mxu1 %v1032_v62  ;;  %v981_v63 = vld [vmem:[%s1729_s3 + $0x14] ss:$24 sps:$4 sm:$0xff]  }
  0xa2   :  { %v91_v7 = vmul.f32 0.015625, %v54_v4  ;;  %v129_v9 = vmul.f32 %v1184_v1, %v1184_v1  ;;  %v978_v2 = vld [vmem:[%s1729_s3 + $0xc] ss:$24 sps:$4 sm:$0xff]  }
  0xa3   :  { %v1193_v10 = vsub.f32 %v1099_v16, %v90_v6  ;;  %v164_v12 = vsel %vm36_vm0, %v128_v8, 0.0 }
  0xa4   :  { %v1196_v11 = vsub.f32 %v1104_v17, %v91_v7  ;;  %144 = vadd.xlane.f32.xlu1 %v143_v5  ;;  %165 = vadd.xlane.f32.xlu0 %v164_v12  ;;  %v75_v13 = vpop.xlane.xlu0 %74  ;;  %v167_v15 = vsel %vm36_vm0, %v129_v9, 0.0 }
  0xa5   :  { %v78_v14 = vpop.xlane.xlu1 %77  ;;  %v98_v18 = vmul.f32 0.015625, %v75_v13  ;;  %v122_v22 = vmul.f32 %v1193_v10, %v1193_v10 }
  0xa6   :  { %v99_v19 = vmul.f32 0.015625, %v78_v14  ;;  %v123_v16 = vmul.f32 %v1196_v11, %v1196_v11 }
  0xa7   :  { %v1205_v23 = vsub.f32 %v1113_v20, %v98_v18  ;;  %v146_v26 = vsel %vm36_vm0, %v122_v22, 0.0 }
  0xa8   :  { %v1208_v17 = vsub.f32 %v1118_v21, %v99_v19  ;;  %168 = vadd.xlane.f32.xlu1 %v167_v15  ;;  %147 = vadd.xlane.f32.xlu0 %v146_v26  ;;  %v57_v27 = vpop.xlane.xlu0 %56  ;;  %v149_v31 = vsel %vm36_vm0, %v123_v16, 0.0 }
  0xa9   :  { %v60_v30 = vpop.xlane.xlu1 %59  ;;  %v92_v32 = vmul.f32 0.015625, %v57_v27  ;;  %v130_v34 = vmul.f32 %v1205_v23, %v1205_v23 }
  0xaa   :  { %v93_v33 = vmul.f32 0.015625, %v60_v30  ;;  %v131_v20 = vmul.f32 %v1208_v17, %v1208_v17 }
  0xab   :  { %v1217_v35 = vsub.f32 %v1127_v24, %v92_v32  ;;  %v170_v38 = vsel %vm36_vm0, %v130_v34, 0.0 }
  0xac   :  { %v1220_v21 = vsub.f32 %v1132_v25, %v93_v33  ;;  %150 = vadd.xlane.f32.xlu1 %v149_v31  ;;  %171 = vadd.xlane.f32.xlu0 %v170_v38  ;;  %v81_v39 = vpop.xlane.xlu0 %80  ;;  %v173_v41 = vsel %vm36_vm0, %v131_v20, 0.0 }
  0xad   :  { %v84_v40 = vpop.xlane.xlu1 %83  ;;  %v100_v42 = vmul.f32 0.015625, %v81_v39  ;;  %v124_v46 = vmul.f32 %v1217_v35, %v1217_v35 }
  0xae   :  { %v101_v43 = vmul.f32 0.015625, %v84_v40  ;;  %v125_v24 = vmul.f32 %v1220_v21, %v1220_v21 }
  0xaf   :  { %v1229_v47 = vsub.f32 %v1141_v28, %v100_v42  ;;  %v152_v48 = vsel %vm36_vm0, %v124_v46, 0.0  ;;  %v1278_v42 = vld [vmem:[%s1730_s1] ss:$0 sm:$0xff] }
  0xb0   :  { %v1232_v25 = vsub.f32 %v1146_v29, %v101_v43  ;;  %174 = vadd.xlane.f32.xlu1 %v173_v41  ;;  %153 = vadd.xlane.f32.xlu0 %v152_v48  ;;  %v155_v50 = vsel %vm36_vm0, %v125_v24, 0.0  ;;  %v966_v29 = vld [vmem:[%s1729_s3] ss:$24 sps:$4 sm:$0xff]  }
  0xb1   :  { %v132_v51 = vmul.f32 %v1229_v47, %v1229_v47  ;;  %467 = vmatpush1.bf16.msra.mxu0 %v966_v29  ;;  %959 = vmatpush1.bf16.msra.mxu1 %v966_v29 }
  0xb2   :  { %v133_v28 = vmul.f32 %v1232_v25, %v1232_v25  ;;  %468 = vmatprep.subr.bf16.mxu0 %v967_v53  ;;  %956 = vmatprep.subr.bf16.mxu1 %v967_v53  ;;  %v1286_v53 = vld [vmem:[%s1731_s2] ss:$0 sm:$0xff] }
  0xb3   :  { %v176_v52 = vsel %vm36_vm0, %v132_v51, 0.0 }
  0xb4   :  { %156 = vadd.xlane.f32.xlu1 %v155_v50  ;;  %177 = vadd.xlane.f32.xlu0 %v176_v52  ;;  %v179_v56 = vsel %vm36_vm0, %v133_v28, 0.0 }
  0xb5   :  { %469 = vmatpush1.bf16.msra.mxu0 %v969_v57  ;;  %960 = vmatpush1.bf16.msra.mxu1 %v969_v57 }
  0xb6   :  { %470 = vmatprep.subr.bf16.mxu0 %v970_v58  ;;  %957 = vmatprep.subr.bf16.mxu1 %v970_v58 }
  0xb8   :  { %180 = vadd.xlane.f32.xlu1 %v179_v56 }
  0xb9   :  { %471 = vmatpush1.bf16.msra.mxu0 %v972_v59  ;;  %961 = vmatpush1.bf16.msra.mxu1 %v972_v59 }
  0xba   :  { %472 = vmatprep.subr.bf16.mxu0 %v973_v60  ;;  %958 = vmatprep.subr.bf16.mxu1 %v973_v60 }
  0xbd   :  { %473 = vmatpush1.bf16.msra.mxu0 %v975_v61  ;;  %962 = vmatpush1.bf16.msra.mxu1 %v975_v61 }
  0xbe   :  { %692 = vmatprep.subr.bf16.mxu0 %v981_v63  ;;  %579 = vmatprep.subr.bf16.mxu1 %v978_v2 }
 0x125   :  { %v136_v3 = vpop.xlane.xlu0 %135 }
 0x126   :  { %v182_v4 = vmul.f32 0.015625, %v136_v3 }
 0x128   :  { %v198_v5 = vadd.f32 1e-05, %v182_v4 }
 0x129   :  { %v139_v6 = vpop.xlane.xlu1 %138  ;;  %v160_v7 = vpop.xlane.xlu0 %159 }
 0x12a   :  { %1000 = vrsqrt.f32 %v198_v5  ;;  %v183_v8 = vmul.f32 0.015625, %v139_v6  ;;  %v190_v9 = vmul.f32 0.015625, %v160_v7  ;;  %v979_v7 = vld [vmem:[%s1729_s3 + $0x10] ss:$24 sps:$4 sm:$0xff]  }
 0x12c   :  { %v199_v12 = vadd.f32 1e-05, %v183_v8  ;;  %v206_v13 = vadd.f32 1e-05, %v190_v9  ;;  %v987_v9 = vld [vmem:[%s1729_s3 + $0x44] ss:$24 sps:$4 sm:$0xff]  }
 0x12d   :  { %v163_v14 = vpop.xlane.xlu1 %162  ;;  %v142_v15 = vpop.xlane.xlu0 %141 }
 0x12e   :  { %1002 = vrsqrt.f32 %v199_v12  ;;  %v191_v18 = vmul.f32 0.015625, %v163_v14  ;;  %v184_v19 = vmul.f32 0.015625, %v142_v15 }
 0x12f   :  { %1004 = vrsqrt.f32 %v206_v13 }
 0x130   :  { %v207_v22 = vadd.f32 1e-05, %v191_v18  ;;  %v200_v16 = vadd.f32 1e-05, %v184_v19 }
 0x131   :  { %v145_v26 = vpop.xlane.xlu1 %144  ;;  %v166_v27 = vpop.xlane.xlu0 %165 }
 0x132   :  { %1006 = vrsqrt.f32 %v207_v22  ;;  %v185_v30 = vmul.f32 0.015625, %v145_v26  ;;  %v192_v31 = vmul.f32 0.015625, %v166_v27 }
 0x133   :  { %1008 = vrsqrt.f32 %v200_v16 }
 0x134   :  { %v1001_v32 = vpop.eup %1000  ;;  %v201_v33 = vadd.f32 1e-05, %v185_v30  ;;  %v208_v34 = vadd.f32 1e-05, %v192_v31 }
 0x135   :  { %v230_v20 = vmul.f32 %v1001_v32, %v1152_v36  ;;  %v169_v38 = vpop.xlane.xlu1 %168  ;;  %v148_v39 = vpop.xlane.xlu0 %147 }
 0x136   :  { %1010 = vrsqrt.f32 %v201_v33  ;;  %v193_v40 = vmul.f32 0.015625, %v169_v38  ;;  %v186_v41 = vmul.f32 0.015625, %v148_v39 }
 0x137   :  { %1012 = vrsqrt.f32 %v208_v34  ;;  %v252_v36 = vmul.f32 %v1278_v42, %v230_v20  ;;  %v984_v34 = vld [vmem:[%s1729_s3 + $0x3c] ss:$24 sps:$4 sm:$0xff]  }
 0x138   :  { %v1003_v43 = vpop.eup %1002  ;;  %v209_v46 = vadd.f32 1e-05, %v193_v40  ;;  %v202_v24 = vadd.f32 1e-05, %v186_v41  ;;  %v993_v40 = vld [vmem:[%s1729_s3 + $0x74] ss:$24 sps:$4 sm:$0xff]  }
 0x139   :  { %v1005_v48 = vpop.eup %1004  ;;  %v231_v49 = vmul.f32 %v1003_v43, %v1160_v44  ;;  %v151_v50 = vpop.xlane.xlu1 %150 }
 0x13a   :  { %v172_v51 = vpop.xlane.xlu0 %171  ;;  %v238_v28 = vmul.f32 %v1005_v48, %v1154_v37  ;;  %1014 = vrsqrt.f32 %v209_v46  ;;  %v187_v29 = vmul.f32 0.015625, %v151_v50  ;;  %v274_v37 = vadd.f32 %v1286_v53, %v252_v36 }
 0x13b   :  { %v194_v52 = vmul.f32 0.015625, %v172_v51  ;;  %1016 = vrsqrt.f32 %v202_v24  ;;  %v253_v56 = vmul.f32 %v1278_v42, %v231_v49 }
 0x13c   :  { %v1007_v57 = vpop.eup %1006  ;;  %v203_v58 = vadd.f32 1e-05, %v187_v29  ;;  %v260_v3 = vmul.f32 %v1278_v42, %v238_v28  ;;  %v991_v29 = vld [vmem:[%s1729_s3 + $0x70] ss:$24 sps:$4 sm:$0xff]  }
 0x13d   :  { %v210_v44 = vadd.f32 1e-05, %v194_v52  ;;  %v1009_v59 = vpop.eup %1008  ;;  %v239_v60 = vmul.f32 %v1007_v57, %v1162_v45  ;;  %v175_v61 = vpop.xlane.xlu1 %174  ;;  %v275_v2 = vadd.f32 %v1286_v53, %v253_v56  ;;  %v999_v57 = vld [vmem:[%s1729_s3 + $0xa4] ss:$24 sps:$4 sm:$0xff]  }
 0x13e   :  { %v154_v63 = vpop.xlane.xlu0 %153  ;;  %v232_v4 = vmul.f32 %v1009_v59, %v1170_v54  ;;  %1018 = vrsqrt.f32 %v203_v58  ;;  %v195_v5 = vmul.f32 0.015625, %v175_v61  ;;  %v282_v22 = vadd.f32 %v1286_v53, %v260_v3  ;;  %v996_v3 = vld [vmem:[%s1729_s3 + $0x9c] ss:$24 sps:$4 sm:$0xff]  }
 0x13f   :  { %v188_v6 = vmul.f32 0.015625, %v154_v63  ;;  %1020 = vrsqrt.f32 %v210_v44  ;;  %v1297_v8 = vpack.c.bf16 %v275_v2, %v274_v37  ;;  %v261_v45 = vmul.f32 %v1278_v42, %v239_v60  ;;  %v988_v37 = vld [vmem:[%s1729_s3 + $0x68] ss:$24 sps:$4 sm:$0xff]  }
 0x140   :  { %v1011_v12 = vpop.eup %1010  ;;  %v211_v13 = vadd.f32 1e-05, %v195_v5  ;;  %v254_v26 = vmul.f32 %v1278_v42, %v232_v4 }
 0x141   :  { %v204_v14 = vadd.f32 1e-05, %v188_v6  ;;  %v1013_v54 = vpop.eup %1012  ;;  %v233_v15 = vmul.f32 %v1011_v12, %v1172_v55  ;;  %v157_v18 = vpop.xlane.xlu1 %156  ;;  %931 = vmatmul.mubr.msk.bf16.vlgmr.msra.gmra.mrb[0].mxu0 %vm36_vm0, %v1297_v8  ;;  %v283_v16 = vadd.f32 %v1286_v53, %v261_v45  ;;  %v976_v55 = vld [vmem:[%s1729_s3 + $0x8] ss:$24 sps:$4 sm:$0xff]  }
 0x142   :  { %v178_v19 = vpop.xlane.xlu0 %177  ;;  %v240_v27 = vmul.f32 %v1013_v54, %v1181_v0  ;;  %1022 = vrsqrt.f32 %v211_v13  ;;  %v189_v30 = vmul.f32 0.015625, %v157_v18  ;;  %693 = vmatpush1.bf16.msra.mxu0 %v979_v7  ;;  %508 = vmatprep.mubr.bf16.mxu0 %v1032_v62  ;;  %v985_v0 = vld [vmem:[%s1729_s3 + $0x40] ss:$24 sps:$4 sm:$0xff]   ;;  %v276_v24 = vadd.f32 %v1286_v53, %v254_v26 }
 0x143   :  { %v196_v31 = vmul.f32 0.015625, %v178_v19  ;;  %1024 = vrsqrt.f32 %v204_v14  ;;  %v1314_v32 = vpack.c.bf16 %v283_v16, %v282_v22  ;;  %v255_v33 = vmul.f32 %v1278_v42, %v233_v15  ;;  %694 = vmatprep.subr.bf16.mxu0 %v987_v9  ;;  %v994_v13 = vld [vmem:[%s1729_s3 + $0x98] ss:$24 sps:$4 sm:$0xff]  }
 0x144   :  { %v1015_v20 = vpop.eup %1014  ;;  %v205_v38 = vadd.f32 1e-05, %v189_v30  ;;  %v262_v49 = vmul.f32 %v1278_v42, %v240_v27 }
 0x145   :  { %v212_v39 = vadd.f32 1e-05, %v196_v31  ;;  %v1017_v41 = vpop.eup %1016  ;;  %v241_v43 = vmul.f32 %v1015_v20, %v1184_v1  ;;  %v181_v46 = vpop.xlane.xlu1 %180  ;;  %935 = vmatmul.mubr.msk.bf16.vlgmr.msra.gmra.mrb[0].mxu1 %vm36_vm0, %v1314_v32  ;;  %v277_v48 = vadd.f32 %v1286_v53, %v255_v33  ;;  %v982_v1 = vld [vmem:[%s1729_s3 + $0x38] ss:$24 sps:$4 sm:$0xff]  }
 0x146   :  { %v234_v50 = vmul.f32 %v1017_v41, %v1193_v10  ;;  %1026 = vrsqrt.f32 %v205_v38  ;;  %v197_v51 = vmul.f32 0.015625, %v181_v46  ;;  %580 = vmatpush1.bf16.msra.mxu1 %v976_v55  ;;  %548 = vmatprep.mubr.bf16.mxu1 %v1032_v62  ;;  %v990_v10 = vld [vmem:[%s1729_s3 + $0x6c] ss:$24 sps:$4 sm:$0xff]   ;;  %v284_v59 = vadd.f32 %v1286_v53, %v262_v49 }
 0x147   :  { %1028 = vrsqrt.f32 %v212_v39  ;;  %v1337_v36 = vpack.c.bf16 %v277_v48, %v276_v24  ;;  %581 = vmatprep.subr.bf16.mxu1 %v984_v34  ;;  %v263_v28 = vmul.f32 %v1278_v42, %v241_v43  ;;  %695 = vmatpush1.bf16.msra.mxu0 %v985_v0 }
 0x148   :  { %v1019_v52 = vpop.eup %1018  ;;  %v213_v56 = vadd.f32 1e-05, %v197_v51  ;;  %696 = vmatprep.subr.bf16.mxu0 %v993_v40  ;;  %v256_v61 = vmul.f32 %v1278_v42, %v234_v50 }
 0x149   :  { %v1021_v58 = vpop.eup %1020  ;;  %v235_v44 = vmul.f32 %v1019_v52, %v1196_v11  ;;  %932 = vmatmul.mubr.msk.bf16.gmra.mrb[4].mxu0 %vm36_vm0, %v1337_v36  ;;  %v285_v60 = vadd.f32 %v1286_v53, %v263_v28 }
 0x14a   :  { %v242_v63 = vmul.f32 %v1021_v58, %v1205_v23  ;;  %1030 = vrsqrt.f32 %v213_v56  ;;  %582 = vmatpush1.bf16.msra.mxu1 %v982_v1  ;;  %518 = vmatprep.mubr.bf16.mxu0 %v1032_v62  ;;  %v997_v23 = vld [vmem:[%s1729_s3 + $0xa0] ss:$24 sps:$4 sm:$0xff]   ;;  %v278_v7 = vadd.f32 %v1286_v53, %v256_v61 }
 0x14b   :  { %v1360_v11 = vpack.c.bf16 %v285_v60, %v284_v59  ;;  %v257_v2 = vmul.f32 %v1278_v42, %v235_v44  ;;  %583 = vmatprep.subr.bf16.mxu1 %v990_v10  ;;  %697 = vmatpush1.bf16.msra.mxu0 %v991_v29 }
 0x14c   :  { %v1023_v4 = vpop.eup %1022  ;;  %698 = vmatprep.subr.bf16.mxu0 %v999_v57  ;;  %v264_v9 = vmul.f32 %v1278_v42, %v242_v63 }
 0x14d   :  { %v1025_v5 = vpop.eup %1024  ;;  %v243_v6 = vmul.f32 %v1023_v4, %v1208_v17  ;;  %936 = vmatmul.mubr.msk.bf16.gmra.mrb[4].mxu1 %vm36_vm0, %v1360_v11  ;;  %v279_v45 = vadd.f32 %v1286_v53, %v257_v2 }
 0x14e   :  { %v236_v12 = vmul.f32 %v1025_v5, %v1217_v35  ;;  %558 = vmatprep.mubr.bf16.mxu1 %v1032_v62  ;;  %584 = vmatpush1.bf16.msra.mxu1 %v988_v37  ;;  %v286_v35 = vadd.f32 %v1286_v53, %v264_v9 }
 0x14f   :  { %v292_v14 = vpack.c.bf16 %v279_v45, %v278_v7  ;;  %v265_v17 = vmul.f32 %v1278_v42, %v243_v6  ;;  %585 = vmatprep.subr.bf16.mxu1 %v996_v3  ;;  %699 = vmatpush1.bf16.msra.mxu0 %v997_v23 }
 0x150   :  { %v1027_v54 = vpop.eup %1026  ;;  %v258_v22 = vmul.f32 %v1278_v42, %v236_v12 }
 0x151   :  { %v1029_v15 = vpop.eup %1028  ;;  %v237_v18 = vmul.f32 %v1027_v54, %v1220_v21  ;;  %933 = vmatmul.mubr.msk.bf16.gmra.mrb[8].mxu0 %vm36_vm0, %v292_v14  ;;  %v287_v19 = vadd.f32 %v1286_v53, %v265_v17 }
 0x152   :  { %v244_v16 = vmul.f32 %v1029_v15, %v1229_v47  ;;  %528 = vmatprep.mubr.bf16.mxu0 %v1032_v62  ;;  %586 = vmatpush1.bf16.msra.mxu1 %v994_v13  ;;  %v280_v21 = vadd.f32 %v1286_v53, %v258_v22 }
 0x153   :  { %v296_v26 = vpack.c.bf16 %v287_v19, %v286_v35  ;;  %v259_v27 = vmul.f32 %v1278_v42, %v237_v18 }
 0x154   :  { %v1031_v30 = vpop.eup %1030  ;;  %v266_v33 = vmul.f32 %v1278_v42, %v244_v16 }
 0x155   :  { %v245_v31 = vmul.f32 %v1031_v30, %v1232_v25  ;;  %937 = vmatmul.mubr.msk.bf16.gmra.mrb[8].mxu1 %vm36_vm0, %v296_v26  ;;  %v281_v55 = vadd.f32 %v1286_v53, %v259_v27 }
 0x156   :  { %568 = vmatprep.mubr.bf16.mxu1 %v1032_v62  ;;  %v288_v0 = vadd.f32 %v1286_v53, %v266_v33 }
 0x157   :  { %v293_v47 = vpack.c.bf16 %v281_v55, %v280_v21  ;;  %v267_v34 = vmul.f32 %v1278_v42, %v245_v31 }
 0x159   :  { %934 = vmatmul.mubr.msk.bf16.gmra.mrb[12].mxu0 %vm36_vm0, %v293_v47  ;;  %v289_v20 = vadd.f32 %v1286_v53, %v267_v34 }
 0x15a   :  { %724 = vmatprep.mubr.bf16.mxu0 %v1032_v62 }
 0x15b   :  { %v297_v25 = vpack.c.bf16 %v289_v20, %v288_v0 }
 0x15d   :  { %938 = vmatmul.mubr.msk.bf16.gmra.mrb[12].mxu1 %vm36_vm0, %v297_v25 }
 0x15e   :  { %611 = vmatprep.mubr.bf16.mxu1 %v1032_v62 }
 0x161   :  { %947 = vmatmul.mubr.msk.bf16.vlgmr.msra.gmra.mrb[16].mxu0 %vm36_vm0, %v1297_v8 }
 0x162   :  { %734 = vmatprep.mubr.bf16.mxu0 %v1032_v62 }
 0x165   :  { %939 = vmatmul.mubr.msk.bf16.vlgmr.msra.gmra.mrb[16].mxu1 %vm36_vm0, %v1297_v8 }
 0x166   :  { %621 = vmatprep.mubr.bf16.mxu1 %v1032_v62 }
 0x169   :  { %948 = vmatmul.mubr.msk.bf16.gmra.mrb[20].mxu0 %vm36_vm0, %v1337_v36 }
 0x16a   :  { %744 = vmatprep.mubr.bf16.mxu0 %v1032_v62 }
 0x16d   :  { %940 = vmatmul.mubr.msk.bf16.gmra.mrb[20].mxu1 %vm36_vm0, %v1337_v36 }
 0x16e   :  { %631 = vmatprep.mubr.bf16.mxu1 %v1032_v62 }
 0x171   :  { %949 = vmatmul.mubr.msk.bf16.gmra.mrb[24].mxu0 %vm36_vm0, %v292_v14 }
 0x172   :  { %754 = vmatprep.mubr.bf16.mxu0 %v1032_v62 }
 0x175   :  { %941 = vmatmul.mubr.msk.bf16.gmra.mrb[24].mxu1 %vm36_vm0, %v292_v14 }
 0x176   :  { %641 = vmatprep.mubr.bf16.mxu1 %v1032_v62 }
 0x179   :  { %950 = vmatmul.mubr.msk.bf16.gmra.mrb[28].mxu0 %vm36_vm0, %v293_v47 }
 0x17a   :  { %764 = vmatprep.mubr.bf16.mxu0 %v1032_v62 }
 0x17d   :  { %942 = vmatmul.mubr.msk.bf16.gmra.mrb[28].mxu1 %vm36_vm0, %v293_v47 }
 0x17e   :  { %651 = vmatprep.mubr.bf16.mxu1 %v1032_v62 }
 0x181   :  { %951 = vmatmul.mubr.msk.bf16.gmra.mrb[32].mxu0 %vm36_vm0, %v1314_v32 }
 0x182   :  { %774 = vmatprep.mubr.bf16.mxu0 %v1032_v62 }
 0x185   :  { %943 = vmatmul.mubr.msk.bf16.gmra.mrb[32].mxu1 %vm36_vm0, %v1314_v32 }
 0x186   :  { %661 = vmatprep.mubr.bf16.mxu1 %v1032_v62 }
 0x189   :  { %952 = vmatmul.mubr.msk.bf16.gmra.mrb[36].mxu0 %vm36_vm0, %v1360_v11 }
 0x18a   :  { %784 = vmatprep.mubr.bf16.mxu0 %v1032_v62 }
 0x18d   :  { %944 = vmatmul.mubr.msk.bf16.gmra.mrb[36].mxu1 %vm36_vm0, %v1360_v11 }
 0x18e   :  { %671 = vmatprep.mubr.bf16.mxu1 %v1032_v62 }
 0x191   :  { %953 = vmatmul.mubr.msk.bf16.gmra.mrb[40].mxu0 %vm36_vm0, %v296_v26 }
 0x192   :  { %794 = vmatprep.mubr.bf16.mxu0 %v1032_v62 }
 0x195   :  { %945 = vmatmul.mubr.msk.bf16.gmra.mrb[40].mxu1 %vm36_vm0, %v296_v26 }
 0x196   :  { %681 = vmatprep.mubr.bf16.mxu1 %v1032_v62 }
 0x199   :  { %954 = vmatmul.mubr.msk.bf16.gmra.mrb[44].mxu0 %vm36_vm0, %v297_v25 }
 0x19d   :  { %946 = vmatmul.mubr.msk.bf16.gmra.mrb[44].mxu1 %vm36_vm0, %v297_v25 }
 0x214   :  { %v500_v42 = vpop.f32.mrb[0].mxu0 }
 0x215   :  { %805 = vst [vmem:[%s1732_s4] sm:$0xff] %v500_v42  ;;  %v502_v53 = vpop.f32.mrb[1].mxu0 }
 0x216   :  { %806 = vst [vmem:[%s1732_s4 + $0x8] sm:$0xff] %v502_v53  ;;  %v504_v8 = vpop.f32.mrb[2].mxu0 }
 0x217   :  { %811 = vst [vmem:[%s1732_s4 + $0x30] sm:$0xff] %v504_v8  ;;  %v506_v62 = vpop.f32.mrb[3].mxu0 }
 0x218   :  { %812 = vst [vmem:[%s1732_s4 + $0x38] sm:$0xff] %v506_v62  ;;  %v540_v32 = vpop.f32.mrb[0].mxu1 }
 0x219   :  { %853 = vst [vmem:[%s1732_s4 + $0x180] sm:$0xff] %v540_v32  ;;  %v542_v38 = vpop.f32.mrb[1].mxu1 }
 0x21a   :  { %854 = vst [vmem:[%s1732_s4 + $0x188] sm:$0xff] %v542_v38  ;;  %v544_v39 = vpop.f32.mrb[2].mxu1 }
 0x21b   :  { %859 = vst [vmem:[%s1732_s4 + $0x1b0] sm:$0xff] %v544_v39  ;;  %v546_v40 = vpop.f32.mrb[3].mxu1 }
 0x21c   :  { %860 = vst [vmem:[%s1732_s4 + $0x1b8] sm:$0xff] %v546_v40  ;;  %v510_v41 = vpop.f32.mrb[4].mxu0 }
 0x21d   :  { %817 = vst [vmem:[%s1732_s4 + $0x60] sm:$0xff] %v510_v41  ;;  %v512_v43 = vpop.f32.mrb[5].mxu0 }
 0x21e   :  { %818 = vst [vmem:[%s1732_s4 + $0x68] sm:$0xff] %v512_v43  ;;  %v514_v46 = vpop.f32.mrb[6].mxu0 }
 0x21f   :  { %823 = vst [vmem:[%s1732_s4 + $0x90] sm:$0xff] %v514_v46  ;;  %v516_v24 = vpop.f32.mrb[7].mxu0 }
 0x220   :  { %824 = vst [vmem:[%s1732_s4 + $0x98] sm:$0xff] %v516_v24  ;;  %v550_v48 = vpop.f32.mrb[4].mxu1 }
 0x221   :  { %865 = vst [vmem:[%s1732_s4 + $0x1e0] sm:$0xff] %v550_v48  ;;  %v552_v49 = vpop.f32.mrb[5].mxu1 }
 0x222   :  { %866 = vst [vmem:[%s1732_s4 + $0x1e8] sm:$0xff] %v552_v49  ;;  %v554_v50 = vpop.f32.mrb[6].mxu1 }
 0x223   :  { %871 = vst [vmem:[%s1732_s4 + $0x210] sm:$0xff] %v554_v50  ;;  %v556_v51 = vpop.f32.mrb[7].mxu1 }
 0x224   :  { %872 = vst [vmem:[%s1732_s4 + $0x218] sm:$0xff] %v556_v51  ;;  %v520_v1 = vpop.f32.mrb[8].mxu0 }
 0x225   :  { %829 = vst [vmem:[%s1732_s4 + $0xc0] sm:$0xff] %v520_v1  ;;  %v522_v36 = vpop.f32.mrb[9].mxu0 }
 0x226   :  { %830 = vst [vmem:[%s1732_s4 + $0xc8] sm:$0xff] %v522_v36  ;;  %v524_v28 = vpop.f32.mrb[10].mxu0 }
 0x227   :  { %835 = vst [vmem:[%s1732_s4 + $0xf0] sm:$0xff] %v524_v28  ;;  %v526_v10 = vpop.f32.mrb[11].mxu0 }
 0x228   :  { %836 = vst [vmem:[%s1732_s4 + $0xf8] sm:$0xff] %v526_v10  ;;  %v560_v29 = vpop.f32.mrb[8].mxu1 }
 0x229   :  { %877 = vst [vmem:[%s1732_s4 + $0x240] sm:$0xff] %v560_v29  ;;  %v562_v52 = vpop.f32.mrb[9].mxu1 }
 0x22a   :  { %878 = vst [vmem:[%s1732_s4 + $0x248] sm:$0xff] %v562_v52  ;;  %v564_v56 = vpop.f32.mrb[10].mxu1 }
 0x22b   :  { %883 = vst [vmem:[%s1732_s4 + $0x270] sm:$0xff] %v564_v56  ;;  %v566_v57 = vpop.f32.mrb[11].mxu1 }
 0x22c   :  { %884 = vst [vmem:[%s1732_s4 + $0x278] sm:$0xff] %v566_v57  ;;  %v530_v58 = vpop.f32.mrb[12].mxu0 }
 0x22d   :  { %841 = vst [vmem:[%s1732_s4 + $0x120] sm:$0xff] %v530_v58  ;;  %v532_v44 = vpop.f32.mrb[13].mxu0 }
 0x22e   :  { %842 = vst [vmem:[%s1732_s4 + $0x128] sm:$0xff] %v532_v44  ;;  %v534_v59 = vpop.f32.mrb[14].mxu0 }
 0x22f   :  { %847 = vst [vmem:[%s1732_s4 + $0x150] sm:$0xff] %v534_v59  ;;  %v536_v60 = vpop.f32.mrb[15].mxu0 }
 0x230   :  { %848 = vst [vmem:[%s1732_s4 + $0x158] sm:$0xff] %v536_v60  ;;  %v570_v61 = vpop.f32.mrb[12].mxu1 }
 0x231   :  { %889 = vst [vmem:[%s1732_s4 + $0x2a0] sm:$0xff] %v570_v61  ;;  %v572_v63 = vpop.f32.mrb[13].mxu1 }
 0x232   :  { %890 = vst [vmem:[%s1732_s4 + $0x2a8] sm:$0xff] %v572_v63  ;;  %v574_v37 = vpop.f32.mrb[14].mxu1 }
 0x233   :  { %895 = vst [vmem:[%s1732_s4 + $0x2d0] sm:$0xff] %v574_v37  ;;  %v576_v11 = vpop.f32.mrb[15].mxu1 }
 0x234   :  { %896 = vst [vmem:[%s1732_s4 + $0x2d8] sm:$0xff] %v576_v11  ;;  %v726_v2 = vpop.f32.mrb[16].mxu0 }
 0x235   :  { %809 = vst [vmem:[%s1732_s4 + $0x20] sm:$0xff] %v726_v2  ;;  %v728_v3 = vpop.f32.mrb[17].mxu0 }
 0x236   :  { %810 = vst [vmem:[%s1732_s4 + $0x28] sm:$0xff] %v728_v3  ;;  %v730_v23 = vpop.f32.mrb[18].mxu0 }
 0x237   :  { %815 = vst [vmem:[%s1732_s4 + $0x50] sm:$0xff] %v730_v23  ;;  %v732_v4 = vpop.f32.mrb[19].mxu0 }
 0x238   :  { %816 = vst [vmem:[%s1732_s4 + $0x58] sm:$0xff] %v732_v4  ;;  %v613_v5 = vpop.f32.mrb[16].mxu1 }
 0x239   :  { %807 = vst [vmem:[%s1732_s4 + $0x10] sm:$0xff] %v613_v5  ;;  %v615_v6 = vpop.f32.mrb[17].mxu1 }
 0x23a   :  { %808 = vst [vmem:[%s1732_s4 + $0x18] sm:$0xff] %v615_v6  ;;  %v617_v7 = vpop.f32.mrb[18].mxu1 }
 0x23b   :  { %813 = vst [vmem:[%s1732_s4 + $0x40] sm:$0xff] %v617_v7  ;;  %v619_v45 = vpop.f32.mrb[19].mxu1 }
 0x23c   :  { %814 = vst [vmem:[%s1732_s4 + $0x48] sm:$0xff] %v619_v45  ;;  %v736_v9 = vpop.f32.mrb[20].mxu0 }
 0x23d   :  { %821 = vst [vmem:[%s1732_s4 + $0x80] sm:$0xff] %v736_v9  ;;  %v738_v12 = vpop.f32.mrb[21].mxu0 }
 0x23e   :  { %822 = vst [vmem:[%s1732_s4 + $0x88] sm:$0xff] %v738_v12  ;;  %v740_v13 = vpop.f32.mrb[22].mxu0 }
 0x23f   :  { %827 = vst [vmem:[%s1732_s4 + $0xb0] sm:$0xff] %v740_v13  ;;  %v742_v14 = vpop.f32.mrb[23].mxu0 }
 0x240   :  { %828 = vst [vmem:[%s1732_s4 + $0xb8] sm:$0xff] %v742_v14  ;;  %v623_v17 = vpop.f32.mrb[20].mxu1 }
 0x241   :  { %819 = vst [vmem:[%s1732_s4 + $0x70] sm:$0xff] %v623_v17  ;;  %v625_v54 = vpop.f32.mrb[21].mxu1 }
 0x242   :  { %820 = vst [vmem:[%s1732_s4 + $0x78] sm:$0xff] %v625_v54  ;;  %v627_v15 = vpop.f32.mrb[22].mxu1 }
 0x243   :  { %825 = vst [vmem:[%s1732_s4 + $0xa0] sm:$0xff] %v627_v15  ;;  %v629_v18 = vpop.f32.mrb[23].mxu1 }
 0x244   :  { %826 = vst [vmem:[%s1732_s4 + $0xa8] sm:$0xff] %v629_v18  ;;  %v746_v35 = vpop.f32.mrb[24].mxu0 }
 0x245   :  { %833 = vst [vmem:[%s1732_s4 + $0xe0] sm:$0xff] %v746_v35  ;;  %v748_v19 = vpop.f32.mrb[25].mxu0 }
 0x246   :  { %834 = vst [vmem:[%s1732_s4 + $0xe8] sm:$0xff] %v748_v19  ;;  %v750_v22 = vpop.f32.mrb[26].mxu0 }
 0x247   :  { %839 = vst [vmem:[%s1732_s4 + $0x110] sm:$0xff] %v750_v22  ;;  %v752_v16 = vpop.f32.mrb[27].mxu0 }
 0x248   :  { %840 = vst [vmem:[%s1732_s4 + $0x118] sm:$0xff] %v752_v16  ;;  %v633_v26 = vpop.f32.mrb[24].mxu1 }
 0x249   :  { %831 = vst [vmem:[%s1732_s4 + $0xd0] sm:$0xff] %v633_v26  ;;  %v635_v27 = vpop.f32.mrb[25].mxu1 }
 0x24a   :  { %832 = vst [vmem:[%s1732_s4 + $0xd8] sm:$0xff] %v635_v27  ;;  %v637_v30 = vpop.f32.mrb[26].mxu1 }
 0x24b   :  { %837 = vst [vmem:[%s1732_s4 + $0x100] sm:$0xff] %v637_v30  ;;  %v639_v31 = vpop.f32.mrb[27].mxu1 }
 0x24c   :  { %838 = vst [vmem:[%s1732_s4 + $0x108] sm:$0xff] %v639_v31  ;;  %v756_v21 = vpop.f32.mrb[28].mxu0 }
 0x24d   :  { %845 = vst [vmem:[%s1732_s4 + $0x140] sm:$0xff] %v756_v21  ;;  %v758_v55 = vpop.f32.mrb[29].mxu0 }
 0x24e   :  { %846 = vst [vmem:[%s1732_s4 + $0x148] sm:$0xff] %v758_v55  ;;  %v760_v33 = vpop.f32.mrb[30].mxu0 }
 0x24f   :  { %851 = vst [vmem:[%s1732_s4 + $0x170] sm:$0xff] %v760_v33  ;;  %v762_v47 = vpop.f32.mrb[31].mxu0 }
 0x250   :  { %852 = vst [vmem:[%s1732_s4 + $0x178] sm:$0xff] %v762_v47  ;;  %v643_v34 = vpop.f32.mrb[28].mxu1 }
 0x251   :  { %843 = vst [vmem:[%s1732_s4 + $0x130] sm:$0xff] %v643_v34  ;;  %v645_v0 = vpop.f32.mrb[29].mxu1 }
 0x252   :  { %844 = vst [vmem:[%s1732_s4 + $0x138] sm:$0xff] %v645_v0  ;;  %v647_v20 = vpop.f32.mrb[30].mxu1 }
 0x253   :  { %849 = vst [vmem:[%s1732_s4 + $0x160] sm:$0xff] %v647_v20  ;;  %v649_v25 = vpop.f32.mrb[31].mxu1 }
 0x254   :  { %850 = vst [vmem:[%s1732_s4 + $0x168] sm:$0xff] %v649_v25  ;;  %v766_v42 = vpop.f32.mrb[32].mxu0 }
 0x255   :  { %857 = vst [vmem:[%s1732_s4 + $0x1a0] sm:$0xff] %v766_v42  ;;  %v768_v53 = vpop.f32.mrb[33].mxu0 }
 0x256   :  { %858 = vst [vmem:[%s1732_s4 + $0x1a8] sm:$0xff] %v768_v53  ;;  %v770_v8 = vpop.f32.mrb[34].mxu0 }
 0x257   :  { %863 = vst [vmem:[%s1732_s4 + $0x1d0] sm:$0xff] %v770_v8  ;;  %v772_v62 = vpop.f32.mrb[35].mxu0 }
 0x258   :  { %864 = vst [vmem:[%s1732_s4 + $0x1d8] sm:$0xff] %v772_v62  ;;  %v653_v32 = vpop.f32.mrb[32].mxu1 }
 0x259   :  { %855 = vst [vmem:[%s1732_s4 + $0x190] sm:$0xff] %v653_v32  ;;  %v655_v38 = vpop.f32.mrb[33].mxu1 }
 0x25a   :  { %856 = vst [vmem:[%s1732_s4 + $0x198] sm:$0xff] %v655_v38  ;;  %v657_v39 = vpop.f32.mrb[34].mxu1 }
 0x25b   :  { %861 = vst [vmem:[%s1732_s4 + $0x1c0] sm:$0xff] %v657_v39  ;;  %v659_v40 = vpop.f32.mrb[35].mxu1 }
 0x25c   :  { %862 = vst [vmem:[%s1732_s4 + $0x1c8] sm:$0xff] %v659_v40  ;;  %v776_v41 = vpop.f32.mrb[36].mxu0 }
 0x25d   :  { %869 = vst [vmem:[%s1732_s4 + $0x200] sm:$0xff] %v776_v41  ;;  %v778_v43 = vpop.f32.mrb[37].mxu0 }
 0x25e   :  { %870 = vst [vmem:[%s1732_s4 + $0x208] sm:$0xff] %v778_v43  ;;  %v780_v46 = vpop.f32.mrb[38].mxu0 }
 0x25f   :  { %875 = vst [vmem:[%s1732_s4 + $0x230] sm:$0xff] %v780_v46  ;;  %v782_v24 = vpop.f32.mrb[39].mxu0 }
 0x260   :  { %876 = vst [vmem:[%s1732_s4 + $0x238] sm:$0xff] %v782_v24  ;;  %v663_v48 = vpop.f32.mrb[36].mxu1 }
 0x261   :  { %867 = vst [vmem:[%s1732_s4 + $0x1f0] sm:$0xff] %v663_v48  ;;  %v665_v49 = vpop.f32.mrb[37].mxu1 }
 0x262   :  { %868 = vst [vmem:[%s1732_s4 + $0x1f8] sm:$0xff] %v665_v49  ;;  %v667_v50 = vpop.f32.mrb[38].mxu1 }
 0x263   :  { %873 = vst [vmem:[%s1732_s4 + $0x220] sm:$0xff] %v667_v50  ;;  %v669_v51 = vpop.f32.mrb[39].mxu1 }
 0x264   :  { %874 = vst [vmem:[%s1732_s4 + $0x228] sm:$0xff] %v669_v51  ;;  %v786_v1 = vpop.f32.mrb[40].mxu0 }
 0x265   :  { %881 = vst [vmem:[%s1732_s4 + $0x260] sm:$0xff] %v786_v1  ;;  %v788_v36 = vpop.f32.mrb[41].mxu0 }
 0x266   :  { %882 = vst [vmem:[%s1732_s4 + $0x268] sm:$0xff] %v788_v36  ;;  %v790_v28 = vpop.f32.mrb[42].mxu0 }
 0x267   :  { %887 = vst [vmem:[%s1732_s4 + $0x290] sm:$0xff] %v790_v28  ;;  %v792_v10 = vpop.f32.mrb[43].mxu0 }
 0x268   :  { %888 = vst [vmem:[%s1732_s4 + $0x298] sm:$0xff] %v792_v10  ;;  %v673_v29 = vpop.f32.mrb[40].mxu1 }
 0x269   :  { %879 = vst [vmem:[%s1732_s4 + $0x250] sm:$0xff] %v673_v29  ;;  %v675_v52 = vpop.f32.mrb[41].mxu1 }
 0x26a   :  { %880 = vst [vmem:[%s1732_s4 + $0x258] sm:$0xff] %v675_v52  ;;  %v677_v56 = vpop.f32.mrb[42].mxu1 }
 0x26b   :  { %885 = vst [vmem:[%s1732_s4 + $0x280] sm:$0xff] %v677_v56  ;;  %v679_v57 = vpop.f32.mrb[43].mxu1 }
 0x26c   :  { %886 = vst [vmem:[%s1732_s4 + $0x288] sm:$0xff] %v679_v57  ;;  %v796_v58 = vpop.f32.mrb[44].mxu0 }
 0x26d   :  { %893 = vst [vmem:[%s1732_s4 + $0x2c0] sm:$0xff] %v796_v58  ;;  %v798_v44 = vpop.f32.mrb[45].mxu0 }
 0x26e   :  { %894 = vst [vmem:[%s1732_s4 + $0x2c8] sm:$0xff] %v798_v44  ;;  %v800_v59 = vpop.f32.mrb[46].mxu0 }
 0x26f   :  { %899 = vst [vmem:[%s1732_s4 + $0x2f0] sm:$0xff] %v800_v59  ;;  %v802_v60 = vpop.f32.mrb[47].mxu0 }
 0x270   :  { %900 = vst [vmem:[%s1732_s4 + $0x2f8] sm:$0xff] %v802_v60  ;;  %v683_v61 = vpop.f32.mrb[44].mxu1 }
 0x271   :  { %891 = vst [vmem:[%s1732_s4 + $0x2b0] sm:$0xff] %v683_v61  ;;  %v685_v63 = vpop.f32.mrb[45].mxu1 }
 0x272   :  { %892 = vst [vmem:[%s1732_s4 + $0x2b8] sm:$0xff] %v685_v63  ;;  %v687_v37 = vpop.f32.mrb[46].mxu1 }
 0x273   :  { %897 = vst [vmem:[%s1732_s4 + $0x2e0] sm:$0xff] %v687_v37  ;;  %v689_v11 = vpop.f32.mrb[47].mxu1 }
 0x274   :  { %898 = vst [vmem:[%s1732_s4 + $0x2e8] sm:$0xff] %v689_v11 }

// kernel: spatial_encoder_2d_forward.15
= control target key start
LH: loop header
LB: loop body
LE: loop exit
PB: predicated region body
PF: predicated region fallthrough
CT: control target
= control target key end

     0   :  { %vm69_vm0 = vcmask 523264   ;;  %s425_s0 = inlined_call_operand.vmem [shape: f32[128,64], index: 0, kind: input, shape index: {}]   ;;  %s426_s1 = inlined_call_operand.vmem [shape: bf16[64,96], index: 1, kind: input, shape index: {}]   ;;  %s427_s2 = inlined_call_operand.hbm [shape: f32[128,96], index: 2, kind: output, shape index: {}]  }
   0x1   :  { %v283_v0 = vld [vmem:[%s426_s1] sm:$0xff]   ;;  %v284_v1 = vld [vmem:[%s426_s1 + $0x8] sm:$0xff]   ;;  %v285_v2 = vld [vmem:[%s426_s1 + $0x10] sm:$0xff]  }
   0x2   :  { %248 = vmatprep.subr.bf16.mxu0 %v283_v0  ;;  %272 = vmatprep.subr.bf16.mxu1 %v283_v0  ;;  %v13_v3 = vld [vmem:[%s425_s0] sm:$0xff]  ;;  %v14_v4 = vld [vmem:[%s425_s0 + $0x8] sm:$0xff]  ;;  %v286_v9 = vld [vmem:[%s426_s1 + $0x18] sm:$0xff]  }
   0x3   :  { %249 = vmatpush3.bf16.msra.mxu0 %v283_v0  ;;  %276 = vmatpush3.bf16.msra.mxu1 %v283_v0  ;;  %v21_v5 = vld [vmem:[%s425_s0 + $0x40] sm:$0xff]  ;;  %v29_v6 = vpack.c.bf16 %v14_v4, %v13_v3  ;;  %v22_v7 = vld [vmem:[%s425_s0 + $0x48] sm:$0xff] }
   0x4   :  { %250 = vmatprep.subr.bf16.mxu0 %v284_v1  ;;  %273 = vmatprep.subr.bf16.mxu1 %v284_v1  ;;  %v33_v8 = vpack.c.bf16 %v22_v7, %v21_v5 }
   0x5   :  { %256 = vmatprep.mubr.msk.bf16.mxu0 %vm69_vm0, %v29_v6 }
   0x6   :  { %264 = vmatprep.mubr.msk.bf16.mxu1 %vm69_vm0, %v33_v8 }
   0x7   :  { %251 = vmatpush3.bf16.msra.mxu0 %v284_v1  ;;  %277 = vmatpush3.bf16.msra.mxu1 %v284_v1 }
   0x8   :  { %252 = vmatprep.subr.bf16.mxu0 %v285_v2  ;;  %274 = vmatprep.subr.bf16.mxu1 %v285_v2 }
   0x9   :  { %7 = vsyncpa [#allocation3], 0  ;;  %v15_v10 = vld [vmem:[%s425_s0 + $0x10] sm:$0xff]  ;;  %v16_v11 = vld [vmem:[%s425_s0 + $0x18] sm:$0xff]  ;;  %vm191_vm1 = vcmask 785408  }
   0xa   :  { %v23_v12 = vld [vmem:[%s425_s0 + $0x50] sm:$0xff]  ;;  %v24_v13 = vld [vmem:[%s425_s0 + $0x58] sm:$0xff]  ;;  %v17_v14 = vld [vmem:[%s425_s0 + $0x20] sm:$0xff]  ;;  %v30_v18 = vpack.c.bf16 %v16_v11, %v15_v10 }
   0xb   :  { %253 = vmatpush3.bf16.msra.mxu0 %v285_v2  ;;  %278 = vmatpush3.bf16.msra.mxu1 %v285_v2  ;;  %v18_v15 = vld [vmem:[%s425_s0 + $0x28] sm:$0xff]  ;;  %v25_v16 = vld [vmem:[%s425_s0 + $0x60] sm:$0xff]  ;;  %v34_v19 = vpack.c.bf16 %v24_v13, %v23_v12  ;;  %v19_v22 = vld [vmem:[%s425_s0 + $0x30] sm:$0xff] }
   0xc   :  { %254 = vmatprep.subr.bf16.mxu0 %v286_v9  ;;  %275 = vmatprep.subr.bf16.mxu1 %v286_v9  ;;  %v26_v17 = vld [vmem:[%s425_s0 + $0x68] sm:$0xff]  ;;  %v31_v20 = vpack.c.bf16 %v18_v15, %v17_v14  ;;  %v20_v23 = vld [vmem:[%s425_s0 + $0x38] sm:$0xff]  ;;  %v27_v24 = vld [vmem:[%s425_s0 + $0x70] sm:$0xff] }
   0xd   :  { %v35_v21 = vpack.c.bf16 %v26_v17, %v25_v16  ;;  %v28_v25 = vld [vmem:[%s425_s0 + $0x78] sm:$0xff]  ;;  %v32_v26 = vpack.c.bf16 %v20_v23, %v19_v22  ;;  %s311_s0 = smov [#allocation2]  }
   0xe   :  { %v36_v27 = vpack.c.bf16 %v28_v25, %v27_v24  ;;  %s213_s20 = sshll.u32 %s311_s0, 4  ;;  %s214_s20 = int_to_ptr.vmem [resolvable:$true] %s213_s20 }
   0xf   :  { %255 = vmatpush3.bf16.msra.mxu0 %v286_v9  ;;  %279 = vmatpush3.bf16.msra.mxu1 %v286_v9  ;;  %s287_s21 = scalar_lea.vmem %s214_s20, 2048  ;;  %p292_p1 = scmp.lt.s32.totalorder %s214_s20, %s214_s20 }
  0x10   :  { %p288_p0 = scmp.ne.s32.totalorder %s214_s20, %s287_s21  ;;  %p293_p2 = scmp.lt.s32.totalorder %s287_s21, %s287_s21 }
  0x12   :  { %257 = vmatmul.mubr.msk.bf16.vlgmr.msra.gmra.mrb[0].mxu0 %vm69_vm0, %v30_v18  ;;  %265 = vmatmul.mubr.msk.bf16.vlgmr.msra.gmra.mrb[0].mxu1 %vm69_vm0, %v34_v19  ;;  %p294_p3 = por %p293_p2, %p292_p1 }
  0x13   :  { %260 = vmatprep.mubr.msk.bf16.mxu0 %vm69_vm0, %v31_v20  ;;  %268 = vmatprep.mubr.msk.bf16.mxu1 %vm69_vm0, %v35_v21 }
  0x14   :  { %p295_p4 = pnand %p294_p3, %p288_p0 }
  0x1a   :  { %261 = vmatmul.mubr.msk.bf16.gmra.mrb[4].mxu0 %vm69_vm0, %v32_v26  ;;  %269 = vmatmul.mubr.msk.bf16.gmra.mrb[4].mxu1 %vm69_vm0, %v36_v27 }
  0xe5   :  { %v258_v28 = vpop.f32.mrb[0].mxu0  ;;  %v266_v29 = vpop.f32.mrb[0].mxu1 }
  0xe6   :  { %194 = vst.msk [vmem:[#allocation2 + $0x10] sm:$0xff] %vm191_vm1, %v258_v28  ;;  %202 = vst.msk [vmem:[#allocation2 + $0x50] sm:$0xff] %vm191_vm1, %v266_v29  ;;  %v128_v30 = vpop.f32.mrb[1].mxu0  ;;  %v160_v31 = vpop.f32.mrb[1].mxu1 }
  0xe7   :  { %192 = vst.msk [vmem:[#allocation2] sm:$0xff] %vm191_vm1, %v128_v30  ;;  %200 = vst.msk [vmem:[#allocation2 + $0x40] sm:$0xff] %vm191_vm1, %v160_v31  ;;  %v259_v32 = vpop.f32.mrb[2].mxu0  ;;  %v267_v33 = vpop.f32.mrb[2].mxu1 }
  0xe8   :  { %195 = vst.msk [vmem:[#allocation2 + $0x18] sm:$0xff] %vm191_vm1, %v259_v32  ;;  %203 = vst.msk [vmem:[#allocation2 + $0x58] sm:$0xff] %vm191_vm1, %v267_v33  ;;  %v131_v34 = vpop.f32.mrb[3].mxu0  ;;  %v163_v35 = vpop.f32.mrb[3].mxu1 }
  0xe9   :  { %193 = vst.msk [vmem:[#allocation2 + $0x8] sm:$0xff] %vm191_vm1, %v131_v34  ;;  %201 = vst.msk [vmem:[#allocation2 + $0x48] sm:$0xff] %vm191_vm1, %v163_v35 }
  0xed   :  { %v262_v36 = vpop.f32.mrb[4].mxu0  ;;  %v270_v37 = vpop.f32.mrb[4].mxu1 }
  0xee   :  { %198 = vst.msk [vmem:[#allocation2 + $0x30] sm:$0xff] %vm191_vm1, %v262_v36  ;;  %206 = vst.msk [vmem:[#allocation2 + $0x70] sm:$0xff] %vm191_vm1, %v270_v37  ;;  %v144_v38 = vpop.f32.mrb[5].mxu0  ;;  %v176_v39 = vpop.f32.mrb[5].mxu1 }
  0xef   :  { %196 = vst.msk [vmem:[#allocation2 + $0x20] sm:$0xff] %vm191_vm1, %v144_v38  ;;  %204 = vst.msk [vmem:[#allocation2 + $0x60] sm:$0xff] %vm191_vm1, %v176_v39  ;;  %v263_v40 = vpop.f32.mrb[6].mxu0  ;;  %v271_v41 = vpop.f32.mrb[6].mxu1 }
  0xf0   :  { %199 = vst.msk [vmem:[#allocation2 + $0x38] sm:$0xff] %vm191_vm1, %v263_v40  ;;  %207 = vst.msk [vmem:[#allocation2 + $0x78] sm:$0xff] %vm191_vm1, %v271_v41  ;;  %v147_v42 = vpop.f32.mrb[7].mxu0  ;;  %v179_v43 = vpop.f32.mrb[7].mxu1 }
  0xf1   :  { %197 = vst.msk [vmem:[#allocation2 + $0x28] sm:$0xff] %vm191_vm1, %v147_v42  ;;  %205 = vst.msk [vmem:[#allocation2 + $0x68] sm:$0xff] %vm191_vm1, %v179_v43 }
  0xf2   :  { %298 = shalt.err (!%p295_p4)
}
  0xf3   :  { %s299_s24 = scalar_lea.hbm %s427_s2, 2048 }
  0xf4   :  { %p300_p5 = scmp.ne.s32.totalorder %s427_s2, %s299_s24  ;;  %p303_p6 = scmp.lt.u32.totalorder %s299_s24, %s427_s2 }
  0xf6   :  { %p305_p7 = pnand %p303_p6, %p300_p5 }
  0xf8   :  { %308 = shalt.err (!%p305_p7)
}
  0xf9   :  { %s312_s29 = smov 128   ;;  %s313_s30 = smov 8  }
  0xfa   :  { %219 = dma.vmem_to_hbm [thread:$0]  %s214_s20, 2048, %s427_s2, [#allocation3], %s312_s29, %s312_s29, %s313_s30  }
  0xfb   :  { %309 = dma.done.wait [#allocation3], 2048  }
  0xfc   :  { %310 = vsyncadd [#allocation3], 4294965248 }
  0xfd   :  { %223 = vsyncpa [#allocation3], 1 }

// kernel: spatial_encoder_2d_forward.10
= control target key start
LH: loop header
LB: loop body
LE: loop exit
PB: predicated region body
PF: predicated region fallthrough
CT: control target
= control target key end

     0   :  { %s4817_s12 = smov 0   ;;  %s7187_s0 = inlined_call_operand.vmem [shape: f32[2,64,768], index: 0, kind: input, shape index: {}]   ;;  %s7188_s1 = inlined_call_operand.vmem [shape: f32[2,64,64], index: 1, kind: input, shape index: {}]   ;;  %s7189_s2 = inlined_call_operand.vmem [shape: f32[2,64,64], index: 2, kind: input, shape index: {}]   ;;  %s7190_s3 = inlined_call_operand.vmem [shape: f32[2,64,256], index: 3, kind: output, shape index: {}]  }
   0x1 LB: > { %s3967_s13 = sadd.s32 4294967295, %s4790_s12   ;;  %p3971_p0 = scmp.ge.s32.totalorder %s4790_s12, 1  ;;  %s4790_s12 = sphi %s4817_s12, %s13_s12  }
   0x2   : > { %p157_p1 = scmp.lt.s32.totalorder %s4790_s12, 3 }
   0x4   : > { %p158_p2 = pnand %p3971_p0, %p157_p1 }
   0x6   : > { %161 = sbr.rel (%p158_p2) target bundleno = 2771 (0xad3), region = 32 }
   0xd   : > { %p191_p3 = scmp.lt.s32.totalorder %s3967_s13, 1  ;;  %vm275_vm0 = vcmask 523264   ;;  %s4792_s18 = smov 112   ;;  %vm565_vm1 = vcmask 130048   ;;  %vm574_vm2 = vcmask 261120   ;;  %vm583_vm3 = vcmask 392192  }
   0xe   : > { %s4793_s19 = smov 16   ;;  %s4794_s20 = smov 64  }
   0xf   : > { %s7453_s13 = smov (!%p191_p3, %s3967_s13), 1  ;;  %s4795_s28 = smov 48  }
  0x10   : > { %s4528_s14 = smul.u32 384, %s7453_s13  ;;  %s4045_s21 = sshll.u32 %s7453_s13, 6 }
  0x11   : > { %s5111_s24 = scalar_lea.vmem %s7188_s1, %s4045_s21  ;;  %s5119_s27 = scalar_lea.vmem %s7189_s2, %s4045_s21 }
  0x12   : > { %s4831_s17 = scalar_lea.vmem %s7187_s0, %s4528_s14  ;;  %s4796_s29 = smov 80  }
  0x13   : > { %v4834_v0 = vld [vmem:[%s4831_s17 + $0x70] sm:$0xff]  ;;  %v4840_v2 = vld [vmem:[%s4831_s17 + $0xa0] sm:$0xff]  ;;  %s4047_s30 = sshll.u32 %s7453_s13, 7 }
  0x14   : > { %v4837_v1 = vld [vmem:[%s4831_s17 + $0x10] sm:$0xff]  ;;  %v282_v3 = vsel %vm275_vm0, %v4834_v0, 0.0  ;;  %v4847_v5 = vld [vmem:[%s4831_s17 + $0x40] sm:$0xff]  ;;  %v285_v6 = vsel %vm275_vm0, %v4840_v2, 0.0  ;;  %s7135_s6 = scalar_lea.vmem %s7190_s3, %s4047_s30 }
  0x15   : > { %v276_v4 = vsel %vm275_vm0, %v4837_v1, 0.0  ;;  %283 = vadd.xlane.f32.xlu1 %v282_v3  ;;  %v279_v7 = vsel %vm275_vm0, %v4847_v5, 0.0  ;;  %v4854_v8 = vld [vmem:[%s4831_s17 + $0x100] sm:$0xff]  ;;  %v4857_v9 = vld [vmem:[%s4831_s17 + $0xd0] sm:$0xff] }
  0x16   : > { %277 = vadd.xlane.f32.xlu0 %v276_v4  ;;  %v291_v10 = vsel %vm275_vm0, %v4854_v8, 0.0  ;;  %v288_v11 = vsel %vm275_vm0, %v4857_v9, 0.0  ;;  %v4864_v12 = vld [vmem:[%s4831_s17 + $0x160] sm:$0xff]  ;;  %v4867_v13 = vld [vmem:[%s4831_s17 + $0x130] sm:$0xff] }
  0x17   : > { %v297_v14 = vsel %vm275_vm0, %v4864_v12, 0.0  ;;  %v294_v15 = vsel %vm275_vm0, %v4867_v13, 0.0  ;;  %v4874_v16 = vld [vmem:[%s4831_s17 + $0x50] sm:$0xff]  ;;  %v4877_v17 = vld [vmem:[%s4831_s17 + $0x20] sm:$0xff] }
  0x18   : > { %v384_v18 = vsel %vm275_vm0, %v4874_v16, 0.0  ;;  %v381_v19 = vsel %vm275_vm0, %v4877_v17, 0.0  ;;  %v4884_v20 = vld [vmem:[%s4831_s17 + $0xb0] sm:$0xff]  ;;  %v4887_v21 = vld [vmem:[%s4831_s17 + $0x80] sm:$0xff] }
  0x19   : > { %286 = vadd.xlane.f32.xlu1 %v285_v6  ;;  %v390_v22 = vsel %vm275_vm0, %v4884_v20, 0.0  ;;  %v387_v23 = vsel %vm275_vm0, %v4887_v21, 0.0  ;;  %v4894_v24 = vld [vmem:[%s4831_s17 + $0x110] sm:$0xff]  ;;  %v4897_v25 = vld [vmem:[%s4831_s17 + $0xe0] sm:$0xff] }
  0x1a   : > { %280 = vadd.xlane.f32.xlu0 %v279_v7  ;;  %v396_v26 = vsel %vm275_vm0, %v4894_v24, 0.0  ;;  %v393_v27 = vsel %vm275_vm0, %v4897_v25, 0.0  ;;  %v4904_v28 = vld [vmem:[%s4831_s17 + $0x170] sm:$0xff]  ;;  %v4907_v29 = vld [vmem:[%s4831_s17 + $0x140] sm:$0xff] }
  0x1b   : > { %v402_v30 = vsel %vm275_vm0, %v4904_v28, 0.0  ;;  %v399_v31 = vsel %vm275_vm0, %v4907_v29, 0.0  ;;  %v4914_v32 = vld [vmem:[%s4831_s17 + $0x30] sm:$0xff]  ;;  %v4918_v34 = vld [vmem:[%s4831_s17 + $0x60] sm:$0xff] }
  0x1c   : > { %7287 = vst [vmem:[#allocation2_spill] sm:$0xff] %v4914_v32  ;;  %v7197_v33 = vsub.f32 0.0, %v4914_v32  ;;  %7288 = vst [vmem:[#allocation3_spill] sm:$0xff] %v4918_v34  ;;  %v4921_v35 = vld [vmem:[%s4831_s17] sm:$0xff]  ;;  %v7196_v36 = vsub.f32 0.0, %v4918_v34  ;;  %v4929_v38 = vld [vmem:[%s4831_s17 + $0x90] sm:$0xff] }
  0x1d   : > { %292 = vadd.xlane.f32.xlu1 %v291_v10  ;;  %7289 = vst [vmem:[#allocation4_spill] sm:$0xff] %v4921_v35  ;;  %v7198_v37 = vsub.f32 0.0, %v4921_v35  ;;  %7290 = vst [vmem:[#allocation5_spill] sm:$0xff] %v4929_v38  ;;  %v4932_v39 = vld [vmem:[%s4831_s17 + $0xc0] sm:$0xff]  ;;  %v7195_v40 = vsub.f32 0.0, %v4929_v38  ;;  %v4943_v42 = vld [vmem:[%s4831_s17 + $0xf0] sm:$0xff] }
  0x1e   : > { %289 = vadd.xlane.f32.xlu0 %v288_v11  ;;  %7291 = vst [vmem:[#allocation6_spill] sm:$0xff] %v4932_v39  ;;  %v7194_v41 = vsub.f32 0.0, %v4932_v39  ;;  %7292 = vst [vmem:[#allocation7_spill] sm:$0xff] %v4943_v42  ;;  %v4946_v43 = vld [vmem:[%s4831_s17 + $0x120] sm:$0xff]  ;;  %v7193_v44 = vsub.f32 0.0, %v4943_v42  ;;  %v4957_v46 = vld [vmem:[%s4831_s17 + $0x150] sm:$0xff] }
  0x1f   : > { %7293 = vst [vmem:[#allocation8_spill] sm:$0xff] %v4946_v43  ;;  %v7192_v45 = vsub.f32 0.0, %v4946_v43  ;;  %7294 = vst [vmem:[#allocation9_spill] sm:$0xff] %v4957_v46  ;;  %v7191_v47 = vsub.f32 0.0, %v4957_v46 }
  0x21   : > { %298 = vadd.xlane.f32.xlu1 %v297_v14 }
  0x22   : > { %295 = vadd.xlane.f32.xlu0 %v294_v15 }
  0x25   : > { %385 = vadd.xlane.f32.xlu1 %v384_v18 }
  0x26   : > { %382 = vadd.xlane.f32.xlu0 %v381_v19 }
  0x29   : > { %391 = vadd.xlane.f32.xlu1 %v390_v22 }
  0x2a   : > { %388 = vadd.xlane.f32.xlu0 %v387_v23 }
  0x2d   : > { %397 = vadd.xlane.f32.xlu1 %v396_v26 }
  0x2e   : > { %394 = vadd.xlane.f32.xlu0 %v393_v27 }
  0x31   : > { %403 = vadd.xlane.f32.xlu1 %v402_v30 }
  0x32   : > { %400 = vadd.xlane.f32.xlu0 %v399_v31 }
  0x42   : > { %511 = vrot.lane.b32.xlu1 %v7197_v33, %s4792_s18 }
  0x46   : > { %513 = vrot.lane.b32.xlu1 %v7196_v36, %s4792_s18 }
  0x48   : > { %509 = vrot.lane.b32.xlu0 %v7198_v37, %s4792_s18 }
  0x4a   : > { %515 = vrot.lane.b32.xlu1 %v7195_v40, %s4792_s18  ;;  %v5176_v40 = vld [vmem:[%s4831_s17 + $0x168] sm:$0xff] }
  0x4b   : > { %7307 = vst [vmem:[#allocation22_spill] sm:$0xff] %v5176_v40 }
  0x4c   : > { %517 = vrot.lane.b32.xlu0 %v7194_v41, %s4792_s18 }
  0x4e   : > { %519 = vrot.lane.b32.xlu1 %v7193_v44, %s4792_s18 }
  0x50   : > { %521 = vrot.lane.b32.xlu0 %v7192_v45, %s4792_s18 }
  0x52   : > { %523 = vrot.lane.b32.xlu1 %v7191_v47, %s4792_s18 }
  0x54   : > { %541 = vrot.lane.b32.xlu0 %v4921_v35, %s4793_s19 }
  0x56   : > { %543 = vrot.lane.b32.xlu1 %v4914_v32, %s4793_s19 }
  0x58   : > { %545 = vrot.lane.b32.xlu0 %v4918_v34, %s4793_s19 }
  0x5a   : > { %547 = vrot.lane.b32.xlu1 %v4929_v38, %s4793_s19 }
  0x5c   : > { %549 = vrot.lane.b32.xlu0 %v4932_v39, %s4793_s19 }
  0x5e   : > { %551 = vrot.lane.b32.xlu1 %v4943_v42, %s4793_s19 }
  0x60   : > { %553 = vrot.lane.b32.xlu0 %v4946_v43, %s4793_s19 }
  0x62   : > { %555 = vrot.lane.b32.xlu1 %v4957_v46, %s4793_s19 }
  0x66   : > { %1034 = vrot.lane.b32.xlu1 %v4837_v1, %s4794_s20 }
  0x6a   : > { %1036 = vrot.lane.b32.xlu1 %v4847_v5, %s4794_s20 }
  0x6e   : > { %1038 = vrot.lane.b32.xlu1 %v4834_v0, %s4794_s20 }
  0x72   : > { %1040 = vrot.lane.b32.xlu1 %v4840_v2, %s4794_s20 }
  0x76   : > { %1042 = vrot.lane.b32.xlu1 %v4857_v9, %s4794_s20 }
  0x7a   : > { %1044 = vrot.lane.b32.xlu1 %v4854_v8, %s4794_s20 }
  0x7e   : > { %1046 = vrot.lane.b32.xlu1 %v4867_v13, %s4794_s20 }
  0x82   : > { %1048 = vrot.lane.b32.xlu1 %v4864_v12, %s4794_s20 }
  0xa2   : > { %v284_v48 = vpop.xlane.xlu1 %283 }
  0xa3   : > { %v278_v49 = vpop.xlane.xlu0 %277  ;;  %v303_v50 = vmul.f32 0.015625, %v284_v48 }
  0xa4   : > { %v301_v51 = vmul.f32 0.015625, %v278_v49 }
  0xa5   : > { %v5002_v52 = vsub.f32 %v4834_v0, %v303_v50 }
  0xa6   : > { %v5005_v53 = vsub.f32 %v4837_v1, %v301_v51  ;;  %v287_v54 = vpop.xlane.xlu1 %286 }
  0xa7   : > { %v281_v55 = vpop.xlane.xlu0 %280  ;;  %v304_v56 = vmul.f32 0.015625, %v287_v54  ;;  %v319_v62 = vmul.f32 %v5002_v52, %v5002_v52 }
  0xa8   : > { %v302_v57 = vmul.f32 0.015625, %v281_v55  ;;  %v317_v58 = vmul.f32 %v5005_v53, %v5005_v53 }
  0xa9   : > { %v5010_v59 = vsub.f32 %v4840_v2, %v304_v56  ;;  %v331_v18 = vsel %vm275_vm0, %v319_v62, 0.0 }
  0xaa   : > { %v5013_v60 = vsub.f32 %v4847_v5, %v302_v57  ;;  %v325_v61 = vsel %vm275_vm0, %v317_v58, 0.0  ;;  %v293_v63 = vpop.xlane.xlu1 %292 }
  0xab   : > { %v290_v3 = vpop.xlane.xlu0 %289  ;;  %326 = vadd.xlane.f32.xlu0 %v325_v61  ;;  %v306_v4 = vmul.f32 0.015625, %v293_v63  ;;  %v320_v10 = vmul.f32 %v5010_v59, %v5010_v59 }
  0xac   : > { %v305_v6 = vmul.f32 0.015625, %v290_v3  ;;  %v318_v7 = vmul.f32 %v5013_v60, %v5013_v60 }
  0xad   : > { %v5023_v11 = vsub.f32 %v4854_v8, %v306_v4  ;;  %v334_v30 = vsel %vm275_vm0, %v320_v10, 0.0 }
  0xae   : > { %v5026_v14 = vsub.f32 %v4857_v9, %v305_v6  ;;  %v328_v15 = vsel %vm275_vm0, %v318_v7, 0.0  ;;  %v299_v19 = vpop.xlane.xlu1 %298 }
  0xaf   : > { %329 = vadd.xlane.f32.xlu1 %v328_v15  ;;  %v296_v22 = vpop.xlane.xlu0 %295  ;;  %332 = vadd.xlane.f32.xlu0 %v331_v18  ;;  %v308_v23 = vmul.f32 0.015625, %v299_v19  ;;  %v322_v50 = vmul.f32 %v5023_v11, %v5023_v11 }
  0xb0   : > { %v307_v26 = vmul.f32 0.015625, %v296_v22  ;;  %v321_v27 = vmul.f32 %v5026_v14, %v5026_v14 }
  0xb1   : > { %v5034_v31 = vsub.f32 %v4864_v12, %v308_v23  ;;  %v340_v63 = vsel %vm275_vm0, %v322_v50, 0.0 }
  0xb2   : > { %v5037_v48 = vsub.f32 %v4867_v13, %v307_v26  ;;  %v337_v49 = vsel %vm275_vm0, %v321_v27, 0.0  ;;  %v386_v51 = vpop.xlane.xlu1 %385 }
  0xb3   : > { %335 = vadd.xlane.f32.xlu1 %v334_v30  ;;  %v383_v54 = vpop.xlane.xlu0 %382  ;;  %338 = vadd.xlane.f32.xlu0 %v337_v49  ;;  %v406_v55 = vmul.f32 0.015625, %v386_v51  ;;  %v324_v58 = vmul.f32 %v5034_v31, %v5034_v31 }
  0xb4   : > { %v405_v56 = vmul.f32 0.015625, %v383_v54  ;;  %v323_v57 = vmul.f32 %v5037_v48, %v5037_v48 }
  0xb5   : > { %v5047_v61 = vsub.f32 %v4874_v16, %v406_v55  ;;  %v346_v18 = vsel %vm275_vm0, %v324_v58, 0.0 }
  0xb6   : > { %v5050_v62 = vsub.f32 %v4877_v17, %v405_v56  ;;  %v343_v3 = vsel %vm275_vm0, %v323_v57, 0.0  ;;  %v392_v4 = vpop.xlane.xlu1 %391 }
  0xb7   : > { %341 = vadd.xlane.f32.xlu1 %v340_v63  ;;  %v389_v6 = vpop.xlane.xlu0 %388  ;;  %344 = vadd.xlane.f32.xlu0 %v343_v3  ;;  %v408_v7 = vmul.f32 0.015625, %v392_v4  ;;  %v422_v26 = vmul.f32 %v5047_v61, %v5047_v61 }
  0xb8   : > { %v407_v10 = vmul.f32 0.015625, %v389_v6  ;;  %v421_v15 = vmul.f32 %v5050_v62, %v5050_v62 }
  0xb9   : > { %v5058_v19 = vsub.f32 %v4884_v20, %v408_v7  ;;  %v432_v57 = vsel %vm275_vm0, %v422_v26, 0.0 }
  0xba   : > { %v5061_v22 = vsub.f32 %v4887_v21, %v407_v10  ;;  %v429_v23 = vsel %vm275_vm0, %v421_v15, 0.0  ;;  %v398_v27 = vpop.xlane.xlu1 %397 }
  0xbb   : > { %347 = vadd.xlane.f32.xlu1 %v346_v18  ;;  %v395_v30 = vpop.xlane.xlu0 %394  ;;  %430 = vadd.xlane.f32.xlu0 %v429_v23  ;;  %v410_v49 = vmul.f32 0.015625, %v398_v27  ;;  %v424_v54 = vmul.f32 %v5058_v19, %v5058_v19 }
  0xbc   : > { %v409_v50 = vmul.f32 0.015625, %v395_v30  ;;  %v423_v51 = vmul.f32 %v5061_v22, %v5061_v22 }
  0xbd   : > { %v5071_v55 = vsub.f32 %v4894_v24, %v410_v49  ;;  %v438_v10 = vsel %vm275_vm0, %v424_v54, 0.0 }
  0xbe   : > { %v5074_v56 = vsub.f32 %v4897_v25, %v409_v50  ;;  %v435_v58 = vsel %vm275_vm0, %v423_v51, 0.0  ;;  %v404_v63 = vpop.xlane.xlu1 %403 }
  0xbf   : > { %433 = vadd.xlane.f32.xlu1 %v432_v57  ;;  %v401_v3 = vpop.xlane.xlu0 %400  ;;  %436 = vadd.xlane.f32.xlu0 %v435_v58  ;;  %v412_v4 = vmul.f32 0.015625, %v404_v63  ;;  %v426_v26 = vmul.f32 %v5071_v55, %v5071_v55 }
  0xc0   : > { %v411_v6 = vmul.f32 0.015625, %v401_v3  ;;  %v425_v7 = vmul.f32 %v5074_v56, %v5074_v56 }
  0xc1   : > { %v5082_v15 = vsub.f32 %v4904_v28, %v412_v4  ;;  %v444_v50 = vsel %vm275_vm0, %v426_v26, 0.0  ;;  %v267_v26 = vld [vmem:[%s5119_s27] sm:$0xff] }
  0xc2   : > { %v5085_v18 = vsub.f32 %v4907_v29, %v411_v6  ;;  %v441_v23 = vsel %vm275_vm0, %v425_v7, 0.0  ;;  %v5090_v27 = vpop.permute.xlu1 %511  ;;  %v259_v6 = vld [vmem:[%s5111_s24] sm:$0xff] }
  0xc3   : > { %7295 = vst [vmem:[#allocation10_spill] sm:$0xff] %v5090_v27  ;;  %439 = vadd.xlane.f32.xlu1 %v438_v10  ;;  %442 = vadd.xlane.f32.xlu0 %v441_v23  ;;  %v510_v30 = vpop.permute.xlu0 %509  ;;  %v428_v54 = vmul.f32 %v5082_v15, %v5082_v15 }
  0xc4   : > { %v427_v49 = vmul.f32 %v5085_v18, %v5085_v18 }
  0xc5   : > { %v450_v63 = vsel %vm275_vm0, %v428_v54, 0.0 }
  0xc6   : > { %v447_v51 = vsel %vm275_vm0, %v427_v49, 0.0  ;;  %v5098_v57 = vpop.permute.xlu1 %513 }
  0xc7   : > { %7296 = vst [vmem:[#allocation11_spill] sm:$0xff] %v5098_v57  ;;  %445 = vadd.xlane.f32.xlu1 %v444_v50  ;;  %448 = vadd.xlane.f32.xlu0 %v447_v51  ;;  %v5100_v58 = vpop.permute.xlu0 %517  ;;  %v485_v50 = vmul.f32 %v259_v6, %v4921_v35 }
  0xc8   : > { %7297 = vst [vmem:[#allocation12_spill] sm:$0xff] %v5100_v58 }
  0xca   : > { %v5104_v3 = vpop.permute.xlu1 %515 }
  0xcb   : > { %7298 = vst [vmem:[#allocation13_spill] sm:$0xff] %v5104_v3  ;;  %451 = vadd.xlane.f32.xlu1 %v450_v63  ;;  %v5106_v4 = vpop.permute.xlu0 %521 }
  0xcc   : > { %7299 = vst [vmem:[#allocation14_spill] sm:$0xff] %v5106_v4 }
  0xce   : > { %v5114_v7 = vpop.permute.xlu1 %519 }
  0xcf   : > { %7300 = vst [vmem:[#allocation15_spill] sm:$0xff] %v5114_v7  ;;  %v542_v10 = vpop.permute.xlu0 %541 }
  0xd0   : > { %v566_v23 = vsel %vm565_vm1, %v510_v30, %v542_v10 }
  0xd1   : > { %v575_v49 = vsel %vm574_vm2, %v566_v23, %v510_v30 }
  0xd2   : > { %v584_v51 = vsel %vm583_vm3, %v575_v49, %v542_v10  ;;  %v5126_v54 = vpop.permute.xlu1 %523 }
  0xd3   : > { %7301 = vst [vmem:[#allocation16_spill] sm:$0xff] %v5126_v54  ;;  %v592_v63 = vmul.f32 %v584_v51, %v267_v26  ;;  %v5144_v51 = vld [vmem:[%s4831_s17 + $0xd8] sm:$0xff] }
  0xd5   : > { %v600_v47 = vadd.f32 %v592_v63, %v485_v50  ;;  %v5141_v50 = vld [vmem:[%s4831_s17 + $0x18] sm:$0xff]  ;;  %v5151_v63 = vld [vmem:[%s4831_s17 + $0x48] sm:$0xff] }
  0xd6   : > { %v5128_v45 = vpop.permute.xlu1 %543 }
  0xd7   : > { %7302 = vst [vmem:[#allocation17_spill] sm:$0xff] %v5128_v45  ;;  %4220 = vmatprep.mubr.msk.f32.mxu1 %vm275_vm0, %v600_v47 }
  0xda   : > { %v5131_v44 = vpop.permute.xlu1 %547 }
  0xdb   : > { %7303 = vst [vmem:[#allocation18_spill] sm:$0xff] %v5131_v44 }
  0xde   : > { %v5133_v41 = vpop.permute.xlu1 %551 }
  0xdf   : > { %7304 = vst [vmem:[#allocation19_spill] sm:$0xff] %v5133_v41 }
  0xe2   : > { %v5135_v30 = vpop.permute.xlu1 %555 }
  0xe3   : > { %7305 = vst [vmem:[#allocation20_spill] sm:$0xff] %v5135_v30  ;;  %v5182_v30 = vpop.permute.xlu0 %545 }
  0xe4   : > { %7308 = vst [vmem:[#allocation23_spill] sm:$0xff] %v5182_v30 }
  0xe6   : > { %v1035_v6 = vpop.permute.xlu1 %1034 }
  0xe7   : > { %v1058_v10 = vsel %vm275_vm0, %v1035_v6, 0.0  ;;  %v5156_v6 = vld [vmem:[%s4831_s17 + $0x78] sm:$0xff]  ;;  %v5184_v4 = vpop.permute.xlu0 %549 }
  0xe8   : > { %1059 = vadd.xlane.f32.xlu1 %v1058_v10  ;;  %v5161_v10 = vld [vmem:[%s4831_s17 + $0xa8] sm:$0xff]  ;;  %7309 = vst [vmem:[#allocation24_spill] sm:$0xff] %v5184_v4 }
  0xea   : > { %v1037_v23 = vpop.permute.xlu1 %1036 }
  0xeb   : > { %v1061_v26 = vsel %vm275_vm0, %v1037_v23, 0.0  ;;  %v5166_v23 = vld [vmem:[%s4831_s17 + $0x108] sm:$0xff]  ;;  %v5186_v7 = vpop.permute.xlu0 %553 }
  0xec   : > { %1062 = vadd.xlane.f32.xlu0 %v1061_v26  ;;  %7306 = vst [vmem:[#allocation21_spill] sm:$0xff] %v5166_v23  ;;  %7310 = vst [vmem:[#allocation25_spill] sm:$0xff] %v5186_v7 }
  0xee   : > { %v1039_v49 = vpop.permute.xlu1 %1038 }
  0xef   : > { %v1064_v47 = vsel %vm275_vm0, %v1039_v49, 0.0  ;;  %v5171_v49 = vld [vmem:[%s4831_s17 + $0x138] sm:$0xff] }
  0xf0   : > { %1065 = vadd.xlane.f32.xlu1 %v1064_v47 }
  0xf2   : > { %v1041_v26 = vpop.permute.xlu1 %1040 }
  0xf6   : > { %v1043_v47 = vpop.permute.xlu1 %1042 }
  0xf7   : > { %v1070_v33 = vsel %vm275_vm0, %v1043_v47, 0.0  ;;  %v1067_v47 = vsel %vm275_vm0, %v1041_v26, 0.0 }
  0xfa   : > { %v1045_v36 = vpop.permute.xlu1 %1044 }
  0xfe   : > { %v1047_v37 = vpop.permute.xlu1 %1046 }
  0xff   : > { %v1076_v54 = vsel %vm275_vm0, %v1047_v37, 0.0 }
 0x101   : > { %2806 = vrot.lane.b32.xlu1 %v5141_v50, %s4794_s20 }
 0x102   : > { %2814 = vrot.lane.b32.xlu0 %v5144_v51, %s4794_s20  ;;  %v1049_v41 = vpop.permute.xlu1 %1048 }
 0x103   : > { %v1079_v57 = vsel %vm275_vm0, %v1049_v41, 0.0 }
 0x105   : > { %2808 = vrot.lane.b32.xlu1 %v5151_v63, %s4794_s20 }
 0x109   : > { %2810 = vrot.lane.b32.xlu1 %v5156_v6, %s4794_s20 }
 0x10d   : > { %2812 = vrot.lane.b32.xlu1 %v5161_v10, %s4794_s20 }
 0x111   : > { %2816 = vrot.lane.b32.xlu1 %v5166_v23, %s4794_s20 }
 0x115   : > { %2818 = vrot.lane.b32.xlu1 %v5171_v49, %s4794_s20 }
 0x119   : > { %2820 = vrot.lane.b32.xlu1 %v5176_v40, %s4794_s20 }
 0x121   : > { %1071 = vadd.xlane.f32.xlu0 %v1070_v33 }
 0x125   : > { %1077 = vadd.xlane.f32.xlu0 %v1076_v54  ;;  %v1073_v54 = vsel %vm275_vm0, %v1045_v36, 0.0 }
 0x138   : > { %v5188_v58 = vpop.xlane.xlu0 %326 }
 0x13c   : > { %v5190_v3 = vpop.xlane.xlu1 %329  ;;  %v5192_v44 = vpop.xlane.xlu0 %332 }
 0x13d   : > { %1068 = vadd.xlane.f32.xlu1 %v1067_v47 }
 0x140   : > { %v5195_v33 = vpop.xlane.xlu1 %335  ;;  %v5197_v37 = vpop.xlane.xlu0 %338 }
 0x141   : > { %1074 = vadd.xlane.f32.xlu1 %v1073_v54 }
 0x144   : > { %v5200_v4 = vpop.xlane.xlu1 %341  ;;  %v5202_v7 = vpop.xlane.xlu0 %344 }
 0x145   : > { %1080 = vadd.xlane.f32.xlu1 %v1079_v57 }
 0x148   : > { %v5205_v30 = vpop.xlane.xlu1 %347  ;;  %v431_v27 = vpop.xlane.xlu0 %430 }
 0x149   : > { %v453_v45 = vmul.f32 0.015625, %v431_v27 }
 0x14b   : > { %v461_v26 = vadd.f32 1e-05, %v453_v45 }
 0x14c   : > { %v434_v47 = vpop.xlane.xlu1 %433  ;;  %v437_v46 = vpop.xlane.xlu0 %436 }
 0x14d   : > { %v454_v43 = vmul.f32 0.015625, %v434_v47  ;;  %v455_v42 = vmul.f32 0.015625, %v437_v46  ;;  %4583 = vrsqrt.f32 %v461_v26 }
 0x14f   : > { %v462_v39 = vadd.f32 1e-05, %v454_v43  ;;  %v463_v36 = vadd.f32 1e-05, %v455_v42 }
 0x150   : > { %v440_v54 = vpop.xlane.xlu1 %439  ;;  %v443_v38 = vpop.xlane.xlu0 %442 }
 0x151   : > { %4585 = vrsqrt.f32 %v462_v39  ;;  %v456_v34 = vmul.f32 0.015625, %v440_v54  ;;  %v457_v32 = vmul.f32 0.015625, %v443_v38 }
 0x152   : > { %4587 = vrsqrt.f32 %v463_v36 }
 0x153   : > { %v464_v41 = vadd.f32 1e-05, %v456_v34  ;;  %v465_v57 = vadd.f32 1e-05, %v457_v32 }
 0x154   : > { %v446_v35 = vpop.xlane.xlu1 %445  ;;  %v449_v40 = vpop.xlane.xlu0 %448 }
 0x155   : > { %4589 = vrsqrt.f32 %v464_v41  ;;  %v458_v27 = vmul.f32 0.015625, %v446_v35  ;;  %v459_v45 = vmul.f32 0.015625, %v449_v40 }
 0x156   : > { %4591 = vrsqrt.f32 %v465_v57 }
 0x157   : > { %v466_v23 = vadd.f32 1e-05, %v458_v27  ;;  %v467_v47 = vadd.f32 1e-05, %v459_v45  ;;  %v4584_v26 = vpop.eup %4583 }
 0x158   : > { %v452_v46 = vpop.xlane.xlu1 %451  ;;  %v477_v38 = vmul.f32 %v4584_v26, %v5050_v62 }
 0x159   : > { %4593 = vrsqrt.f32 %v466_v23  ;;  %v460_v42 = vmul.f32 0.015625, %v452_v46 }
 0x15a   : > { %4595 = vrsqrt.f32 %v467_v47 }
 0x15b   : > { %v4586_v43 = vpop.eup %4585  ;;  %v468_v39 = vadd.f32 1e-05, %v460_v42 }
 0x15c   : > { %v478_v34 = vmul.f32 %v4586_v43, %v5047_v61  ;;  %v4588_v32 = vpop.eup %4587  ;;  %v353_v43 = vmul.f32 0.015625, %v5197_v37 }
 0x15d   : > { %4597 = vrsqrt.f32 %v468_v39  ;;  %v479_v35 = vmul.f32 %v4588_v32, %v5061_v22 }
 0x15e   : > { %v4400_v36 = vpack.c.bf16 %v478_v34, %v477_v38  ;;  %v361_v39 = vadd.f32 1e-05, %v353_v43  ;;  %v355_v38 = vmul.f32 0.015625, %v5202_v7 }
 0x15f   : > { %v4590_v54 = vpop.eup %4589 }
 0x160   : > { %4401 = vmatprep.subr.bf16.mxu0 %v4400_v36  ;;  %v480_v40 = vmul.f32 %v4590_v54, %v5058_v19  ;;  %v4592_v41 = vpop.eup %4591  ;;  %v349_v19 = vmul.f32 0.015625, %v5188_v58  ;;  %v363_v58 = vadd.f32 1e-05, %v355_v38 }
 0x161   : > { %4403 = vmatpush3.bf16.msra.mxu0 %v4400_v36  ;;  %v481_v27 = vmul.f32 %v4592_v41, %v5074_v56  ;;  %v351_v56 = vmul.f32 0.015625, %v5192_v44 }
 0x162   : > { %v4404_v23 = vpack.c.bf16 %v480_v40, %v479_v35  ;;  %v357_v42 = vadd.f32 1e-05, %v349_v19 }
 0x163   : > { %v4594_v57 = vpop.eup %4593 }
 0x164   : > { %4405 = vmatprep.subr.bf16.mxu0 %v4404_v23  ;;  %v482_v62 = vmul.f32 %v4594_v57, %v5071_v55  ;;  %v4596_v45 = vpop.eup %4595  ;;  %4599 = vrsqrt.f32 %v357_v42  ;;  %v359_v55 = vadd.f32 1e-05, %v351_v56  ;;  %v354_v56 = vmul.f32 0.015625, %v5200_v4 }
 0x165   : > { %4407 = vmatpush3.bf16.msra.mxu0 %v4404_v23  ;;  %v483_v46 = vmul.f32 %v4596_v45, %v5085_v18 }
 0x166   : > { %v4408_v61 = vpack.c.bf16 %v482_v62, %v481_v27  ;;  %4601 = vrsqrt.f32 %v359_v55  ;;  %v362_v43 = vadd.f32 1e-05, %v354_v56 }
 0x167   : > { %v4598_v47 = vpop.eup %4597  ;;  %4603 = vrsqrt.f32 %v361_v39  ;;  %v356_v39 = vmul.f32 0.015625, %v5205_v30 }
 0x168   : > { %4409 = vmatprep.subr.bf16.mxu0 %v4408_v61  ;;  %v484_v22 = vmul.f32 %v4598_v47, %v5082_v15  ;;  %4605 = vrsqrt.f32 %v363_v58 }
 0x169   : > { %4411 = vmatpush3.bf16.msra.mxu0 %v4408_v61 }
 0x16a   : > { %v4412_v26 = vpack.c.bf16 %v484_v22, %v483_v46 }
 0x16c   : > { %4413 = vmatprep.subr.bf16.mxu0 %v4412_v26 }
 0x16d   : > { %4415 = vmatpush3.bf16.msra.mxu0 %v4412_v26 }
 0x16e   : > { %v4600_v36 = vpop.eup %4599 }
 0x16f   : > { %v5228_v37 = vmul.f32 %v4600_v36, %v5005_v53 }
 0x170   : > { %v4602_v7 = vpop.eup %4601 }
 0x171   : > { %7311 = vst [vmem:[#allocation26_spill] sm:$0xff] %v5228_v37  ;;  %v5234_v35 = vmul.f32 %v4602_v7, %v5002_v52  ;;  %v4604_v40 = vpop.eup %4603  ;;  %v616_v22 = vsub.f32 0.0, %v5228_v37 }
 0x172   : > { %v5240_v53 = vmul.f32 %v4604_v40, %v5026_v14  ;;  %v4606_v57 = vpop.eup %4605  ;;  %v350_v14 = vmul.f32 0.015625, %v5190_v3 }
 0x173   : > { %7312 = vst [vmem:[#allocation27_spill] sm:$0xff] %v5234_v35  ;;  %v5248_v45 = vmul.f32 %v4606_v57, %v5037_v48  ;;  %v352_v48 = vmul.f32 0.015625, %v5195_v33  ;;  %v618_v42 = vsub.f32 0.0, %v5234_v35  ;;  %v364_v33 = vadd.f32 1e-05, %v356_v39 }
 0x174   : > { %7313 = vst [vmem:[#allocation28_spill] sm:$0xff] %v5240_v53  ;;  %v358_v26 = vadd.f32 1e-05, %v350_v14  ;;  %v620_v55 = vsub.f32 0.0, %v5240_v53 }
 0x175   : > { %v1060_v18 = vpop.xlane.xlu1 %1059  ;;  %7314 = vst [vmem:[#allocation29_spill] sm:$0xff] %v5248_v45  ;;  %v360_v3 = vadd.f32 1e-05, %v352_v48  ;;  %v622_v38 = vsub.f32 0.0, %v5248_v45 }
 0x176   : > { %v1082_v34 = vmul.f32 0.015625, %v1060_v18  ;;  %4607 = vrsqrt.f32 %v358_v26 }
 0x177   : > { %4609 = vrsqrt.f32 %v360_v3 }
 0x178   : > { %v5220_v15 = vsub.f32 %v4837_v1, %v1082_v34  ;;  %4611 = vrsqrt.f32 %v362_v43 }
 0x179   : > { %v5244_v27 = vpop.xlane.xlu0 %1062  ;;  %4613 = vrsqrt.f32 %v364_v33 }
 0x17a   : > { %v1098_v32 = vmul.f32 %v5220_v15, %v5220_v15 }
 0x17c   : > { %1114 = vrot.lane.b32.xlu0 %v1098_v32, %s4794_s20 }
 0x17d   : > { %v5225_v44 = vpop.xlane.xlu1 %1065  ;;  %v2815_v47 = vpop.permute.xlu0 %2814 }
 0x17e   : > { %v2842_v19 = vsel %vm275_vm0, %v2815_v47, 0.0 }
 0x180   : > { %664 = vrot.lane.b32.xlu0 %v5228_v37, %s4793_s19  ;;  %v4608_v18 = vpop.eup %4607 }
 0x181   : > { %v2807_v1 = vpop.permute.xlu1 %2806  ;;  %v5267_v34 = vmul.f32 %v4608_v18, %v5013_v60  ;;  %v4610_v4 = vpop.eup %4609 }
 0x182   : > { %v2830_v54 = vsel %vm275_vm0, %v2807_v1, 0.0  ;;  %v5272_v58 = vmul.f32 %v4610_v4, %v5010_v59  ;;  %v4612_v32 = vpop.eup %4611 }
 0x183   : > { %2831 = vadd.xlane.f32.xlu1 %v2830_v54  ;;  %7315 = vst [vmem:[#allocation30_spill] sm:$0xff] %v5267_v34  ;;  %v5277_v30 = vmul.f32 %v4612_v32, %v5023_v11  ;;  %v4614_v36 = vpop.eup %4613  ;;  %v617_v59 = vsub.f32 0.0, %v5267_v34 }
 0x184   : > { %668 = vrot.lane.b32.xlu0 %v5234_v35, %s4793_s19  ;;  %7316 = vst [vmem:[#allocation31_spill] sm:$0xff] %v5272_v58  ;;  %v5282_v60 = vmul.f32 %v4614_v36, %v5034_v31  ;;  %v619_v54 = vsub.f32 0.0, %v5272_v58 }
 0x185   : > { %v2809_v41 = vpop.permute.xlu1 %2808  ;;  %7317 = vst [vmem:[#allocation32_spill] sm:$0xff] %v5277_v30  ;;  %v621_v40 = vsub.f32 0.0, %v5277_v30 }
 0x186   : > { %v2833_v23 = vsel %vm275_vm0, %v2809_v41, 0.0  ;;  %7318 = vst [vmem:[#allocation33_spill] sm:$0xff] %v5282_v60  ;;  %v623_v31 = vsub.f32 0.0, %v5282_v60 }
 0x187   : > { %2834 = vadd.xlane.f32.xlu1 %v2833_v23 }
 0x188   : > { %672 = vrot.lane.b32.xlu0 %v5240_v53, %s4793_s19 }
 0x189   : > { %v2811_v52 = vpop.permute.xlu1 %2810 }
 0x18a   : > { %v2836_v62 = vsel %vm275_vm0, %v2811_v52, 0.0 }
 0x18b   : > { %2837 = vadd.xlane.f32.xlu1 %v2836_v62 }
 0x18c   : > { %676 = vrot.lane.b32.xlu0 %v5248_v45, %s4793_s19 }
 0x18d   : > { %v2813_v61 = vpop.permute.xlu1 %2812 }
 0x18e   : > { %v2839_v46 = vsel %vm275_vm0, %v2813_v61, 0.0 }
 0x18f   : > { %2840 = vadd.xlane.f32.xlu1 %v2839_v46 }
 0x190   : > { %632 = vrot.lane.b32.xlu0 %v616_v22, %s4792_s18 }
 0x191   : > { %v2817_v7 = vpop.permute.xlu1 %2816 }
 0x193   : > { %2843 = vadd.xlane.f32.xlu1 %v2842_v19 }
 0x194   : > { %636 = vrot.lane.b32.xlu0 %v618_v42, %s4792_s18 }
 0x195   : > { %v2819_v1 = vpop.permute.xlu1 %2818 }
 0x196   : > { %v2848_v11 = vsel %vm275_vm0, %v2819_v1, 0.0 }
 0x198   : > { %640 = vrot.lane.b32.xlu0 %v620_v55, %s4792_s18 }
 0x199   : > { %v2821_v62 = vpop.permute.xlu1 %2820 }
 0x19a   : > { %v2851_v14 = vsel %vm275_vm0, %v2821_v62, 0.0 }
 0x19c   : > { %644 = vrot.lane.b32.xlu0 %v622_v38, %s4792_s18 }
 0x1a4   : > { %666 = vrot.lane.b32.xlu1 %v5267_v34, %s4793_s19 }
 0x1a8   : > { %670 = vrot.lane.b32.xlu1 %v5272_v58, %s4793_s19  ;;  %v5480_v58 = vld [vmem:[%s4831_s17 + $0x148] sm:$0xff] }
 0x1ac   : > { %674 = vrot.lane.b32.xlu1 %v5277_v30, %s4793_s19 }
 0x1ae   : > { %v1072_v41 = vpop.xlane.xlu0 %1071 }
 0x1af   : > { %v1086_v23 = vmul.f32 0.015625, %v1072_v41 }
 0x1b0   : > { %678 = vrot.lane.b32.xlu1 %v5282_v60, %s4793_s19 }
 0x1b1   : > { %v5296_v57 = vsub.f32 %v4857_v9, %v1086_v23  ;;  %v2845_v9 = vsel %vm275_vm0, %v2817_v7, 0.0 }
 0x1b2   : > { %v1078_v22 = vpop.xlane.xlu0 %1077 }
 0x1b3   : > { %v1102_v52 = vmul.f32 %v5296_v57, %v5296_v57 }
 0x1b4   : > { %634 = vrot.lane.b32.xlu1 %v617_v59, %s4792_s18 }
 0x1b8   : > { %638 = vrot.lane.b32.xlu1 %v619_v54, %s4792_s18 }
 0x1bb   : > { %2849 = vadd.xlane.f32.xlu0 %v2848_v11 }
 0x1bc   : > { %642 = vrot.lane.b32.xlu1 %v621_v40, %s4792_s18 }
 0x1c0   : > { %646 = vrot.lane.b32.xlu1 %v623_v31, %s4792_s18 }
 0x1d1   : > { %1122 = vrot.lane.b32.xlu0 %v1102_v52, %s4794_s20 }
 0x1d5   : > { %1202 = vrot.lane.b32.xlu0 %v4877_v17, %s4794_s20  ;;  %v1069_v17 = vpop.xlane.xlu1 %1068 }
 0x1d9   : > { %1204 = vrot.lane.b32.xlu0 %v4874_v16, %s4794_s20  ;;  %v1083_v16 = vmul.f32 0.015625, %v5244_v27  ;;  %v1075_v46 = vpop.xlane.xlu1 %1074 }
 0x1dd   : > { %1206 = vrot.lane.b32.xlu0 %v4887_v21, %s4794_s20  ;;  %v5317_v21 = vsub.f32 %v4847_v5, %v1083_v16  ;;  %v1087_v5 = vmul.f32 0.015625, %v1075_v46  ;;  %v1081_v26 = vpop.xlane.xlu1 %1080 }
 0x1de   : > { %v1089_v42 = vmul.f32 0.015625, %v1081_v26  ;;  %v5417_v26 = vld [vmem:[%s4831_s17 + $0x28] sm:$0xff] }
 0x1df   : > { %v1099_v61 = vmul.f32 %v5317_v21, %v5317_v21 }
 0x1e0   : > { %v5347_v56 = vsub.f32 %v4864_v12, %v1089_v42 }
 0x1e1   : > { %1208 = vrot.lane.b32.xlu0 %v4884_v20, %s4794_s20  ;;  %v1084_v20 = vmul.f32 0.015625, %v5225_v44  ;;  %v1088_v44 = vmul.f32 0.015625, %v1078_v22 }
 0x1e3   : > { %v5323_v47 = vsub.f32 %v4834_v0, %v1084_v20  ;;  %v5335_v0 = vsub.f32 %v4854_v8, %v1087_v5  ;;  %v5339_v48 = vsub.f32 %v4867_v13, %v1088_v44  ;;  %v1105_v8 = vmul.f32 %v5347_v56, %v5347_v56 }
 0x1e4   : > { %2846 = vadd.xlane.f32.xlu1 %v2845_v9 }
 0x1e5   : > { %1210 = vrot.lane.b32.xlu0 %v4897_v25, %s4794_s20  ;;  %v1085_v25 = vmul.f32 0.015625, %v1069_v17  ;;  %v1104_v3 = vmul.f32 %v5339_v48, %v5339_v48 }
 0x1e7   : > { %v5329_v27 = vsub.f32 %v4840_v2, %v1085_v25  ;;  %v1103_v2 = vmul.f32 %v5335_v0, %v5335_v0 }
 0x1e8   : > { %2852 = vadd.xlane.f32.xlu1 %v2851_v14 }
 0x1e9   : > { %1212 = vrot.lane.b32.xlu0 %v4894_v24, %s4794_s20  ;;  %v1100_v24 = vmul.f32 %v5323_v47, %v5323_v47  ;;  %v1101_v19 = vmul.f32 %v5329_v27, %v5329_v27 }
 0x1ee   : > { %v1115_v39 = vpop.permute.xlu0 %1114 }
 0x1ef   : > { %v1138_v52 = vsel %vm275_vm0, %v1115_v39, 0.0 }
 0x1f2   : > { %v5362_v36 = vpop.permute.xlu0 %664 }
 0x1f3   : > { %7319 = vst [vmem:[#allocation34_spill] sm:$0xff] %v5362_v36 }
 0x1f6   : > { %v5372_v11 = vpop.permute.xlu0 %668 }
 0x1f7   : > { %7320 = vst [vmem:[#allocation35_spill] sm:$0xff] %v5372_v11  ;;  %v5804_v11 = vld [vmem:[%s5119_s27 + $0x8] sm:$0xff] }
 0x1f9   : > { %1116 = vrot.lane.b32.xlu1 %v1099_v61, %s4794_s20 }
 0x1fa   : > { %v5382_v41 = vpop.permute.xlu0 %672 }
 0x1fb   : > { %7321 = vst [vmem:[#allocation36_spill] sm:$0xff] %v5382_v41 }
 0x1fd   : > { %1118 = vrot.lane.b32.xlu1 %v1100_v24, %s4794_s20 }
 0x1fe   : > { %v5385_v23 = vpop.permute.xlu0 %676 }
 0x1ff   : > { %7322 = vst [vmem:[#allocation37_spill] sm:$0xff] %v5385_v23 }
 0x201   : > { %1120 = vrot.lane.b32.xlu1 %v1101_v19, %s4794_s20 }
 0x202   : > { %v5388_v9 = vpop.permute.xlu0 %632 }
 0x203   : > { %7323 = vst [vmem:[#allocation38_spill] sm:$0xff] %v5388_v9  ;;  %v264_v9 = vld [vmem:[%s5111_s24 + $0x28] sm:$0xff] }
 0x205   : > { %1124 = vrot.lane.b32.xlu1 %v1103_v2, %s4794_s20  ;;  %v5422_v2 = vld [vmem:[%s4831_s17 + $0x88] sm:$0xff] }
 0x206   : > { %v5390_v62 = vpop.permute.xlu0 %636 }
 0x207   : > { %7324 = vst [vmem:[#allocation39_spill] sm:$0xff] %v5390_v62  ;;  %v261_v62 = vld [vmem:[%s5111_s24 + $0x10] sm:$0xff] }
 0x209   : > { %1126 = vrot.lane.b32.xlu1 %v1104_v3, %s4794_s20 }
 0x20a   : > { %v5392_v17 = vpop.permute.xlu0 %640 }
 0x20b   : > { %7325 = vst [vmem:[#allocation40_spill] sm:$0xff] %v5392_v17 }
 0x20d   : > { %1128 = vrot.lane.b32.xlu1 %v1105_v8, %s4794_s20 }
 0x20e   : > { %v5401_v25 = vpop.permute.xlu0 %644 }
 0x20f   : > { %7327 = vst [vmem:[#allocation42_spill] sm:$0xff] %v5401_v25 }
 0x210   : > { %v2832_v13 = vpop.xlane.xlu1 %2831 }
 0x211   : > { %v2854_v55 = vmul.f32 0.015625, %v2832_v13 }
 0x213   : > { %v5354_v43 = vsub.f32 %v5141_v50, %v2854_v55 }
 0x214   : > { %v2835_v38 = vpop.xlane.xlu1 %2834 }
 0x215   : > { %v2855_v33 = vmul.f32 0.015625, %v2835_v38  ;;  %v2870_v18 = vmul.f32 %v5354_v43, %v5354_v43 }
 0x217   : > { %2886 = vrot.lane.b32.xlu0 %v2870_v18, %s4794_s20  ;;  %v5360_v4 = vsub.f32 %v5151_v63, %v2855_v33  ;;  %v7335_v33 = vld [vmem:[#allocation21_spill] sm:$0xff] }
 0x218   : > { %v2838_v12 = vpop.xlane.xlu1 %2837 }
 0x219   : > { %v2856_v32 = vmul.f32 0.015625, %v2838_v12  ;;  %v2871_v54 = vmul.f32 %v5360_v4, %v5360_v4 }
 0x21b   : > { %1216 = vrot.lane.b32.xlu0 %v4904_v28, %s4794_s20  ;;  %v5367_v59 = vsub.f32 %v5156_v6, %v2856_v32 }
 0x21c   : > { %v2841_v7 = vpop.xlane.xlu1 %2840 }
 0x21d   : > { %v2857_v1 = vmul.f32 0.015625, %v2841_v7  ;;  %v2872_v31 = vmul.f32 %v5367_v59, %v5367_v59 }
 0x21f   : > { %2888 = vrot.lane.b32.xlu0 %v2871_v54, %s4794_s20  ;;  %v5375_v40 = vsub.f32 %v5161_v10, %v2857_v1  ;;  %v7336_v1 = vld [vmem:[#allocation22_spill] sm:$0xff] }
 0x220   : > { %v2844_v14 = vpop.xlane.xlu1 %2843 }
 0x221   : > { %v2873_v28 = vmul.f32 %v5375_v40, %v5375_v40  ;;  %v2858_v16 = vmul.f32 0.015625, %v2844_v14 }
 0x223   : > { %2890 = vrot.lane.b32.xlu0 %v2872_v31, %s4794_s20  ;;  %v5395_v20 = vsub.f32 %v5144_v51, %v2858_v16  ;;  %v5450_v16 = vld [vmem:[%s4831_s17 + $0x58] sm:$0xff] }
 0x224   : > { %v5399_v61 = vpop.permute.xlu1 %666 }
 0x225   : > { %7326 = vst [vmem:[#allocation41_spill] sm:$0xff] %v5399_v61  ;;  %v2874_v46 = vmul.f32 %v5395_v20, %v5395_v20 }
 0x227   : > { %2892 = vrot.lane.b32.xlu0 %v2873_v28, %s4794_s20 }
 0x228   : > { %v5406_v5 = vpop.permute.xlu1 %670 }
 0x229   : > { %7328 = vst [vmem:[#allocation43_spill] sm:$0xff] %v5406_v5 }
 0x231   : > { %1139 = vadd.xlane.f32.xlu1 %v1138_v52 }
 0x242   : > { %1214 = vrot.lane.b32.xlu1 %v4907_v29, %s4794_s20  ;;  %v5413_v29 = vpop.permute.xlu1 %674 }
 0x243   : > { %7329 = vst [vmem:[#allocation44_spill] sm:$0xff] %v5413_v29 }
 0x246   : > { %2894 = vrot.lane.b32.xlu1 %v2874_v46, %s4794_s20  ;;  %v5424_v42 = vpop.permute.xlu1 %678 }
 0x247   : > { %7330 = vst [vmem:[#allocation45_spill] sm:$0xff] %v5424_v42 }
 0x248   : > { %v2850_v24 = vpop.xlane.xlu0 %2849 }
 0x249   : > { %v2860_v22 = vmul.f32 0.015625, %v2850_v24  ;;  %v5455_v24 = vld [vmem:[%s4831_s17 + $0xb8] sm:$0xff] }
 0x24a   : > { %v5428_v3 = vpop.permute.xlu1 %634 }
 0x24b   : > { %v5409_v44 = vsub.f32 %v5171_v49, %v2860_v22  ;;  %7331 = vst [vmem:[#allocation46_spill] sm:$0xff] %v5428_v3  ;;  %v5807_v3 = vld [vmem:[%s5119_s27] sm:$0xff] }
 0x24d   : > { %v2876_v19 = vmul.f32 %v5409_v44, %v5409_v44 }
 0x24e   : > { %v5430_v8 = vpop.permute.xlu1 %638 }
 0x24f   : > { %2898 = vrot.lane.b32.xlu1 %v2876_v19, %s4794_s20  ;;  %7332 = vst [vmem:[#allocation47_spill] sm:$0xff] %v5430_v8  ;;  %v5461_v19 = vld [vmem:[%s4831_s17 + $0xe8] sm:$0xff] }
 0x252   : > { %v5432_v13 = vpop.permute.xlu1 %642 }
 0x253   : > { %2974 = vrot.lane.b32.xlu1 %v5417_v26, %s4794_s20  ;;  %7333 = vst [vmem:[#allocation48_spill] sm:$0xff] %v5432_v13 }
 0x256   : > { %v5434_v55 = vpop.permute.xlu1 %646 }
 0x257   : > { %2978 = vrot.lane.b32.xlu1 %v5422_v2, %s4794_s20  ;;  %7334 = vst [vmem:[#allocation49_spill] sm:$0xff] %v5434_v55 }
 0x271   : > { %v2847_v39 = vpop.xlane.xlu1 %2846 }
 0x272   : > { %v2859_v38 = vmul.f32 0.015625, %v2847_v39  ;;  %v5466_v39 = vld [vmem:[%s4831_s17 + $0x118] sm:$0xff] }
 0x274   : > { %v5437_v18 = vsub.f32 %v7335_v33, %v2859_v38  ;;  %v1123_v38 = vpop.permute.xlu0 %1122 }
 0x275   : > { %v2853_v12 = vpop.xlane.xlu1 %2852  ;;  %v1150_v30 = vsel %vm275_vm0, %v1123_v38, 0.0 }
 0x276   : > { %v2875_v32 = vmul.f32 %v5437_v18, %v5437_v18  ;;  %v2861_v7 = vmul.f32 0.015625, %v2853_v12  ;;  %v5471_v12 = vld [vmem:[%s4831_s17 + $0x178] sm:$0xff] }
 0x278   : > { %v5442_v54 = vsub.f32 %v7336_v1, %v2861_v7  ;;  %2896 = vrot.lane.b32.xlu0 %v2875_v32, %s4794_s20  ;;  %v1203_v32 = vpop.permute.xlu0 %1202 }
 0x279   : > { %v1117_v31 = vpop.permute.xlu1 %1116 }
 0x27a   : > { %v2877_v28 = vmul.f32 %v5442_v54, %v5442_v54  ;;  %v1141_v52 = vsel %vm275_vm0, %v1117_v31, 0.0 }
 0x27b   : > { %1142 = vadd.xlane.f32.xlu1 %v1141_v52 }
 0x27c   : > { %2900 = vrot.lane.b32.xlu0 %v2877_v28, %s4794_s20  ;;  %v1205_v7 = vpop.permute.xlu0 %1204 }
 0x27d   : > { %v1119_v14 = vpop.permute.xlu1 %1118  ;;  %v1229_v25 = vsel %vm275_vm0, %v1205_v7, 0.0 }
 0x27e   : > { %v1144_v52 = vsel %vm275_vm0, %v1119_v14, 0.0 }
 0x280   : > { %2976 = vrot.lane.b32.xlu0 %v5450_v16, %s4794_s20  ;;  %v1207_v31 = vpop.permute.xlu0 %1206 }
 0x281   : > { %v1121_v46 = vpop.permute.xlu1 %1120 }
 0x282   : > { %v1147_v22 = vsel %vm275_vm0, %v1121_v46, 0.0 }
 0x283   : > { %1148 = vadd.xlane.f32.xlu1 %v1147_v22 }
 0x284   : > { %2980 = vrot.lane.b32.xlu0 %v5455_v24, %s4794_s20  ;;  %v1209_v28 = vpop.permute.xlu0 %1208 }
 0x285   : > { %v1125_v22 = vpop.permute.xlu1 %1124  ;;  %v1235_v14 = vsel %vm275_vm0, %v1209_v28, 0.0 }
 0x286   : > { %v1153_v28 = vsel %vm275_vm0, %v1125_v22, 0.0 }
 0x288   : > { %2982 = vrot.lane.b32.xlu0 %v5461_v19, %s4794_s20  ;;  %v1211_v46 = vpop.permute.xlu0 %1210 }
 0x289   : > { %v1127_v45 = vpop.permute.xlu1 %1126 }
 0x28c   : > { %2984 = vrot.lane.b32.xlu0 %v5466_v39, %s4794_s20  ;;  %v1213_v60 = vpop.permute.xlu0 %1212 }
 0x28d   : > { %v1129_v42 = vpop.permute.xlu1 %1128 }
 0x28e   : > { %v1159_v53 = vsel %vm275_vm0, %v1129_v42, 0.0 }
 0x290   : > { %v2887_v55 = vpop.permute.xlu0 %2886 }
 0x294   : > { %2988 = vrot.lane.b32.xlu1 %v5471_v12, %s4794_s20  ;;  %v1217_v23 = vpop.permute.xlu0 %1216 }
 0x298   : > { %v2889_v38 = vpop.permute.xlu0 %2888 }
 0x299   : > { %v2913_v7 = vsel %vm275_vm0, %v2889_v38, 0.0 }
 0x29c   : > { %v2891_v42 = vpop.permute.xlu0 %2890 }
 0x2ab   : > { %1145 = vadd.xlane.f32.xlu0 %v1144_v52 }
 0x2b8   : > { %1151 = vadd.xlane.f32.xlu1 %v1150_v30  ;;  %v1241_v30 = vsel %vm275_vm0, %v1213_v60, 0.0 }
 0x2bc   : > { %1160 = vadd.xlane.f32.xlu1 %v1159_v53 }
 0x2be   : > { %v5485_v52 = vpop.xlane.xlu1 %1139 }
 0x2c0   : > { %1230 = vadd.xlane.f32.xlu1 %v1229_v25  ;;  %v2893_v25 = vpop.permute.xlu0 %2892 }
 0x2c1   : > { %2986 = vrot.lane.b32.xlu0 %v5480_v58, %s4794_s20  ;;  %v2919_v29 = vsel %vm275_vm0, %v2893_v25, 0.0 }
 0x2c2   : > { %v1215_v13 = vpop.permute.xlu1 %1214 }
 0x2c3   : > { %v1244_v53 = vsel %vm275_vm0, %v1215_v13, 0.0 }
 0x2c4   : > { %1236 = vadd.xlane.f32.xlu1 %v1235_v14  ;;  %v1156_v14 = vsel %vm275_vm0, %v1127_v45, 0.0  ;;  %v2910_v45 = vsel %vm275_vm0, %v2887_v55, 0.0  ;;  %v2061_v55 = vsel %vm275_vm0, %v5161_v10, 0.0 }
 0x2c6   : > { %v2895_v60 = vpop.permute.xlu1 %2894 }
 0x2c8   : > { %1242 = vadd.xlane.f32.xlu1 %v1241_v30  ;;  %v1226_v30 = vsel %vm275_vm0, %v1203_v32, 0.0 }
 0x2ca   : > { %v2899_v35 = vpop.permute.xlu1 %2898 }
 0x2cc   : > { %1245 = vadd.xlane.f32.xlu1 %v1244_v53  ;;  %v1232_v53 = vsel %vm275_vm0, %v1207_v31, 0.0  ;;  %v2055_v31 = vsel %vm275_vm0, %v5151_v63, 0.0  ;;  %v2928_v63 = vsel %vm275_vm0, %v2899_v35, 0.0 }
 0x2ce   : > { %v2975_v25 = vpop.permute.xlu1 %2974 }
 0x2cf   : > { %v2998_v32 = vsel %vm275_vm0, %v2975_v25, 0.0 }
 0x2d0   : > { %2914 = vadd.xlane.f32.xlu1 %v2913_v7 }
 0x2d4   : > { %2920 = vadd.xlane.f32.xlu1 %v2919_v29  ;;  %v1238_v29 = vsel %vm275_vm0, %v1211_v46, 0.0 }
 0x2e0   : > { %1154 = vadd.xlane.f32.xlu0 %v1153_v28 }
 0x2e4   : > { %1157 = vadd.xlane.f32.xlu0 %v1156_v14  ;;  %v1247_v14 = vsel %vm275_vm0, %v1217_v23, 0.0 }
 0x2e8   : > { %1227 = vadd.xlane.f32.xlu0 %v1226_v30  ;;  %v2979_v30 = vpop.permute.xlu1 %2978 }
 0x2ea   : > { %v2897_v13 = vpop.permute.xlu0 %2896 }
 0x2eb   : > { %v2925_v38 = vsel %vm275_vm0, %v2897_v13, 0.0  ;;  %v2916_v13 = vsel %vm275_vm0, %v2891_v42, 0.0  ;;  %v2052_v42 = vsel %vm275_vm0, %v5141_v50, 0.0 }
 0x2ec   : > { %1233 = vadd.xlane.f32.xlu0 %v1232_v53  ;;  %2926 = vadd.xlane.f32.xlu1 %v2925_v38  ;;  %v3004_v53 = vsel %vm275_vm0, %v2979_v30, 0.0  ;;  %v2922_v38 = vsel %vm275_vm0, %v2895_v60, 0.0  ;;  %v2058_v60 = vsel %vm275_vm0, %v5156_v6, 0.0  ;;  %v1162_v6 = vmul.f32 0.015625, %v5485_v52 }
 0x2ee   : > { %v2901_v7 = vpop.permute.xlu0 %2900 }
 0x2ef   : > { %v2931_v22 = vsel %vm275_vm0, %v2901_v7, 0.0 }
 0x2f0   : > { %1239 = vadd.xlane.f32.xlu0 %v1238_v29  ;;  %2932 = vadd.xlane.f32.xlu1 %v2931_v22  ;;  %v2067_v29 = vsel %vm275_vm0, %v7335_v33, 0.0  ;;  %v2064_v22 = vsel %vm275_vm0, %v5144_v51, 0.0 }
 0x2f2   : > { %v2977_v28 = vpop.permute.xlu0 %2976 }
 0x2f3   : > { %v3001_v10 = vsel %vm275_vm0, %v2977_v28, 0.0 }
 0x2f4   : > { %2911 = vadd.xlane.f32.xlu0 %v2910_v45  ;;  %2999 = vadd.xlane.f32.xlu1 %v2998_v32  ;;  %v2070_v32 = vsel %vm275_vm0, %v5171_v49, 0.0 }
 0x2f6   : > { %v2981_v46 = vpop.permute.xlu0 %2980 }
 0x2f7   : > { %v3007_v35 = vsel %vm275_vm0, %v2981_v46, 0.0 }
 0x2f8   : > { %1248 = vadd.xlane.f32.xlu0 %v1247_v14  ;;  %2056 = vadd.xlane.f32.xlu1 %v2055_v31  ;;  %v1170_v14 = vadd.f32 1e-05, %v1162_v6 }
 0x2fa   : > { %v2983_v7 = vpop.permute.xlu0 %2982  ;;  %4615 = vrsqrt.f32 %v1170_v14 }
 0x2fb   : > { %v3010_v23 = vsel %vm275_vm0, %v2983_v7, 0.0 }
 0x2fc   : > { %2917 = vadd.xlane.f32.xlu0 %v2916_v13  ;;  %3005 = vadd.xlane.f32.xlu1 %v3004_v53 }
 0x2fe   : > { %v2985_v50 = vpop.permute.xlu0 %2984 }
 0x2ff   : > { %v3013_v33 = vsel %vm275_vm0, %v2985_v50, 0.0 }
 0x300   : > { %2923 = vadd.xlane.f32.xlu0 %v2922_v38  ;;  %2062 = vadd.xlane.f32.xlu1 %v2061_v55 }
 0x304   : > { %2929 = vadd.xlane.f32.xlu0 %v2928_v63  ;;  %3011 = vadd.xlane.f32.xlu1 %v3010_v23  ;;  %v4616_v51 = vpop.eup %4615 }
 0x305   : > { %v5526_v46 = vmul.f32 %v4616_v51, %v5220_v15  ;;  %v2073_v15 = vsel %vm275_vm0, %v7336_v1, 0.0 }
 0x307   : > { %v1530_v55 = vsub.f32 0.0, %v5526_v46 }
 0x308   : > { %2053 = vadd.xlane.f32.xlu0 %v2052_v42  ;;  %2068 = vadd.xlane.f32.xlu1 %v2067_v29  ;;  %v1143_v25 = vpop.xlane.xlu1 %1142 }
 0x309   : > { %v1163_v52 = vmul.f32 0.015625, %v1143_v25 }
 0x30b   : > { %v1171_v23 = vadd.f32 1e-05, %v1163_v52 }
 0x30c   : > { %3002 = vadd.xlane.f32.xlu0 %v3001_v10 }
 0x310   : > { %2059 = vadd.xlane.f32.xlu0 %v2058_v60  ;;  %v1149_v45 = vpop.xlane.xlu1 %1148 }
 0x311   : > { %v1165_v30 = vmul.f32 0.015625, %v1149_v45 }
 0x313   : > { %v1173_v13 = vadd.f32 1e-05, %v1165_v30 }
 0x314   : > { %3008 = vadd.xlane.f32.xlu0 %v3007_v35  ;;  %v2989_v28 = vpop.permute.xlu1 %2988 }
 0x315   : > { %v3019_v31 = vsel %vm275_vm0, %v2989_v28, 0.0  ;;  %4617 = vrsqrt.f32 %v1173_v13 }
 0x318   : > { %2065 = vadd.xlane.f32.xlu0 %v2064_v22 }
 0x31c   : > { %3014 = vadd.xlane.f32.xlu0 %v3013_v33 }
 0x31f   : > { %v4618_v42 = vpop.eup %4617 }
 0x320   : > { %2071 = vadd.xlane.f32.xlu0 %v2070_v32  ;;  %v5538_v35 = vmul.f32 %v4618_v42, %v5329_v27 }
 0x322   : > { %v1533_v25 = vsub.f32 0.0, %v5538_v35 }
 0x324   : > { %3020 = vadd.xlane.f32.xlu0 %v3019_v31 }
 0x338   : > { %v1146_v53 = vpop.xlane.xlu0 %1145 }
 0x339   : > { %v1164_v38 = vmul.f32 0.015625, %v1146_v53 }
 0x33a   : > { %1546 = vrot.lane.b32.xlu0 %v1530_v55, %s4795_s28 }
 0x33b   : > { %v1172_v49 = vadd.f32 1e-05, %v1164_v38 }
 0x33c   : > { %v2987_v7 = vpop.permute.xlu0 %2986 }
 0x33d   : > { %4619 = vrsqrt.f32 %v1172_v49  ;;  %v3016_v63 = vsel %vm275_vm0, %v2987_v7, 0.0 }
 0x33e   : > { %3017 = vadd.xlane.f32.xlu1 %v3016_v63  ;;  %4621 = vrsqrt.f32 %v1171_v23 }
 0x342   : > { %2074 = vadd.xlane.f32.xlu1 %v2073_v15 }
 0x345   : > { %v1152_v1 = vpop.xlane.xlu1 %1151 }
 0x347   : > { %v4620_v29 = vpop.eup %4619 }
 0x348   : > { %v5534_v10 = vmul.f32 %v4620_v29, %v5323_v47  ;;  %v4622_v22 = vpop.eup %4621  ;;  %v1166_v47 = vmul.f32 0.015625, %v1152_v1 }
 0x349   : > { %v5544_v50 = vmul.f32 %v4622_v22, %v5317_v21  ;;  %v1161_v45 = vpop.xlane.xlu1 %1160  ;;  %v4711_v21 = vld [vmem:[%s4831_s17 + $0x50] sm:$0xff] }
 0x34a   : > { %v1532_v60 = vsub.f32 0.0, %v5534_v10  ;;  %v1174_v33 = vadd.f32 1e-05, %v1166_v47  ;;  %v1169_v52 = vmul.f32 0.015625, %v1161_v45 }
 0x34b   : > { %v1531_v27 = vsub.f32 0.0, %v5544_v50 }
 0x34c   : > { %1550 = vrot.lane.b32.xlu0 %v1532_v60, %s4795_s28  ;;  %4623 = vrsqrt.f32 %v1174_v33  ;;  %v1177_v42 = vadd.f32 1e-05, %v1169_v52 }
 0x34d   : > { %v1231_v32 = vpop.xlane.xlu1 %1230 }
 0x34e   : > { %v1251_v28 = vmul.f32 0.015625, %v1231_v32 }
 0x350   : > { %1552 = vrot.lane.b32.xlu0 %v1533_v25, %s4795_s28  ;;  %v5555_v6 = vsub.f32 %v4711_v21, %v1251_v28 }
 0x351   : > { %v1237_v53 = vpop.xlane.xlu1 %1236 }
 0x352   : > { %v1267_v31 = vmul.f32 %v5555_v6, %v5555_v6  ;;  %v1253_v60 = vmul.f32 0.015625, %v1237_v53  ;;  %v4714_v53 = vld [vmem:[%s4831_s17 + $0x80] sm:$0xff] }
 0x353   : > { %1578 = vrot.lane.b32.xlu1 %v5526_v46, %s4796_s29 }
 0x355   : > { %v1243_v63 = vpop.xlane.xlu1 %1242 }
 0x356   : > { %v4624_v14 = vpop.eup %4623 }
 0x357   : > { %1548 = vrot.lane.b32.xlu1 %v1531_v27, %s4795_s28  ;;  %v5563_v51 = vmul.f32 %v4624_v14, %v5296_v57  ;;  %v4712_v57 = vld [vmem:[%s4831_s17 + $0x20] sm:$0xff]  ;;  %v4713_v27 = vld [vmem:[%s4831_s17 + $0xb0] sm:$0xff] }
 0x358   : > { %v5574_v45 = vsub.f32 %v4713_v27, %v1253_v60 }
 0x359   : > { %v1246_v1 = vpop.xlane.xlu1 %1245  ;;  %v1534_v21 = vsub.f32 0.0, %v5563_v51 }
 0x35b   : > { %1580 = vrot.lane.b32.xlu1 %v5544_v50, %s4796_s29 }
 0x35d   : > { %v2915_v14 = vpop.xlane.xlu1 %2914 }
 0x35f   : > { %1582 = vrot.lane.b32.xlu1 %v5534_v10, %s4796_s29 }
 0x363   : > { %1584 = vrot.lane.b32.xlu1 %v5538_v35, %s4796_s29 }
 0x367   : > { %1284 = vrot.lane.b32.xlu1 %v1267_v31, %s4794_s20  ;;  %v1269_v31 = vmul.f32 %v5574_v45, %v5574_v45 }
 0x36b   : > { %1586 = vrot.lane.b32.xlu1 %v5563_v51, %s4796_s29 }
 0x36d   : > { %v1155_v30 = vpop.xlane.xlu0 %1154 }
 0x36e   : > { %v1167_v13 = vmul.f32 0.015625, %v1155_v30 }
 0x370   : > { %v1175_v55 = vadd.f32 1e-05, %v1167_v13 }
 0x371   : > { %v1158_v38 = vpop.xlane.xlu0 %1157 }
 0x372   : > { %4625 = vrsqrt.f32 %v1175_v55  ;;  %v1168_v49 = vmul.f32 0.015625, %v1158_v38 }
 0x374   : > { %v1176_v7 = vadd.f32 1e-05, %v1168_v49  ;;  %v2935_v49 = vmul.f32 0.015625, %v2915_v14 }
 0x375   : > { %v1228_v15 = vpop.xlane.xlu0 %1227 }
 0x376   : > { %v1250_v23 = vmul.f32 0.015625, %v1228_v15  ;;  %4627 = vrsqrt.f32 %v1176_v7  ;;  %v1255_v7 = vmul.f32 0.015625, %v1243_v63  ;;  %v2943_v60 = vadd.f32 1e-05, %v2935_v49  ;;  %v2921_v63 = vpop.xlane.xlu1 %2920 }
 0x377   : > { %4629 = vrsqrt.f32 %v1177_v42  ;;  %v2937_v14 = vmul.f32 0.015625, %v2921_v63 }
 0x378   : > { %v5568_v29 = vsub.f32 %v4712_v57, %v1250_v23 }
 0x379   : > { %v1234_v22 = vpop.xlane.xlu0 %1233 }
 0x37a   : > { %v1266_v25 = vmul.f32 %v5568_v29, %v5568_v29  ;;  %v1252_v28 = vmul.f32 0.015625, %v1234_v22  ;;  %v4715_v22 = vld [vmem:[%s4831_s17 + $0x110] sm:$0xff] }
 0x37c   : > { %v4626_v47 = vpop.eup %4625  ;;  %1282 = vrot.lane.b32.xlu0 %v1266_v25, %s4794_s20  ;;  %v5586_v55 = vsub.f32 %v4714_v53, %v1252_v28  ;;  %v5600_v25 = vsub.f32 %v4715_v22, %v1255_v7  ;;  %v4716_v53 = vld [vmem:[%s4831_s17 + $0x170] sm:$0xff]  ;;  %v2945_v7 = vadd.f32 1e-05, %v2937_v14  ;;  %v4718_v22 = vld [vmem:[%s4831_s17 + $0x140] sm:$0xff] }
 0x37d   : > { %v1240_v33 = vpop.xlane.xlu0 %1239  ;;  %v5577_v32 = vmul.f32 %v4626_v47, %v5335_v0 }
 0x37e   : > { %v1268_v57 = vmul.f32 %v5586_v55, %v5586_v55  ;;  %7337 = vst [vmem:[#allocation21_spill] sm:$0xff] %v5600_v25  ;;  %v1254_v28 = vmul.f32 0.015625, %v1240_v33  ;;  %v1256_v33 = vmul.f32 0.015625, %v1246_v1 }
 0x37f   : > { %1588 = vrot.lane.b32.xlu1 %v5577_v32, %s4796_s29  ;;  %v1535_v38 = vsub.f32 0.0, %v5577_v32 }
 0x380   : > { %1554 = vrot.lane.b32.xlu0 %v1534_v21, %s4795_s28  ;;  %v4628_v13 = vpop.eup %4627  ;;  %v5625_v1 = vsub.f32 %v4718_v22, %v1256_v33 }
 0x381   : > { %v2912_v30 = vpop.xlane.xlu0 %2911  ;;  %v5592_v23 = vmul.f32 %v4628_v13, %v5339_v48  ;;  %v4630_v42 = vpop.eup %4629  ;;  %v1271_v13 = vmul.f32 %v5600_v25, %v5600_v25 }
 0x382   : > { %v2934_v0 = vmul.f32 0.015625, %v2912_v30  ;;  %v5603_v27 = vmul.f32 %v4630_v42, %v5347_v56  ;;  %7340 = vst [vmem:[#allocation51_spill] sm:$0xff] %v5625_v1  ;;  %v1272_v14 = vmul.f32 %v5625_v1, %v5625_v1 }
 0x383   : > { %1288 = vrot.lane.b32.xlu1 %v1269_v31, %s4794_s20  ;;  %v1536_v31 = vsub.f32 0.0, %v5592_v23 }
 0x384   : > { %v2942_v52 = vadd.f32 1e-05, %v2934_v0  ;;  %1556 = vrot.lane.b32.xlu0 %v1535_v38, %s4795_s28  ;;  %v4717_v38 = vld [vmem:[%s4831_s17 + $0xe0] sm:$0xff] }
 0x385   : > { %v1249_v15 = vpop.xlane.xlu0 %1248  ;;  %v5615_v49 = vsub.f32 %v4717_v38, %v1254_v28 }
 0x386   : > { %4631 = vrsqrt.f32 %v2942_v52  ;;  %v1257_v47 = vmul.f32 0.015625, %v1249_v15  ;;  %v1537_v52 = vsub.f32 0.0, %v5603_v27  ;;  %v2927_v15 = vpop.xlane.xlu1 %2926 }
 0x387   : > { %1590 = vrot.lane.b32.xlu1 %v5592_v23, %s4796_s29  ;;  %4633 = vrsqrt.f32 %v2943_v60  ;;  %7339 = vst [vmem:[#allocation50_spill] sm:$0xff] %v5615_v49  ;;  %v1270_v63 = vmul.f32 %v5615_v49, %v5615_v49 }
 0x388   : > { %1286 = vrot.lane.b32.xlu0 %v1268_v57, %s4794_s20  ;;  %v5612_v0 = vsub.f32 %v4716_v53, %v1257_v47  ;;  %v2939_v47 = vmul.f32 0.015625, %v2927_v15 }
 0x389   : > { %v2918_v48 = vpop.xlane.xlu0 %2917 }
 0x38a   : > { %v2936_v21 = vmul.f32 0.015625, %v2918_v48  ;;  %7338 = vst [vmem:[#allocation22_spill] sm:$0xff] %v5612_v0  ;;  %v1273_v42 = vmul.f32 %v5612_v0, %v5612_v0  ;;  %v2933_v53 = vpop.xlane.xlu1 %2932 }
 0x38b   : > { %1592 = vrot.lane.b32.xlu1 %v5603_v27, %s4796_s29 }
 0x38c   : > { %v2944_v30 = vadd.f32 1e-05, %v2936_v21  ;;  %1558 = vrot.lane.b32.xlu0 %v1536_v31, %s4795_s28 }
 0x38d   : > { %v2924_v56 = vpop.xlane.xlu0 %2923 }
 0x38e   : > { %4635 = vrsqrt.f32 %v2944_v30  ;;  %v2938_v48 = vmul.f32 0.015625, %v2924_v56  ;;  %v2947_v30 = vadd.f32 1e-05, %v2939_v47 }
 0x38f   : > { %1292 = vrot.lane.b32.xlu1 %v1271_v13, %s4794_s20  ;;  %4637 = vrsqrt.f32 %v2945_v7 }
 0x390   : > { %1560 = vrot.lane.b32.xlu0 %v1537_v52, %s4795_s28  ;;  %v4632_v60 = vpop.eup %4631  ;;  %v2946_v13 = vadd.f32 1e-05, %v2938_v48  ;;  %4639 = vrsqrt.f32 %v2947_v30 }
 0x391   : > { %v5622_v57 = vpop.xlane.xlu0 %2929  ;;  %v5632_v21 = vmul.f32 %v4632_v60, %v5354_v43  ;;  %v4634_v31 = vpop.eup %4633 }
 0x392   : > { %v5640_v56 = vmul.f32 %v4634_v31, %v5360_v4  ;;  %4641 = vrsqrt.f32 %v2946_v13  ;;  %v3000_v4 = vpop.xlane.xlu1 %2999 }
 0x393   : > { %1296 = vrot.lane.b32.xlu1 %v1273_v42, %s4794_s20  ;;  %7341 = vst [vmem:[#allocation52_spill] sm:$0xff] %v5632_v21  ;;  %v3270_v43 = vsub.f32 0.0, %v5632_v21 }
 0x394   : > { %1290 = vrot.lane.b32.xlu0 %v1270_v63, %s4794_s20  ;;  %7342 = vst [vmem:[#allocation53_spill] sm:$0xff] %v5640_v56  ;;  %v3271_v42 = vsub.f32 0.0, %v5640_v56  ;;  %v3022_v63 = vmul.f32 0.015625, %v3000_v4 }
 0x395   : > { %v2054_v28 = vpop.xlane.xlu0 %2053 }
 0x397   : > { %3318 = vrot.lane.b32.xlu1 %v5632_v21, %s4796_s29 }
 0x398   : > { %1294 = vrot.lane.b32.xlu0 %v1272_v14, %s4794_s20  ;;  %v4636_v33 = vpop.eup %4635  ;;  %v5666_v14 = vsub.f32 %v5417_v26, %v3022_v63  ;;  %v4720_v63 = vld [vmem:[%s4831_s17 + $0x48] sm:$0xff] }
 0x399   : > { %v3003_v38 = vpop.xlane.xlu0 %3002  ;;  %v5647_v7 = vmul.f32 %v4636_v33, %v5367_v59  ;;  %v4638_v15 = vpop.eup %4637 }
 0x39a   : > { %v3023_v52 = vmul.f32 0.015625, %v3003_v38  ;;  %v5657_v22 = vmul.f32 %v4638_v15, %v5375_v40  ;;  %v4640_v59 = vpop.eup %4639  ;;  %7346 = vst [vmem:[#allocation57_spill] sm:$0xff] %v5666_v14  ;;  %v3038_v33 = vmul.f32 %v5666_v14, %v5666_v14  ;;  %v2057_v15 = vpop.xlane.xlu1 %2056 }
 0x39b   : > { %3320 = vrot.lane.b32.xlu1 %v5640_v56, %s4796_s29  ;;  %7343 = vst [vmem:[#allocation54_spill] sm:$0xff] %v5647_v7  ;;  %v3272_v47 = vsub.f32 0.0, %v5647_v7  ;;  %v5675_v13 = vmul.f32 %v4640_v59, %v5437_v18  ;;  %v4719_v18 = vld [vmem:[%s4831_s17 + $0x18] sm:$0xff]  ;;  %v2940_v59 = vmul.f32 0.015625, %v5622_v57 }
 0x39c   : > { %3286 = vrot.lane.b32.xlu0 %v3270_v43, %s4795_s28  ;;  %v5654_v60 = vsub.f32 %v5450_v16, %v3023_v52  ;;  %7345 = vst [vmem:[#allocation56_spill] sm:$0xff] %v5657_v22  ;;  %v4642_v31 = vpop.eup %4641  ;;  %v3273_v40 = vsub.f32 0.0, %v5657_v22 }
 0x39d   : > { %v5672_v30 = vmul.f32 %v4642_v31, %v5395_v20  ;;  %7348 = vst [vmem:[#allocation59_spill] sm:$0xff] %v5675_v13  ;;  %v3275_v38 = vsub.f32 0.0, %v5675_v13  ;;  %v2076_v20 = vmul.f32 0.015625, %v2054_v28  ;;  %v2941_v28 = vmul.f32 0.015625, %v2933_v53 }
 0x39e   : > { %7344 = vst [vmem:[#allocation55_spill] sm:$0xff] %v5654_v60  ;;  %v3039_v48 = vmul.f32 %v5654_v60, %v5654_v60 }
 0x39f   : > { %3322 = vrot.lane.b32.xlu1 %v5647_v7, %s4796_s29  ;;  %7347 = vst [vmem:[#allocation58_spill] sm:$0xff] %v5672_v30  ;;  %v3274_v43 = vsub.f32 0.0, %v5672_v30  ;;  %v5689_v52 = vsub.f32 %v4719_v18, %v2076_v20  ;;  %v3006_v20 = vpop.xlane.xlu1 %3005 }
 0x3a0   : > { %3288 = vrot.lane.b32.xlu0 %v3271_v42, %s4795_s28  ;;  %v2077_v42 = vmul.f32 0.015625, %v2057_v15  ;;  %v3024_v18 = vmul.f32 0.015625, %v3006_v20 }
 0x3a1   : > { %v2092_v4 = vmul.f32 %v5689_v52, %v5689_v52 }
 0x3a2   : > { %v5702_v57 = vsub.f32 %v5422_v2, %v3024_v18 }
 0x3a3   : > { %3324 = vrot.lane.b32.xlu1 %v5657_v22, %s4796_s29  ;;  %v2063_v20 = vpop.xlane.xlu1 %2062 }
 0x3a4   : > { %3290 = vrot.lane.b32.xlu0 %v3272_v47, %s4795_s28  ;;  %v5694_v47 = vsub.f32 %v4720_v63, %v2077_v42  ;;  %7349 = vst [vmem:[#allocation60_spill] sm:$0xff] %v5702_v57  ;;  %v2079_v18 = vmul.f32 0.015625, %v2063_v20 }
 0x3a6   : > { %v2093_v31 = vmul.f32 %v5694_v47, %v5694_v47 }
 0x3a7   : > { %3056 = vrot.lane.b32.xlu1 %v3039_v48, %s4794_s20  ;;  %v2100_v48 = vsel %vm275_vm0, %v2092_v4, 0.0 }
 0x3a8   : > { %3292 = vrot.lane.b32.xlu0 %v3273_v40, %s4795_s28  ;;  %v2948_v40 = vadd.f32 1e-05, %v2940_v59  ;;  %v3040_v59 = vmul.f32 %v5702_v57, %v5702_v57  ;;  %v5903_v57 = vld [vmem:[%s5111_s24 + $0x38] sm:$0xff] }
 0x3a9   : > { %7357 = vst [vmem:[#allocation68_spill] sm:$0xff] %v5903_v57 }
 0x3aa   : > { %4643 = vrsqrt.f32 %v2948_v40 }
 0x3ab   : > { %3326 = vrot.lane.b32.xlu1 %v5672_v30, %s4796_s29 }
 0x3ac   : > { %3054 = vrot.lane.b32.xlu0 %v3038_v33, %s4794_s20  ;;  %v2103_v33 = vsel %vm275_vm0, %v2093_v31, 0.0 }
 0x3af   : > { %3296 = vrot.lane.b32.xlu1 %v3275_v38, %s4795_s28  ;;  %v2949_v38 = vadd.f32 1e-05, %v2941_v28 }
 0x3b0   : > { %3294 = vrot.lane.b32.xlu0 %v3274_v43, %s4795_s28  ;;  %v2060_v43 = vpop.xlane.xlu0 %2059 }
 0x3b1   : > { %4645 = vrsqrt.f32 %v2949_v38  ;;  %v4721_v38 = vld [vmem:[%s4831_s17 + $0x78] sm:$0xff] }
 0x3b3   : > { %3328 = vrot.lane.b32.xlu1 %v5675_v13, %s4796_s29 }
 0x3b4   : > { %v3009_v15 = vpop.xlane.xlu0 %3008  ;;  %v4644_v4 = vpop.eup %4643 }
 0x3b5   : > { %v3025_v42 = vmul.f32 0.015625, %v3009_v15 }
 0x3b7   : > { %v5705_v63 = vsub.f32 %v5455_v24, %v3025_v42  ;;  %v4722_v42 = vld [vmem:[%s4831_s17 + $0xa8] sm:$0xff] }
 0x3b9   : > { %7350 = vst [vmem:[#allocation61_spill] sm:$0xff] %v5705_v63  ;;  %v3041_v31 = vmul.f32 %v5705_v63, %v5705_v63 }
 0x3bb   : > { %v4646_v53 = vpop.eup %4645 }
 0x3bc   : > { %v5716_v28 = vmul.f32 %v4646_v53, %v5442_v54 }
 0x3be   : > { %7352 = vst [vmem:[#allocation63_spill] sm:$0xff] %v5716_v28 }
 0x3cf   : > { %2101 = vadd.xlane.f32.xlu0 %v2100_v48  ;;  %v5710_v48 = vmul.f32 %v4644_v4, %v5409_v44  ;;  %v2078_v44 = vmul.f32 0.015625, %v2060_v43  ;;  %v5733_v4 = vsub.f32 %v4722_v42, %v2079_v18 }
 0x3d1   : > { %7351 = vst [vmem:[#allocation62_spill] sm:$0xff] %v5710_v48  ;;  %v3276_v40 = vsub.f32 0.0, %v5710_v48  ;;  %v5728_v54 = vsub.f32 %v4721_v38, %v2078_v44 }
 0x3d3   : > { %v2094_v15 = vmul.f32 %v5728_v54, %v5728_v54 }
 0x3d5   : > { %v2106_v53 = vsel %vm275_vm0, %v2094_v15, 0.0 }
 0x3d7   : > { %2104 = vadd.xlane.f32.xlu1 %v2103_v33  ;;  %v3277_v33 = vsub.f32 0.0, %v5716_v28 }
 0x3e5   : > { %3058 = vrot.lane.b32.xlu0 %v3040_v59, %s4794_s20  ;;  %v2095_v59 = vmul.f32 %v5733_v4, %v5733_v4 }
 0x3e7   : > { %v2109_v43 = vsel %vm275_vm0, %v2095_v59, 0.0  ;;  %v4723_v59 = vld [vmem:[%s4831_s17 + $0xd8] sm:$0xff] }
 0x3e8   : > { %3060 = vrot.lane.b32.xlu1 %v3041_v31, %s4794_s20  ;;  %v2066_v31 = vpop.xlane.xlu0 %2065 }
 0x3e9   : > { %3298 = vrot.lane.b32.xlu0 %v3276_v40, %s4795_s28  ;;  %v3012_v40 = vpop.xlane.xlu1 %3011 }
 0x3ec   : > { %3300 = vrot.lane.b32.xlu1 %v3277_v33, %s4795_s28  ;;  %v3026_v33 = vmul.f32 0.015625, %v3012_v40  ;;  %v3015_v44 = vpop.xlane.xlu0 %3014 }
 0x3ed   : > { %3330 = vrot.lane.b32.xlu0 %v5710_v48, %s4796_s29  ;;  %v3027_v38 = vmul.f32 0.015625, %v3015_v44  ;;  %v2069_v40 = vpop.xlane.xlu1 %2068 }
 0x3ee   : > { %v5740_v20 = vsub.f32 %v5461_v19, %v3026_v33  ;;  %v2081_v33 = vmul.f32 0.015625, %v2069_v40 }
 0x3ef   : > { %v5743_v18 = vsub.f32 %v5466_v39, %v3027_v38  ;;  %v4724_v38 = vld [vmem:[%s4831_s17 + $0x108] sm:$0xff] }
 0x3f0   : > { %3332 = vrot.lane.b32.xlu1 %v5716_v28, %s4796_s29  ;;  %7353 = vst [vmem:[#allocation64_spill] sm:$0xff] %v5740_v20  ;;  %v3042_v15 = vmul.f32 %v5740_v20, %v5740_v20  ;;  %v5757_v17 = vsub.f32 %v4724_v38, %v2081_v33 }
 0x3f1   : > { %7354 = vst [vmem:[#allocation65_spill] sm:$0xff] %v5743_v18  ;;  %v3043_v42 = vmul.f32 %v5743_v18, %v5743_v18 }
 0x40c   : > { %2107 = vadd.xlane.f32.xlu0 %v2106_v53  ;;  %v2080_v53 = vmul.f32 0.015625, %v2066_v31 }
 0x414   : > { %2110 = vadd.xlane.f32.xlu1 %v2109_v43  ;;  %v5752_v43 = vsub.f32 %v4723_v59, %v2080_v53  ;;  %v3018_v53 = vpop.xlane.xlu1 %3017 }
 0x415   : > { %v3028_v59 = vmul.f32 0.015625, %v3018_v53 }
 0x416   : > { %v2096_v44 = vmul.f32 %v5752_v43, %v5752_v43 }
 0x417   : > { %v5764_v8 = vsub.f32 %v5480_v58, %v3028_v59 }
 0x418   : > { %v2112_v41 = vsel %vm275_vm0, %v2096_v44, 0.0  ;;  %v2075_v53 = vpop.xlane.xlu1 %2074 }
 0x419   : > { %7355 = vst [vmem:[#allocation66_spill] sm:$0xff] %v5764_v8  ;;  %v2083_v59 = vmul.f32 0.015625, %v2075_v53 }
 0x422   : > { %3062 = vrot.lane.b32.xlu0 %v3042_v15, %s4794_s20  ;;  %v2097_v15 = vmul.f32 %v5757_v17, %v5757_v17 }
 0x424   : > { %v2115_v31 = vsel %vm275_vm0, %v2097_v15, 0.0  ;;  %v4725_v15 = vld [vmem:[%s4831_s17 + $0x138] sm:$0xff] }
 0x425   : > { %3064 = vrot.lane.b32.xlu1 %v3043_v42, %s4794_s20  ;;  %v2072_v42 = vpop.xlane.xlu0 %2071 }
 0x426   : > { %v2082_v38 = vmul.f32 0.015625, %v2072_v42 }
 0x429   : > { %v3021_v40 = vpop.xlane.xlu0 %3020 }
 0x42a   : > { %v3029_v34 = vmul.f32 0.015625, %v3021_v40  ;;  %v4726_v40 = vld [vmem:[%s4831_s17 + $0x168] sm:$0xff] }
 0x42b   : > { %v5781_v5 = vsub.f32 %v4726_v40, %v2083_v59 }
 0x42c   : > { %v5767_v33 = vsub.f32 %v5471_v12, %v3029_v34 }
 0x42d   : > { %v2099_v37 = vmul.f32 %v5781_v5, %v5781_v5 }
 0x42e   : > { %7356 = vst [vmem:[#allocation67_spill] sm:$0xff] %v5767_v33  ;;  %v3045_v44 = vmul.f32 %v5767_v33, %v5767_v33 }
 0x42f   : > { %v2121_v42 = vsel %vm275_vm0, %v2099_v37, 0.0 }
 0x441   : > { %2113 = vadd.xlane.f32.xlu0 %v2112_v41  ;;  %v3044_v41 = vmul.f32 %v5764_v8, %v5764_v8 }
 0x449   : > { %2116 = vadd.xlane.f32.xlu1 %v2115_v31  ;;  %v5776_v31 = vsub.f32 %v4725_v15, %v2082_v38  ;;  %v2156_v38 = vsel %vm275_vm0, %v5417_v26, 0.0  ;;  %v2159_v15 = vsel %vm275_vm0, %v5450_v16, 0.0 }
 0x44b   : > { %v2098_v34 = vmul.f32 %v5776_v31, %v5776_v31 }
 0x457   : > { %3066 = vrot.lane.b32.xlu0 %v3044_v41, %s4794_s20  ;;  %v2118_v41 = vsel %vm275_vm0, %v2098_v34, 0.0  ;;  %v1547_v34 = vpop.permute.xlu0 %1546 }
 0x45a   : > { %3068 = vrot.lane.b32.xlu1 %v3045_v44, %s4794_s20  ;;  %v1579_v44 = vpop.permute.xlu1 %1578 }
 0x45b   : > { %v1602_v40 = vsel %vm565_vm1, %v1547_v34, %v1579_v44 }
 0x45c   : > { %v1610_v26 = vsel %vm574_vm2, %v1602_v40, %v1547_v34 }
 0x45d   : > { %v1618_v16 = vsel %vm583_vm3, %v1610_v26, %v1579_v44  ;;  %v2165_v26 = vsel %vm275_vm0, %v5455_v24, 0.0 }
 0x45e   : > { %v1549_v53 = vpop.permute.xlu1 %1548 }
 0x462   : > { %v1581_v59 = vpop.permute.xlu1 %1580 }
 0x463   : > { %v1603_v37 = vsel %vm565_vm1, %v1549_v53, %v1581_v59 }
 0x466   : > { %v1583_v40 = vpop.permute.xlu1 %1582 }
 0x476   : > { %2119 = vadd.xlane.f32.xlu0 %v2118_v41  ;;  %v4727_v41 = vld [vmem:[%s5111_s24] sm:$0xff] }
 0x47e   : > { %2122 = vadd.xlane.f32.xlu1 %v2121_v42  ;;  %v260_v42 = vld [vmem:[%s5111_s24 + $0x8] sm:$0xff] }
 0x482   : > { %2157 = vadd.xlane.f32.xlu1 %v2156_v38  ;;  %v1611_v38 = vsel %vm574_vm2, %v1603_v37, %v1549_v53  ;;  %v1551_v53 = vpop.permute.xlu0 %1550 }
 0x486   : > { %2160 = vadd.xlane.f32.xlu1 %v2159_v15  ;;  %v1619_v15 = vsel %vm583_vm3, %v1611_v38, %v1581_v59  ;;  %v1553_v44 = vpop.permute.xlu0 %1552  ;;  %v2162_v59 = vsel %vm275_vm0, %v5422_v2, 0.0 }
 0x487   : > { %v1627_v34 = vmul.f32 %v1619_v15, %v5804_v11  ;;  %v1604_v15 = vsel %vm565_vm1, %v1551_v53, %v1583_v40 }
 0x488   : > { %v1612_v2 = vsel %vm574_vm2, %v1604_v15, %v1551_v53  ;;  %v5835_v53 = vld [vmem:[%s5119_s27 + $0x18] sm:$0xff] }
 0x48a   : > { %v1283_v37 = vpop.permute.xlu0 %1282 }
 0x48c   : > { %1370 = vrot.lane.b32.xlu0 %v4727_v41, %s4794_s20  ;;  %v1626_v41 = vmul.f32 %v5807_v3, %v1618_v16 }
 0x490   : > { %1372 = vrot.lane.b32.xlu0 %v260_v42, %s4794_s20  ;;  %v1306_v42 = vsel %vm275_vm0, %v1283_v37, 0.0  ;;  %v263_v37 = vld [vmem:[%s5111_s24 + $0x20] sm:$0xff] }
 0x494   : > { %1374 = vrot.lane.b32.xlu0 %v261_v62, %s4794_s20  ;;  %v1585_v62 = vpop.permute.xlu1 %1584 }
 0x497   : > { %1642 = vrot.lane.b32.xlu1 %v1626_v41, %s4794_s20  ;;  %v1620_v41 = vsel %vm583_vm3, %v1612_v2, %v1583_v40 }
 0x498   : > { %1644 = vrot.lane.b32.xlu0 %v1627_v34, %s4794_s20  ;;  %v1285_v38 = vpop.permute.xlu1 %1284  ;;  %v5823_v34 = vld [vmem:[%s5119_s27 + $0x10] sm:$0xff] }
 0x499   : > { %v1309_v16 = vsel %vm275_vm0, %v1285_v38, 0.0  ;;  %v1628_v24 = vmul.f32 %v1620_v41, %v5823_v34  ;;  %v262_v38 = vld [vmem:[%s5111_s24 + $0x18] sm:$0xff] }
 0x4b7   : > { %2163 = vadd.xlane.f32.xlu0 %v2162_v59  ;;  %v1605_v59 = vsel %vm565_vm1, %v1553_v44, %v1585_v62 }
 0x4bb   : > { %2166 = vadd.xlane.f32.xlu1 %v2165_v26  ;;  %1307 = vadd.xlane.f32.xlu0 %v1306_v42  ;;  %v1613_v26 = vsel %vm574_vm2, %v1605_v59, %v1553_v44  ;;  %v2168_v44 = vsel %vm275_vm0, %v5461_v19, 0.0 }
 0x4bc   : > { %v1621_v42 = vsel %vm583_vm3, %v1613_v26, %v1585_v62  ;;  %v1587_v62 = vpop.permute.xlu1 %1586 }
 0x4bd   : > { %v1629_v40 = vmul.f32 %v1621_v42, %v5835_v53 }
 0x4bf   : > { %1310 = vadd.xlane.f32.xlu0 %v1309_v16  ;;  %v1555_v16 = vpop.permute.xlu0 %1554 }
 0x4c0   : > { %v1589_v26 = vpop.permute.xlu1 %1588 }
 0x4c3   : > { %v1557_v15 = vpop.permute.xlu0 %1556 }
 0x4c7   : > { %v1287_v2 = vpop.permute.xlu0 %1286 }
 0x4cb   : > { %v5839_v41 = vpop.permute.xlu0 %1558 }
 0x4cc   : > { %1646 = vrot.lane.b32.xlu1 %v1628_v24, %s4794_s20 }
 0x4cf   : > { %v1561_v24 = vpop.permute.xlu0 %1560 }
 0x4d0   : > { %1378 = vrot.lane.b32.xlu1 %v263_v37, %s4794_s20  ;;  %v2171_v37 = vsel %vm275_vm0, %v5466_v39, 0.0 }
 0x4d3   : > { %v1291_v59 = vpop.permute.xlu0 %1290 }
 0x4d5   : > { %1376 = vrot.lane.b32.xlu0 %v262_v38, %s4794_s20  ;;  %v1312_v38 = vsel %vm275_vm0, %v1287_v2, 0.0  ;;  %v265_v2 = vld [vmem:[%s5111_s24 + $0x30] sm:$0xff] }
 0x4d7   : > { %v5845_v42 = vpop.permute.xlu0 %1294 }
 0x4d9   : > { %1648 = vrot.lane.b32.xlu0 %v1629_v40, %s4794_s20  ;;  %v1289_v40 = vpop.permute.xlu1 %1288 }
 0x4da   : > { %v1315_v61 = vsel %vm275_vm0, %v1289_v40, 0.0 }
 0x4db   : > { %v5849_v19 = vpop.permute.xlu0 %3286 }
 0x4f4   : > { %2169 = vadd.xlane.f32.xlu1 %v2168_v44  ;;  %v1607_v44 = vsel %vm565_vm1, %v1557_v15, %v1589_v26 }
 0x4f5   : > { %v1615_v39 = vsel %vm574_vm2, %v1607_v44, %v1557_v15  ;;  %v5871_v44 = vld [vmem:[%s5119_s27 + $0x20] sm:$0xff] }
 0x4f6   : > { %v1623_v36 = vsel %vm583_vm3, %v1615_v39, %v1589_v26 }
 0x4f8   : > { %2172 = vadd.xlane.f32.xlu0 %v2171_v37  ;;  %v5855_v37 = vpop.permute.xlu0 %3288 }
 0x4fc   : > { %1313 = vadd.xlane.f32.xlu0 %v1312_v38  ;;  %v5861_v38 = vld [vmem:[%s5119_s27 + $0x28] sm:$0xff]  ;;  %v5865_v8 = vpop.permute.xlu0 %3290 }
 0x4fd   : > { %v1631_v40 = vmul.f32 %v1623_v36, %v5861_v38 }
 0x500   : > { %1316 = vadd.xlane.f32.xlu0 %v1315_v61  ;;  %v1606_v61 = vsel %vm565_vm1, %v1555_v16, %v1587_v62  ;;  %v5873_v26 = vpop.permute.xlu0 %3292 }
 0x501   : > { %v1614_v15 = vsel %vm574_vm2, %v1606_v61, %v1555_v16  ;;  %v2174_v16 = vsel %vm275_vm0, %v5480_v58, 0.0  ;;  %v2177_v61 = vsel %vm275_vm0, %v5471_v12, 0.0 }
 0x505   : > { %1380 = vrot.lane.b32.xlu1 %v264_v9, %s4794_s20  ;;  %v1622_v9 = vsel %vm583_vm3, %v1614_v15, %v1587_v62 }
 0x506   : > { %v1630_v39 = vmul.f32 %v1622_v9, %v5871_v44 }
 0x509   : > { %1382 = vrot.lane.b32.xlu1 %v265_v2, %s4794_s20  ;;  %v5877_v2 = vpop.permute.xlu0 %3054 }
 0x50d   : > { %1652 = vrot.lane.b32.xlu1 %v1631_v40, %s4794_s20  ;;  %v5879_v33 = vpop.permute.xlu0 %3294  ;;  %v1591_v40 = vpop.permute.xlu1 %1590 }
 0x511   : > { %v5881_v36 = vpop.xlane.xlu0 %2101  ;;  %v1593_v15 = vpop.permute.xlu1 %1592 }
 0x512   : > { %v1609_v58 = vsel %vm565_vm1, %v1561_v24, %v1593_v15 }
 0x515   : > { %v5883_v14 = vpop.permute.xlu0 %3058  ;;  %v1293_v20 = vpop.permute.xlu1 %1292 }
 0x516   : > { %1650 = vrot.lane.b32.xlu0 %v1630_v39, %s4794_s20  ;;  %v1318_v39 = vsel %vm275_vm0, %v1291_v59, 0.0  ;;  %v1321_v18 = vsel %vm275_vm0, %v1293_v20, 0.0  ;;  %v5908_v59 = vld [vmem:[%s5119_s27 + $0x38] sm:$0xff]  ;;  %v1608_v20 = vsel %vm565_vm1, %v5839_v41, %v1591_v40 }
 0x519   : > { %v5887_v62 = vpop.permute.xlu0 %3298  ;;  %v1297_v63 = vpop.permute.xlu1 %1296 }
 0x51a   : > { %v1327_v28 = vsel %vm275_vm0, %v1297_v63, 0.0 }
 0x51d   : > { %v5891_v9 = vpop.permute.xlu0 %3330 }
 0x521   : > { %v5894_v60 = vpop.xlane.xlu0 %2107 }
 0x525   : > { %v5899_v12 = vpop.permute.xlu0 %3062 }
 0x531   : > { %2175 = vadd.xlane.f32.xlu1 %v2174_v16  ;;  %v1617_v16 = vsel %vm574_vm2, %v1609_v58, %v1561_v24  ;;  %v1616_v24 = vsel %vm574_vm2, %v1608_v20, %v5839_v41  ;;  %v3319_v41 = vpop.permute.xlu1 %3318 }
 0x532   : > { %v1625_v1 = vsel %vm583_vm3, %v1617_v16, %v1593_v15  ;;  %v1624_v58 = vsel %vm583_vm3, %v1616_v24, %v1591_v40  ;;  %v5924_v16 = vld [vmem:[%s5119_s27 + $0x30] sm:$0xff]  ;;  %v1324_v40 = vsel %vm275_vm0, %v5845_v42, 0.0 }
 0x535   : > { %2178 = vadd.xlane.f32.xlu0 %v2177_v61  ;;  %v5910_v61 = vpop.xlane.xlu0 %2113  ;;  %v3321_v24 = vpop.permute.xlu1 %3320 }
 0x539   : > { %1319 = vadd.xlane.f32.xlu0 %v1318_v39  ;;  %v1633_v39 = vmul.f32 %v1625_v1, %v5908_v59  ;;  %v3323_v7 = vpop.permute.xlu1 %3322 }
 0x53d   : > { %1322 = vadd.xlane.f32.xlu0 %v1321_v18  ;;  %v5916_v18 = vpop.permute.xlu0 %3066  ;;  %v3325_v56 = vpop.permute.xlu1 %3324 }
 0x541   : > { %v5920_v15 = vpop.xlane.xlu0 %2119 }
 0x542   : > { %1384 = vrot.lane.b32.xlu1 %v5903_v57, %s4794_s20  ;;  %v1632_v57 = vmul.f32 %v1624_v58, %v5924_v16 }
 0x545   : > { %v5927_v0 = vpop.permute.xlu0 %1370 }
 0x546   : > { %1656 = vrot.lane.b32.xlu1 %v1633_v39, %s4794_s20  ;;  %7358 = vst [vmem:[#allocation69_spill] sm:$0xff] %v5927_v0 }
 0x549   : > { %v5930_v1 = vpop.permute.xlu0 %1372 }
 0x54a   : > { %7359 = vst [vmem:[#allocation70_spill] sm:$0xff] %v5930_v1 }
 0x54d   : > { %v5932_v39 = vpop.permute.xlu0 %1374 }
 0x54e   : > { %7360 = vst [vmem:[#allocation71_spill] sm:$0xff] %v5932_v39 }
 0x551   : > { %v5934_v13 = vpop.permute.xlu0 %1644 }
 0x553   : > { %1654 = vrot.lane.b32.xlu0 %v1632_v57, %s4794_s20  ;;  %v3343_v57 = vsel %vm565_vm1, %v5855_v37, %v3321_v24 }
 0x554   : > { %v3351_v30 = vsel %vm574_vm2, %v3343_v57, %v5855_v37 }
 0x555   : > { %v5936_v20 = vpop.xlane.xlu0 %2163  ;;  %v3359_v49 = vsel %vm583_vm3, %v3351_v30, %v3321_v24 }
 0x556   : > { %v3367_v25 = vmul.f32 %v3359_v49, %v5804_v11 }
 0x559   : > { %v5940_v58 = vpop.xlane.xlu0 %1307 }
 0x55d   : > { %v5947_v48 = vpop.xlane.xlu0 %1310 }
 0x561   : > { %v5951_v42 = vpop.permute.xlu0 %1376 }
 0x562   : > { %7361 = vst [vmem:[#allocation72_spill] sm:$0xff] %v5951_v42 }
 0x56a   : > { %1325 = vadd.xlane.f32.xlu1 %v1324_v40  ;;  %v3342_v40 = vsel %vm565_vm1, %v5849_v19, %v3319_v41 }
 0x56b   : > { %v3350_v63 = vsel %vm574_vm2, %v3342_v40, %v5849_v19 }
 0x56c   : > { %v3358_v37 = vsel %vm583_vm3, %v3350_v63, %v3319_v41 }
 0x56d   : > { %v3366_v30 = vmul.f32 %v5807_v3, %v3358_v37  ;;  %v3078_v37 = vsel %vm275_vm0, %v5877_v2, 0.0  ;;  %v3344_v2 = vsel %vm565_vm1, %v5865_v8, %v3323_v7 }
 0x572   : > { %1328 = vadd.xlane.f32.xlu0 %v1327_v28  ;;  %v5958_v28 = vpop.permute.xlu0 %1648 }
 0x57b   : > { %3384 = vrot.lane.b32.xlu1 %v3367_v25, %s4794_s20 }
 0x585   : > { %v5961_v57 = vpop.xlane.xlu0 %2172 }
 0x588   : > { %3382 = vrot.lane.b32.xlu0 %v3366_v30, %s4794_s20 }
 0x589   : > { %v1314_v11 = vpop.xlane.xlu0 %1313 }
 0x58a   : > { %v1332_v49 = vmul.f32 0.015625, %v1314_v11  ;;  %v3057_v11 = vpop.permute.xlu1 %3056 }
 0x58c   : > { %v1340_v24 = vadd.f32 1e-05, %v1332_v49 }
 0x58d   : > { %v1317_v25 = vpop.xlane.xlu0 %1316 }
 0x58e   : > { %v1333_v21 = vmul.f32 0.015625, %v1317_v25  ;;  %4647 = vrsqrt.f32 %v1340_v24  ;;  %v3352_v24 = vsel %vm574_vm2, %v3344_v2, %v5865_v8 }
 0x58f   : > { %v3360_v25 = vsel %vm583_vm3, %v3352_v24, %v3323_v7 }
 0x590   : > { %v1341_v22 = vadd.f32 1e-05, %v1333_v21  ;;  %v3345_v21 = vsel %vm565_vm1, %v5873_v26, %v3325_v56 }
 0x592   : > { %4649 = vrsqrt.f32 %v1341_v22  ;;  %v3081_v22 = vsel %vm275_vm0, %v3057_v11, 0.0  ;;  %v3084_v11 = vsel %vm275_vm0, %v5883_v14, 0.0 }
 0x598   : > { %v4648_v19 = vpop.eup %4647 }
 0x599   : > { %v5966_v41 = vmul.f32 %v4648_v19, %v5586_v55  ;;  %v3353_v55 = vsel %vm574_vm2, %v3345_v21, %v5873_v26  ;;  %v3368_v19 = vmul.f32 %v3360_v25, %v5823_v34 }
 0x59c   : > { %v4650_v40 = vpop.eup %4649 }
 0x59d   : > { %v5969_v63 = vmul.f32 %v4650_v40, %v5574_v45  ;;  %v3361_v45 = vsel %vm583_vm3, %v3353_v55, %v3325_v56  ;;  %v3327_v40 = vpop.permute.xlu1 %3326 }
 0x59e   : > { %v3369_v49 = vmul.f32 %v3361_v45, %v5835_v53 }
 0x59f   : > { %3079 = vadd.xlane.f32.xlu1 %v3078_v37 }
 0x5a1   : > { %v3297_v26 = vpop.permute.xlu1 %3296 }
 0x5a5   : > { %v3329_v37 = vpop.permute.xlu1 %3328 }
 0x5a7   : > { %3082 = vadd.xlane.f32.xlu0 %v3081_v22  ;;  %v3347_v22 = vsel %vm565_vm1, %v3297_v26, %v3329_v37 }
 0x5a8   : > { %v3355_v8 = vsel %vm574_vm2, %v3347_v22, %v3297_v26 }
 0x5a9   : > { %v2105_v56 = vpop.xlane.xlu1 %2104  ;;  %v3363_v7 = vsel %vm583_vm3, %v3355_v8, %v3329_v37  ;;  %v3090_v37 = vsel %vm275_vm0, %v5899_v12, 0.0  ;;  %v3348_v12 = vsel %vm565_vm1, %v5887_v62, %v5891_v9 }
 0x5aa   : > { %v3371_v45 = vmul.f32 %v3363_v7, %v5861_v38 }
 0x5ad   : > { %v3061_v21 = vpop.permute.xlu1 %3060 }
 0x5ae   : > { %v3087_v55 = vsel %vm275_vm0, %v3061_v21, 0.0 }
 0x5b0   : > { %3388 = vrot.lane.b32.xlu1 %v3369_v49, %s4794_s20  ;;  %v3346_v49 = vsel %vm565_vm1, %v5879_v33, %v3327_v40 }
 0x5b1   : > { %v3354_v14 = vsel %vm574_vm2, %v3346_v49, %v5879_v33  ;;  %v3301_v25 = vpop.permute.xlu1 %3300  ;;  %v3356_v49 = vsel %vm574_vm2, %v3348_v12, %v5887_v62  ;;  %v2124_v62 = vmul.f32 0.015625, %v5881_v36  ;;  %v2125_v12 = vmul.f32 0.015625, %v2105_v56 }
 0x5b2   : > { %v3362_v2 = vsel %vm583_vm3, %v3354_v14, %v3327_v40  ;;  %v3364_v14 = vsel %vm583_vm3, %v3356_v49, %v5891_v9  ;;  %v1523_v49 = vmul.f32 %v5930_v1, %v5544_v50  ;;  %v1525_v50 = vmul.f32 %v5951_v42, %v5538_v35 }
 0x5b3   : > { %v3370_v24 = vmul.f32 %v3362_v2, %v5871_v44  ;;  %v2132_v9 = vadd.f32 1e-05, %v2124_v62  ;;  %v2133_v36 = vadd.f32 1e-05, %v2125_v12  ;;  %v1522_v12 = vmul.f32 %v5927_v0, %v5526_v46 }
 0x5b5   : > { %4651 = vrsqrt.f32 %v2132_v9  ;;  %v1651_v9 = vpop.permute.xlu0 %1650 }
 0x5b6   : > { %4653 = vrsqrt.f32 %v2133_v36  ;;  %v2128_v36 = vmul.f32 0.015625, %v5910_v61 }
 0x5bd   : > { %3386 = vrot.lane.b32.xlu0 %v3368_v19, %s4794_s20  ;;  %v3333_v19 = vpop.permute.xlu1 %3332 }
 0x5be   : > { %v3349_v21 = vsel %vm565_vm1, %v3301_v25, %v3333_v19 }
 0x5bf   : > { %v3357_v33 = vsel %vm574_vm2, %v3349_v21, %v3301_v25  ;;  %v3096_v21 = vsel %vm275_vm0, %v5916_v18, 0.0  ;;  %v2126_v18 = vmul.f32 0.015625, %v5894_v60  ;;  %v1669_v60 = vadd.f32 %v5958_v28, %v1525_v50 }
 0x5c1   : > { %v2111_v26 = vpop.xlane.xlu1 %2110 }
 0x5d4   : > { %3085 = vadd.xlane.f32.xlu1 %v3084_v11  ;;  %v3065_v11 = vpop.permute.xlu1 %3064 }
 0x5d5   : > { %v3093_v22 = vsel %vm275_vm0, %v3065_v11, 0.0 }
 0x5d8   : > { %v6010_v40 = vpop.xlane.xlu1 %2116 }
 0x5dc   : > { %3088 = vadd.xlane.f32.xlu0 %v3087_v55  ;;  %v3365_v55 = vsel %vm583_vm3, %v3357_v33, %v3333_v19  ;;  %v3069_v7 = vpop.permute.xlu1 %3068 }
 0x5dd   : > { %v3373_v8 = vmul.f32 %v3365_v55, %v5908_v59  ;;  %v3099_v55 = vsel %vm275_vm0, %v3069_v7, 0.0 }
 0x5e5   : > { %3392 = vrot.lane.b32.xlu1 %v3371_v45, %s4794_s20  ;;  %v6018_v45 = vpop.xlane.xlu1 %2122 }
 0x5e9   : > { %v6024_v2 = vpop.xlane.xlu1 %2157 }
 0x5ed   : > { %v6028_v25 = vpop.xlane.xlu1 %2160 }
 0x5f1   : > { %v1643_v19 = vpop.permute.xlu1 %1642 }
 0x5f2   : > { %3390 = vrot.lane.b32.xlu0 %v3370_v24, %s4794_s20  ;;  %v3372_v24 = vmul.f32 %v3364_v14, %v5924_v16  ;;  %v1667_v14 = vadd.f32 %v5934_v13, %v1523_v49  ;;  %v6055_v13 = vpop.xlane.xlu0 %2178  ;;  %v1666_v35 = vadd.f32 %v1643_v19, %v1522_v12 }
 0x609   : > { %3091 = vadd.xlane.f32.xlu1 %v3090_v37  ;;  %v6030_v37 = vpop.xlane.xlu1 %2166 }
 0x60d   : > { %v1647_v11 = vpop.permute.xlu1 %1646 }
 0x611   : > { %3094 = vadd.xlane.f32.xlu0 %v3093_v22  ;;  %v6035_v22 = vpop.permute.xlu1 %1378 }
 0x612   : > { %7362 = vst [vmem:[#allocation73_spill] sm:$0xff] %v6035_v22 }
 0x615   : > { %v6037_v33 = vpop.xlane.xlu1 %2169 }
 0x61a   : > { %3396 = vrot.lane.b32.xlu1 %v3373_v8, %s4794_s20  ;;  %v6040_v8 = vpop.permute.xlu1 %1380 }
 0x61b   : > { %7363 = vst [vmem:[#allocation74_spill] sm:$0xff] %v6040_v8  ;;  %v1527_v28 = vmul.f32 %v6040_v8, %v5577_v32  ;;  %v2136_v32 = vadd.f32 1e-05, %v2128_v36  ;;  %v2181_v36 = vmul.f32 0.015625, %v6028_v25 }
 0x61e   : > { %v6049_v7 = vpop.permute.xlu1 %1382 }
 0x61f   : > { %7364 = vst [vmem:[#allocation75_spill] sm:$0xff] %v6049_v7 }
 0x622   : > { %v1653_v56 = vpop.permute.xlu1 %1652 }
 0x627   : > { %3394 = vrot.lane.b32.xlu0 %v3372_v24, %s4794_s20  ;;  %v1524_v24 = vmul.f32 %v5932_v39, %v5534_v10 }
 0x629   : > { %v1668_v62 = vadd.f32 %v1647_v11, %v1524_v24  ;;  %v2127_v11 = vmul.f32 0.015625, %v2111_v26  ;;  %v1526_v26 = vmul.f32 %v6035_v22, %v5563_v51  ;;  %v1671_v24 = vadd.f32 %v1653_v56, %v1527_v28 }
 0x63e   : > { %3097 = vadd.xlane.f32.xlu1 %v3096_v21  ;;  %v2134_v21 = vadd.f32 1e-05, %v2126_v18  ;;  %v6064_v18 = vpop.xlane.xlu1 %2175 }
 0x640   : > { %4655 = vrsqrt.f32 %v2134_v21  ;;  %v1670_v21 = vadd.f32 %v1651_v9, %v1526_v26  ;;  %v4729_v26 = vld [vmem:[%s4831_s17 + $0x28] sm:$0xff] }
 0x646   : > { %3100 = vadd.xlane.f32.xlu0 %v3099_v55  ;;  %v4652_v55 = vpop.eup %4651 }
 0x647   : > { %v6058_v10 = vmul.f32 %v4652_v55, %v5689_v52  ;;  %v2135_v52 = vadd.f32 1e-05, %v2127_v11  ;;  %v4654_v46 = vpop.eup %4653 }
 0x648   : > { %v6082_v61 = vmul.f32 %v4654_v46, %v5694_v47 }
 0x649   : > { %v2388_v49 = vsub.f32 0.0, %v6058_v10  ;;  %4657 = vrsqrt.f32 %v2135_v52  ;;  %v2180_v52 = vmul.f32 0.015625, %v6024_v2 }
 0x64a   : > { %v4656_v19 = vpop.eup %4655  ;;  %4659 = vrsqrt.f32 %v2136_v32 }
 0x64b   : > { %v6085_v51 = vmul.f32 %v4656_v19, %v5728_v54  ;;  %v1528_v54 = vmul.f32 %v6049_v7, %v5592_v23  ;;  %v6120_v46 = vsub.f32 %v4729_v26, %v2180_v52  ;;  %v2129_v19 = vmul.f32 0.015625, %v6010_v40 }
 0x64d   : > { %v2390_v9 = vsub.f32 0.0, %v6085_v51  ;;  %v2196_v32 = vmul.f32 %v6120_v46, %v6120_v46 }
 0x64f   : > { %1684 = vrot.lane.b32.xlu1 %v1667_v14, %s4794_s20  ;;  %v6068_v14 = vpop.xlane.xlu0 %1319  ;;  %v2204_v25 = vsel %vm275_vm0, %v2196_v32, 0.0 }
 0x653   : > { %1686 = vrot.lane.b32.xlu1 %v1668_v62, %s4794_s20  ;;  %v6076_v62 = vpop.permute.xlu1 %1384  ;;  %v6079_v55 = vpop.xlane.xlu0 %1322 }
 0x654   : > { %7365 = vst [vmem:[#allocation76_spill] sm:$0xff] %v6076_v62  ;;  %v1529_v56 = vmul.f32 %v6076_v62, %v5603_v27  ;;  %v4658_v12 = vpop.eup %4657 }
 0x655   : > { %v4660_v27 = vpop.eup %4659 }
 0x656   : > { %v6109_v23 = vmul.f32 %v4660_v27, %v5752_v43  ;;  %v4730_v43 = vld [vmem:[%s4831_s17 + $0x58] sm:$0xff] }
 0x657   : > { %1688 = vrot.lane.b32.xlu1 %v1669_v60, %s4794_s20  ;;  %v1657_v50 = vpop.permute.xlu1 %1656  ;;  %v2389_v60 = vsub.f32 0.0, %v6082_v61  ;;  %v1655_v47 = vpop.permute.xlu0 %1654 }
 0x658   : > { %v1673_v11 = vadd.f32 %v1657_v50, %v1529_v56  ;;  %v2130_v50 = vmul.f32 0.015625, %v5920_v15 }
 0x65b   : > { %2404 = vrot.lane.b32.xlu1 %v2388_v49, %s4792_s18  ;;  %v1672_v49 = vadd.f32 %v1655_v47, %v1528_v54  ;;  %v1329_v32 = vpop.xlane.xlu0 %1328 }
 0x65c   : > { %1682 = vrot.lane.b32.xlu0 %v1666_v35, %s4794_s20  ;;  %v6102_v35 = vmul.f32 %v4658_v12, %v5733_v4  ;;  %v2392_v4 = vsub.f32 0.0, %v6109_v23  ;;  %v2183_v12 = vmul.f32 0.015625, %v6030_v37 }
 0x65e   : > { %v2391_v28 = vsub.f32 0.0, %v6102_v35 }
 0x65f   : > { %1692 = vrot.lane.b32.xlu1 %v1671_v24, %s4794_s20  ;;  %v6123_v24 = vsub.f32 %v4730_v43, %v2181_v36 }
 0x660   : > { %1690 = vrot.lane.b32.xlu0 %v1670_v21, %s4794_s20 }
 0x661   : > { %v2197_v21 = vmul.f32 %v6123_v24, %v6123_v24 }
 0x663   : > { %2438 = vrot.lane.b32.xlu1 %v6082_v61, %s4793_s19  ;;  %v2207_v2 = vsel %vm275_vm0, %v2197_v21, 0.0  ;;  %v6169_v21 = vpop.xlane.xlu1 %1325 }
 0x664   : > { %2436 = vrot.lane.b32.xlu0 %v6058_v10, %s4793_s19 }
 0x667   : > { %2408 = vrot.lane.b32.xlu1 %v2390_v9, %s4792_s18  ;;  %v2137_v9 = vadd.f32 1e-05, %v2129_v19 }
 0x668   : > { %2406 = vrot.lane.b32.xlu0 %v2389_v60, %s4792_s18  ;;  %v2138_v60 = vadd.f32 1e-05, %v2130_v50  ;;  %v2184_v50 = vmul.f32 0.015625, %v6037_v33 }
 0x669   : > { %4661 = vrsqrt.f32 %v2137_v9  ;;  %v3385_v9 = vpop.permute.xlu1 %3384 }
 0x66a   : > { %4663 = vrsqrt.f32 %v2138_v60  ;;  %v1331_v60 = vmul.f32 0.015625, %v5947_v48  ;;  %v2187_v48 = vmul.f32 0.015625, %v6055_v13 }
 0x66b   : > { %1696 = vrot.lane.b32.xlu1 %v1673_v11, %s4794_s20 }
 0x66c   : > { %1694 = vrot.lane.b32.xlu0 %v1672_v49, %s4794_s20  ;;  %v4731_v49 = vld [vmem:[%s4831_s17 + $0x88] sm:$0xff] }
 0x66f   : > { %2442 = vrot.lane.b32.xlu1 %v6102_v35, %s4793_s19 }
 0x670   : > { %2440 = vrot.lane.b32.xlu0 %v6085_v51, %s4793_s19 }
 0x673   : > { %2444 = vrot.lane.b32.xlu1 %v6109_v23, %s4793_s19  ;;  %v4662_v40 = vpop.eup %4661 }
 0x674   : > { %2410 = vrot.lane.b32.xlu0 %v2391_v28, %s4792_s18  ;;  %v6134_v56 = vmul.f32 %v4662_v40, %v5757_v17  ;;  %v4664_v47 = vpop.eup %4663  ;;  %v2182_v17 = vmul.f32 0.015625, %v5936_v20  ;;  %v4733_v40 = vld [vmem:[%s4831_s17 + $0xe8] sm:$0xff] }
 0x675   : > { %v6139_v15 = vmul.f32 %v4664_v47, %v5776_v31  ;;  %v4732_v31 = vld [vmem:[%s4831_s17 + $0xb8] sm:$0xff]  ;;  %v6179_v47 = vsub.f32 %v4733_v40, %v2184_v50 }
 0x676   : > { %v2393_v54 = vsub.f32 0.0, %v6134_v56  ;;  %v6150_v27 = vsub.f32 %v4731_v49, %v2182_v17  ;;  %v6153_v28 = vsub.f32 %v4732_v31, %v2183_v12  ;;  %v2186_v17 = vmul.f32 0.015625, %v6064_v18  ;;  %v4735_v31 = vld [vmem:[%s4831_s17 + $0x148] sm:$0xff] }
 0x677   : > { %v2394_v11 = vsub.f32 0.0, %v6139_v15  ;;  %v1330_v12 = vmul.f32 0.015625, %v5940_v58  ;;  %v1339_v49 = vadd.f32 1e-05, %v1331_v60 }
 0x678   : > { %2412 = vrot.lane.b32.xlu0 %v2392_v4, %s4792_s18  ;;  %v2131_v4 = vmul.f32 0.015625, %v6018_v45  ;;  %v2199_v52 = vmul.f32 %v6153_v28, %v6153_v28  ;;  %v2198_v36 = vmul.f32 %v6150_v27, %v6150_v27 }
 0x67a   : > { %v2139_v26 = vadd.f32 1e-05, %v2131_v4  ;;  %v2213_v43 = vsel %vm275_vm0, %v2199_v52, 0.0  ;;  %v2210_v20 = vsel %vm275_vm0, %v2198_v36, 0.0  ;;  %v6189_v4 = vsub.f32 %v4735_v31, %v2186_v17 }
 0x67b   : > { %v2200_v36 = vmul.f32 %v6179_v47, %v6179_v47 }
 0x67c   : > { %4665 = vrsqrt.f32 %v2139_v26  ;;  %7366 = vst [vmem:[#allocation77_spill] sm:$0xff] %v6189_v4  ;;  %v1338_v26 = vadd.f32 1e-05, %v1330_v12  ;;  %v2202_v13 = vmul.f32 %v6189_v4, %v6189_v4 }
 0x67d   : > { %4667 = vrsqrt.f32 %v1339_v49  ;;  %v1334_v49 = vmul.f32 0.015625, %v6068_v14 }
 0x67e   : > { %4669 = vrsqrt.f32 %v1338_v26 }
 0x686   : > { %v4666_v37 = vpop.eup %4665 }
 0x687   : > { %v6163_v19 = vmul.f32 %v4666_v37, %v5781_v5  ;;  %v6175_v5 = vpop.permute.xlu0 %3382  ;;  %v4668_v12 = vpop.eup %4667 }
 0x688   : > { %v1355_v26 = vmul.f32 %v4668_v12, %v5555_v6  ;;  %v1336_v12 = vmul.f32 0.015625, %v6169_v21  ;;  %v7369_v21 = vld [vmem:[#allocation56_spill] sm:$0xff] }
 0x689   : > { %v2395_v45 = vsub.f32 0.0, %v6163_v19 }
 0x68b   : > { %v3083_v33 = vpop.xlane.xlu0 %3082 }
 0x697   : > { %2208 = vadd.xlane.f32.xlu1 %v2207_v2  ;;  %2205 = vadd.xlane.f32.xlu0 %v2204_v25  ;;  %v2185_v2 = vmul.f32 0.015625, %v5961_v57  ;;  %v6173_v25 = vpop.xlane.xlu1 %3079 }
 0x69b   : > { %v6186_v57 = vpop.permute.xlu1 %3388 }
 0x69f   : > { %v3086_v18 = vpop.xlane.xlu1 %3085 }
 0x6a0   : > { %v3104_v6 = vmul.f32 0.015625, %v3086_v18  ;;  %v3102_v18 = vmul.f32 0.015625, %v6173_v25 }
 0x6a3   : > { %v6206_v40 = vpop.permute.xlu1 %3392 }
 0x6a7   : > { %v3092_v31 = vpop.xlane.xlu1 %3091 }
 0x6a8   : > { %2446 = vrot.lane.b32.xlu1 %v6134_v56, %s4793_s19 }
 0x6ac   : > { %2448 = vrot.lane.b32.xlu1 %v6139_v15, %s4793_s19 }
 0x6ad   : > { %2414 = vrot.lane.b32.xlu0 %v2393_v54, %s4792_s18  ;;  %v4734_v54 = vld [vmem:[%s4831_s17 + $0x118] sm:$0xff] }
 0x6b1   : > { %2416 = vrot.lane.b32.xlu0 %v2394_v11, %s4792_s18  ;;  %v6182_v11 = vsub.f32 %v4734_v54, %v2185_v2  ;;  %v2222_v2 = vsel %vm275_vm0, %v2202_v13, 0.0  ;;  %v1335_v54 = vmul.f32 0.015625, %v6079_v55  ;;  %v6215_v13 = vpop.permute.xlu1 %3396 }
 0x6b3   : > { %v2201_v52 = vmul.f32 %v6182_v11, %v6182_v11 }
 0x6b5   : > { %v2219_v37 = vsel %vm275_vm0, %v2201_v52, 0.0  ;;  %v4670_v52 = vpop.eup %4669 }
 0x6d0   : > { %2214 = vadd.xlane.f32.xlu1 %v2213_v43  ;;  %2211 = vadd.xlane.f32.xlu0 %v2210_v20  ;;  %v4736_v43 = vld [vmem:[%s4831_s17 + $0x178] sm:$0xff]  ;;  %v3387_v20 = vpop.permute.xlu0 %3386 }
 0x6d1   : > { %v6197_v58 = vsub.f32 %v4736_v43, %v2187_v48  ;;  %v1342_v43 = vadd.f32 1e-05, %v1334_v49 }
 0x6d3   : > { %v2203_v60 = vmul.f32 %v6197_v58, %v6197_v58 }
 0x6d4   : > { %v3089_v50 = vpop.xlane.xlu0 %3088 }
 0x6d5   : > { %v2225_v17 = vsel %vm275_vm0, %v2203_v60, 0.0  ;;  %v3105_v60 = vmul.f32 0.015625, %v3089_v50  ;;  %v3112_v50 = vadd.f32 1e-05, %v3104_v6  ;;  %v7371_v6 = vld [vmem:[#allocation21_spill] sm:$0xff] }
 0x6d8   : > { %v6211_v48 = vpop.permute.xlu0 %3390 }
 0x6e1   : > { %2450 = vrot.lane.b32.xlu1 %v6163_v19, %s4793_s19 }
 0x6e6   : > { %2418 = vrot.lane.b32.xlu0 %v2395_v45, %s4792_s18  ;;  %v2216_v45 = vsel %vm275_vm0, %v2200_v36, 0.0  ;;  %v1343_v36 = vadd.f32 1e-05, %v1335_v54  ;;  %v1337_v54 = vmul.f32 0.015625, %v1329_v32  ;;  %v1344_v32 = vadd.f32 1e-05, %v1336_v12 }
 0x6e8   : > { %4671 = vrsqrt.f32 %v1343_v36 }
 0x6e9   : > { %4673 = vrsqrt.f32 %v1342_v43  ;;  %v3103_v43 = vmul.f32 0.015625, %v3083_v33 }
 0x705   : > { %2220 = vadd.xlane.f32.xlu1 %v2219_v37  ;;  %2217 = vadd.xlane.f32.xlu0 %v2216_v45  ;;  %v3095_v37 = vpop.xlane.xlu0 %3094  ;;  %v1354_v45 = vmul.f32 %v4670_v52, %v5568_v29  ;;  %v7368_v29 = vld [vmem:[#allocation54_spill] sm:$0xff]  ;;  %v3113_v52 = vadd.f32 1e-05, %v3105_v60 }
 0x706   : > { %v3264_v49 = vmul.f32 %v7368_v29, %v5932_v39  ;;  %v3107_v36 = vmul.f32 0.015625, %v3095_v37  ;;  %v7370_v37 = vld [vmem:[#allocation52_spill] sm:$0xff] }
 0x707   : > { %v4543_v55 = vpack.i.bf16 %v1355_v26, %v1354_v45  ;;  %v1345_v26 = vadd.f32 1e-05, %v1337_v54  ;;  %v3262_v60 = vmul.f32 %v7370_v37, %v5927_v0  ;;  %4675 = vrsqrt.f32 %v3113_v52 }
 0x708   : > { %v3408_v45 = vadd.f32 %v3387_v20, %v3264_v49  ;;  %v3115_v33 = vadd.f32 1e-05, %v3107_v36  ;;  %v3111_v54 = vadd.f32 1e-05, %v3103_v43 }
 0x709   : > { %2223 = vadd.xlane.f32.xlu0 %v2222_v2  ;;  %v7367_v2 = vld [vmem:[#allocation53_spill] sm:$0xff]  ;;  %v3395_v4 = vpop.permute.xlu0 %3394  ;;  %4677 = vrsqrt.f32 %v1345_v26  ;;  %v3406_v25 = vadd.f32 %v6175_v5, %v3262_v60  ;;  %v7376_v60 = vld [vmem:[#allocation63_spill] sm:$0xff] }
 0x70a   : > { %v3263_v14 = vmul.f32 %v7367_v2, %v5930_v1  ;;  %v3106_v1 = vmul.f32 0.015625, %v3092_v31  ;;  %4679 = vrsqrt.f32 %v3112_v50 }
 0x70b   : > { %4681 = vrsqrt.f32 %v1344_v32 }
 0x70c   : > { %v3407_v30 = vadd.f32 %v3385_v9, %v3263_v14  ;;  %v3265_v14 = vmul.f32 %v7369_v21, %v5951_v42  ;;  %v3114_v29 = vadd.f32 1e-05, %v3106_v1  ;;  %v7372_v21 = vld [vmem:[#allocation50_spill] sm:$0xff]  ;;  %4683 = vrsqrt.f32 %v3115_v33 }
 0x70d   : > { %2226 = vadd.xlane.f32.xlu0 %v2225_v17  ;;  %v3098_v17 = vpop.xlane.xlu1 %3097  ;;  %v3101_v2 = vpop.xlane.xlu0 %3100  ;;  %4685 = vrsqrt.f32 %v3111_v54  ;;  %v7373_v1 = vld [vmem:[#allocation62_spill] sm:$0xff]  ;;  %v3269_v33 = vmul.f32 %v7376_v60, %v6076_v62 }
 0x70e   : > { %v3109_v20 = vmul.f32 0.015625, %v3101_v2  ;;  %v3409_v31 = vadd.f32 %v6186_v57, %v3265_v14  ;;  %v3108_v49 = vmul.f32 0.015625, %v3098_v17  ;;  %4687 = vrsqrt.f32 %v3114_v29  ;;  %v7374_v17 = vld [vmem:[#allocation58_spill] sm:$0xff] }
 0x70f   : > { %v3268_v5 = vmul.f32 %v7373_v1, %v6049_v7  ;;  %v3266_v43 = vmul.f32 %v7374_v17, %v6035_v22  ;;  %v7375_v2 = vpack.i.bf16 %v5969_v63, %v5966_v41  ;;  %v7382_v17 = vld [vmem:[#allocation65_spill] sm:$0xff]  ;;  %v6351_v22 = vld [vmem:[%s5111_s24 + $0x10] sm:$0xff] }
 0x710   : > { %v3117_v36 = vadd.f32 1e-05, %v3109_v20  ;;  %v3116_v26 = vadd.f32 1e-05, %v3108_v49 }
 0x711   : > { %v6224_v9 = vpop.permute.xlu1 %1684  ;;  %v3410_v32 = vadd.f32 %v6211_v48, %v3266_v43  ;;  %v6252_v14 = vpop.permute.xlu0 %1682  ;;  %v7378_v48 = vld [vmem:[#allocation61_spill] sm:$0xff] }
 0x715   : > { %v6237_v52 = vpop.permute.xlu1 %1686 }
 0x716   : > { %4544 = vrot.lane.b32.xlu1 %v4543_v55, %s4794_s20  ;;  %v4672_v55 = vpop.eup %4671 }
 0x717   : > { %v1359_v12 = vmul.f32 %v4672_v55, %v7371_v6  ;;  %v3412_v55 = vadd.f32 %v3395_v4, %v3268_v5  ;;  %v3413_v4 = vadd.f32 %v6215_v13, %v3269_v33  ;;  %v7385_v33 = vld [vmem:[#allocation57_spill] sm:$0xff] }
 0x71a   : > { %3424 = vrot.lane.b32.xlu1 %v3407_v30, %s4794_s20  ;;  %v4674_v30 = vpop.eup %4673 }
 0x71b   : > { %v1358_v37 = vmul.f32 %v4674_v30, %v7372_v21  ;;  %v4676_v50 = vpop.eup %4675 }
 0x71c   : > { %v4678_v30 = vpop.eup %4677  ;;  %v3129_v54 = vmul.f32 %v4676_v50, %v7378_v48 }
 0x71d   : > { %v4553_v57 = vpack.i.bf16 %v1359_v12, %v1358_v37  ;;  %v4680_v20 = vpop.eup %4679 }
 0x71e   : > { %3426 = vrot.lane.b32.xlu1 %v3408_v45, %s4794_s20  ;;  %v3110_v45 = vadd.f32 1e-05, %v3102_v18  ;;  %v6250_v18 = vpop.permute.xlu1 %1688  ;;  %v4682_v63 = vpop.eup %4681 }
 0x71f   : > { %v4684_v6 = vpop.eup %4683 }
 0x720   : > { %4689 = vrsqrt.f32 %v3110_v45  ;;  %v4686_v49 = vpop.eup %4685  ;;  %v7380_v45 = vld [vmem:[#allocation60_spill] sm:$0xff]  ;;  %v3131_v43 = vmul.f32 %v4684_v6, %v7382_v17  ;;  %v7387_v6 = vld [vmem:[#allocation66_spill] sm:$0xff] }
 0x721   : > { %4691 = vrsqrt.f32 %v3117_v36  ;;  %v3128_v21 = vmul.f32 %v4680_v20, %v7380_v45  ;;  %v4688_v37 = vpop.eup %4687 }
 0x722   : > { %3428 = vrot.lane.b32.xlu1 %v3409_v31, %s4794_s20  ;;  %4693 = vrsqrt.f32 %v3116_v26  ;;  %v7377_v31 = vld [vmem:[#allocation59_spill] sm:$0xff]  ;;  %v2405_v36 = vpop.permute.xlu1 %2404 }
 0x723   : > { %3422 = vrot.lane.b32.xlu0 %v3406_v25, %s4794_s20  ;;  %v3267_v41 = vmul.f32 %v7377_v31, %v6040_v8  ;;  %v7379_v25 = vld [vmem:[#allocation22_spill] sm:$0xff]  ;;  %v7381_v26 = vld [vmem:[#allocation51_spill] sm:$0xff]  ;;  %v4568_v5 = vpack.i.bf16 %v3129_v54, %v3128_v21  ;;  %v7401_v8 = vld [vmem:[#allocation44_spill] sm:$0xff] }
 0x724   : > { %v1361_v29 = vmul.f32 %v4678_v30, %v7379_v25  ;;  %v1360_v13 = vmul.f32 %v4682_v63, %v7381_v26  ;;  %v7389_v26 = vld [vmem:[#allocation38_spill] sm:$0xff] }
 0x725   : > { %v3411_v12 = vadd.f32 %v6206_v40, %v3267_v41  ;;  %v7386_v41 = vld [vmem:[#allocation67_spill] sm:$0xff] }
 0x726   : > { %4554 = vrot.lane.b32.xlu1 %v4553_v57, %s4794_s20  ;;  %v6266_v57 = vpop.permute.xlu0 %1690 }
 0x727   : > { %4549 = vrot.lane.b32.xlu0 %v7375_v2, %s4794_s20  ;;  %v4558_v2 = vpack.i.bf16 %v1361_v29, %v1360_v13 }
 0x72a   : > { %3434 = vrot.lane.b32.xlu1 %v3412_v55, %s4794_s20  ;;  %v4690_v1 = vpop.eup %4689  ;;  %v7383_v55 = vld [vmem:[#allocation55_spill] sm:$0xff]  ;;  %v2437_v48 = vpop.permute.xlu0 %2436 }
 0x72b   : > { %3430 = vrot.lane.b32.xlu0 %v3410_v32, %s4794_s20  ;;  %v4692_v40 = vpop.eup %4691  ;;  %v3127_v50 = vmul.f32 %v4686_v49, %v7383_v55  ;;  %v7384_v32 = vld [vmem:[#allocation64_spill] sm:$0xff]  ;;  %v3126_v20 = vmul.f32 %v4690_v1, %v7385_v33  ;;  %v7393_v33 = vld [vmem:[#allocation39_spill] sm:$0xff] }
 0x72c   : > { %v3130_v30 = vmul.f32 %v4688_v37, %v7384_v32  ;;  %v4694_v60 = vpop.eup %4693  ;;  %v3133_v63 = vmul.f32 %v4692_v40, %v7386_v41  ;;  %v7388_v37 = vld [vmem:[#allocation34_spill] sm:$0xff] }
 0x72d   : > { %v4563_v54 = vpack.i.bf16 %v3127_v50, %v3126_v20  ;;  %v688_v13 = vsel %vm565_vm1, %v7389_v26, %v7388_v37  ;;  %v7391_v40 = vld [vmem:[#allocation46_spill] sm:$0xff] }
 0x72e   : > { %3436 = vrot.lane.b32.xlu1 %v3413_v4, %s4794_s20  ;;  %v4573_v31 = vpack.i.bf16 %v3131_v43, %v3130_v30  ;;  %v6277_v4 = vpop.permute.xlu1 %1692  ;;  %v2407_v49 = vpop.permute.xlu0 %2406  ;;  %v696_v17 = vsel %vm574_vm2, %v688_v13, %v7389_v26  ;;  %v7390_v43 = vld [vmem:[#allocation41_spill] sm:$0xff] }
 0x72f   : > { %3432 = vrot.lane.b32.xlu0 %v3411_v12, %s4794_s20  ;;  %v3132_v12 = vmul.f32 %v4694_v60, %v7387_v6  ;;  %v704_v55 = vsel %vm583_vm3, %v696_v17, %v7388_v37  ;;  %v7392_v60 = vld [vmem:[#allocation35_spill] sm:$0xff]  ;;  %v7394_v6 = vld [vmem:[#allocation26_spill] sm:$0xff] }
 0x730   : > { %v690_v20 = vsel %vm565_vm1, %v7393_v33, %v7392_v60  ;;  %v7396_v37 = vld [vmem:[#allocation47_spill] sm:$0xff] }
 0x731   : > { %v4578_v25 = vpack.i.bf16 %v3133_v63, %v3132_v12  ;;  %v698_v63 = vsel %vm574_vm2, %v690_v20, %v7393_v33  ;;  %v6332_v33 = vld [vmem:[%s5111_s24 + $0x8] sm:$0xff]  ;;  %v7397_v20 = vld [vmem:[#allocation30_spill] sm:$0xff] }
 0x732   : > { %4569 = vrot.lane.b32.xlu1 %v4568_v5, %s4794_s20  ;;  %v2439_v29 = vpop.permute.xlu1 %2438  ;;  %v6283_v21 = vpop.permute.xlu0 %1694 }
 0x733   : > { %4559 = vrot.lane.b32.xlu0 %v4558_v2, %s4794_s20  ;;  %v689_v2 = vsel %vm565_vm1, %v7391_v40, %v7390_v43 }
 0x734   : > { %v697_v50 = vsel %vm574_vm2, %v689_v2, %v7391_v40  ;;  %v6323_v2 = vld [vmem:[%s5119_s27 + $0x8] sm:$0xff] }
 0x735   : > { %v705_v41 = vsel %vm583_vm3, %v697_v50, %v7390_v43  ;;  %v706_v43 = vsel %vm583_vm3, %v698_v63, %v7392_v60 }
 0x736   : > { %4574 = vrot.lane.b32.xlu1 %v4573_v31, %s4794_s20  ;;  %v2409_v45 = vpop.permute.xlu1 %2408  ;;  %v6290_v5 = vpop.permute.xlu0 %2440  ;;  %v712_v31 = vmul.f32 %v5807_v3, %v704_v55  ;;  %v713_v3 = vmul.f32 %v6323_v2, %v705_v41  ;;  %v2460_v55 = vsel %vm565_vm1, %v2405_v36, %v2437_v48 }
 0x737   : > { %4564 = vrot.lane.b32.xlu0 %v4563_v54, %s4794_s20  ;;  %v4737_v54 = vld [vmem:[%s5111_s24] sm:$0xff]  ;;  %v2468_v41 = vsel %vm574_vm2, %v2460_v55, %v2405_v36  ;;  %v7400_v36 = vld [vmem:[#allocation27_spill] sm:$0xff] }
 0x738   : > { %v608_v12 = vmul.f32 %v4737_v54, %v7394_v6  ;;  %v609_v6 = vmul.f32 %v6332_v33, %v7397_v20  ;;  %v610_v55 = vmul.f32 %v6351_v22, %v7400_v36  ;;  %v6368_v36 = vld [vmem:[%s5119_s27] sm:$0xff] }
 0x73a   : > { %4579 = vrot.lane.b32.xlu1 %v4578_v25, %s4794_s20  ;;  %v6288_v1 = vpop.permute.xlu1 %1696  ;;  %v6303_v30 = vpop.permute.xlu0 %2410  ;;  %v7395_v25 = vld [vmem:[#allocation43_spill] sm:$0xff]  ;;  %v720_v40 = vadd.f32 %v712_v31, %v608_v12  ;;  %v7398_v31 = vld [vmem:[#allocation36_spill] sm:$0xff]  ;;  %v721_v63 = vadd.f32 %v713_v3, %v609_v6 }
 0x73b   : > { %v691_v26 = vsel %vm565_vm1, %v7396_v37, %v7395_v25  ;;  %v7399_v12 = vld [vmem:[#allocation40_spill] sm:$0xff] }
 0x73c   : > { %v699_v50 = vsel %vm574_vm2, %v691_v26, %v7396_v37  ;;  %v692_v62 = vsel %vm565_vm1, %v7399_v12, %v7398_v31  ;;  %v714_v37 = vmul.f32 %v706_v43, %v5823_v34  ;;  %v7402_v3 = vld [vmem:[#allocation48_spill] sm:$0xff]  ;;  %v2476_v34 = vsel %vm583_vm3, %v2468_v41, %v2437_v48  ;;  %v7404_v41 = vld [vmem:[#allocation37_spill] sm:$0xff] }
 0x73d   : > { %v707_v26 = vsel %vm583_vm3, %v699_v50, %v7395_v25  ;;  %v700_v20 = vsel %vm574_vm2, %v692_v62, %v7399_v12  ;;  %v693_v6 = vsel %vm565_vm1, %v7402_v3, %v7401_v8  ;;  %v2462_v12 = vsel %vm565_vm1, %v2409_v45, %v6290_v5 }
 0x73e   : > { %v6301_v32 = vpop.permute.xlu1 %2442  ;;  %v6320_v17 = vpop.permute.xlu0 %2412  ;;  %v722_v43 = vadd.f32 %v714_v37, %v610_v55  ;;  %v715_v50 = vmul.f32 %v707_v26, %v5835_v53  ;;  %v708_v62 = vsel %vm583_vm3, %v700_v20, %v7398_v31  ;;  %v2484_v39 = vmul.f32 %v6368_v36, %v2476_v34  ;;  %v7403_v53 = vld [vmem:[#allocation31_spill] sm:$0xff]  ;;  %v7405_v37 = vld [vmem:[#allocation42_spill] sm:$0xff] }
 0x73f   : > { %v694_v26 = vsel %vm565_vm1, %v7405_v37, %v7404_v41  ;;  %v2470_v20 = vsel %vm574_vm2, %v2462_v12, %v2409_v45  ;;  %v7406_v45 = vld [vmem:[#allocation28_spill] sm:$0xff] }
 0x742   : > { %v6318_v13 = vpop.permute.xlu1 %2444  ;;  %v6342_v60 = vpop.xlane.xlu0 %2205 }
 0x746   : > { %v6340_v7 = vpop.xlane.xlu1 %2208  ;;  %v2415_v48 = vpop.permute.xlu0 %2414 }
 0x74a   : > { %v6371_v0 = vpop.permute.xlu1 %2446  ;;  %v2417_v12 = vpop.permute.xlu0 %2416 }
 0x755   : > { %728 = vxpose.xlu0.b32.start [1/8] (short) (narrow) %v720_v40, 64  ;;  %v2461_v40 = vsel %vm565_vm1, %v2407_v49, %v2439_v29 }
 0x756   : > { %v2469_v25 = vsel %vm574_vm2, %v2461_v40, %v2407_v49  ;;  %v6374_v49 = vld [vmem:[%s5111_s24 + $0x18] sm:$0xff] }
 0x757   : > { %v611_v31 = vmul.f32 %v6374_v49, %v7403_v53  ;;  %v2477_v40 = vsel %vm583_vm3, %v2469_v25, %v2439_v29  ;;  %v702_v53 = vsel %vm574_vm2, %v694_v26, %v7405_v37  ;;  %v6393_v29 = vld [vmem:[%s5111_s24 + $0x20] sm:$0xff]  ;;  %v7408_v25 = vld [vmem:[#allocation49_spill] sm:$0xff] }
 0x758   : > { %v710_v26 = vsel %vm583_vm3, %v702_v53, %v7404_v41  ;;  %v2382_v53 = vmul.f32 %v6351_v22, %v6085_v51 }
 0x759   : > { %729 = vxpose.xlu0.b32.cont [2/8] (short) (narrow) %v721_v63, 64  ;;  %v701_v63 = vsel %vm574_vm2, %v693_v6, %v7402_v3  ;;  %v723_v55 = vadd.f32 %v715_v50, %v611_v31  ;;  %v2380_v3 = vmul.f32 %v4737_v54, %v6058_v10  ;;  %v716_v6 = vmul.f32 %v708_v62, %v5871_v44  ;;  %v7407_v54 = vld [vmem:[#allocation45_spill] sm:$0xff] }
 0x75a   : > { %v709_v34 = vsel %vm583_vm3, %v701_v63, %v7401_v8  ;;  %v612_v10 = vmul.f32 %v6393_v29, %v7406_v45  ;;  %v2485_v44 = vmul.f32 %v6323_v2, %v2477_v40  ;;  %v695_v8 = vsel %vm565_vm1, %v7408_v25, %v7407_v54 }
 0x75b   : > { %v2492_v42 = vadd.f32 %v2484_v39, %v2380_v3  ;;  %v2478_v50 = vsel %vm583_vm3, %v2470_v20, %v6290_v5  ;;  %v2449_v39 = vpop.permute.xlu1 %2448  ;;  %v2381_v31 = vmul.f32 %v6332_v33, %v6082_v61  ;;  %v717_v37 = vmul.f32 %v709_v34, %v5861_v38  ;;  %v6420_v61 = vld [vmem:[%s5111_s24 + $0x28] sm:$0xff]  ;;  %v7409_v38 = vld [vmem:[#allocation32_spill] sm:$0xff] }
 0x75c   : > { %v724_v63 = vadd.f32 %v716_v6, %v612_v10  ;;  %v2464_v40 = vsel %vm565_vm1, %v6320_v17, %v6318_v13  ;;  %v703_v5 = vsel %vm574_vm2, %v695_v8, %v7408_v25  ;;  %v613_v41 = vmul.f32 %v6420_v61, %v7409_v38  ;;  %v7410_v25 = vld [vmem:[#allocation29_spill] sm:$0xff] }
 0x75d   : > { %730 = vxpose.xlu0.b32.cont [3/8] (short) (narrow) %v722_v43, 64  ;;  %v2463_v43 = vsel %vm565_vm1, %v6303_v30, %v6301_v32  ;;  %v2493_v20 = vadd.f32 %v2485_v44, %v2381_v31  ;;  %v2472_v3 = vsel %vm574_vm2, %v2464_v40, %v6320_v17  ;;  %v6430_v34 = vpop.xlane.xlu0 %2211  ;;  %v718_v45 = vmul.f32 %v710_v26, %v5924_v16  ;;  %v6440_v17 = vld [vmem:[%s5111_s24 + $0x30] sm:$0xff]  ;;  %v7412_v38 = vld [vmem:[#allocation33_spill] sm:$0xff] }
 0x75e   : > { %v2471_v62 = vsel %vm574_vm2, %v2463_v43, %v6303_v30  ;;  %v6416_v30 = vld [vmem:[%s5119_s27 + $0x10] sm:$0xff]  ;;  %v725_v43 = vadd.f32 %v717_v37, %v613_v41  ;;  %v711_v10 = vsel %vm583_vm3, %v703_v5, %v7407_v54  ;;  %v614_v8 = vmul.f32 %v6440_v17, %v7410_v25 }
 0x75f   : > { %v6428_v6 = vpop.xlane.xlu1 %2214  ;;  %v2383_v31 = vmul.f32 %v6374_v49, %v6102_v35  ;;  %v719_v37 = vmul.f32 %v711_v10, %v5908_v59  ;;  %v2466_v26 = vsel %vm565_vm1, %v2417_v12, %v2449_v39 }
 0x760   : > { %v2474_v35 = vsel %vm574_vm2, %v2466_v26, %v2417_v12  ;;  %v2385_v12 = vmul.f32 %v6420_v61, %v6134_v56  ;;  %v6486_v56 = vld [vmem:[%s5111_s24 + $0x38] sm:$0xff] }
 0x761   : > { %731 = vxpose.xlu0.b32.cont [4/8] (short) (narrow) %v723_v55, 64  ;;  %v2479_v55 = vsel %vm583_vm3, %v2471_v62, %v6301_v32  ;;  %v2465_v32 = vsel %vm565_vm1, %v2415_v48, %v6371_v0  ;;  %v2480_v62 = vsel %vm583_vm3, %v2472_v3, %v6318_v13  ;;  %v2419_v5 = vpop.permute.xlu0 %2418  ;;  %v6458_v13 = vld [vmem:[%s5119_s27 + $0x20] sm:$0xff]  ;;  %v2384_v3 = vmul.f32 %v6393_v29, %v6109_v23 }
 0x762   : > { %v2473_v54 = vsel %vm574_vm2, %v2465_v32, %v2415_v48  ;;  %v2488_v48 = vmul.f32 %v6458_v13, %v2480_v62  ;;  %v2482_v32 = vsel %vm583_vm3, %v2474_v35, %v2449_v39 }
 0x763   : > { %2500 = vxpose.xlu1.b32.start [1/8] (short) (narrow) %v2492_v42, 64  ;;  %v2486_v42 = vmul.f32 %v6416_v30, %v2478_v50  ;;  %v6445_v50 = vld [vmem:[%s5119_s27 + $0x18] sm:$0xff]  ;;  %v2451_v40 = vpop.permute.xlu1 %2450 }
 0x764   : > { %v2487_v51 = vmul.f32 %v6445_v50, %v2479_v55  ;;  %v2481_v55 = vsel %vm583_vm3, %v2473_v54, %v6371_v0 }
 0x765   : > { %732 = vxpose.xlu0.b32.cont [5/8] (short) (narrow) %v724_v63, 64  ;;  %v2494_v44 = vadd.f32 %v2486_v42, %v2382_v53  ;;  %v726_v63 = vadd.f32 %v718_v45, %v614_v8  ;;  %v2496_v53 = vadd.f32 %v2488_v48, %v2384_v3  ;;  %v6468_v45 = vld [vmem:[%s5119_s27 + $0x28] sm:$0xff]  ;;  %v2386_v8 = vmul.f32 %v6440_v17, %v6139_v15 }
 0x766   : > { %v2495_v42 = vadd.f32 %v2487_v51, %v2383_v31  ;;  %v2489_v10 = vmul.f32 %v6468_v45, %v2481_v55  ;;  %v6482_v51 = vld [vmem:[%s5119_s27 + $0x38] sm:$0xff]  ;;  %v6522_v55 = vld [vmem:[%s4831_s17 + $0x60] sm:$0xff] }
 0x767   : > { %2501 = vxpose.xlu1.b32.cont [2/8] (short) (narrow) %v2493_v20, 64  ;;  %v7411_v20 = vld [vmem:[#allocation68_spill] sm:$0xff] }
 0x768   : > { %v615_v41 = vmul.f32 %v7412_v38, %v7411_v20  ;;  %v2497_v23 = vadd.f32 %v2489_v10, %v2385_v12  ;;  %v7417_v38 = vld [vmem:[#allocation3_spill] sm:$0xff]  ;;  %v6530_v10 = vld [vmem:[%s4831_s17 + $0x90] sm:$0xff] }
 0x769   : > { %733 = vxpose.xlu0.b32.cont [6/8] (short) (narrow) %v725_v43, 64  ;;  %v2467_v43 = vsel %vm565_vm1, %v2419_v5, %v2451_v40  ;;  %v6540_v12 = vld [vmem:[%s4831_s17 + $0xf0] sm:$0xff] }
 0x76a   : > { %v727_v59 = vadd.f32 %v719_v37, %v615_v41  ;;  %v2475_v0 = vsel %vm574_vm2, %v2467_v43, %v2419_v5  ;;  %v7415_v37 = vld [vmem:[#allocation2_spill] sm:$0xff]  ;;  %v6514_v5 = vld [vmem:[%s4831_s17 + $0x30] sm:$0xff]  ;;  %v7418_v41 = vsub.f32 0.0, %v7417_v38 }
 0x76b   : > { %2502 = vxpose.xlu1.b32.cont [3/8] (short) (narrow) %v2494_v44, 64  ;;  %v2490_v44 = vmul.f32 %v2482_v32, %v5924_v16  ;;  %v2483_v25 = vsel %vm583_vm3, %v2475_v0, %v2451_v40  ;;  %v7416_v26 = vsub.f32 0.0, %v7415_v37  ;;  %v6535_v32 = vld [vmem:[%s4831_s17 + $0xc0] sm:$0xff] }
 0x76c   : > { %v2491_v62 = vmul.f32 %v6482_v51, %v2483_v25  ;;  %v6555_v25 = vld [vmem:[%s4831_s17 + $0x8] sm:$0xff] }
 0x76d   : > { %734 = vxpose.xlu0.b32.cont [7/8] (short) (narrow) %v726_v63, 64  ;;  %v2498_v39 = vadd.f32 %v2490_v44, %v2386_v8  ;;  %v6550_v44 = vld [vmem:[%s4831_s17 + $0x150] sm:$0xff] }
 0x76f   : > { %2503 = vxpose.xlu1.b32.cont [4/8] (short) (narrow) %v2495_v42, 64 }
 0x771   : > { %735 = vxpose.xlu0.b32.end [8/8] (short) (narrow) %v727_v59, 64  ;;  %v7419_v59 = vld [vmem:[#allocation5_spill] sm:$0xff] }
 0x772   : > { %v7420_v3 = vsub.f32 0.0, %v7419_v59 }
 0x773   : > { %2504 = vxpose.xlu1.b32.cont [5/8] (short) (narrow) %v2496_v53, 64 }
 0x775   : > { %1706 = vxpose.xlu0.b32.start [1/8] (short) (narrow) %v6252_v14, 64  ;;  %v2387_v14 = vmul.f32 %v6486_v56, %v6163_v19 }
 0x777   : > { %2505 = vxpose.xlu1.b32.cont [6/8] (short) (narrow) %v2497_v23, 64  ;;  %v2499_v16 = vadd.f32 %v2491_v62, %v2387_v14  ;;  %v6545_v23 = vld [vmem:[%s4831_s17 + $0x120] sm:$0xff]  ;;  %v6561_v62 = vld [vmem:[%s4831_s17 + $0x38] sm:$0xff]  ;;  %v2228_v14 = vmul.f32 0.015625, %v6342_v60 }
 0x779   : > { %1707 = vxpose.xlu0.b32.cont [2/8] (short) (narrow) %v6224_v9, 64 }
 0x77b   : > { %2506 = vxpose.xlu1.b32.cont [7/8] (short) (narrow) %v2498_v39, 64  ;;  %v2229_v39 = vmul.f32 0.015625, %v6340_v7  ;;  %v6576_v7 = vld [vmem:[%s4831_s17 + $0x98] sm:$0xff] }
 0x77d   : > { %1708 = vxpose.xlu0.b32.cont [3/8] (short) (narrow) %v6237_v52, 64 }
 0x77f   : > { %2507 = vxpose.xlu1.b32.end [8/8] (short) (narrow) %v2499_v16, 64  ;;  %v2237_v16 = vadd.f32 1e-05, %v2229_v39  ;;  %v2230_v39 = vmul.f32 0.015625, %v6430_v34  ;;  %v6617_v34 = vld [vmem:[%s4831_s17 + $0x158] sm:$0xff] }
 0x781   : > { %1709 = vxpose.xlu0.b32.cont [4/8] (short) (narrow) %v6250_v18, 64  ;;  %4695 = vrsqrt.f32 %v2237_v16 }
 0x785   : > { %1710 = vxpose.xlu0.b32.cont [5/8] (short) (narrow) %v6266_v57, 64 }
 0x789   : > { %1711 = vxpose.xlu0.b32.cont [6/8] (short) (narrow) %v6277_v4, 64  ;;  %v7413_v4 = vld [vmem:[#allocation4_spill] sm:$0xff] }
 0x78d   : > { %1712 = vxpose.xlu0.b32.cont [7/8] (short) (narrow) %v6283_v21, 64  ;;  %v7414_v21 = vsub.f32 0.0, %v7413_v4 }
 0x791   : > { %1713 = vxpose.xlu0.b32.end [8/8] (short) (narrow) %v6288_v1, 64 }
 0x792   : > { %v6496_v15 = vpop.xlane.xlu1 %2220  ;;  %v6498_v9 = vpop.xlane.xlu0 %2217 }
 0x796   : > { %v4545_v19 = vpop.permute.xlu1 %4544  ;;  %v6500_v54 = vpop.xlane.xlu0 %2223 }
 0x797   : > { %v4547_v52 = vunpack.i.h.bf16 %v4545_v19  ;;  %v4546_v63 = vunpack.i.l.bf16 %v4545_v19  ;;  %v6567_v19 = vld [vmem:[%s4831_s17 + $0x68] sm:$0xff] }
 0x799   : > { %v6502_v31 = vpack.c.bf16 %v4547_v52, %v4546_v63  ;;  %v2236_v52 = vadd.f32 1e-05, %v2228_v14 }
 0x79a   : > { %v6504_v18 = vpop.xlane.xlu0 %2226  ;;  %v3425_v57 = vpop.permute.xlu1 %3424 }
 0x79b   : > { %4433 = vmatprep.subr.bf16.mxu0 %v6502_v31  ;;  %4697 = vrsqrt.f32 %v2236_v52 }
 0x79d   : > { %1402 = vrot.lane.b32.xlu1 %v7414_v21, %s4795_s28 }
 0x79e   : > { %v3423_v1 = vpop.permute.xlu0 %3422  ;;  %v3427_v40 = vpop.permute.xlu1 %3426 }
 0x79f   : > { %3446 = vxpose.xlu0.b32.start [1/8] (short) (narrow) %v3423_v1, 64  ;;  %v6582_v1 = vld [vmem:[%s4831_s17 + $0xc8] sm:$0xff] }
 0x7a1   : > { %1404 = vrot.lane.b32.xlu1 %v7416_v26, %s4795_s28 }
 0x7a2   : > { %v4550_v42 = vpop.permute.xlu0 %4549  ;;  %v3429_v20 = vpop.permute.xlu1 %3428 }
 0x7a3   : > { %3447 = vxpose.xlu0.b32.cont [2/8] (short) (narrow) %v3425_v57, 64  ;;  %v4552_v4 = vunpack.i.h.bf16 %v4550_v42  ;;  %v4551_v21 = vunpack.i.l.bf16 %v4550_v42  ;;  %v6591_v42 = vld [vmem:[%s4831_s17 + $0xf8] sm:$0xff] }
 0x7a5   : > { %1428 = vrot.lane.b32.xlu1 %v6514_v5, %s4796_s29  ;;  %v4436_v38 = vpack.c.bf16 %v4552_v4, %v4551_v21  ;;  %v2233_v4 = vmul.f32 0.015625, %v6496_v15  ;;  %v6612_v21 = vld [vmem:[%s4831_s17] sm:$0xff] }
 0x7a6   : > { %v3431_v48 = vpop.permute.xlu0 %3430  ;;  %v4555_v35 = vpop.permute.xlu1 %4554 }
 0x7a7   : > { %3448 = vxpose.xlu0.b32.cont [3/8] (short) (narrow) %v3427_v40, 64  ;;  %v4557_v40 = vunpack.i.h.bf16 %v4555_v35 }
 0x7a9   : > { %1406 = vrot.lane.b32.xlu1 %v7418_v41, %s4795_s28 }
 0x7aa   : > { %v3433_v43 = vpop.permute.xlu0 %3432  ;;  %v3435_v53 = vpop.permute.xlu1 %3434 }
 0x7ab   : > { %3449 = vxpose.xlu0.b32.cont [4/8] (short) (narrow) %v3429_v20, 64  ;;  %v4556_v20 = vunpack.i.l.bf16 %v4555_v35 }
 0x7ad   : > { %1430 = vrot.lane.b32.xlu1 %v6522_v55, %s4796_s29 }
 0x7ae   : > { %v3437_v0 = vpop.permute.xlu1 %3436  ;;  %v4560_v8 = vpop.permute.xlu0 %4559 }
 0x7af   : > { %3450 = vxpose.xlu0.b32.cont [5/8] (short) (narrow) %v3431_v48, 64  ;;  %v4696_v48 = vpop.eup %4695  ;;  %v4562_v59 = vunpack.i.h.bf16 %v4560_v8 }
 0x7b0   : > { %v4698_v35 = vpop.eup %4697  ;;  %v2253_v52 = vmul.f32 %v4696_v48, %v6123_v24 }
 0x7b1   : > { %1408 = vrot.lane.b32.xlu1 %v7420_v3, %s4795_s28  ;;  %v4561_v3 = vunpack.i.l.bf16 %v4560_v8  ;;  %v2252_v16 = vmul.f32 %v4698_v35, %v6120_v46  ;;  %v2232_v46 = vmul.f32 0.015625, %v6498_v9  ;;  %v2235_v9 = vmul.f32 0.015625, %v6504_v18  ;;  %v7423_v35 = vld [vmem:[#allocation7_spill] sm:$0xff]  ;;  %v7425_v18 = vld [vmem:[#allocation8_spill] sm:$0xff] }
 0x7b2   : > { %v6569_v63 = vpop.permute.xlu0 %4564  ;;  %v6573_v57 = vpop.permute.xlu1 %4569 }
 0x7b3   : > { %3451 = vxpose.xlu0.b32.cont [6/8] (short) (narrow) %v3433_v43, 64  ;;  %v4440_v43 = vpack.c.bf16 %v4557_v40, %v4556_v20  ;;  %v4444_v8 = vpack.c.bf16 %v4562_v59, %v4561_v3  ;;  %v4464_v40 = vpack.c.bf16 %v2253_v52, %v2252_v16  ;;  %v2241_v20 = vadd.f32 1e-05, %v2233_v4 }
 0x7b4   : > { %v2240_v48 = vadd.f32 1e-05, %v2232_v46  ;;  %v2234_v3 = vmul.f32 0.015625, %v6500_v54  ;;  %v7426_v16 = vsub.f32 0.0, %v7425_v18 }
 0x7b5   : > { %1432 = vrot.lane.b32.xlu1 %v6530_v10, %s4796_s29 }
 0x7b6   : > { %v6584_v37 = vpop.permute.xlu1 %4574 }
 0x7b7   : > { %3452 = vxpose.xlu0.b32.cont [7/8] (short) (narrow) %v3435_v53, 64 }
 0x7b9   : > { %1434 = vrot.lane.b32.xlu1 %v6535_v32, %s4796_s29 }
 0x7ba   : > { %v6596_v53 = vpop.permute.xlu1 %4579 }
 0x7bb   : > { %3453 = vxpose.xlu0.b32.end [8/8] (short) (narrow) %v3437_v0, 64  ;;  %v6600_v0 = vld [vmem:[%s4831_s17 + $0x128] sm:$0xff] }
 0x7bd   : > { %1436 = vrot.lane.b32.xlu1 %v6540_v12, %s4796_s29 }
 0x7c1   : > { %1438 = vrot.lane.b32.xlu1 %v6545_v23, %s4796_s29 }
 0x7c5   : > { %1440 = vrot.lane.b32.xlu1 %v6550_v44, %s4796_s29 }
 0x7c9   : > { %3166 = vrot.lane.b32.xlu1 %v6555_v25, %s4796_s29 }
 0x7cd   : > { %3168 = vrot.lane.b32.xlu1 %v6561_v62, %s4796_s29 }
 0x7d1   : > { %3170 = vrot.lane.b32.xlu1 %v6567_v19, %s4796_s29 }
 0x7d5   : > { %v744_v60 = vpop.trf.xlu0  ;;  %3172 = vrot.lane.b32.xlu1 %v6576_v7, %s4796_s29 }
 0x7d6   : > { %4192 = vmatprep.mubr.msk.f32.mxu0 %vm275_vm0, %v744_v60 }
 0x7d9   : > { %v745_v26 = vpop.trf.xlu0  ;;  %3174 = vrot.lane.b32.xlu1 %v6582_v1, %s4796_s29 }
 0x7da   : > { %4193 = vmatmul.mubr.msk.f32.vlgmr.msra.gmra.mrb[0].mxu0 %vm275_vm0, %v745_v26  ;;  %v2238_v26 = vadd.f32 1e-05, %v2230_v39  ;;  %v2243_v39 = vadd.f32 1e-05, %v2235_v9 }
 0x7db   : > { %4435 = vmatpush3.bf16.msra.mxu0 %v6502_v31  ;;  %v2231_v31 = vmul.f32 0.015625, %v6428_v6 }
 0x7dc   : > { %4437 = vmatprep.subr.bf16.mxu0 %v4436_v38 }
 0x7dd   : > { %v746_v41 = vpop.trf.xlu0  ;;  %3176 = vrot.lane.b32.xlu1 %v6591_v42, %s4796_s29  ;;  %v2239_v6 = vadd.f32 1e-05, %v2231_v31  ;;  %v7424_v31 = vsub.f32 0.0, %v7423_v35 }
 0x7de   : > { %4195 = vmatprep.mubr.msk.f32.mxu0 %vm275_vm0, %v746_v41 }
 0x7df   : > { %4439 = vmatpush3.bf16.msra.mxu0 %v4436_v38  ;;  %4699 = vrsqrt.f32 %v2239_v6  ;;  %v7421_v38 = vld [vmem:[#allocation6_spill] sm:$0xff] }
 0x7e0   : > { %4441 = vmatprep.subr.bf16.mxu0 %v4440_v43  ;;  %v7422_v41 = vsub.f32 0.0, %v7421_v38  ;;  %4701 = vrsqrt.f32 %v2238_v26  ;;  %v7427_v26 = vld [vmem:[#allocation9_spill] sm:$0xff] }
 0x7e1   : > { %v747_v14 = vpop.trf.xlu0  ;;  %3178 = vrot.lane.b32.xlu1 %v6600_v0, %s4796_s29  ;;  %4703 = vrsqrt.f32 %v2241_v20  ;;  %v7428_v46 = vsub.f32 0.0, %v7427_v26  ;;  %v4567_v26 = vunpack.i.h.bf16 %v6569_v63 }
 0x7e2   : > { %4196 = vmatmul.mubr.msk.f32.gmra.mrb[2].mxu0 %vm275_vm0, %v747_v14  ;;  %4705 = vrsqrt.f32 %v2240_v48 }
 0x7e3   : > { %4443 = vmatpush3.bf16.msra.mxu0 %v4440_v43  ;;  %v6608_v60 = vpop.trf.xlu1  ;;  %4707 = vrsqrt.f32 %v2243_v39 }
 0x7e4   : > { %4445 = vmatprep.subr.bf16.mxu0 %v4444_v8  ;;  %1426 = vrot.lane.b32.xlu0 %v6612_v21, %s4796_s29 }
 0x7e5   : > { %v748_v24 = vpop.trf.xlu0  ;;  %3180 = vrot.lane.b32.xlu1 %v6617_v34, %s4796_s29 }
 0x7e6   : > { %4198 = vmatprep.mubr.msk.f32.mxu0 %vm275_vm0, %v748_v24  ;;  %v2268_v24 = vsub.f32 0.0, %v6555_v25 }
 0x7e7   : > { %4447 = vmatpush3.bf16.msra.mxu0 %v4444_v8  ;;  %v6623_v15 = vpop.trf.xlu1  ;;  %v2242_v8 = vadd.f32 1e-05, %v2234_v3  ;;  %v2269_v3 = vsub.f32 0.0, %v6561_v62 }
 0x7e8   : > { %4465 = vmatprep.subr.bf16.mxu0 %v4464_v40  ;;  %1410 = vrot.lane.b32.xlu0 %v7422_v41, %s4795_s28 }
 0x7e9   : > { %v749_v59 = vpop.trf.xlu0  ;;  %v4700_v6 = vpop.eup %4699  ;;  %4709 = vrsqrt.f32 %v2242_v8 }
 0x7ea   : > { %4199 = vmatmul.mubr.msk.f32.gmra.mrb[4].mxu0 %vm275_vm0, %v749_v59  ;;  %v4702_v4 = vpop.eup %4701  ;;  %v2255_v48 = vmul.f32 %v4700_v6, %v6153_v28  ;;  %v2270_v28 = vsub.f32 0.0, %v6567_v19 }
 0x7eb   : > { %v6631_v43 = vpop.trf.xlu1  ;;  %v4704_v38 = vpop.eup %4703  ;;  %v2254_v41 = vmul.f32 %v4702_v4, %v6150_v27 }
 0x7ec   : > { %1412 = vrot.lane.b32.xlu0 %v7424_v31, %s4795_s28  ;;  %v4706_v9 = vpop.eup %4705 }
 0x7ed   : > { %v750_v14 = vpop.trf.xlu0  ;;  %v4468_v31 = vpack.c.bf16 %v2255_v48, %v2254_v41  ;;  %v2256_v39 = vmul.f32 %v4706_v9, %v6179_v47  ;;  %v4708_v27 = vpop.eup %4707  ;;  %v7429_v47 = vld [vmem:[#allocation77_spill] sm:$0xff] }
 0x7ee   : > { %4201 = vmatprep.mubr.msk.f32.mxu0 %vm275_vm0, %v750_v14  ;;  %v2257_v14 = vmul.f32 %v4704_v38, %v6182_v11  ;;  %v2259_v6 = vmul.f32 %v4708_v27, %v6197_v58  ;;  %v2272_v38 = vsub.f32 0.0, %v6582_v1  ;;  %v2275_v27 = vsub.f32 0.0, %v6617_v34 }
 0x7ef   : > { %v6640_v54 = vpop.trf.xlu1 }
 0x7f0   : > { %1414 = vrot.lane.b32.xlu0 %v7426_v16, %s4795_s28 }
 0x7f1   : > { %v751_v52 = vpop.trf.xlu0 }
 0x7f2   : > { %4202 = vmatmul.mubr.msk.f32.gmra.mrb[6].mxu0 %vm275_vm0, %v751_v52  ;;  %v4472_v52 = vpack.c.bf16 %v2257_v14, %v2256_v39 }
 0x7f3   : > { %v6650_v59 = vpop.trf.xlu1  ;;  %v4710_v8 = vpop.eup %4709 }
 0x7f4   : > { %1416 = vrot.lane.b32.xlu0 %v7428_v46, %s4795_s28  ;;  %v2258_v11 = vmul.f32 %v4710_v8, %v7429_v47  ;;  %v4566_v46 = vunpack.i.l.bf16 %v6569_v63  ;;  %v2273_v63 = vsub.f32 0.0, %v6591_v42  ;;  %v4577_v47 = vunpack.i.h.bf16 %v6584_v37 }
 0x7f5   : > { %v1722_v20 = vpop.trf.xlu0 }
 0x7f6   : > { %4248 = vmatprep.mubr.msk.f32.mxu0 %vm275_vm0, %v1722_v20  ;;  %v4476_v20 = vpack.c.bf16 %v2259_v6, %v2258_v11  ;;  %v4496_v48 = vpack.c.bf16 %v4567_v26, %v4566_v46  ;;  %v4576_v11 = vunpack.i.l.bf16 %v6584_v37  ;;  %v4582_v46 = vunpack.i.h.bf16 %v6596_v53 }
 0x7f7   : > { %v6663_v16 = vpop.trf.xlu1 }
 0x7f8   : > { %3142 = vrot.lane.b32.xlu0 %v2268_v24, %s4795_s28 }
 0x7f9   : > { %v1723_v35 = vpop.trf.xlu0 }
 0x7fa   : > { %4249 = vmatmul.mubr.msk.f32.vlgmr.msra.gmra.mrb[8].mxu0 %vm275_vm0, %v1723_v35 }
 0x7fb   : > { %4467 = vmatpush3.bf16.msra.mxu0 %v4464_v40  ;;  %v2271_v40 = vsub.f32 0.0, %v6576_v7  ;;  %v2522_v58 = vpop.trf.xlu1 }
 0x7fc   : > { %4469 = vmatprep.subr.bf16.mxu0 %v4468_v31  ;;  %3144 = vrot.lane.b32.xlu0 %v2269_v3, %s4795_s28 }
 0x7fd   : > { %v1724_v18 = vpop.trf.xlu0 }
 0x7fe   : > { %4251 = vmatprep.mubr.msk.f32.mxu0 %vm275_vm0, %v1724_v18  ;;  %v4572_v18 = vunpack.i.h.bf16 %v6573_v57 }
 0x7ff   : > { %4471 = vmatpush3.bf16.msra.mxu0 %v4468_v31  ;;  %v2523_v35 = vpop.trf.xlu1  ;;  %v2274_v31 = vsub.f32 0.0, %v6600_v0 }
 0x800   : > { %4473 = vmatprep.subr.bf16.mxu0 %v4472_v52  ;;  %3146 = vrot.lane.b32.xlu0 %v2270_v28, %s4795_s28 }
 0x801   : > { %v1725_v4 = vpop.trf.xlu0 }
 0x802   : > { %4252 = vmatmul.mubr.msk.f32.gmra.mrb[10].mxu0 %vm275_vm0, %v1725_v4 }
 0x803   : > { %4475 = vmatpush3.bf16.msra.mxu0 %v4472_v52  ;;  %v4571_v52 = vunpack.i.l.bf16 %v6573_v57 }
 0x804   : > { %4477 = vmatprep.subr.bf16.mxu0 %v4476_v20  ;;  %3148 = vrot.lane.b32.xlu0 %v2271_v40, %s4795_s28 }
 0x805   : > { %v1726_v41 = vpop.trf.xlu0  ;;  %v4500_v4 = vpack.c.bf16 %v4572_v18, %v4571_v52 }
 0x806   : > { %4254 = vmatprep.mubr.msk.f32.mxu0 %vm275_vm0, %v1726_v41  ;;  %v4504_v41 = vpack.c.bf16 %v4577_v47, %v4576_v11 }
 0x807   : > { %4479 = vmatpush3.bf16.msra.mxu0 %v4476_v20  ;;  %v4581_v20 = vunpack.i.l.bf16 %v6596_v53 }
 0x808   : > { %4497 = vmatprep.subr.bf16.mxu0 %v4496_v48  ;;  %3150 = vrot.lane.b32.xlu0 %v2272_v38, %s4795_s28 }
 0x809   : > { %v1727_v9 = vpop.trf.xlu0 }
 0x80a   : > { %4255 = vmatmul.mubr.msk.f32.gmra.mrb[12].mxu0 %vm275_vm0, %v1727_v9 }
 0x80c   : > { %3152 = vrot.lane.b32.xlu0 %v2273_v63, %s4795_s28 }
 0x80d   : > { %v1728_v39 = vpop.trf.xlu0 }
 0x80e   : > { %4257 = vmatprep.mubr.msk.f32.mxu0 %vm275_vm0, %v1728_v39 }
 0x80f   : > { %v6690_v14 = vpop.permute.xlu1 %1402 }
 0x810   : > { %3154 = vrot.lane.b32.xlu0 %v2274_v31, %s4795_s28 }
 0x811   : > { %v1729_v8 = vpop.trf.xlu0 }
 0x812   : > { %4258 = vmatmul.mubr.msk.f32.gmra.mrb[14].mxu0 %vm275_vm0, %v1729_v8 }
 0x813   : > { %v1405_v6 = vpop.permute.xlu1 %1404  ;;  %4304 = vmatprep.mubr.msk.f32.mxu0 %vm275_vm0, %v6608_v60 }
 0x814   : > { %3156 = vrot.lane.b32.xlu0 %v2275_v27, %s4795_s28 }
 0x816   : > { %4305 = vmatmul.mubr.msk.f32.vlgmr.msra.gmra.mrb[16].mxu0 %vm275_vm0, %v6623_v15 }
 0x817   : > { %4499 = vmatpush3.bf16.msra.mxu0 %v4496_v48  ;;  %v1429_v57 = vpop.permute.xlu1 %1428  ;;  %4307 = vmatprep.mubr.msk.f32.mxu0 %vm275_vm0, %v6631_v43  ;;  %v4508_v43 = vpack.c.bf16 %v4582_v46, %v4581_v20 }
 0x818   : > { %v1451_v26 = vsel %vm565_vm1, %v1405_v6, %v1429_v57  ;;  %4501 = vmatprep.subr.bf16.mxu0 %v4500_v4 }
 0x819   : > { %v1459_v60 = vsel %vm574_vm2, %v1451_v26, %v1405_v6 }
 0x81a   : > { %v1467_v37 = vsel %vm583_vm3, %v1459_v60, %v1429_v57  ;;  %4308 = vmatmul.mubr.msk.f32.gmra.mrb[18].mxu0 %vm275_vm0, %v6640_v54 }
 0x81b   : > { %v1475_v15 = vmul.f32 %v6323_v2, %v1467_v37  ;;  %4503 = vmatpush3.bf16.msra.mxu0 %v4500_v4  ;;  %v1407_v48 = vpop.permute.xlu1 %1406  ;;  %4310 = vmatprep.mubr.msk.f32.mxu0 %vm275_vm0, %v6650_v59 }
 0x81c   : > { %4505 = vmatprep.subr.bf16.mxu0 %v4504_v41 }
 0x81d   : > { %1492 = vrot.lane.b32.xlu1 %v1475_v15, %s4794_s20 }
 0x81e   : > { %4311 = vmatmul.mubr.msk.f32.gmra.mrb[20].mxu0 %vm275_vm0, %v6663_v16 }
 0x81f   : > { %4507 = vmatpush3.bf16.msra.mxu0 %v4504_v41  ;;  %v1431_v53 = vpop.permute.xlu1 %1430  ;;  %v3462_v9 = vpop.trf.xlu0  ;;  %4313 = vmatprep.mubr.msk.f32.mxu0 %vm275_vm0, %v2522_v58 }
 0x820   : > { %4509 = vmatprep.subr.bf16.mxu0 %v4508_v43  ;;  %v1452_v20 = vsel %vm565_vm1, %v1407_v48, %v1431_v53 }
 0x821   : > { %v1460_v15 = vsel %vm574_vm2, %v1452_v20, %v1407_v48 }
 0x822   : > { %4314 = vmatmul.mubr.msk.f32.gmra.mrb[22].mxu0 %vm275_vm0, %v2523_v35 }
 0x823   : > { %4511 = vmatpush3.bf16.msra.mxu0 %v4508_v43  ;;  %v1409_v54 = vpop.permute.xlu1 %1408  ;;  %4360 = vmatprep.mubr.msk.f32.mxu0 %vm275_vm0, %v3462_v9  ;;  %v3463_v59 = vpop.trf.xlu0 }
 0x826   : > { %4361 = vmatmul.mubr.msk.f32.vlgmr.msra.gmra.mrb[24].mxu0 %vm275_vm0, %v3463_v59 }
 0x827   : > { %v1433_v39 = vpop.permute.xlu1 %1432  ;;  %v3464_v8 = vpop.trf.xlu0 }
 0x828   : > { %v1453_v18 = vsel %vm565_vm1, %v1409_v54, %v1433_v39  ;;  %4363 = vmatprep.mubr.msk.f32.mxu0 %vm275_vm0, %v3464_v8  ;;  %v1468_v8 = vsel %vm583_vm3, %v1460_v15, %v1431_v53 }
 0x829   : > { %v1461_v16 = vsel %vm574_vm2, %v1453_v18, %v1409_v54 }
 0x82a   : > { %v1469_v58 = vsel %vm583_vm3, %v1461_v16, %v1433_v39 }
 0x82b   : > { %v1477_v52 = vmul.f32 %v6445_v50, %v1469_v58  ;;  %v3465_v35 = vpop.trf.xlu0  ;;  %v1435_v57 = vpop.permute.xlu1 %1434  ;;  %v1476_v58 = vmul.f32 %v6416_v30, %v1468_v8 }
 0x82c   : > { %4364 = vmatmul.mubr.msk.f32.gmra.mrb[26].mxu0 %vm275_vm0, %v3465_v35 }
 0x82d   : > { %1496 = vrot.lane.b32.xlu1 %v1477_v52, %s4794_s20 }
 0x82f   : > { %v3466_v6 = vpop.trf.xlu0  ;;  %v1437_v26 = vpop.permute.xlu1 %1436 }
 0x830   : > { %4366 = vmatprep.mubr.msk.f32.mxu0 %vm275_vm0, %v3466_v6 }
 0x833   : > { %v3467_v47 = vpop.trf.xlu0  ;;  %v1439_v60 = vpop.permute.xlu1 %1438 }
 0x834   : > { %4367 = vmatmul.mubr.msk.f32.gmra.mrb[28].mxu0 %vm275_vm0, %v3467_v47 }
 0x837   : > { %v3468_v11 = vpop.trf.xlu0  ;;  %v1441_v46 = vpop.permute.xlu1 %1440 }
 0x838   : > { %4369 = vmatprep.mubr.msk.f32.mxu0 %vm275_vm0, %v3468_v11 }
 0x83b   : > { %v3469_v4 = vpop.trf.xlu0  ;;  %v3167_v39 = vpop.permute.xlu1 %3166 }
 0x83c   : > { %4370 = vmatmul.mubr.msk.f32.gmra.mrb[30].mxu0 %vm275_vm0, %v3469_v4 }
 0x83f   : > { %v3169_v6 = vpop.permute.xlu1 %3168 }
 0x856   : > { %v1427_v37 = vpop.permute.xlu0 %1426 }
 0x857   : > { %v1450_v41 = vsel %vm565_vm1, %v6690_v14, %v1427_v37 }
 0x858   : > { %v1458_v43 = vsel %vm574_vm2, %v1450_v41, %v6690_v14  ;;  %v6764_v41 = vld [vmem:[%s5119_s27 + $0x30] sm:$0xff] }
 0x859   : > { %v1466_v9 = vsel %vm583_vm3, %v1458_v43, %v1427_v37  ;;  %v3171_v43 = vpop.permute.xlu1 %3170 }
 0x85a   : > { %v1474_v54 = vmul.f32 %v6368_v36, %v1466_v9  ;;  %v1411_v59 = vpop.permute.xlu0 %1410 }
 0x85b   : > { %v1454_v18 = vsel %vm565_vm1, %v1411_v59, %v1435_v57 }
 0x85c   : > { %v1462_v16 = vsel %vm574_vm2, %v1454_v18, %v1411_v59  ;;  %1490 = vrot.lane.b32.xlu0 %v1474_v54, %s4794_s20 }
 0x85d   : > { %v1470_v14 = vsel %vm583_vm3, %v1462_v16, %v1435_v57 }
 0x85e   : > { %v1413_v48 = vpop.permute.xlu0 %1412  ;;  %v1478_v47 = vmul.f32 %v6458_v13, %v1470_v14 }
 0x85f   : > { %v1455_v52 = vsel %vm565_vm1, %v1413_v48, %v1437_v26 }
 0x860   : > { %v1463_v35 = vsel %vm574_vm2, %v1455_v52, %v1413_v48  ;;  %1494 = vrot.lane.b32.xlu0 %v1476_v58, %s4794_s20  ;;  %v3173_v58 = vpop.permute.xlu1 %3172 }
 0x861   : > { %v1471_v53 = vsel %vm583_vm3, %v1463_v35, %v1437_v26 }
 0x862   : > { %v1479_v11 = vmul.f32 %v6468_v45, %v1471_v53  ;;  %v1415_v4 = vpop.permute.xlu0 %1414 }
 0x863   : > { %v1456_v20 = vsel %vm565_vm1, %v1415_v4, %v1439_v60 }
 0x864   : > { %v1464_v37 = vsel %vm574_vm2, %v1456_v20, %v1415_v4  ;;  %1498 = vrot.lane.b32.xlu0 %v1478_v47, %s4794_s20  ;;  %1500 = vrot.lane.b32.xlu1 %v1479_v11, %s4794_s20  ;;  %v3175_v4 = vpop.permute.xlu1 %3174 }
 0x865   : > { %v1472_v57 = vsel %vm583_vm3, %v1464_v37, %v1439_v60 }
 0x866   : > { %v1480_v15 = vmul.f32 %v6764_v41, %v1472_v57  ;;  %v1417_v26 = vpop.permute.xlu0 %1416 }
 0x867   : > { %v1457_v9 = vsel %vm565_vm1, %v1417_v26, %v1441_v46 }
 0x868   : > { %v1465_v54 = vsel %vm574_vm2, %v1457_v9, %v1417_v26  ;;  %1502 = vrot.lane.b32.xlu0 %v1480_v15, %s4794_s20 }
 0x869   : > { %v1473_v59 = vsel %vm583_vm3, %v1465_v54, %v1441_v46 }
 0x86a   : > { %v1481_v8 = vmul.f32 %v6482_v51, %v1473_v59  ;;  %v3143_v18 = vpop.permute.xlu0 %3142 }
 0x86b   : > { %v3190_v16 = vsel %vm565_vm1, %v3143_v18, %v3167_v39 }
 0x86c   : > { %v3198_v60 = vsel %vm574_vm2, %v3190_v16, %v3143_v18  ;;  %1504 = vrot.lane.b32.xlu1 %v1481_v8, %s4794_s20 }
 0x86d   : > { %v3206_v48 = vsel %vm583_vm3, %v3198_v60, %v3167_v39 }
 0x86e   : > { %v3214_v14 = vmul.f32 %v6368_v36, %v3206_v48  ;;  %v3145_v52 = vpop.permute.xlu0 %3144 }
 0x86f   : > { %v3191_v35 = vsel %vm565_vm1, %v3145_v52, %v3169_v6 }
 0x870   : > { %v3199_v53 = vsel %vm574_vm2, %v3191_v35, %v3145_v52  ;;  %3230 = vrot.lane.b32.xlu0 %v3214_v14, %s4794_s20 }
 0x871   : > { %v3207_v46 = vsel %vm583_vm3, %v3199_v53, %v3169_v6  ;;  %v3177_v6 = vpop.permute.xlu1 %3176 }
 0x872   : > { %v3215_v47 = vmul.f32 %v6323_v2, %v3207_v46  ;;  %v3147_v11 = vpop.permute.xlu0 %3146 }
 0x873   : > { %v3192_v20 = vsel %vm565_vm1, %v3147_v11, %v3171_v43 }
 0x874   : > { %v3200_v37 = vsel %vm574_vm2, %v3192_v20, %v3147_v11  ;;  %3232 = vrot.lane.b32.xlu1 %v3215_v47, %s4794_s20 }
 0x875   : > { %v3208_v36 = vsel %vm583_vm3, %v3200_v37, %v3171_v43  ;;  %v3179_v48 = vpop.permute.xlu1 %3178 }
 0x876   : > { %v3216_v39 = vmul.f32 %v6416_v30, %v3208_v36  ;;  %v3149_v57 = vpop.permute.xlu0 %3148 }
 0x877   : > { %v3193_v15 = vsel %vm565_vm1, %v3149_v57, %v3173_v58 }
 0x878   : > { %v3201_v26 = vsel %vm574_vm2, %v3193_v15, %v3149_v57  ;;  %3234 = vrot.lane.b32.xlu0 %v3216_v39, %s4794_s20 }
 0x879   : > { %v3209_v9 = vsel %vm583_vm3, %v3201_v26, %v3173_v58  ;;  %v3181_v11 = vpop.permute.xlu1 %3180  ;;  %v7430_v26 = vld [vmem:[#allocation70_spill] sm:$0xff] }
 0x87a   : > { %v3217_v54 = vmul.f32 %v6445_v50, %v3209_v9  ;;  %v3151_v59 = vpop.permute.xlu0 %3150 }
 0x87b   : > { %v3194_v8 = vsel %vm565_vm1, %v3151_v59, %v3175_v4 }
 0x87c   : > { %v3202_v18 = vsel %vm574_vm2, %v3194_v8, %v3151_v59  ;;  %3236 = vrot.lane.b32.xlu1 %v3217_v54, %s4794_s20  ;;  %v7431_v59 = vld [vmem:[#allocation72_spill] sm:$0xff] }
 0x87d   : > { %v3210_v43 = vsel %vm583_vm3, %v3202_v18, %v3175_v4  ;;  %v1397_v8 = vmul.f32 %v6530_v10, %v7431_v59 }
 0x87e   : > { %v3218_v16 = vmul.f32 %v6458_v13, %v3210_v43  ;;  %v3153_v60 = vpop.permute.xlu0 %3152 }
 0x87f   : > { %v3195_v14 = vsel %vm565_vm1, %v3153_v60, %v3177_v6 }
 0x880   : > { %v3203_v52 = vsel %vm574_vm2, %v3195_v14, %v3153_v60  ;;  %3238 = vrot.lane.b32.xlu0 %v3218_v16, %s4794_s20 }
 0x881   : > { %v3211_v58 = vsel %vm583_vm3, %v3203_v52, %v3177_v6  ;;  %v1395_v6 = vmul.f32 %v6514_v5, %v7430_v26 }
 0x882   : > { %v3219_v35 = vmul.f32 %v6468_v45, %v3211_v58  ;;  %v3155_v53 = vpop.permute.xlu0 %3154 }
 0x883   : > { %v3196_v46 = vsel %vm565_vm1, %v3155_v53, %v3179_v48 }
 0x884   : > { %v3204_v47 = vsel %vm574_vm2, %v3196_v46, %v3155_v53  ;;  %3240 = vrot.lane.b32.xlu1 %v3219_v35, %s4794_s20  ;;  %v7432_v53 = vld [vmem:[#allocation17_spill] sm:$0xff]  ;;  %v7433_v46 = vld [vmem:[#allocation10_spill] sm:$0xff] }
 0x885   : > { %v3212_v4 = vsel %vm583_vm3, %v3204_v47, %v3179_v48  ;;  %v567_v47 = vsel %vm565_vm1, %v7433_v46, %v7432_v53 }
 0x886   : > { %v3220_v20 = vmul.f32 %v6764_v41, %v3212_v4  ;;  %v3157_v37 = vpop.permute.xlu0 %3156  ;;  %v7434_v4 = vld [vmem:[#allocation23_spill] sm:$0xff] }
 0x887   : > { %v3197_v36 = vsel %vm565_vm1, %v3157_v37, %v3181_v11 }
 0x888   : > { %v3205_v39 = vsel %vm574_vm2, %v3197_v36, %v3157_v37  ;;  %3242 = vrot.lane.b32.xlu0 %v3220_v20, %s4794_s20  ;;  %v7435_v20 = vld [vmem:[#allocation11_spill] sm:$0xff] }
 0x889   : > { %v3213_v57 = vsel %vm583_vm3, %v3205_v39, %v3181_v11  ;;  %v568_v37 = vsel %vm565_vm1, %v7435_v20, %v7434_v4  ;;  %v576_v39 = vsel %vm574_vm2, %v567_v47, %v7433_v46 }
 0x88a   : > { %v3221_v15 = vmul.f32 %v6482_v51, %v3213_v57  ;;  %v577_v57 = vsel %vm574_vm2, %v568_v37, %v7435_v20  ;;  %v7443_v20 = vld [vmem:[#allocation14_spill] sm:$0xff] }
 0x88c   : > { %3244 = vrot.lane.b32.xlu1 %v3221_v15, %s4794_s20  ;;  %v7436_v15 = vld [vmem:[#allocation18_spill] sm:$0xff] }
 0x88f   : > { %v1493_v9 = vpop.permute.xlu1 %1492 }
 0x890   : > { %v1515_v54 = vadd.f32 %v1493_v9, %v1395_v6  ;;  %v7437_v6 = vld [vmem:[#allocation13_spill] sm:$0xff] }
 0x891   : > { %v569_v9 = vsel %vm565_vm1, %v7437_v6, %v7436_v15 }
 0x892   : > { %1909 = vrot.lane.b32.xlu1 %v1515_v54, %s4794_s20  ;;  %v7438_v54 = vld [vmem:[#allocation24_spill] sm:$0xff] }
 0x89f   : > { %v1497_v18 = vpop.permute.xlu1 %1496 }
 0x8a0   : > { %v1517_v43 = vadd.f32 %v1497_v18, %v1397_v8  ;;  %v7439_v8 = vld [vmem:[#allocation12_spill] sm:$0xff] }
 0x8a1   : > { %v570_v18 = vsel %vm565_vm1, %v7439_v8, %v7438_v54 }
 0x8a2   : > { %1913 = vrot.lane.b32.xlu1 %v1517_v43, %s4794_s20  ;;  %v585_v43 = vsel %vm583_vm3, %v576_v39, %v7432_v53 }
 0x8a3   : > { %v593_v47 = vmul.f32 %v6323_v2, %v585_v43 }
 0x8ad   : > { %v4194_v16 = vpop.f32.mrb[0].mxu0 }
 0x8ae   : > { %v850_v60 = vpop.f32.mrb[1].mxu0 }
 0x8af   : > { %v4416_v48 = vpack.c.bf16 %v4194_v16, %v850_v60  ;;  %v586_v16 = vsel %vm583_vm3, %v577_v57, %v7434_v4  ;;  %v578_v60 = vsel %vm574_vm2, %v569_v9, %v7437_v6  ;;  %v486_v4 = vmul.f32 %v6514_v5, %v6332_v33  ;;  %v7445_v5 = vld [vmem:[#allocation16_spill] sm:$0xff] }
 0x8b0   : > { %v587_v39 = vsel %vm583_vm3, %v578_v60, %v7436_v15  ;;  %v487_v57 = vmul.f32 %v6522_v55, %v6351_v22  ;;  %v488_v22 = vmul.f32 %v6530_v10, %v6374_v49  ;;  %v7446_v60 = vld [vmem:[#allocation69_spill] sm:$0xff] }
 0x8b1   : > { %4417 = vmatprep.subr.bf16.mxu1 %v4416_v48  ;;  %v595_v33 = vmul.f32 %v6445_v50, %v587_v39  ;;  %v492_v39 = vmul.f32 %v6550_v44, %v6486_v56 }
 0x8b2   : > { %4419 = vmatpush3.bf16.msra.mxu1 %v4416_v48 }
 0x8b5   : > { %v4197_v14 = vpop.f32.mrb[2].mxu0 }
 0x8b6   : > { %v860_v52 = vpop.f32.mrb[3].mxu0 }
 0x8b7   : > { %v4420_v58 = vpack.c.bf16 %v4197_v14, %v860_v52  ;;  %v7440_v14 = vld [vmem:[#allocation19_spill] sm:$0xff] }
 0x8b8   : > { %v7441_v52 = vld [vmem:[#allocation15_spill] sm:$0xff] }
 0x8b9   : > { %4421 = vmatprep.subr.bf16.mxu1 %v4420_v58 }
 0x8ba   : > { %4423 = vmatpush3.bf16.msra.mxu1 %v4420_v58  ;;  %v571_v58 = vsel %vm565_vm1, %v7441_v52, %v7440_v14 }
 0x8bb   : > { %v580_v6 = vsel %vm574_vm2, %v571_v58, %v7441_v52 }
 0x8bd   : > { %v4200_v35 = vpop.f32.mrb[4].mxu0 }
 0x8be   : > { %v870_v11 = vpop.f32.mrb[5].mxu0 }
 0x8bf   : > { %v4424_v36 = vpack.c.bf16 %v4200_v35, %v870_v11  ;;  %v579_v35 = vsel %vm574_vm2, %v570_v18, %v7439_v8  ;;  %v7442_v11 = vld [vmem:[#allocation25_spill] sm:$0xff]  ;;  %v601_v8 = vadd.f32 %v593_v47, %v486_v4  ;;  %v589_v18 = vsel %vm583_vm3, %v580_v6, %v7440_v14 }
 0x8c0   : > { %v572_v53 = vsel %vm565_vm1, %v7443_v20, %v7442_v11  ;;  %v588_v2 = vsel %vm583_vm3, %v579_v35, %v7438_v54  ;;  %v603_v35 = vadd.f32 %v595_v33, %v488_v22  ;;  %v7449_v6 = vld [vmem:[#allocation73_spill] sm:$0xff] }
 0x8c1   : > { %4425 = vmatprep.subr.bf16.mxu1 %v4424_v36  ;;  %v581_v9 = vsel %vm574_vm2, %v572_v53, %v7443_v20  ;;  %v596_v54 = vmul.f32 %v6458_v13, %v588_v2  ;;  %v490_v13 = vmul.f32 %v6540_v12, %v6420_v61  ;;  %v7447_v61 = vld [vmem:[#allocation71_spill] sm:$0xff]  ;;  %v1398_v2 = vmul.f32 %v6535_v32, %v7449_v6 }
 0x8c2   : > { %4427 = vmatpush3.bf16.msra.mxu1 %v4424_v36  ;;  %v594_v36 = vmul.f32 %v6416_v30, %v586_v16  ;;  %v7444_v30 = vld [vmem:[#allocation20_spill] sm:$0xff]  ;;  %v489_v16 = vmul.f32 %v6535_v32, %v6393_v29  ;;  %v590_v50 = vsel %vm583_vm3, %v581_v9, %v7442_v11  ;;  %v597_v29 = vmul.f32 %v6468_v45, %v589_v18 }
 0x8c3   : > { %v573_v15 = vsel %vm565_vm1, %v7445_v5, %v7444_v30  ;;  %v598_v47 = vmul.f32 %v6764_v41, %v590_v50  ;;  %v1396_v53 = vmul.f32 %v6522_v55, %v7447_v61  ;;  %v7451_v50 = vld [vmem:[#allocation76_spill] sm:$0xff] }
 0x8c4   : > { %v602_v43 = vadd.f32 %v594_v36, %v487_v57  ;;  %v582_v49 = vsel %vm574_vm2, %v573_v15, %v7445_v5  ;;  %v604_v11 = vadd.f32 %v596_v54, %v489_v16  ;;  %v605_v4 = vadd.f32 %v597_v29, %v490_v13  ;;  %v7448_v57 = vld [vmem:[#allocation74_spill] sm:$0xff] }
 0x8c5   : > { %v4203_v48 = vpop.f32.mrb[6].mxu0  ;;  %v591_v20 = vsel %vm583_vm3, %v582_v49, %v7444_v30  ;;  %v1399_v55 = vmul.f32 %v6540_v12, %v7448_v57 }
 0x8c6   : > { %v880_v46 = vpop.f32.mrb[7].mxu0  ;;  %v599_v36 = vmul.f32 %v6482_v51, %v591_v20 }
 0x8c7   : > { %v4428_v37 = vpack.c.bf16 %v4203_v48, %v880_v46  ;;  %v1394_v48 = vmul.f32 %v6612_v21, %v7446_v60  ;;  %v491_v21 = vmul.f32 %v6545_v23, %v6440_v17 }
 0x8c9   : > { %4429 = vmatprep.subr.bf16.mxu1 %v4428_v37  ;;  %v606_v17 = vadd.f32 %v598_v47, %v491_v21 }
 0x8ca   : > { %4431 = vmatpush3.bf16.msra.mxu1 %v4428_v37 }
 0x8cd   : > { %4221 = vmatmul.mubr.msk.f32.vlgmr.msra.gmra.mrb[0].mxu1 %vm275_vm0, %v601_v8  ;;  %v4250_v52 = vpop.f32.mrb[8].mxu0  ;;  %v607_v8 = vadd.f32 %v599_v36, %v492_v39 }
 0x8ce   : > { %v1491_v10 = vpop.permute.xlu0 %1490  ;;  %4223 = vmatprep.mubr.msk.f32.mxu1 %vm275_vm0, %v602_v43  ;;  %v1860_v14 = vpop.f32.mrb[9].mxu0  ;;  %v7450_v43 = vld [vmem:[#allocation75_spill] sm:$0xff] }
 0x8cf   : > { %v1514_v58 = vadd.f32 %v1491_v10, %v1394_v48  ;;  %v4448_v46 = vpack.c.bf16 %v4250_v52, %v1860_v14  ;;  %v1400_v16 = vmul.f32 %v6545_v23, %v7450_v43  ;;  %v1401_v48 = vmul.f32 %v6550_v44, %v7451_v50 }
 0x8d1   : > { %1907 = vrot.lane.b32.xlu0 %v1514_v58, %s4794_s20  ;;  %4224 = vmatmul.mubr.msk.f32.gmra.mrb[2].mxu1 %vm275_vm0, %v603_v35 }
 0x8d2   : > { %v1495_v45 = vpop.permute.xlu0 %1494  ;;  %4226 = vmatprep.mubr.msk.f32.mxu1 %vm275_vm0, %v604_v11  ;;  %4449 = vmatprep.subr.bf16.mxu1 %v4448_v46 }
 0x8d3   : > { %v1516_v37 = vadd.f32 %v1495_v45, %v1396_v53  ;;  %4451 = vmatpush3.bf16.msra.mxu1 %v4448_v46 }
 0x8d5   : > { %1911 = vrot.lane.b32.xlu0 %v1516_v37, %s4794_s20  ;;  %4227 = vmatmul.mubr.msk.f32.gmra.mrb[4].mxu1 %vm275_vm0, %v605_v4  ;;  %v4253_v9 = vpop.f32.mrb[10].mxu0  ;;  %v3135_v37 = vmul.f32 %v7430_v26, %v6561_v62 }
 0x8d6   : > { %v1501_v33 = vpop.permute.xlu1 %1500  ;;  %v1499_v30 = vpop.permute.xlu0 %1498  ;;  %4229 = vmatprep.mubr.msk.f32.mxu1 %vm275_vm0, %v606_v17 }
 0x8d7   : > { %v1519_v51 = vadd.f32 %v1501_v33, %v1399_v55  ;;  %v1518_v5 = vadd.f32 %v1499_v30, %v1398_v2  ;;  %v1870_v15 = vpop.f32.mrb[11].mxu0  ;;  %v3136_v2 = vmul.f32 %v7447_v61, %v6567_v19  ;;  %v3138_v33 = vmul.f32 %v7449_v6, %v6582_v1 }
 0x8d8   : > { %v4452_v56 = vpack.c.bf16 %v4253_v9, %v1870_v15  ;;  %v3139_v30 = vmul.f32 %v7448_v57, %v6591_v42  ;;  %v3140_v15 = vmul.f32 %v7450_v43, %v6600_v0 }
 0x8d9   : > { %1917 = vrot.lane.b32.xlu1 %v1519_v51, %s4794_s20  ;;  %1915 = vrot.lane.b32.xlu0 %v1518_v5, %s4794_s20 }
 0x8da   : > { %4230 = vmatmul.mubr.msk.f32.gmra.mrb[6].mxu1 %vm275_vm0, %v607_v8  ;;  %4453 = vmatprep.subr.bf16.mxu1 %v4452_v56  ;;  %v1503_v18 = vpop.permute.xlu0 %1502  ;;  %v3141_v8 = vmul.f32 %v7451_v50, %v6617_v34 }
 0x8db   : > { %4455 = vmatpush3.bf16.msra.mxu1 %v4452_v56 }
 0x8dd   : > { %2316 = vrot.lane.b32.xlu1 %v6555_v25, %s4793_s19  ;;  %2284 = vrot.lane.b32.xlu0 %v2268_v24, %s4792_s18  ;;  %v4256_v32 = vpop.f32.mrb[12].mxu0  ;;  %v1520_v24 = vadd.f32 %v1503_v18, %v1400_v16 }
 0x8de   : > { %v1880_v12 = vpop.f32.mrb[13].mxu0  ;;  %v1505_v54 = vpop.permute.xlu1 %1504 }
 0x8df   : > { %v4456_v22 = vpack.c.bf16 %v4256_v32, %v1880_v12  ;;  %v1521_v52 = vadd.f32 %v1505_v54, %v1401_v48 }
 0x8e1   : > { %2318 = vrot.lane.b32.xlu1 %v6561_v62, %s4793_s19  ;;  %2286 = vrot.lane.b32.xlu0 %v2269_v3, %s4792_s18 }
 0x8e2   : > { %4457 = vmatprep.subr.bf16.mxu1 %v4456_v22  ;;  %v3231_v20 = vpop.permute.xlu0 %3230 }
 0x8e3   : > { %4459 = vmatpush3.bf16.msra.mxu1 %v4456_v22 }
 0x8e5   : > { %1921 = vrot.lane.b32.xlu1 %v1521_v52, %s4794_s20  ;;  %1919 = vrot.lane.b32.xlu0 %v1520_v24, %s4794_s20  ;;  %v4259_v49 = vpop.f32.mrb[14].mxu0 }
 0x8e6   : > { %v1890_v23 = vpop.f32.mrb[15].mxu0  ;;  %v3233_v45 = vpop.permute.xlu1 %3232 }
 0x8e7   : > { %v4460_v10 = vpack.c.bf16 %v4259_v49, %v1890_v23  ;;  %v3255_v4 = vadd.f32 %v3233_v45, %v3135_v37  ;;  %v4761_v23 = vld [vmem:[%s5111_s24] sm:$0xff] }
 0x8e9   : > { %2320 = vrot.lane.b32.xlu1 %v6567_v19, %s4793_s19  ;;  %2288 = vrot.lane.b32.xlu0 %v2270_v28, %s4792_s18  ;;  %v4306_v44 = vpop.f32.mrb[16].mxu0 }
 0x8ea   : > { %v2622_v3 = vpop.f32.mrb[17].mxu0  ;;  %4461 = vmatprep.subr.bf16.mxu1 %v4460_v10  ;;  %v3235_v36 = vpop.permute.xlu0 %3234 }
 0x8eb   : > { %v6929_v13 = vpack.c.bf16 %v4306_v44, %v2622_v3  ;;  %4463 = vmatpush3.bf16.msra.mxu1 %v4460_v10  ;;  %v3256_v26 = vadd.f32 %v3235_v36, %v3136_v2  ;;  %v4762_v10 = vld [vmem:[%s4831_s17 + $0x8] sm:$0xff]  ;;  %v4763_v3 = vld [vmem:[%s5119_s27] sm:$0xff] }
 0x8ec   : > { %v2260_v44 = vmul.f32 %v4762_v10, %v4761_v23 }
 0x8ed   : > { %2322 = vrot.lane.b32.xlu1 %v6576_v7, %s4793_s19  ;;  %2290 = vrot.lane.b32.xlu0 %v2271_v40, %s4792_s18  ;;  %v4309_v14 = vpop.f32.mrb[18].mxu0 }
 0x8ee   : > { %4481 = vmatprep.subr.bf16.mxu1 %v6929_v13  ;;  %v2632_v29 = vpop.f32.mrb[19].mxu0  ;;  %v3237_v39 = vpop.permute.xlu1 %3236 }
 0x8ef   : > { %v6937_v58 = vpack.c.bf16 %v4309_v14, %v2632_v29 }
 0x8f1   : > { %2324 = vrot.lane.b32.xlu1 %v6582_v1, %s4793_s19  ;;  %2292 = vrot.lane.b32.xlu0 %v2272_v38, %s4792_s18  ;;  %v4312_v28 = vpop.f32.mrb[20].mxu0 }
 0x8f2   : > { %v2642_v35 = vpop.f32.mrb[21].mxu0 }
 0x8f3   : > { %v6944_v46 = vpack.c.bf16 %v4312_v28, %v2642_v35  ;;  %v4764_v28 = vld [vmem:[%s5111_s24 + $0x8] sm:$0xff]  ;;  %v4765_v35 = vld [vmem:[%s4831_s17 + $0x38] sm:$0xff] }
 0x8f5   : > { %2326 = vrot.lane.b32.xlu1 %v6591_v42, %s4793_s19  ;;  %2294 = vrot.lane.b32.xlu0 %v2273_v63, %s4792_s18  ;;  %v4315_v40 = vpop.f32.mrb[22].mxu0  ;;  %v3134_v63 = vmul.f32 %v7446_v60, %v6555_v25  ;;  %v3137_v25 = vmul.f32 %v7431_v59, %v6576_v7  ;;  %v3239_v60 = vpop.permute.xlu0 %3238 }
 0x8f6   : > { %v2652_v47 = vpop.f32.mrb[23].mxu0  ;;  %v3241_v9 = vpop.permute.xlu1 %3240  ;;  %v3258_v19 = vadd.f32 %v3239_v60, %v3138_v33  ;;  %v4771_v33 = vld [vmem:[%s4831_s17 + $0x98] sm:$0xff] }
 0x8f7   : > { %v6951_v11 = vpack.c.bf16 %v4315_v40, %v2652_v47  ;;  %v3259_v7 = vadd.f32 %v3241_v9, %v3139_v30  ;;  %v4766_v40 = vld [vmem:[%s5119_s27 + $0x8] sm:$0xff]  ;;  %v4770_v9 = vld [vmem:[%s5111_s24 + $0x18] sm:$0xff] }
 0x8f8   : > { %v2263_v30 = vmul.f32 %v4771_v33, %v4770_v9 }
 0x8f9   : > { %2328 = vrot.lane.b32.xlu1 %v6600_v0, %s4793_s19  ;;  %2296 = vrot.lane.b32.xlu0 %v2274_v31, %s4792_s18  ;;  %v4362_v38 = vpop.f32.mrb[24].mxu0  ;;  %v3254_v31 = vadd.f32 %v3231_v20, %v3134_v63 }
 0x8fa   : > { %v3600_v21 = vpop.f32.mrb[25].mxu0  ;;  %v3243_v59 = vpop.permute.xlu0 %3242 }
 0x8fb   : > { %v6958_v53 = vpack.c.bf16 %v4362_v38, %v3600_v21  ;;  %v3260_v42 = vadd.f32 %v3243_v59, %v3140_v15 }
 0x8fd   : > { %2330 = vrot.lane.b32.xlu1 %v6617_v34, %s4793_s19  ;;  %2298 = vrot.lane.b32.xlu0 %v2275_v27, %s4792_s18  ;;  %v3257_v27 = vadd.f32 %v3237_v39, %v3137_v25 }
 0x8fe   : > { %v3245_v51 = vpop.permute.xlu1 %3244 }
 0x8ff   : > { %v4365_v17 = vpop.f32.mrb[26].mxu0  ;;  %v3261_v57 = vadd.f32 %v3245_v51, %v3141_v8  ;;  %v4773_v8 = vld [vmem:[%s5111_s24 + $0x20] sm:$0xff] }
 0x900   : > { %v3610_v55 = vpop.f32.mrb[27].mxu0 }
 0x901   : > { %3649 = vrot.lane.b32.xlu1 %v3255_v4, %s4794_s20  ;;  %3647 = vrot.lane.b32.xlu0 %v3254_v31, %s4794_s20  ;;  %v6975_v62 = vpack.c.bf16 %v4365_v17, %v3610_v55  ;;  %v4767_v31 = vld [vmem:[%s5111_s24 + $0x10] sm:$0xff]  ;;  %v4768_v4 = vld [vmem:[%s4831_s17 + $0x68] sm:$0xff] }
 0x902   : > { %v2262_v36 = vmul.f32 %v4768_v4, %v4767_v31  ;;  %v4769_v55 = vld [vmem:[%s5119_s27 + $0x10] sm:$0xff] }
 0x904   : > { %v1910_v0 = vpop.permute.xlu1 %1909 }
 0x905   : > { %3653 = vrot.lane.b32.xlu1 %v3257_v27, %s4794_s20  ;;  %3651 = vrot.lane.b32.xlu0 %v3256_v26, %s4794_s20 }
 0x907   : > { %v4368_v61 = vpop.f32.mrb[28].mxu0 }
 0x908   : > { %v3620_v5 = vpop.f32.mrb[29].mxu0 }
 0x909   : > { %3657 = vrot.lane.b32.xlu1 %v3259_v7, %s4794_s20  ;;  %3655 = vrot.lane.b32.xlu0 %v3258_v19, %s4794_s20  ;;  %v6989_v1 = vpack.c.bf16 %v4368_v61, %v3620_v5 }
 0x90d   : > { %3661 = vrot.lane.b32.xlu1 %v3261_v57, %s4794_s20  ;;  %3659 = vrot.lane.b32.xlu0 %v3260_v42, %s4794_s20  ;;  %v4774_v42 = vld [vmem:[%s4831_s17 + $0xc8] sm:$0xff] }
 0x90e   : > { %v2264_v57 = vmul.f32 %v4774_v42, %v4773_v8 }
 0x90f   : > { %v4371_v6 = vpop.f32.mrb[30].mxu0 }
 0x910   : > { %v3630_v56 = vpop.f32.mrb[31].mxu0 }
 0x911   : > { %v6993_v32 = vpack.c.bf16 %v4371_v6, %v3630_v56  ;;  %v4775_v56 = vld [vmem:[%s5119_s27 + $0x20] sm:$0xff] }
 0x914   : > { %v1914_v34 = vpop.permute.xlu1 %1913 }
 0x943   : > { %v1908_v12 = vpop.permute.xlu0 %1907 }
 0x944   : > { %4276 = vmatprep.mubr.msk.f32.mxu1 %vm275_vm0, %v1908_v12 }
 0x945   : > { %4277 = vmatmul.mubr.msk.f32.vlgmr.msra.gmra.mrb[8].mxu1 %vm275_vm0, %v1910_v0 }
 0x946   : > { %4483 = vmatpush3.bf16.msra.mxu1 %v6929_v13 }
 0x947   : > { %4485 = vmatprep.subr.bf16.mxu1 %v6937_v58  ;;  %v1912_v22 = vpop.permute.xlu0 %1911 }
 0x948   : > { %4279 = vmatprep.mubr.msk.f32.mxu1 %vm275_vm0, %v1912_v22 }
 0x949   : > { %4280 = vmatmul.mubr.msk.f32.gmra.mrb[10].mxu1 %vm275_vm0, %v1914_v34 }
 0x94a   : > { %4487 = vmatpush3.bf16.msra.mxu1 %v6937_v58 }
 0x94b   : > { %4489 = vmatprep.subr.bf16.mxu1 %v6944_v46  ;;  %v1918_v18 = vpop.permute.xlu1 %1917  ;;  %v1916_v54 = vpop.permute.xlu0 %1915 }
 0x94c   : > { %4282 = vmatprep.mubr.msk.f32.mxu1 %vm275_vm0, %v1916_v54  ;;  %v4776_v54 = vld [vmem:[%s5111_s24 + $0x28] sm:$0xff] }
 0x94d   : > { %4283 = vmatmul.mubr.msk.f32.gmra.mrb[12].mxu1 %vm275_vm0, %v1918_v18 }
 0x94e   : > { %4491 = vmatpush3.bf16.msra.mxu1 %v6944_v46  ;;  %v2261_v46 = vmul.f32 %v4765_v35, %v4764_v28 }
 0x94f   : > { %4493 = vmatprep.subr.bf16.mxu1 %v6951_v11  ;;  %v2317_v43 = vpop.permute.xlu1 %2316  ;;  %v2285_v16 = vpop.permute.xlu0 %2284 }
 0x950   : > { %v2340_v50 = vsel %vm565_vm1, %v2285_v16, %v2317_v43 }
 0x951   : > { %v2348_v48 = vsel %vm574_vm2, %v2340_v50, %v2285_v16 }
 0x952   : > { %v2356_v24 = vsel %vm583_vm3, %v2348_v48, %v2317_v43  ;;  %4495 = vmatpush3.bf16.msra.mxu1 %v6951_v11  ;;  %v4777_v43 = vld [vmem:[%s4831_s17 + $0xf8] sm:$0xff]  ;;  %v4778_v48 = vld [vmem:[%s5119_s27 + $0x28] sm:$0xff] }
 0x953   : > { %4513 = vmatprep.subr.bf16.mxu1 %v6958_v53  ;;  %v2319_v52 = vpop.permute.xlu1 %2318  ;;  %v2287_v49 = vpop.permute.xlu0 %2286  ;;  %v2364_v13 = vmul.f32 %v4763_v3, %v2356_v24  ;;  %v2265_v16 = vmul.f32 %v4777_v43, %v4776_v54  ;;  %v4780_v3 = vld [vmem:[%s4831_s17 + $0x128] sm:$0xff] }
 0x954   : > { %v2341_v14 = vsel %vm565_vm1, %v2287_v49, %v2319_v52 }
 0x955   : > { %v2349_v29 = vsel %vm574_vm2, %v2341_v14, %v2287_v49  ;;  %v2372_v21 = vadd.f32 %v2364_v13, %v2260_v44  ;;  %v4779_v44 = vld [vmem:[%s5111_s24 + $0x30] sm:$0xff] }
 0x956   : > { %v2357_v58 = vsel %vm583_vm3, %v2349_v29, %v2319_v52  ;;  %v2266_v13 = vmul.f32 %v4780_v3, %v4779_v44 }
 0x957   : > { %v2365_v47 = vmul.f32 %v4766_v40, %v2357_v58  ;;  %v1922_v11 = vpop.permute.xlu1 %1921  ;;  %v1920_v38 = vpop.permute.xlu0 %1919  ;;  %v4781_v40 = vld [vmem:[%s5111_s24 + $0x38] sm:$0xff] }
 0x958   : > { %4285 = vmatprep.mubr.msk.f32.mxu1 %vm275_vm0, %v1920_v38 }
 0x959   : > { %4286 = vmatmul.mubr.msk.f32.gmra.mrb[14].mxu1 %vm275_vm0, %v1922_v11  ;;  %v2373_v20 = vadd.f32 %v2365_v47, %v2261_v46  ;;  %v4782_v47 = vld [vmem:[%s4831_s17 + $0x158] sm:$0xff] }
 0x95a   : > { %4332 = vmatprep.mubr.msk.f32.mxu1 %vm275_vm0, %v2372_v21  ;;  %v2267_v11 = vmul.f32 %v4782_v47, %v4781_v40 }
 0x95b   : > { %v2321_v45 = vpop.permute.xlu1 %2320  ;;  %v2289_v63 = vpop.permute.xlu0 %2288 }
 0x95c   : > { %v2342_v37 = vsel %vm565_vm1, %v2289_v63, %v2321_v45 }
 0x95d   : > { %v2350_v17 = vsel %vm574_vm2, %v2342_v37, %v2289_v63  ;;  %4333 = vmatmul.mubr.msk.f32.vlgmr.msra.gmra.mrb[16].mxu1 %vm275_vm0, %v2373_v20  ;;  %v4783_v20 = vld [vmem:[%s5119_s27 + $0x38] sm:$0xff] }
 0x95e   : > { %v2358_v39 = vsel %vm583_vm3, %v2350_v17, %v2321_v45  ;;  %4515 = vmatpush3.bf16.msra.mxu1 %v6958_v53  ;;  %v4772_v53 = vld [vmem:[%s5119_s27 + $0x18] sm:$0xff] }
 0x95f   : > { %v2366_v2 = vmul.f32 %v4769_v55, %v2358_v39  ;;  %4517 = vmatprep.subr.bf16.mxu1 %v6975_v62  ;;  %v2323_v25 = vpop.permute.xlu1 %2322  ;;  %v2291_v26 = vpop.permute.xlu0 %2290 }
 0x960   : > { %v2343_v27 = vsel %vm565_vm1, %v2291_v26, %v2323_v25 }
 0x961   : > { %v2374_v60 = vadd.f32 %v2366_v2, %v2262_v36  ;;  %v2351_v19 = vsel %vm574_vm2, %v2343_v27, %v2291_v26 }
 0x962   : > { %v2359_v7 = vsel %vm583_vm3, %v2351_v19, %v2323_v25  ;;  %4519 = vmatpush3.bf16.msra.mxu1 %v6975_v62 }
 0x963   : > { %v2367_v59 = vmul.f32 %v4772_v53, %v2359_v7  ;;  %4521 = vmatprep.subr.bf16.mxu1 %v6989_v1  ;;  %v2325_v61 = vpop.permute.xlu1 %2324  ;;  %v2293_v51 = vpop.permute.xlu0 %2292  ;;  %4335 = vmatprep.mubr.msk.f32.mxu1 %vm275_vm0, %v2374_v60 }
 0x964   : > { %v2344_v5 = vsel %vm565_vm1, %v2293_v51, %v2325_v61 }
 0x965   : > { %v2375_v15 = vadd.f32 %v2367_v59, %v2263_v30  ;;  %v2352_v6 = vsel %vm574_vm2, %v2344_v5, %v2293_v51 }
 0x966   : > { %v2360_v62 = vsel %vm583_vm3, %v2352_v6, %v2325_v61  ;;  %4523 = vmatpush3.bf16.msra.mxu1 %v6989_v1 }
 0x967   : > { %v2368_v0 = vmul.f32 %v4775_v56, %v2360_v62  ;;  %4525 = vmatprep.subr.bf16.mxu1 %v6993_v32  ;;  %v2327_v12 = vpop.permute.xlu1 %2326  ;;  %v2295_v34 = vpop.permute.xlu0 %2294  ;;  %4336 = vmatmul.mubr.msk.f32.gmra.mrb[18].mxu1 %vm275_vm0, %v2375_v15 }
 0x968   : > { %v2345_v22 = vsel %vm565_vm1, %v2295_v34, %v2327_v12 }
 0x969   : > { %v2376_v18 = vadd.f32 %v2368_v0, %v2264_v57  ;;  %v2353_v50 = vsel %vm574_vm2, %v2345_v22, %v2295_v34 }
 0x96a   : > { %v2361_v1 = vsel %vm583_vm3, %v2353_v50, %v2327_v12  ;;  %4527 = vmatpush3.bf16.msra.mxu1 %v6993_v32 }
 0x96b   : > { %v2369_v24 = vmul.f32 %v4778_v48, %v2361_v1  ;;  %v2329_v52 = vpop.permute.xlu1 %2328  ;;  %v2297_v49 = vpop.permute.xlu0 %2296  ;;  %4338 = vmatprep.mubr.msk.f32.mxu1 %vm275_vm0, %v2376_v18 }
 0x96c   : > { %v2346_v23 = vsel %vm565_vm1, %v2297_v49, %v2329_v52 }
 0x96d   : > { %v2377_v10 = vadd.f32 %v2369_v24, %v2265_v16  ;;  %v2354_v14 = vsel %vm574_vm2, %v2346_v23, %v2297_v49 }
 0x96e   : > { %v2362_v29 = vsel %vm583_vm3, %v2354_v14, %v2329_v52 }
 0x96f   : > { %v2370_v32 = vmul.f32 %v6764_v41, %v2362_v29  ;;  %v2331_v58 = vpop.permute.xlu1 %2330  ;;  %v2299_v28 = vpop.permute.xlu0 %2298  ;;  %4339 = vmatmul.mubr.msk.f32.gmra.mrb[20].mxu1 %vm275_vm0, %v2377_v10 }
 0x970   : > { %v2347_v35 = vsel %vm565_vm1, %v2299_v28, %v2331_v58 }
 0x971   : > { %v2378_v46 = vadd.f32 %v2370_v32, %v2266_v13  ;;  %v2355_v38 = vsel %vm574_vm2, %v2347_v35, %v2299_v28 }
 0x972   : > { %v2363_v21 = vsel %vm583_vm3, %v2355_v38, %v2331_v58 }
 0x973   : > { %v2371_v45 = vmul.f32 %v4783_v20, %v2363_v21  ;;  %v3648_v63 = vpop.permute.xlu0 %3647  ;;  %4341 = vmatprep.mubr.msk.f32.mxu1 %vm275_vm0, %v2378_v46  ;;  %v3650_v41 = vpop.permute.xlu1 %3649 }
 0x975   : > { %v2379_v37 = vadd.f32 %v2371_v45, %v2267_v11 }
 0x977   : > { %v3652_v31 = vpop.permute.xlu0 %3651  ;;  %4342 = vmatmul.mubr.msk.f32.gmra.mrb[22].mxu1 %vm275_vm0, %v2379_v37  ;;  %v3654_v4 = vpop.permute.xlu1 %3653 }
 0x978   : > { %4388 = vmatprep.mubr.msk.f32.mxu1 %vm275_vm0, %v3648_v63 }
 0x97b   : > { %4389 = vmatmul.mubr.msk.f32.vlgmr.msra.gmra.mrb[24].mxu1 %vm275_vm0, %v3650_v41  ;;  %v3656_v36 = vpop.permute.xlu0 %3655  ;;  %v3658_v17 = vpop.permute.xlu1 %3657 }
 0x97c   : > { %4391 = vmatprep.mubr.msk.f32.mxu1 %vm275_vm0, %v3652_v31 }
 0x97f   : > { %4392 = vmatmul.mubr.msk.f32.gmra.mrb[26].mxu1 %vm275_vm0, %v3654_v4  ;;  %v3660_v39 = vpop.permute.xlu0 %3659  ;;  %v3662_v55 = vpop.permute.xlu1 %3661 }
 0x980   : > { %4394 = vmatprep.mubr.msk.f32.mxu1 %vm275_vm0, %v3656_v36 }
 0x983   : > { %4395 = vmatmul.mubr.msk.f32.gmra.mrb[28].mxu1 %vm275_vm0, %v3658_v17 }
 0x984   : > { %4397 = vmatprep.mubr.msk.f32.mxu1 %vm275_vm0, %v3660_v39 }
 0x987   : > { %4398 = vmatmul.mubr.msk.f32.gmra.mrb[30].mxu1 %vm275_vm0, %v3662_v55 }
 0x9a0   : > { %v7082_v2 = vpop.f32.mrb[0].mxu1 }
 0x9a1   : > { %v7084_v25 = vpop.f32.mrb[1].mxu1  ;;  %v1019_v40 = vmul.f32 0.015625, %v7082_v2 }
 0x9a2   : > { %v1018_v47 = vmul.f32 0.015625, %v7084_v25 }
 0x9a4   : > { %v7086_v26 = vpop.f32.mrb[2].mxu1 }
 0x9a5   : > { %v7088_v27 = vpop.f32.mrb[3].mxu1  ;;  %v1021_v45 = vmul.f32 0.015625, %v7086_v26 }
 0x9a6   : > { %v1020_v63 = vmul.f32 0.015625, %v7088_v27 }
 0x9a8   : > { %v7090_v60 = vpop.f32.mrb[4].mxu1 }
 0x9a9   : > { %v7092_v9 = vpop.f32.mrb[5].mxu1  ;;  %v1023_v36 = vmul.f32 0.015625, %v7090_v60 }
 0x9aa   : > { %v1022_v17 = vmul.f32 0.015625, %v7092_v9 }
 0x9ad   : > { %v7094_v33 = vpop.f32.mrb[6].mxu1 }
 0x9ae   : > { %v7096_v30 = vpop.f32.mrb[7].mxu1  ;;  %v1025_v26 = vmul.f32 0.015625, %v7094_v33 }
 0x9af   : > { %v1024_v27 = vmul.f32 0.015625, %v7096_v30 }
 0xa18   : > { %v4278_v19 = vpop.f32.mrb[8].mxu1 }
 0xa19   : > { %v2045_v7 = vmul.f32 0.015625, %v4278_v19  ;;  %v2005_v53 = vpop.f32.mrb[9].mxu1 }
 0xa1a   : > { %v2044_v59 = vmul.f32 0.015625, %v2005_v53 }
 0xa1b   : > { %3802 = vrot.lane.b32.xlu1 %v2045_v7, %s4794_s20 }
 0xa1c   : > { %3800 = vrot.lane.b32.xlu0 %v2044_v59, %s4794_s20  ;;  %v4281_v61 = vpop.f32.mrb[10].mxu1 }
 0xa1d   : > { %v2047_v51 = vmul.f32 0.015625, %v4281_v61  ;;  %v2015_v5 = vpop.f32.mrb[11].mxu1 }
 0xa1e   : > { %v2046_v15 = vmul.f32 0.015625, %v2015_v5 }
 0xa1f   : > { %3806 = vrot.lane.b32.xlu1 %v2047_v51, %s4794_s20 }
 0xa20   : > { %3804 = vrot.lane.b32.xlu0 %v2046_v15, %s4794_s20  ;;  %v4284_v8 = vpop.f32.mrb[12].mxu1 }
 0xa21   : > { %v2049_v42 = vmul.f32 0.015625, %v4284_v8  ;;  %v2025_v57 = vpop.f32.mrb[13].mxu1 }
 0xa22   : > { %v2048_v6 = vmul.f32 0.015625, %v2025_v57 }
 0xa23   : > { %3810 = vrot.lane.b32.xlu1 %v2049_v42, %s4794_s20 }
 0xa24   : > { %3808 = vrot.lane.b32.xlu0 %v2048_v6, %s4794_s20 }
 0xa2c   : > { %v4287_v62 = vpop.f32.mrb[14].mxu1 }
 0xa2d   : > { %v2051_v56 = vmul.f32 0.015625, %v4287_v62  ;;  %v2035_v0 = vpop.f32.mrb[15].mxu1 }
 0xa2e   : > { %v2050_v12 = vmul.f32 0.015625, %v2035_v0 }
 0xa2f   : > { %3814 = vrot.lane.b32.xlu1 %v2051_v56, %s4794_s20 }
 0xa30   : > { %v7105_v34 = vpop.f32.mrb[16].mxu1  ;;  %3812 = vrot.lane.b32.xlu0 %v2050_v12, %s4794_s20 }
 0xa31   : > { %v7108_v22 = vpop.f32.mrb[17].mxu1  ;;  %v2791_v53 = vmul.f32 0.015625, %v7105_v34 }
 0xa32   : > { %v2790_v59 = vmul.f32 0.015625, %v7108_v22 }
 0xa3a   : > { %v7110_v18 = vpop.f32.mrb[18].mxu1 }
 0xa3b   : > { %v7112_v54 = vpop.f32.mrb[19].mxu1  ;;  %v2793_v5 = vmul.f32 0.015625, %v7110_v18 }
 0xa3c   : > { %v2792_v15 = vmul.f32 0.015625, %v7112_v54 }
 0xa42   : > { %v7114_v43 = vpop.f32.mrb[20].mxu1 }
 0xa43   : > { %v7116_v16 = vpop.f32.mrb[21].mxu1  ;;  %v2795_v62 = vmul.f32 0.015625, %v7114_v43 }
 0xa44   : > { %v2794_v56 = vmul.f32 0.015625, %v7116_v16 }
 0xa4a   : > { %v7118_v50 = vpop.f32.mrb[22].mxu1 }
 0xa4b   : > { %v7120_v1 = vpop.f32.mrb[23].mxu1  ;;  %v2797_v18 = vmul.f32 0.015625, %v7118_v50 }
 0xa4c   : > { %v2796_v54 = vmul.f32 0.015625, %v7120_v1 }
 0xa4e   : > { %v4390_v48 = vpop.f32.mrb[24].mxu1 }
 0xa4f   : > { %v3785_v24 = vmul.f32 0.015625, %v4390_v48  ;;  %v3745_v52 = vpop.f32.mrb[25].mxu1 }
 0xa50   : > { %v3784_v49 = vmul.f32 0.015625, %v3745_v52 }
 0xa51   : > { %3834 = vrot.lane.b32.xlu1 %v3785_v24, %s4794_s20 }
 0xa52   : > { %v4393_v23 = vpop.f32.mrb[26].mxu1  ;;  %3832 = vrot.lane.b32.xlu0 %v3784_v49, %s4794_s20 }
 0xa53   : > { %v3787_v10 = vmul.f32 0.015625, %v4393_v23  ;;  %v3755_v44 = vpop.f32.mrb[27].mxu1 }
 0xa54   : > { %v3786_v3 = vmul.f32 0.015625, %v3755_v44 }
 0xa55   : > { %3838 = vrot.lane.b32.xlu1 %v3787_v10, %s4794_s20 }
 0xa56   : > { %v4396_v13 = vpop.f32.mrb[28].mxu1  ;;  %3836 = vrot.lane.b32.xlu0 %v3786_v3, %s4794_s20 }
 0xa57   : > { %v3789_v14 = vmul.f32 0.015625, %v4396_v13  ;;  %v3765_v29 = vpop.f32.mrb[29].mxu1 }
 0xa58   : > { %v3788_v32 = vmul.f32 0.015625, %v3765_v29 }
 0xa59   : > { %3842 = vrot.lane.b32.xlu1 %v3789_v14, %s4794_s20 }
 0xa5a   : > { %v4399_v58 = vpop.f32.mrb[30].mxu1  ;;  %3840 = vrot.lane.b32.xlu0 %v3788_v32, %s4794_s20 }
 0xa5b   : > { %v3791_v28 = vmul.f32 0.015625, %v4399_v58  ;;  %v3775_v35 = vpop.f32.mrb[31].mxu1 }
 0xa5c   : > { %v3790_v46 = vmul.f32 0.015625, %v3775_v35 }
 0xa5d   : > { %3846 = vrot.lane.b32.xlu1 %v3791_v28, %s4794_s20 }
 0xa5e   : > { %3844 = vrot.lane.b32.xlu0 %v3790_v46, %s4794_s20 }
 0xa8d   : > { %v3803_v11 = vpop.permute.xlu1 %3802 }
 0xa8e   : > { %v3857_v38 = vsel %vm275_vm0, %v1019_v40, %v3803_v11  ;;  %v3801_v21 = vpop.permute.xlu0 %3800 }
 0xa8f   : > { %3874 = vst [vmem:[%s7135_s6 + $0x10] sm:$0xff] %v3857_v38  ;;  %v3856_v20 = vsel %vm275_vm0, %v1018_v47, %v3801_v21 }
 0xa90   : > { %3872 = vst [vmem:[%s7135_s6] sm:$0xff] %v3856_v20 }
 0xa91   : > { %v3807_v41 = vpop.permute.xlu1 %3806 }
 0xa92   : > { %v3859_v37 = vsel %vm275_vm0, %v1021_v45, %v3807_v41  ;;  %v3805_v31 = vpop.permute.xlu0 %3804 }
 0xa93   : > { %3878 = vst [vmem:[%s7135_s6 + $0x30] sm:$0xff] %v3859_v37  ;;  %v3858_v4 = vsel %vm275_vm0, %v1020_v63, %v3805_v31 }
 0xa94   : > { %3876 = vst [vmem:[%s7135_s6 + $0x20] sm:$0xff] %v3858_v4 }
 0xa95   : > { %v3811_v39 = vpop.permute.xlu1 %3810 }
 0xa96   : > { %v3861_v55 = vsel %vm275_vm0, %v1023_v36, %v3811_v39  ;;  %v3809_v2 = vpop.permute.xlu0 %3808 }
 0xa97   : > { %3882 = vst [vmem:[%s7135_s6 + $0x50] sm:$0xff] %v3861_v55  ;;  %v3860_v25 = vsel %vm275_vm0, %v1022_v17, %v3809_v2 }
 0xa98   : > { %3880 = vst [vmem:[%s7135_s6 + $0x40] sm:$0xff] %v3860_v25 }
 0xaa1   : > { %v3815_v19 = vpop.permute.xlu1 %3814 }
 0xaa2   : > { %v3863_v60 = vsel %vm275_vm0, %v1025_v26, %v3815_v19  ;;  %v3813_v7 = vpop.permute.xlu0 %3812 }
 0xaa3   : > { %3886 = vst [vmem:[%s7135_s6 + $0x70] sm:$0xff] %v3863_v60  ;;  %v3862_v9 = vsel %vm275_vm0, %v1024_v27, %v3813_v7 }
 0xaa4   : > { %3884 = vst [vmem:[%s7135_s6 + $0x60] sm:$0xff] %v3862_v9 }
 0xac3   : > { %v3835_v61 = vpop.permute.xlu1 %3834 }
 0xac4   : > { %v3865_v33 = vsel %vm275_vm0, %v2791_v53, %v3835_v61  ;;  %v3833_v51 = vpop.permute.xlu0 %3832 }
 0xac5   : > { %3875 = vst [vmem:[%s7135_s6 + $0x18] sm:$0xff] %v3865_v33  ;;  %v3864_v30 = vsel %vm275_vm0, %v2790_v59, %v3833_v51 }
 0xac6   : > { %3873 = vst [vmem:[%s7135_s6 + $0x8] sm:$0xff] %v3864_v30 }
 0xac7   : > { %v3839_v8 = vpop.permute.xlu1 %3838 }
 0xac8   : > { %v3867_v42 = vsel %vm275_vm0, %v2793_v5, %v3839_v8  ;;  %v3837_v57 = vpop.permute.xlu0 %3836 }
 0xac9   : > { %3879 = vst [vmem:[%s7135_s6 + $0x38] sm:$0xff] %v3867_v42  ;;  %v3866_v6 = vsel %vm275_vm0, %v2792_v15, %v3837_v57 }
 0xaca   : > { %3877 = vst [vmem:[%s7135_s6 + $0x28] sm:$0xff] %v3866_v6 }
 0xacb   : > { %v3843_v0 = vpop.permute.xlu1 %3842 }
 0xacc   : > { %v3869_v12 = vsel %vm275_vm0, %v2795_v62, %v3843_v0  ;;  %v3841_v34 = vpop.permute.xlu0 %3840 }
 0xacd   : > { %3883 = vst [vmem:[%s7135_s6 + $0x58] sm:$0xff] %v3869_v12  ;;  %v3868_v22 = vsel %vm275_vm0, %v2794_v56, %v3841_v34 }
 0xace   : > { %3881 = vst [vmem:[%s7135_s6 + $0x48] sm:$0xff] %v3868_v22 }
 0xacf   : > { %v3847_v48 = vpop.permute.xlu1 %3846 }
 0xad0   : > { %v3871_v24 = vsel %vm275_vm0, %v2797_v18, %v3847_v48  ;;  %v3845_v43 = vpop.permute.xlu0 %3844 }
 0xad1   : > { %3887 = vst [vmem:[%s7135_s6 + $0x78] sm:$0xff] %v3871_v24  ;;  %v3870_v52 = vsel %vm275_vm0, %v2796_v54, %v3845_v43 }
 0xad2   : > { %3885 = vst [vmem:[%s7135_s6 + $0x68] sm:$0xff] %v3870_v52 }
 0xad3 PF: > { %s13_s12 = sadd.s32 1, %s4790_s12  }
 0xad4   : > { %p10_p4 = scmp.ge.s32.totalorder %s13_s12, 4  }
 0xad6   :  { %12 = sbr.rel (!%p10_p4) target bundleno = 1 (0x1), region = 68 }

// kernel: spatial_encoder_2d_forward.11
= control target key start
LH: loop header
LB: loop body
LE: loop exit
PB: predicated region body
PF: predicated region fallthrough
CT: control target
= control target key end

     0   :  { %vm60_vm0 = vcmask 523264   ;;  %s3284_s3 = inlined_call_operand.vmem [shape: f32[128,64], index: 3, kind: input, shape index: {}]   ;;  %s3285_s1 = inlined_call_operand.vmem [shape: bf16[256,64], index: 1, kind: input, shape index: {}]   ;;  %s3286_s0 = inlined_call_operand.vmem [shape: f32[128,256], index: 0, kind: input, shape index: {}]   ;;  %s3287_s4 = inlined_call_operand.vmem [shape: f32[1,64], index: 4, kind: input, shape index: {}]   ;;  %s3288_s2 = inlined_call_operand.vmem [shape: f32[1,64], index: 2, kind: input, shape index: {}]   ;;  %s3289_s5 = inlined_call_operand.vmem [shape: f32[1,64], index: 5, kind: input, shape index: {}]   ;;  %s3290_s8 = inlined_call_operand.vmem [shape: bf16[64,64], index: 8, kind: input, shape index: {}]   ;;  %s3291_s6 = inlined_call_operand.vmem [shape: f32[1,64], index: 6, kind: input, shape index: {}]   ;;  %s3292_s7 = inlined_call_operand.vmem [shape: f32[1,64], index: 7, kind: input, shape index: {}]   ;;  %s3293_s10 = inlined_call_operand.vmem [shape: bf16[64,64], index: 10, kind: input, shape index: {}]   ;;  %s3294_s9 = inlined_call_operand.vmem [shape: f32[1,64], index: 9, kind: input, shape index: {}]   ;;  %s3295_s11 = inlined_call_operand.vmem [shape: f32[1,64], index: 11, kind: input, shape index: {}]   ;;  %s3296_s12 = inlined_call_operand.vmem [shape: f32[128,64], index: 12, kind: output, shape index: {}]  }
   0x1   :  { %v2073_v0 = vld [vmem:[%s3284_s3] sm:$0xff]  ;;  %v2078_v1 = vld [vmem:[%s3284_s3 + $0x10] sm:$0xff]  ;;  %v2083_v2 = vld [vmem:[%s3284_s3 + $0x8] sm:$0xff] }
   0x2   :  { %v61_v3 = vsel %vm60_vm0, %v2073_v0, 0.0  ;;  %v67_v4 = vsel %vm60_vm0, %v2078_v1, 0.0  ;;  %v2092_v5 = vld [vmem:[%s3284_s3 + $0x18] sm:$0xff]  ;;  %v64_v6 = vsel %vm60_vm0, %v2083_v2, 0.0  ;;  %v2101_v8 = vld [vmem:[%s3284_s3 + $0x20] sm:$0xff]  ;;  %v2106_v9 = vld [vmem:[%s3284_s3 + $0x28] sm:$0xff] }
   0x3   :  { %62 = vadd.xlane.f32.xlu0 %v61_v3  ;;  %68 = vadd.xlane.f32.xlu1 %v67_v4  ;;  %v70_v7 = vsel %vm60_vm0, %v2092_v5, 0.0  ;;  %v2111_v10 = vld [vmem:[%s3284_s3 + $0x30] sm:$0xff]  ;;  %v73_v11 = vsel %vm60_vm0, %v2101_v8, 0.0  ;;  %v2118_v12 = vld [vmem:[%s3284_s3 + $0x38] sm:$0xff]  ;;  %v1852_v13 = vld [vmem:[%s3285_s1 + $0x40] sm:$0xff]   ;;  %v76_v14 = vsel %vm60_vm0, %v2106_v9, 0.0 }
   0x4   :  { %v1853_v15 = vld [vmem:[%s3285_s1] sm:$0xff]   ;;  %1715 = vmatprep.subr.bf16.mxu0 %v1852_v13  ;;  %v1854_v16 = vld [vmem:[%s3285_s1 + $0x48] sm:$0xff]   ;;  %v79_v18 = vsel %vm60_vm0, %v2111_v10, 0.0  ;;  %v82_v20 = vsel %vm60_vm0, %v2118_v12, 0.0  ;;  %v1856_v21 = vld [vmem:[%s3285_s1 + $0x50] sm:$0xff]  }
   0x5   :  { %1716 = vmatpush3.bf16.msra.mxu0 %v1853_v15  ;;  %v1855_v17 = vld [vmem:[%s3285_s1 + $0x8] sm:$0xff]   ;;  %v2139_v19 = vld [vmem:[%s3284_s3 + $0x40] sm:$0xff]  ;;  %v1857_v23 = vld [vmem:[%s3285_s1 + $0x10] sm:$0xff]  }
   0x6   :  { %1717 = vmatprep.subr.bf16.mxu0 %v1854_v16  ;;  %v2149_v22 = vld [vmem:[%s3284_s3 + $0x48] sm:$0xff]  ;;  %v85_v24 = vsel %vm60_vm0, %v2139_v19, 0.0  ;;  %v2159_v25 = vld [vmem:[%s3284_s3 + $0x50] sm:$0xff]  ;;  %v1858_v27 = vld [vmem:[%s3285_s1 + $0x58] sm:$0xff]  }
   0x7   :  { %65 = vadd.xlane.f32.xlu0 %v64_v6  ;;  %71 = vadd.xlane.f32.xlu1 %v70_v7  ;;  %v88_v26 = vsel %vm60_vm0, %v2149_v22, 0.0  ;;  %v2169_v28 = vld [vmem:[%s3284_s3 + $0x58] sm:$0xff]  ;;  %v91_v30 = vsel %vm60_vm0, %v2159_v25, 0.0  ;;  %v2179_v31 = vld [vmem:[%s3284_s3 + $0x60] sm:$0xff]  ;;  %v2189_v34 = vld [vmem:[%s3284_s3 + $0x68] sm:$0xff] }
   0x8   :  { %v1859_v29 = vld [vmem:[%s3285_s1 + $0x18] sm:$0xff]   ;;  %v94_v32 = vsel %vm60_vm0, %v2169_v28, 0.0  ;;  %v1860_v33 = vld [vmem:[%s3285_s1 + $0x60] sm:$0xff]   ;;  %v315_v36 = vld [vmem:[%s3286_s0 + $0x8] sm:$0xff]  ;;  %v97_v38 = vsel %vm60_vm0, %v2179_v31, 0.0  ;;  %v100_v39 = vsel %vm60_vm0, %v2189_v34, 0.0 }
   0x9   :  { %1718 = vmatpush3.bf16.msra.mxu0 %v1855_v17  ;;  %v1861_v35 = vld [vmem:[%s3285_s1 + $0x20] sm:$0xff]   ;;  %v317_v37 = vld [vmem:[%s3286_s0 + $0x18] sm:$0xff]  ;;  %v1862_v40 = vld [vmem:[%s3285_s1 + $0x68] sm:$0xff]  }
   0xa   :  { %1719 = vmatprep.subr.bf16.mxu0 %v1856_v21  ;;  %v347_v41 = vpack.c.bf16 %v317_v37, %v315_v36  ;;  %v2210_v42 = vld [vmem:[%s3284_s3 + $0x70] sm:$0xff]  ;;  %v2215_v43 = vld [vmem:[%s3284_s3 + $0x78] sm:$0xff]  ;;  %v1863_v44 = vld [vmem:[%s3285_s1 + $0x28] sm:$0xff]  }
   0xb   :  { %74 = vadd.xlane.f32.xlu0 %v73_v11  ;;  %77 = vadd.xlane.f32.xlu1 %v76_v14  ;;  %v103_v45 = vsel %vm60_vm0, %v2210_v42, 0.0  ;;  %v106_v46 = vsel %vm60_vm0, %v2215_v43, 0.0  ;;  %v1864_v47 = vld [vmem:[%s3285_s1 + $0x70] sm:$0xff]   ;;  %v1866_v49 = vld [vmem:[%s3285_s1 + $0x78] sm:$0xff]   ;;  %v314_v51 = vld [vmem:[%s3286_s0] sm:$0xff] }
   0xc   :  { %529 = vmatprep.mubr.bf16.mxu0 %v347_v41  ;;  %v1865_v48 = vld [vmem:[%s3285_s1 + $0x30] sm:$0xff]   ;;  %v1867_v50 = vld [vmem:[%s3285_s1 + $0x38] sm:$0xff]   ;;  %v319_v53 = vld [vmem:[%s3286_s0 + $0x28] sm:$0xff] }
   0xd   :  { %1720 = vmatpush3.bf16.msra.mxu0 %v1857_v23  ;;  %v316_v52 = vld [vmem:[%s3286_s0 + $0x10] sm:$0xff]  ;;  %v321_v54 = vld [vmem:[%s3286_s0 + $0x38] sm:$0xff]  ;;  %v318_v57 = vld [vmem:[%s3286_s0 + $0x20] sm:$0xff] }
   0xe   :  { %1721 = vmatprep.subr.bf16.mxu0 %v1858_v27  ;;  %v346_v55 = vpack.c.bf16 %v316_v52, %v314_v51  ;;  %v349_v56 = vpack.c.bf16 %v321_v54, %v319_v53  ;;  %v320_v58 = vld [vmem:[%s3286_s0 + $0x30] sm:$0xff]  ;;  %v323_v59 = vld [vmem:[%s3286_s0 + $0x48] sm:$0xff]  ;;  %v325_v60 = vld [vmem:[%s3286_s0 + $0x58] sm:$0xff] }
   0xf   :  { %80 = vadd.xlane.f32.xlu0 %v79_v18  ;;  %83 = vadd.xlane.f32.xlu1 %v82_v20  ;;  %v348_v61 = vpack.c.bf16 %v320_v58, %v318_v57  ;;  %v351_v62 = vpack.c.bf16 %v325_v60, %v323_v59  ;;  %v322_v63 = vld [vmem:[%s3286_s0 + $0x40] sm:$0xff]  ;;  %v324_v3 = vld [vmem:[%s3286_s0 + $0x50] sm:$0xff]  ;;  %v327_v4 = vld [vmem:[%s3286_s0 + $0x68] sm:$0xff] }
  0x10   :  { %v329_v6 = vld [vmem:[%s3286_s0 + $0x78] sm:$0xff]  ;;  %v350_v7 = vpack.c.bf16 %v324_v3, %v322_v63  ;;  %v326_v13 = vld [vmem:[%s3286_s0 + $0x60] sm:$0xff]  ;;  %v328_v14 = vld [vmem:[%s3286_s0 + $0x70] sm:$0xff] }
  0x11   :  { %1722 = vmatpush3.bf16.msra.mxu0 %v1859_v29  ;;  %v353_v11 = vpack.c.bf16 %v329_v6, %v327_v4  ;;  %v331_v15 = vld [vmem:[%s3286_s0 + $0x88] sm:$0xff]  ;;  %v333_v16 = vld [vmem:[%s3286_s0 + $0x98] sm:$0xff]  ;;  %v352_v17 = vpack.c.bf16 %v328_v14, %v326_v13  ;;  %v330_v20 = vld [vmem:[%s3286_s0 + $0x80] sm:$0xff] }
  0x12   :  { %1723 = vmatprep.subr.bf16.mxu0 %v1860_v33  ;;  %v355_v18 = vpack.c.bf16 %v333_v16, %v331_v15  ;;  %v332_v21 = vld [vmem:[%s3286_s0 + $0x90] sm:$0xff]  ;;  %v335_v23 = vld [vmem:[%s3286_s0 + $0xa8] sm:$0xff]  ;;  %v334_v29 = vld [vmem:[%s3286_s0 + $0xa0] sm:$0xff] }
  0x13   :  { %86 = vadd.xlane.f32.xlu0 %v85_v24  ;;  %89 = vadd.xlane.f32.xlu1 %v88_v26  ;;  %v337_v24 = vld [vmem:[%s3286_s0 + $0xb8] sm:$0xff]  ;;  %v354_v26 = vpack.c.bf16 %v332_v21, %v330_v20  ;;  %v338_v37 = vld [vmem:[%s3286_s0 + $0xc0] sm:$0xff] }
  0x14   :  { %v357_v27 = vpack.c.bf16 %v337_v24, %v335_v23  ;;  %v341_v33 = vld [vmem:[%s3286_s0 + $0xd8] sm:$0xff] }
  0x15   :  { %1724 = vmatpush3.bf16.msra.mxu0 %v1861_v35 }
  0x16   :  { %1725 = vmatprep.subr.bf16.mxu0 %v1862_v40  ;;  %v345_v40 = vld [vmem:[%s3286_s0 + $0xf8] sm:$0xff] }
  0x17   :  { %92 = vadd.xlane.f32.xlu0 %v91_v30  ;;  %95 = vadd.xlane.f32.xlu1 %v94_v32  ;;  %v336_v30 = vld [vmem:[%s3286_s0 + $0xb0] sm:$0xff]  ;;  %v339_v32 = vld [vmem:[%s3286_s0 + $0xc8] sm:$0xff] }
  0x18   :  { %v356_v35 = vpack.c.bf16 %v336_v30, %v334_v29  ;;  %v359_v36 = vpack.c.bf16 %v341_v33, %v339_v32 }
  0x19   :  { %1726 = vmatpush3.bf16.msra.mxu0 %v1863_v44 }
  0x1a   :  { %1727 = vmatprep.subr.bf16.mxu0 %v1864_v47 }
  0x1b   :  { %98 = vadd.xlane.f32.xlu0 %v97_v38  ;;  %101 = vadd.xlane.f32.xlu1 %v100_v39  ;;  %v340_v38 = vld [vmem:[%s3286_s0 + $0xd0] sm:$0xff]  ;;  %v343_v39 = vld [vmem:[%s3286_s0 + $0xe8] sm:$0xff] }
  0x1c   :  { %v358_v41 = vpack.c.bf16 %v340_v38, %v338_v37  ;;  %v361_v44 = vpack.c.bf16 %v345_v40, %v343_v39 }
  0x1d   :  { %1728 = vmatpush3.bf16.msra.mxu0 %v1865_v48 }
  0x1e   :  { %1729 = vmatprep.subr.bf16.mxu0 %v1866_v49 }
  0x1f   :  { %104 = vadd.xlane.f32.xlu0 %v103_v45  ;;  %107 = vadd.xlane.f32.xlu1 %v106_v46  ;;  %v342_v45 = vld [vmem:[%s3286_s0 + $0xe0] sm:$0xff]  ;;  %v344_v46 = vld [vmem:[%s3286_s0 + $0xf0] sm:$0xff] }
  0x20   :  { %v360_v47 = vpack.c.bf16 %v344_v46, %v342_v45 }
  0x21   :  { %1730 = vmatpush3.bf16.msra.mxu0 %v1867_v50 }
  0x24   :  { %530 = vmatmul.mubr.bf16.vlgmr.msra.gmra.mrb[0].mxu0 %v346_v55 }
  0x25   :  { %537 = vmatprep.mubr.bf16.mxu0 %v349_v56 }
  0x2c   :  { %538 = vmatmul.mubr.bf16.gmra.mrb[4].mxu0 %v348_v61 }
  0x2d   :  { %545 = vmatprep.mubr.bf16.mxu0 %v351_v62 }
  0x34   :  { %546 = vmatmul.mubr.bf16.gmra.mrb[8].mxu0 %v350_v7 }
  0x35   :  { %553 = vmatprep.mubr.bf16.mxu0 %v353_v11 }
  0x3c   :  { %554 = vmatmul.mubr.bf16.gmra.mrb[12].mxu0 %v352_v17 }
  0x3d   :  { %561 = vmatprep.mubr.bf16.mxu0 %v355_v18 }
  0x44   :  { %562 = vmatmul.mubr.bf16.gmra.mrb[16].mxu0 %v354_v26 }
  0x45   :  { %569 = vmatprep.mubr.bf16.mxu0 %v357_v27 }
  0x4c   :  { %570 = vmatmul.mubr.bf16.gmra.mrb[20].mxu0 %v356_v35 }
  0x4d   :  { %577 = vmatprep.mubr.bf16.mxu0 %v359_v36 }
  0x54   :  { %578 = vmatmul.mubr.bf16.gmra.mrb[24].mxu0 %v358_v41 }
  0x55   :  { %585 = vmatprep.mubr.bf16.mxu0 %v361_v44 }
  0x5c   :  { %586 = vmatmul.mubr.bf16.gmra.mrb[28].mxu0 %v360_v47 }
  0x90   :  { %v63_v48 = vpop.xlane.xlu0 %62  ;;  %v69_v49 = vpop.xlane.xlu1 %68 }
  0x91   :  { %v110_v50 = vmul.f32 0.015625, %v63_v48  ;;  %v112_v51 = vmul.f32 0.015625, %v69_v49 }
  0x93   :  { %v2327_v52 = vsub.f32 %v2073_v0, %v110_v50  ;;  %v2330_v53 = vsub.f32 %v2078_v1, %v112_v51 }
  0x94   :  { %v66_v54 = vpop.xlane.xlu0 %65  ;;  %v72_v55 = vpop.xlane.xlu1 %71 }
  0x95   :  { %v111_v56 = vmul.f32 0.015625, %v66_v54  ;;  %v113_v57 = vmul.f32 0.015625, %v72_v55  ;;  %v142_v58 = vmul.f32 %v2327_v52, %v2327_v52  ;;  %v144_v59 = vmul.f32 %v2330_v53, %v2330_v53 }
  0x97   :  { %v2337_v60 = vsub.f32 %v2083_v2, %v111_v56  ;;  %v2340_v61 = vsub.f32 %v2092_v5, %v113_v57  ;;  %v158_v0 = vsel %vm60_vm0, %v142_v58, 0.0  ;;  %v164_v63 = vsel %vm60_vm0, %v144_v59, 0.0 }
  0x98   :  { %159 = vadd.xlane.f32.xlu0 %v158_v0  ;;  %v75_v1 = vpop.xlane.xlu0 %74  ;;  %v78_v62 = vpop.xlane.xlu1 %77 }
  0x99   :  { %v114_v3 = vmul.f32 0.015625, %v75_v1  ;;  %v115_v4 = vmul.f32 0.015625, %v78_v62  ;;  %v143_v6 = vmul.f32 %v2337_v60, %v2337_v60  ;;  %v145_v7 = vmul.f32 %v2340_v61, %v2340_v61 }
  0x9b   :  { %v2349_v2 = vsub.f32 %v2101_v8, %v114_v3  ;;  %v2352_v5 = vsub.f32 %v2106_v9, %v115_v4  ;;  %v161_v11 = vsel %vm60_vm0, %v143_v6, 0.0  ;;  %v167_v15 = vsel %vm60_vm0, %v145_v7, 0.0 }
  0x9c   :  { %165 = vadd.xlane.f32.xlu0 %v164_v63  ;;  %162 = vadd.xlane.f32.xlu1 %v161_v11  ;;  %v81_v13 = vpop.xlane.xlu0 %80  ;;  %v84_v14 = vpop.xlane.xlu1 %83 }
  0x9d   :  { %v116_v16 = vmul.f32 0.015625, %v81_v13  ;;  %v117_v17 = vmul.f32 0.015625, %v84_v14  ;;  %v146_v18 = vmul.f32 %v2349_v2, %v2349_v2  ;;  %v147_v8 = vmul.f32 %v2352_v5, %v2352_v5 }
  0x9f   :  { %v2361_v20 = vsub.f32 %v2111_v10, %v116_v16  ;;  %v2364_v9 = vsub.f32 %v2118_v12, %v117_v17  ;;  %v170_v21 = vsel %vm60_vm0, %v146_v18, 0.0  ;;  %v173_v26 = vsel %vm60_vm0, %v147_v8, 0.0 }
  0xa0   :  { %168 = vadd.xlane.f32.xlu1 %v167_v15  ;;  %171 = vadd.xlane.f32.xlu0 %v170_v21  ;;  %v87_v23 = vpop.xlane.xlu0 %86  ;;  %v90_v24 = vpop.xlane.xlu1 %89 }
  0xa1   :  { %v118_v27 = vmul.f32 0.015625, %v87_v23  ;;  %v119_v29 = vmul.f32 0.015625, %v90_v24  ;;  %v148_v30 = vmul.f32 %v2361_v20, %v2361_v20  ;;  %v149_v10 = vmul.f32 %v2364_v9, %v2364_v9 }
  0xa3   :  { %v2373_v32 = vsub.f32 %v2139_v19, %v118_v27  ;;  %v2376_v12 = vsub.f32 %v2149_v22, %v119_v29  ;;  %v176_v33 = vsel %vm60_vm0, %v148_v30, 0.0  ;;  %v179_v37 = vsel %vm60_vm0, %v149_v10, 0.0 }
  0xa4   :  { %174 = vadd.xlane.f32.xlu1 %v173_v26  ;;  %177 = vadd.xlane.f32.xlu0 %v176_v33  ;;  %v93_v35 = vpop.xlane.xlu0 %92  ;;  %v96_v36 = vpop.xlane.xlu1 %95 }
  0xa5   :  { %v120_v38 = vmul.f32 0.015625, %v93_v35  ;;  %v121_v39 = vmul.f32 0.015625, %v96_v36  ;;  %v150_v40 = vmul.f32 %v2373_v32, %v2373_v32  ;;  %v151_v19 = vmul.f32 %v2376_v12, %v2376_v12 }
  0xa7   :  { %v2385_v41 = vsub.f32 %v2159_v25, %v120_v38  ;;  %v2388_v22 = vsub.f32 %v2169_v28, %v121_v39  ;;  %v182_v44 = vsel %vm60_vm0, %v150_v40, 0.0  ;;  %v185_v47 = vsel %vm60_vm0, %v151_v19, 0.0 }
  0xa8   :  { %180 = vadd.xlane.f32.xlu1 %v179_v37  ;;  %183 = vadd.xlane.f32.xlu0 %v182_v44  ;;  %v99_v45 = vpop.xlane.xlu0 %98  ;;  %v102_v46 = vpop.xlane.xlu1 %101 }
  0xa9   :  { %v122_v48 = vmul.f32 0.015625, %v99_v45  ;;  %v123_v49 = vmul.f32 0.015625, %v102_v46  ;;  %v152_v50 = vmul.f32 %v2385_v41, %v2385_v41  ;;  %v153_v25 = vmul.f32 %v2388_v22, %v2388_v22 }
  0xab   :  { %v2397_v51 = vsub.f32 %v2179_v31, %v122_v48  ;;  %v2400_v28 = vsub.f32 %v2189_v34, %v123_v49  ;;  %v188_v54 = vsel %vm60_vm0, %v152_v50, 0.0  ;;  %v191_v57 = vsel %vm60_vm0, %v153_v25, 0.0 }
  0xac   :  { %186 = vadd.xlane.f32.xlu1 %v185_v47  ;;  %189 = vadd.xlane.f32.xlu0 %v188_v54  ;;  %v105_v55 = vpop.xlane.xlu0 %104  ;;  %v108_v56 = vpop.xlane.xlu1 %107 }
  0xad   :  { %v124_v58 = vmul.f32 0.015625, %v105_v55  ;;  %v125_v59 = vmul.f32 0.015625, %v108_v56  ;;  %v154_v0 = vmul.f32 %v2397_v51, %v2397_v51  ;;  %v155_v31 = vmul.f32 %v2400_v28, %v2400_v28 }
  0xaf   :  { %v2409_v1 = vsub.f32 %v2210_v42, %v124_v58  ;;  %v2412_v34 = vsub.f32 %v2215_v43, %v125_v59  ;;  %v194_v62 = vsel %vm60_vm0, %v154_v0, 0.0  ;;  %v197_v63 = vsel %vm60_vm0, %v155_v31, 0.0 }
  0xb0   :  { %192 = vadd.xlane.f32.xlu1 %v191_v57  ;;  %195 = vadd.xlane.f32.xlu0 %v194_v62 }
  0xb1   :  { %v156_v3 = vmul.f32 %v2409_v1, %v2409_v1  ;;  %v157_v4 = vmul.f32 %v2412_v34, %v2412_v34 }
  0xb3   :  { %v200_v6 = vsel %vm60_vm0, %v156_v3, 0.0  ;;  %v203_v42 = vsel %vm60_vm0, %v157_v4, 0.0 }
  0xb4   :  { %198 = vadd.xlane.f32.xlu1 %v197_v63  ;;  %201 = vadd.xlane.f32.xlu0 %v200_v6 }
  0xb8   :  { %204 = vadd.xlane.f32.xlu1 %v203_v42 }
  0xf7   :  { %v1731_v43 = vpop.f32.mrb[0].mxu0 }
  0xf8   :  { %v1732_v7 = vpop.f32.mrb[1].mxu0 }
  0xf9   :  { %v2422_v11 = vadd.f32 %v1732_v7, %v1731_v43  ;;  %v1734_v13 = vpop.f32.mrb[2].mxu0 }
  0xfa   :  { %v1735_v14 = vpop.f32.mrb[3].mxu0 }
  0xfb   :  { %v2424_v15 = vadd.f32 %v1735_v14, %v1734_v13 }
  0xff   :  { %v1737_v16 = vpop.f32.mrb[4].mxu0 }
 0x100   :  { %v1738_v17 = vpop.f32.mrb[5].mxu0 }
 0x101   :  { %v2426_v18 = vadd.f32 %v1738_v17, %v1737_v16  ;;  %v1740_v8 = vpop.f32.mrb[6].mxu0 }
 0x102   :  { %v1741_v21 = vpop.f32.mrb[7].mxu0 }
 0x103   :  { %v2428_v23 = vadd.f32 %v1741_v21, %v1740_v8 }
 0x107   :  { %v1743_v24 = vpop.f32.mrb[8].mxu0 }
 0x108   :  { %v1744_v26 = vpop.f32.mrb[9].mxu0 }
 0x109   :  { %v2430_v27 = vadd.f32 %v1744_v26, %v1743_v24  ;;  %v1746_v29 = vpop.f32.mrb[10].mxu0 }
 0x10a   :  { %v1747_v30 = vpop.f32.mrb[11].mxu0 }
 0x10b   :  { %v2432_v10 = vadd.f32 %v1747_v30, %v1746_v29 }
 0x10f   :  { %v1749_v33 = vpop.f32.mrb[12].mxu0 }
 0x110   :  { %v1750_v35 = vpop.f32.mrb[13].mxu0 }
 0x111   :  { %v2434_v36 = vadd.f32 %v1750_v35, %v1749_v33  ;;  %v1752_v37 = vpop.f32.mrb[14].mxu0  ;;  %v2453_v35 = vld [vmem:[%s3287_s4] ss:$0 sm:$0xff] }
 0x112   :  { %v1753_v38 = vpop.f32.mrb[15].mxu0 }
 0x113   :  { %v2436_v39 = vadd.f32 %v1753_v38, %v1752_v37 }
 0x117   :  { %v1755_v40 = vpop.f32.mrb[16].mxu0 }
 0x118   :  { %v1756_v19 = vpop.f32.mrb[17].mxu0 }
 0x119   :  { %v2438_v44 = vadd.f32 %v1756_v19, %v1755_v40  ;;  %v1758_v45 = vpop.f32.mrb[18].mxu0 }
 0x11a   :  { %v1759_v46 = vpop.f32.mrb[19].mxu0 }
 0x11b   :  { %v2440_v47 = vadd.f32 %v1759_v46, %v1758_v45  ;;  %v2458_v45 = vld [vmem:[%s3288_s2] ss:$0 sm:$0xff] }
 0x11f   :  { %v1761_v48 = vpop.f32.mrb[20].mxu0 }
 0x120   :  { %v1762_v50 = vpop.f32.mrb[21].mxu0 }
 0x121   :  { %v2442_v54 = vadd.f32 %v1762_v50, %v1761_v48  ;;  %v1764_v55 = vpop.f32.mrb[22].mxu0 }
 0x122   :  { %v1765_v56 = vpop.f32.mrb[23].mxu0 }
 0x123   :  { %v2444_v58 = vadd.f32 %v1765_v56, %v1764_v55  ;;  %v2464_v55 = vld [vmem:[%s3289_s5] ss:$0 sm:$0xff] }
 0x125   :  { %v160_v49 = vpop.xlane.xlu0 %159 }
 0x126   :  { %v206_v25 = vmul.f32 0.015625, %v160_v49 }
 0x127   :  { %v1767_v4 = vpop.f32.mrb[24].mxu0 }
 0x128   :  { %v222_v57 = vadd.f32 1e-05, %v206_v25  ;;  %v1768_v13 = vpop.f32.mrb[25].mxu0 }
 0x129   :  { %v163_v59 = vpop.xlane.xlu1 %162  ;;  %v166_v0 = vpop.xlane.xlu0 %165  ;;  %v2446_v14 = vadd.f32 %v1768_v13, %v1767_v4 }
 0x12a   :  { %1876 = vrsqrt.f32 %v222_v57  ;;  %v207_v31 = vmul.f32 0.015625, %v163_v59  ;;  %v208_v62 = vmul.f32 0.015625, %v166_v0  ;;  %v1770_v16 = vpop.f32.mrb[26].mxu0 }
 0x12b   :  { %v1771_v21 = vpop.f32.mrb[27].mxu0 }
 0x12c   :  { %v223_v63 = vadd.f32 1e-05, %v207_v31  ;;  %v224_v3 = vadd.f32 1e-05, %v208_v62  ;;  %v2448_v29 = vadd.f32 %v1771_v21, %v1770_v16  ;;  %v532_v62 = vadd.f32 %v2422_v11, %v2458_v45 }
 0x12d   :  { %v169_v6 = vpop.xlane.xlu1 %168  ;;  %v172_v42 = vpop.xlane.xlu0 %171  ;;  %v540_v21 = vadd.f32 %v2426_v18, %v2458_v45 }
 0x12e   :  { %1878 = vrsqrt.f32 %v223_v63  ;;  %v209_v43 = vmul.f32 0.015625, %v169_v6  ;;  %v210_v7 = vmul.f32 0.015625, %v172_v42  ;;  %v535_v6 = vadd.f32 %v2424_v15, %v2458_v45 }
 0x12f   :  { %1880 = vrsqrt.f32 %v224_v3  ;;  %v1773_v19 = vpop.f32.mrb[28].mxu0 }
 0x130   :  { %v225_v17 = vadd.f32 1e-05, %v209_v43  ;;  %v226_v8 = vadd.f32 1e-05, %v210_v7  ;;  %v1774_v56 = vpop.f32.mrb[29].mxu0 }
 0x131   :  { %v175_v24 = vpop.xlane.xlu1 %174  ;;  %v178_v26 = vpop.xlane.xlu0 %177  ;;  %v2467_v59 = vadd.f32 %v1774_v56, %v1773_v19 }
 0x132   :  { %1882 = vrsqrt.f32 %v225_v17  ;;  %v211_v30 = vmul.f32 0.015625, %v175_v24  ;;  %v212_v33 = vmul.f32 0.015625, %v178_v26  ;;  %v1776_v0 = vpop.f32.mrb[30].mxu0 }
 0x133   :  { %1884 = vrsqrt.f32 %v226_v8  ;;  %v1777_v3 = vpop.f32.mrb[31].mxu0 }
 0x134   :  { %v1877_v37 = vpop.eup %1876  ;;  %v227_v38 = vadd.f32 1e-05, %v211_v30  ;;  %v228_v40 = vadd.f32 1e-05, %v212_v33  ;;  %v2475_v16 = vadd.f32 %v1777_v3, %v1776_v0  ;;  %v543_v30 = vadd.f32 %v2428_v23, %v2458_v45 }
 0x135   :  { %v181_v46 = vpop.xlane.xlu1 %180  ;;  %v184_v48 = vpop.xlane.xlu0 %183  ;;  %v254_v49 = vmul.f32 %v1877_v37, %v2327_v52  ;;  %v551_v0 = vadd.f32 %v2432_v10, %v2458_v45 }
 0x136   :  { %1886 = vrsqrt.f32 %v227_v38  ;;  %v213_v50 = vmul.f32 0.015625, %v181_v46  ;;  %v214_v25 = vmul.f32 0.015625, %v184_v48 }
 0x137   :  { %1888 = vrsqrt.f32 %v228_v40  ;;  %v276_v57 = vmul.f32 %v2453_v35, %v254_v49 }
 0x138   :  { %v1879_v31 = vpop.eup %1878  ;;  %v229_v52 = vadd.f32 1e-05, %v213_v50  ;;  %v230_v63 = vadd.f32 1e-05, %v214_v25 }
 0x139   :  { %v1881_v4 = vpop.eup %1880  ;;  %v187_v42 = vpop.xlane.xlu1 %186  ;;  %v298_v7 = vadd.f32 %v2464_v55, %v276_v57  ;;  %v255_v13 = vmul.f32 %v1879_v31, %v2337_v60 }
 0x13a   :  { %v190_v43 = vpop.xlane.xlu0 %189  ;;  %1890 = vrsqrt.f32 %v229_v52  ;;  %v215_v17 = vmul.f32 0.015625, %v187_v42  ;;  %v256_v11 = vmul.f32 %v1881_v4, %v2330_v53  ;;  %v548_v53 = vadd.f32 %v2430_v27, %v2458_v45 }
 0x13b   :  { %v216_v8 = vmul.f32 0.015625, %v190_v43  ;;  %1892 = vrsqrt.f32 %v230_v63  ;;  %v2480_v24 = vadd.f32 %v532_v62, %v298_v7  ;;  %v277_v15 = vmul.f32 %v2453_v35, %v255_v13 }
 0x13c   :  { %v1883_v26 = vpop.eup %1882  ;;  %v231_v60 = vadd.f32 1e-05, %v215_v17  ;;  %v278_v37 = vmul.f32 %v2453_v35, %v256_v11 }
 0x13d   :  { %v232_v33 = vadd.f32 1e-05, %v216_v8  ;;  %v1885_v38 = vpop.eup %1884  ;;  %v193_v40 = vpop.xlane.xlu1 %192  ;;  %v612_v18 = vsel %vm60_vm0, %v2480_v24, 0.0  ;;  %v299_v46 = vadd.f32 %v2464_v55, %v277_v15  ;;  %v257_v48 = vmul.f32 %v1883_v26, %v2340_v61 }
 0x13e   :  { %v196_v19 = vpop.xlane.xlu0 %195  ;;  %1894 = vrsqrt.f32 %v231_v60  ;;  %v217_v49 = vmul.f32 0.015625, %v193_v40  ;;  %613 = vadd.xlane.f32.xlu0 %v612_v18  ;;  %v300_v50 = vadd.f32 %v2464_v55, %v278_v37  ;;  %v258_v56 = vmul.f32 %v1885_v38, %v2349_v2 }
 0x13f   :  { %v218_v23 = vmul.f32 0.015625, %v196_v19  ;;  %1896 = vrsqrt.f32 %v232_v33  ;;  %v2493_v25 = vadd.f32 %v535_v6, %v299_v46  ;;  %v279_v27 = vmul.f32 %v2453_v35, %v257_v48 }
 0x140   :  { %v1887_v57 = vpop.eup %1886  ;;  %v233_v31 = vadd.f32 1e-05, %v217_v49  ;;  %v2499_v61 = vadd.f32 %v540_v21, %v300_v50  ;;  %v280_v42 = vmul.f32 %v2453_v35, %v258_v56  ;;  %v556_v21 = vadd.f32 %v2434_v36, %v2458_v45 }
 0x141   :  { %v234_v62 = vadd.f32 1e-05, %v218_v23  ;;  %v1889_v52 = vpop.eup %1888  ;;  %v199_v63 = vpop.xlane.xlu1 %198  ;;  %v615_v4 = vsel %vm60_vm0, %v2493_v25, 0.0  ;;  %v301_v6 = vadd.f32 %v2464_v55, %v279_v27  ;;  %v259_v2 = vmul.f32 %v1887_v57, %v2352_v5 }
 0x142   :  { %v202_v3 = vpop.xlane.xlu0 %201  ;;  %1898 = vrsqrt.f32 %v233_v31  ;;  %v219_v43 = vmul.f32 0.015625, %v199_v63  ;;  %616 = vadd.xlane.f32.xlu1 %v615_v4  ;;  %v618_v10 = vsel %vm60_vm0, %v2499_v61, 0.0  ;;  %v302_v17 = vadd.f32 %v2464_v55, %v280_v42 }
 0x143   :  { %v220_v7 = vmul.f32 0.015625, %v202_v3  ;;  %1900 = vrsqrt.f32 %v234_v62  ;;  %619 = vadd.xlane.f32.xlu0 %v618_v10  ;;  %v2508_v13 = vadd.f32 %v543_v30, %v301_v6  ;;  %v281_v8 = vmul.f32 %v2453_v35, %v259_v2 }
 0x144   :  { %v1891_v11 = vpop.eup %1890  ;;  %v235_v5 = vadd.f32 1e-05, %v219_v43  ;;  %v260_v26 = vmul.f32 %v1889_v52, %v2361_v20  ;;  %v2517_v38 = vadd.f32 %v548_v53, %v302_v17  ;;  %v559_v49 = vadd.f32 %v2436_v39, %v2458_v45 }
 0x145   :  { %v236_v15 = vadd.f32 1e-05, %v220_v7  ;;  %v1893_v60 = vpop.eup %1892  ;;  %v205_v33 = vpop.xlane.xlu1 %204  ;;  %v621_v37 = vsel %vm60_vm0, %v2508_v13, 0.0  ;;  %v303_v30 = vadd.f32 %v2464_v55, %v281_v8  ;;  %v261_v40 = vmul.f32 %v1891_v11, %v2364_v9 }
 0x146   :  { %1902 = vrsqrt.f32 %v235_v5  ;;  %v221_v19 = vmul.f32 0.015625, %v205_v33  ;;  %622 = vadd.xlane.f32.xlu1 %v621_v37  ;;  %v282_v36 = vmul.f32 %v2453_v35, %v260_v26  ;;  %v262_v18 = vmul.f32 %v1893_v60, %v2373_v32 }
 0x147   :  { %1904 = vrsqrt.f32 %v236_v15  ;;  %v624_v20 = vsel %vm60_vm0, %v2517_v38, 0.0  ;;  %v2525_v46 = vadd.f32 %v551_v0, %v303_v30  ;;  %v283_v53 = vmul.f32 %v2453_v35, %v261_v40 }
 0x148   :  { %v1895_v48 = vpop.eup %1894  ;;  %v237_v9 = vadd.f32 1e-05, %v221_v19  ;;  %625 = vadd.xlane.f32.xlu0 %v624_v20  ;;  %v304_v23 = vadd.f32 %v2464_v55, %v282_v36  ;;  %v284_v50 = vmul.f32 %v2453_v35, %v262_v18  ;;  %v564_v32 = vadd.f32 %v2438_v44, %v2458_v45 }
 0x149   :  { %v1897_v27 = vpop.eup %1896  ;;  %v627_v56 = vsel %vm60_vm0, %v2525_v46, 0.0  ;;  %v305_v57 = vadd.f32 %v2464_v55, %v283_v53  ;;  %v263_v0 = vmul.f32 %v1895_v48, %v2376_v12  ;;  %v567_v42 = vadd.f32 %v2440_v47, %v2458_v45 }
 0x14a   :  { %1906 = vrsqrt.f32 %v237_v9  ;;  %628 = vadd.xlane.f32.xlu1 %v627_v56  ;;  %v2538_v39 = vadd.f32 %v556_v21, %v304_v23  ;;  %v306_v31 = vadd.f32 %v2464_v55, %v284_v50  ;;  %v264_v62 = vmul.f32 %v1897_v27, %v2385_v41 }
 0x14b   :  { %v2542_v52 = vadd.f32 %v559_v49, %v305_v57  ;;  %v285_v63 = vmul.f32 %v2453_v35, %v263_v0  ;;  %v572_v7 = vadd.f32 %v2442_v54, %v2458_v45  ;;  %v575_v54 = vadd.f32 %v2444_v58, %v2458_v45 }
 0x14c   :  { %v1899_v44 = vpop.eup %1898  ;;  %v630_v3 = vsel %vm60_vm0, %v2538_v39, 0.0  ;;  %v2547_v4 = vadd.f32 %v564_v32, %v306_v31  ;;  %v286_v12 = vmul.f32 %v2453_v35, %v264_v62  ;;  %v580_v33 = vadd.f32 %v2446_v14, %v2458_v45 }
 0x14d   :  { %v1901_v6 = vpop.eup %1900  ;;  %631 = vadd.xlane.f32.xlu0 %v630_v3  ;;  %v633_v41 = vsel %vm60_vm0, %v2542_v52, 0.0  ;;  %v307_v2 = vadd.f32 %v2464_v55, %v285_v63  ;;  %v265_v43 = vmul.f32 %v1899_v44, %v2388_v22  ;;  %v588_v18 = vadd.f32 %v2467_v59, %v2458_v45 }
 0x14e   :  { %634 = vadd.xlane.f32.xlu1 %v633_v41  ;;  %v636_v10 = vsel %vm60_vm0, %v2547_v4, 0.0  ;;  %v308_v17 = vadd.f32 %v2464_v55, %v286_v12  ;;  %v266_v8 = vmul.f32 %v1901_v6, %v2397_v51  ;;  %v583_v20 = vadd.f32 %v2448_v29, %v2458_v45 }
 0x14f   :  { %v2562_v47 = vadd.f32 %v567_v42, %v307_v2  ;;  %v287_v11 = vmul.f32 %v2453_v35, %v265_v43  ;;  %v591_v29 = vadd.f32 %v2475_v16, %v2458_v45 }
 0x150   :  { %v1903_v21 = vpop.eup %1902  ;;  %v2565_v5 = vadd.f32 %v572_v7, %v308_v17  ;;  %v288_v22 = vmul.f32 %v2453_v35, %v266_v8 }
 0x151   :  { %v1905_v15 = vpop.eup %1904  ;;  %637 = vadd.xlane.f32.xlu0 %v636_v10  ;;  %v639_v26 = vsel %vm60_vm0, %v2562_v47, 0.0  ;;  %v309_v60 = vadd.f32 %v2464_v55, %v287_v11  ;;  %v267_v51 = vmul.f32 %v1903_v21, %v2400_v28 }
 0x152   :  { %640 = vadd.xlane.f32.xlu1 %v639_v26  ;;  %v642_v37 = vsel %vm60_vm0, %v2565_v5, 0.0  ;;  %v310_v30 = vadd.f32 %v2464_v55, %v288_v22  ;;  %v268_v40 = vmul.f32 %v1905_v15, %v2409_v1 }
 0x153   :  { %v2580_v58 = vadd.f32 %v575_v54, %v309_v60  ;;  %v289_v19 = vmul.f32 %v2453_v35, %v267_v51 }
 0x154   :  { %v1907_v36 = vpop.eup %1906  ;;  %v2585_v28 = vadd.f32 %v580_v33, %v310_v30  ;;  %v290_v14 = vmul.f32 %v2453_v35, %v268_v40 }
 0x155   :  { %643 = vadd.xlane.f32.xlu0 %v642_v37  ;;  %v645_v53 = vsel %vm60_vm0, %v2580_v58, 0.0  ;;  %v311_v1 = vadd.f32 %v2464_v55, %v289_v19  ;;  %v269_v48 = vmul.f32 %v1907_v36, %v2412_v34 }
 0x156   :  { %646 = vadd.xlane.f32.xlu1 %v645_v53  ;;  %v648_v49 = vsel %vm60_vm0, %v2585_v28, 0.0  ;;  %v312_v59 = vadd.f32 %v2464_v55, %v290_v14 }
 0x157   :  { %v2597_v9 = vadd.f32 %v583_v20, %v311_v1  ;;  %v291_v23 = vmul.f32 %v2453_v35, %v269_v48 }
 0x158   :  { %v2600_v50 = vadd.f32 %v588_v18, %v312_v59 }
 0x159   :  { %649 = vadd.xlane.f32.xlu0 %v648_v49  ;;  %v651_v27 = vsel %vm60_vm0, %v2597_v9, 0.0  ;;  %v313_v34 = vadd.f32 %v2464_v55, %v291_v23 }
 0x15a   :  { %652 = vadd.xlane.f32.xlu1 %v651_v27  ;;  %v654_v32 = vsel %vm60_vm0, %v2600_v50, 0.0 }
 0x15b   :  { %v2609_v56 = vadd.f32 %v591_v29, %v313_v34 }
 0x15d   :  { %655 = vadd.xlane.f32.xlu0 %v654_v32  ;;  %v657_v35 = vsel %vm60_vm0, %v2609_v56, 0.0 }
 0x15e   :  { %658 = vadd.xlane.f32.xlu1 %v657_v35 }
 0x1cb   :  { %v614_v57 = vpop.xlane.xlu0 %613 }
 0x1cc   :  { %v660_v0 = vmul.f32 0.015625, %v614_v57 }
 0x1ce   :  { %v2614_v45 = vsub.f32 %v2480_v24, %v660_v0 }
 0x1cf   :  { %v617_v16 = vpop.xlane.xlu1 %616 }
 0x1d0   :  { %v661_v31 = vmul.f32 0.015625, %v617_v16  ;;  %v620_v62 = vpop.xlane.xlu0 %619  ;;  %v692_v55 = vmul.f32 %v2614_v45, %v2614_v45 }
 0x1d1   :  { %v662_v63 = vmul.f32 0.015625, %v620_v62 }
 0x1d2   :  { %v2619_v44 = vsub.f32 %v2493_v25, %v661_v31  ;;  %v708_v3 = vsel %vm60_vm0, %v692_v55, 0.0 }
 0x1d3   :  { %v2623_v12 = vsub.f32 %v2499_v61, %v662_v63  ;;  %v623_v6 = vpop.xlane.xlu1 %622  ;;  %709 = vadd.xlane.f32.xlu0 %v708_v3 }
 0x1d4   :  { %v663_v42 = vmul.f32 0.015625, %v623_v6  ;;  %v693_v24 = vmul.f32 %v2619_v44, %v2619_v44 }
 0x1d5   :  { %v626_v41 = vpop.xlane.xlu0 %625  ;;  %v694_v2 = vmul.f32 %v2623_v12, %v2623_v12 }
 0x1d6   :  { %v2630_v43 = vsub.f32 %v2508_v13, %v663_v42  ;;  %v664_v25 = vmul.f32 0.015625, %v626_v41  ;;  %v711_v7 = vsel %vm60_vm0, %v693_v24, 0.0 }
 0x1d7   :  { %712 = vadd.xlane.f32.xlu1 %v711_v7  ;;  %v629_v10 = vpop.xlane.xlu1 %628  ;;  %v714_v61 = vsel %vm60_vm0, %v694_v2, 0.0 }
 0x1d8   :  { %v2635_v17 = vsub.f32 %v2517_v38, %v664_v25  ;;  %v665_v8 = vmul.f32 0.015625, %v629_v10  ;;  %715 = vadd.xlane.f32.xlu0 %v714_v61  ;;  %v695_v11 = vmul.f32 %v2630_v43, %v2630_v43 }
 0x1da   :  { %v2640_v21 = vsub.f32 %v2525_v46, %v665_v8  ;;  %v632_v13 = vpop.xlane.xlu0 %631  ;;  %v717_v22 = vsel %vm60_vm0, %v695_v11, 0.0  ;;  %v696_v15 = vmul.f32 %v2635_v17, %v2635_v17  ;;  %v1869_v8 = vld [vmem:[%s3290_s8 + $0x8] sm:$0xff]   ;;  %v1870_v11 = vld [vmem:[%s3290_s8 + $0x10] sm:$0xff]  }
 0x1db   :  { %v666_v54 = vmul.f32 0.015625, %v632_v13  ;;  %718 = vadd.xlane.f32.xlu1 %v717_v22  ;;  %v635_v26 = vpop.xlane.xlu1 %634  ;;  %v1871_v13 = vld [vmem:[%s3290_s8 + $0x18] sm:$0xff]  }
 0x1dc   :  { %v667_v60 = vmul.f32 0.015625, %v635_v26  ;;  %v720_v38 = vsel %vm60_vm0, %v696_v15, 0.0  ;;  %v697_v51 = vmul.f32 %v2640_v21, %v2640_v21 }
 0x1dd   :  { %v2649_v33 = vsub.f32 %v2538_v39, %v666_v54  ;;  %721 = vadd.xlane.f32.xlu0 %v720_v38 }
 0x1de   :  { %v2652_v46 = vsub.f32 %v2542_v52, %v667_v60  ;;  %v638_v37 = vpop.xlane.xlu0 %637  ;;  %v723_v30 = vsel %vm60_vm0, %v697_v51, 0.0 }
 0x1df   :  { %v668_v40 = vmul.f32 0.015625, %v638_v37  ;;  %724 = vadd.xlane.f32.xlu1 %v723_v30  ;;  %v641_v19 = vpop.xlane.xlu1 %640  ;;  %v698_v36 = vmul.f32 %v2649_v33, %v2649_v33 }
 0x1e0   :  { %v669_v18 = vmul.f32 0.015625, %v641_v19  ;;  %v699_v14 = vmul.f32 %v2652_v46, %v2652_v46 }
 0x1e1   :  { %v2660_v39 = vsub.f32 %v2547_v4, %v668_v40  ;;  %v726_v20 = vsel %vm60_vm0, %v698_v36, 0.0 }
 0x1e2   :  { %v2664_v52 = vsub.f32 %v2562_v47, %v669_v18  ;;  %727 = vadd.xlane.f32.xlu0 %v726_v20  ;;  %v644_v53 = vpop.xlane.xlu0 %643  ;;  %v729_v1 = vsel %vm60_vm0, %v699_v14, 0.0 }
 0x1e3   :  { %v670_v48 = vmul.f32 0.015625, %v644_v53  ;;  %730 = vadd.xlane.f32.xlu1 %v729_v1  ;;  %v647_v49 = vpop.xlane.xlu1 %646  ;;  %v700_v59 = vmul.f32 %v2660_v39, %v2660_v39 }
 0x1e4   :  { %v671_v23 = vmul.f32 0.015625, %v647_v49  ;;  %v701_v4 = vmul.f32 %v2664_v52, %v2664_v52 }
 0x1e5   :  { %v2672_v29 = vsub.f32 %v2565_v5, %v670_v48  ;;  %v732_v47 = vsel %vm60_vm0, %v700_v59, 0.0 }
 0x1e6   :  { %v2676_v27 = vsub.f32 %v2580_v58, %v671_v23  ;;  %733 = vadd.xlane.f32.xlu0 %v732_v47  ;;  %v650_v34 = vpop.xlane.xlu0 %649  ;;  %v735_v32 = vsel %vm60_vm0, %v701_v4, 0.0  ;;  %v2724_v47 = vld [vmem:[%s3291_s6] ss:$0 sm:$0xff] }
 0x1e7   :  { %v672_v35 = vmul.f32 0.015625, %v650_v34  ;;  %736 = vadd.xlane.f32.xlu1 %v735_v32  ;;  %v653_v57 = vpop.xlane.xlu1 %652  ;;  %v702_v0 = vmul.f32 %v2672_v29, %v2672_v29 }
 0x1e8   :  { %v673_v16 = vmul.f32 0.015625, %v653_v57  ;;  %v703_v5 = vmul.f32 %v2676_v27, %v2676_v27 }
 0x1e9   :  { %v2684_v31 = vsub.f32 %v2585_v28, %v672_v35  ;;  %v738_v58 = vsel %vm60_vm0, %v702_v0, 0.0 }
 0x1ea   :  { %v2688_v62 = vsub.f32 %v2597_v9, %v673_v16  ;;  %739 = vadd.xlane.f32.xlu0 %v738_v58  ;;  %v656_v55 = vpop.xlane.xlu0 %655  ;;  %v741_v63 = vsel %vm60_vm0, %v703_v5, 0.0 }
 0x1eb   :  { %v674_v3 = vmul.f32 0.015625, %v656_v55  ;;  %742 = vadd.xlane.f32.xlu1 %v741_v63  ;;  %v659_v6 = vpop.xlane.xlu1 %658  ;;  %v704_v42 = vmul.f32 %v2684_v31, %v2684_v31 }
 0x1ec   :  { %v675_v24 = vmul.f32 0.015625, %v659_v6  ;;  %v705_v28 = vmul.f32 %v2688_v62, %v2688_v62 }
 0x1ed   :  { %v2696_v41 = vsub.f32 %v2600_v50, %v674_v3  ;;  %v744_v9 = vsel %vm60_vm0, %v704_v42, 0.0  ;;  %v1868_v50 = vld [vmem:[%s3290_s8] sm:$0xff]  }
 0x1ee   :  { %v2700_v2 = vsub.f32 %v2609_v56, %v675_v24  ;;  %745 = vadd.xlane.f32.xlu0 %v744_v9  ;;  %v747_v25 = vsel %vm60_vm0, %v705_v28, 0.0  ;;  %1803 = vmatprep.subr.bf16.mxu1 %v1868_v50  ;;  %v2731_v3 = vld [vmem:[%s3292_s7] ss:$0 sm:$0xff] }
 0x1ef   :  { %748 = vadd.xlane.f32.xlu1 %v747_v25  ;;  %v706_v7 = vmul.f32 %v2696_v41, %v2696_v41  ;;  %1804 = vmatpush3.bf16.msra.mxu1 %v1868_v50 }
 0x1f0   :  { %v707_v10 = vmul.f32 %v2700_v2, %v2700_v2  ;;  %1805 = vmatprep.subr.bf16.mxu1 %v1869_v8 }
 0x1f1   :  { %v750_v61 = vsel %vm60_vm0, %v706_v7, 0.0 }
 0x1f2   :  { %751 = vadd.xlane.f32.xlu0 %v750_v61  ;;  %v753_v56 = vsel %vm60_vm0, %v707_v10, 0.0 }
 0x1f3   :  { %754 = vadd.xlane.f32.xlu1 %v753_v56  ;;  %1806 = vmatpush3.bf16.msra.mxu1 %v1869_v8 }
 0x1f4   :  { %1807 = vmatprep.subr.bf16.mxu1 %v1870_v11 }
 0x1f7   :  { %1808 = vmatpush3.bf16.msra.mxu1 %v1870_v11 }
 0x1f8   :  { %1809 = vmatprep.subr.bf16.mxu1 %v1871_v13 }
 0x1fb   :  { %1810 = vmatpush3.bf16.msra.mxu1 %v1871_v13 }
 0x260   :  { %v710_v22 = vpop.xlane.xlu0 %709 }
 0x261   :  { %v756_v15 = vmul.f32 0.015625, %v710_v22 }
 0x263   :  { %v772_v54 = vadd.f32 1e-05, %v756_v15 }
 0x264   :  { %v713_v26 = vpop.xlane.xlu1 %712 }
 0x265   :  { %1908 = vrsqrt.f32 %v772_v54  ;;  %v757_v60 = vmul.f32 0.015625, %v713_v26  ;;  %v716_v38 = vpop.xlane.xlu0 %715 }
 0x266   :  { %v758_v51 = vmul.f32 0.015625, %v716_v38 }
 0x267   :  { %v773_v37 = vadd.f32 1e-05, %v757_v60 }
 0x268   :  { %v774_v30 = vadd.f32 1e-05, %v758_v51  ;;  %v719_v40 = vpop.xlane.xlu1 %718 }
 0x269   :  { %1910 = vrsqrt.f32 %v773_v37  ;;  %v759_v19 = vmul.f32 0.015625, %v719_v40 }
 0x26a   :  { %1912 = vrsqrt.f32 %v774_v30  ;;  %v722_v36 = vpop.xlane.xlu0 %721 }
 0x26b   :  { %v775_v18 = vadd.f32 1e-05, %v759_v19  ;;  %v760_v14 = vmul.f32 0.015625, %v722_v36 }
 0x26c   :  { %v725_v20 = vpop.xlane.xlu1 %724 }
 0x26d   :  { %1914 = vrsqrt.f32 %v775_v18  ;;  %v776_v53 = vadd.f32 1e-05, %v760_v14  ;;  %v761_v1 = vmul.f32 0.015625, %v725_v20 }
 0x26f   :  { %v1909_v48 = vpop.eup %1908  ;;  %1916 = vrsqrt.f32 %v776_v53  ;;  %v777_v49 = vadd.f32 1e-05, %v761_v1  ;;  %v728_v59 = vpop.xlane.xlu0 %727 }
 0x270   :  { %v762_v23 = vmul.f32 0.015625, %v728_v59  ;;  %v731_v4 = vpop.xlane.xlu1 %730  ;;  %v804_v34 = vmul.f32 %v1909_v48, %v2614_v45 }
 0x271   :  { %1918 = vrsqrt.f32 %v777_v49  ;;  %v763_v32 = vmul.f32 0.015625, %v731_v4 }
 0x272   :  { %v778_v35 = vadd.f32 1e-05, %v762_v23  ;;  %v826_v5 = vmul.f32 %v2724_v47, %v804_v34 }
 0x273   :  { %v1911_v57 = vpop.eup %1910  ;;  %v779_v0 = vadd.f32 1e-05, %v763_v32  ;;  %v734_v16 = vpop.xlane.xlu0 %733 }
 0x274   :  { %v1913_v58 = vpop.eup %1912  ;;  %1920 = vrsqrt.f32 %v778_v35  ;;  %v764_v55 = vmul.f32 0.015625, %v734_v16  ;;  %v737_v63 = vpop.xlane.xlu1 %736  ;;  %v805_v6 = vmul.f32 %v1911_v57, %v2619_v44  ;;  %v2737_v10 = vadd.f32 %v2731_v3, %v826_v5 }
 0x275   :  { %v806_v45 = vmul.f32 %v1913_v58, %v2623_v12  ;;  %1922 = vrsqrt.f32 %v779_v0  ;;  %v765_v42 = vmul.f32 0.015625, %v737_v63 }
 0x276   :  { %v780_v24 = vadd.f32 1e-05, %v764_v55  ;;  %v827_v28 = vmul.f32 %v2724_v47, %v805_v6 }
 0x277   :  { %v1915_v9 = vpop.eup %1914  ;;  %v781_v25 = vadd.f32 1e-05, %v765_v42  ;;  %v740_v7 = vpop.xlane.xlu0 %739  ;;  %v828_v61 = vmul.f32 %v2724_v47, %v806_v45 }
 0x278   :  { %v807_v50 = vmul.f32 %v1915_v9, %v2630_v43  ;;  %1924 = vrsqrt.f32 %v780_v24  ;;  %v766_v56 = vmul.f32 0.015625, %v740_v7  ;;  %v743_v44 = vpop.xlane.xlu1 %742  ;;  %v2742_v12 = vadd.f32 %v2731_v3, %v827_v28 }
 0x279   :  { %v1917_v8 = vpop.eup %1916  ;;  %1926 = vrsqrt.f32 %v781_v25  ;;  %v767_v11 = vmul.f32 0.015625, %v743_v44  ;;  %v2749_v38 = vadd.f32 %v2731_v3, %v828_v61 }
 0x27a   :  { %v808_v13 = vmul.f32 %v1917_v8, %v2635_v17  ;;  %v782_v22 = vadd.f32 1e-05, %v766_v56  ;;  %v864_v15 = vpack.c.bf16 %v2742_v12, %v2737_v10  ;;  %v829_v54 = vmul.f32 %v2724_v47, %v807_v50 }
 0x27b   :  { %v1919_v26 = vpop.eup %1918  ;;  %v783_v60 = vadd.f32 1e-05, %v767_v11  ;;  %v746_v43 = vpop.xlane.xlu0 %745 }
 0x27c   :  { %v809_v51 = vmul.f32 %v1919_v26, %v2640_v21  ;;  %1928 = vrsqrt.f32 %v782_v22  ;;  %v768_v37 = vmul.f32 0.015625, %v746_v43  ;;  %v749_v30 = vpop.xlane.xlu1 %748  ;;  %1811 = vmatprep.mubr.msk.bf16.mxu1 %vm60_vm0, %v864_v15  ;;  %v2754_v17 = vadd.f32 %v2731_v3, %v829_v54 }
 0x27d   :  { %1930 = vrsqrt.f32 %v783_v60  ;;  %v769_v40 = vmul.f32 0.015625, %v749_v30  ;;  %v830_v19 = vmul.f32 %v2724_v47, %v808_v13 }
 0x27e   :  { %v1921_v36 = vpop.eup %1920  ;;  %v784_v18 = vadd.f32 1e-05, %v768_v37  ;;  %v865_v14 = vpack.c.bf16 %v2754_v17, %v2749_v38  ;;  %v831_v20 = vmul.f32 %v2724_v47, %v809_v51 }
 0x27f   :  { %v1923_v21 = vpop.eup %1922  ;;  %v810_v53 = vmul.f32 %v1921_v36, %v2649_v33  ;;  %v785_v1 = vadd.f32 1e-05, %v769_v40  ;;  %v752_v48 = vpop.xlane.xlu0 %751  ;;  %v2762_v49 = vadd.f32 %v2731_v3, %v830_v19  ;;  %v1872_v36 = vld [vmem:[%s3293_s10] sm:$0xff]  }
 0x280   :  { %v811_v59 = vmul.f32 %v1923_v21, %v2652_v46  ;;  %1932 = vrsqrt.f32 %v784_v18  ;;  %v770_v23 = vmul.f32 0.015625, %v752_v48  ;;  %v755_v4 = vpop.xlane.xlu1 %754  ;;  %1812 = vmatmul.mubr.msk.bf16.vlgmr.msra.gmra.mrb[0].mxu1 %vm60_vm0, %v865_v14  ;;  %v2767_v34 = vadd.f32 %v2731_v3, %v831_v20  ;;  %1827 = vmatprep.subr.bf16.mxu1 %v1872_v36  ;;  %v1875_v18 = vld [vmem:[%s3293_s10 + $0x18] sm:$0xff]   ;;  %v2850_v14 = vld [vmem:[%s3294_s9] ss:$0 sm:$0xff] }
 0x281   :  { %3311 = vst [vmem:[#allocation2_spill] sm:$0xff] %v2762_v49  ;;  %1934 = vrsqrt.f32 %v785_v1  ;;  %v771_v32 = vmul.f32 0.015625, %v755_v4  ;;  %v832_v35 = vmul.f32 %v2724_v47, %v810_v53  ;;  %1828 = vmatpush3.bf16.msra.mxu1 %v1872_v36 }
 0x282   :  { %3312 = vst [vmem:[#allocation3_spill] sm:$0xff] %v2767_v34  ;;  %v1925_v33 = vpop.eup %1924  ;;  %v786_v57 = vadd.f32 1e-05, %v770_v23  ;;  %v866_v0 = vpack.c.bf16 %v2767_v34, %v2762_v49  ;;  %v833_v16 = vmul.f32 %v2724_v47, %v811_v59 }
 0x283   :  { %v1927_v46 = vpop.eup %1926  ;;  %v812_v5 = vmul.f32 %v1925_v33, %v2660_v39  ;;  %v787_v58 = vadd.f32 1e-05, %v771_v32  ;;  %v2777_v63 = vadd.f32 %v2731_v3, %v832_v35 }
 0x284   :  { %v813_v55 = vmul.f32 %v1927_v46, %v2664_v52  ;;  %1936 = vrsqrt.f32 %v786_v57  ;;  %1815 = vmatprep.mubr.msk.bf16.mxu1 %vm60_vm0, %v866_v0  ;;  %v2780_v6 = vadd.f32 %v2731_v3, %v833_v16 }
 0x285   :  { %3313 = vst [vmem:[#allocation4_spill] sm:$0xff] %v2777_v63  ;;  %1938 = vrsqrt.f32 %v787_v58  ;;  %v834_v45 = vmul.f32 %v2724_v47, %v812_v5 }
 0x286   :  { %3314 = vst [vmem:[#allocation5_spill] sm:$0xff] %v2780_v6  ;;  %v1929_v42 = vpop.eup %1928  ;;  %v867_v24 = vpack.c.bf16 %v2780_v6, %v2777_v63  ;;  %v835_v39 = vmul.f32 %v2724_v47, %v813_v55 }
 0x287   :  { %v1931_v28 = vpop.eup %1930  ;;  %v814_v52 = vmul.f32 %v1929_v42, %v2672_v29  ;;  %v2790_v25 = vadd.f32 %v2731_v3, %v834_v45 }
 0x288   :  { %v815_v9 = vmul.f32 %v1931_v28, %v2676_v27  ;;  %1816 = vmatmul.mubr.msk.bf16.gmra.mrb[4].mxu1 %vm60_vm0, %v867_v24  ;;  %v2793_v7 = vadd.f32 %v2731_v3, %v835_v39 }
 0x289   :  { %3315 = vst [vmem:[#allocation6_spill] sm:$0xff] %v2790_v25  ;;  %v836_v61 = vmul.f32 %v2724_v47, %v814_v52 }
 0x28a   :  { %3316 = vst [vmem:[#allocation7_spill] sm:$0xff] %v2793_v7  ;;  %v1933_v50 = vpop.eup %1932  ;;  %v868_v56 = vpack.c.bf16 %v2793_v7, %v2790_v25  ;;  %v837_v44 = vmul.f32 %v2724_v47, %v815_v9 }
 0x28b   :  { %v1935_v8 = vpop.eup %1934  ;;  %v816_v29 = vmul.f32 %v1933_v50, %v2684_v31  ;;  %v2803_v11 = vadd.f32 %v2731_v3, %v836_v61 }
 0x28c   :  { %v817_v27 = vmul.f32 %v1935_v8, %v2688_v62  ;;  %1819 = vmatprep.mubr.msk.bf16.mxu1 %vm60_vm0, %v868_v56  ;;  %v2806_v13 = vadd.f32 %v2731_v3, %v837_v44 }
 0x28d   :  { %3317 = vst [vmem:[#allocation8_spill] sm:$0xff] %v2803_v11  ;;  %v838_v22 = vmul.f32 %v2724_v47, %v816_v29 }
 0x28e   :  { %3318 = vst [vmem:[#allocation9_spill] sm:$0xff] %v2806_v13  ;;  %v1937_v15 = vpop.eup %1936  ;;  %v869_v54 = vpack.c.bf16 %v2806_v13, %v2803_v11  ;;  %v839_v26 = vmul.f32 %v2724_v47, %v817_v27 }
 0x28f   :  { %v1939_v60 = vpop.eup %1938  ;;  %v818_v31 = vmul.f32 %v1937_v15, %v2696_v41  ;;  %v2816_v43 = vadd.f32 %v2731_v3, %v838_v22 }
 0x290   :  { %v819_v62 = vmul.f32 %v1939_v60, %v2700_v2  ;;  %1820 = vmatmul.mubr.msk.bf16.gmra.mrb[8].mxu1 %vm60_vm0, %v869_v54  ;;  %v2819_v51 = vadd.f32 %v2731_v3, %v839_v26 }
 0x291   :  { %3319 = vst [vmem:[#allocation10_spill] sm:$0xff] %v2816_v43  ;;  %v840_v37 = vmul.f32 %v2724_v47, %v818_v31 }
 0x292   :  { %3320 = vst [vmem:[#allocation11_spill] sm:$0xff] %v2819_v51  ;;  %v870_v30 = vpack.c.bf16 %v2819_v51, %v2816_v43  ;;  %v841_v40 = vmul.f32 %v2724_v47, %v819_v62  ;;  %v1873_v47 = vld [vmem:[%s3293_s10 + $0x8] sm:$0xff]  }
 0x293   :  { %v2827_v41 = vadd.f32 %v2731_v3, %v840_v37  ;;  %1829 = vmatprep.subr.bf16.mxu1 %v1873_v47 }
 0x294   :  { %1823 = vmatprep.mubr.msk.bf16.mxu1 %vm60_vm0, %v870_v30  ;;  %v2830_v2 = vadd.f32 %v2731_v3, %v841_v40  ;;  %1830 = vmatpush3.bf16.msra.mxu1 %v1873_v47  ;;  %v1874_v3 = vld [vmem:[%s3293_s10 + $0x10] sm:$0xff]  }
 0x295   :  { %3321 = vst [vmem:[#allocation12_spill] sm:$0xff] %v2827_v41  ;;  %1831 = vmatprep.subr.bf16.mxu1 %v1874_v3 }
 0x296   :  { %3322 = vst [vmem:[#allocation13_spill] sm:$0xff] %v2830_v2  ;;  %v871_v19 = vpack.c.bf16 %v2830_v2, %v2827_v41 }
 0x298   :  { %1824 = vmatmul.mubr.msk.bf16.gmra.mrb[12].mxu1 %vm60_vm0, %v871_v19 }
 0x299   :  { %1832 = vmatpush3.bf16.msra.mxu1 %v1874_v3 }
 0x29a   :  { %1833 = vmatprep.subr.bf16.mxu1 %v1875_v18 }
 0x29d   :  { %1834 = vmatpush3.bf16.msra.mxu1 %v1875_v18 }
 0x353   :  { %v1813_v20 = vpop.f32.mrb[0].mxu1 }
 0x354   :  { %v978_v21 = vadd.f32 %v1813_v20, %v2850_v14  ;;  %v969_v53 = vpop.f32.mrb[1].mxu1  ;;  %v3297_v20 = vmov -1.0  }
 0x355   :  { %v970_v1 = vadd.f32 %v2850_v14, %v969_v53  ;;  %v1814_v48 = vpop.f32.mrb[2].mxu1 }
 0x356   :  { %v1050_v59 = vmul.f32 0.70710677, %v978_v21  ;;  %v981_v23 = vadd.f32 %v1814_v48, %v2850_v14  ;;  %v972_v4 = vpop.f32.mrb[3].mxu1  ;;  %v2859_v56 = vmul.f32 0.5, %v978_v21 }
 0x357   :  { %v1048_v32 = vmul.f32 0.70710677, %v970_v1  ;;  %v973_v57 = vadd.f32 %v2850_v14, %v972_v4  ;;  %v2861_v29 = vmul.f32 0.5, %v970_v1 }
 0x358   :  { %v1098_v35 = vand.u32 2147483647, %v1050_v59  ;;  %v1051_v33 = vmul.f32 0.70710677, %v981_v23  ;;  %vm1066_vm1 = vcmp.ge.f32.partialorder %v1050_v59, 0.0  ;;  %v2869_v15 = vmul.f32 0.5, %v981_v23 }
 0x359   :  { %v1096_v0 = vand.u32 2147483647, %v1048_v32  ;;  %v2856_v45 = vmul.f32 0.70710677, %v973_v57  ;;  %vm1064_vm2 = vcmp.ge.f32.partialorder %v1048_v32, 0.0  ;;  %v2892_v21 = vsel %vm1066_vm1, 1.0, %v3297_v20 }
 0x35a   :  { %v1114_v16 = vmul.f32 0.3275911, %v1098_v35  ;;  %v1099_v5 = vand.u32 2147483647, %v1051_v33  ;;  %v1322_v55 = vsub.f32 0.0, %v1098_v35  ;;  %vm1067_vm3 = vcmp.ge.f32.partialorder %v1051_v33, 0.0 }
 0x35b   :  { %v1112_v46 = vmul.f32 0.3275911, %v1096_v0  ;;  %v1817_v42 = vpop.f32.mrb[4].mxu1  ;;  %v1097_v52 = vand.u32 2147483647, %v2856_v45  ;;  %v1320_v60 = vsub.f32 0.0, %v1096_v0 }
 0x35c   :  { %v1130_v58 = vadd.f32 1.0, %v1114_v16  ;;  %v1115_v39 = vmul.f32 0.3275911, %v1099_v5  ;;  %v985_v28 = vpop.f32.mrb[5].mxu1  ;;  %v1338_v44 = vmul.f32 %v1322_v55, %v1098_v35  ;;  %v2864_v27 = vadd.f32 %v1817_v42, %v2850_v14 }
 0x35d   :  { %v1128_v24 = vadd.f32 1.0, %v1112_v46  ;;  %v1818_v9 = vpop.f32.mrb[6].mxu1  ;;  %v1113_v8 = vmul.f32 0.3275911, %v1097_v52  ;;  %v2867_v22 = vadd.f32 %v2850_v14, %v985_v28  ;;  %v1323_v31 = vsub.f32 0.0, %v1099_v5 }
 0x35e   :  { %1940 = vrcp.f32 %v1130_v58  ;;  %v1131_v61 = vadd.f32 1.0, %v1115_v39  ;;  %v988_v50 = vpop.f32.mrb[7].mxu1  ;;  %v2872_v26 = vadd.f32 %v1818_v9, %v2850_v14  ;;  %v2875_v62 = vmul.f32 0.70710677, %v2864_v27 }
 0x35f   :  { %1942 = vrcp.f32 %v1128_v24  ;;  %v1129_v54 = vadd.f32 1.0, %v1113_v8  ;;  %v1356_v30 = vmul.f32 1.442695, %v1338_v44  ;;  %v2880_v40 = vmul.f32 0.70710677, %v2867_v22 }
 0x360   :  { %1944 = vrcp.f32 %v1131_v61  ;;  %v1321_v36 = vsub.f32 0.0, %v1097_v52  ;;  %v1102_v47 = vand.u32 2147483647, %v2875_v62  ;;  %v2886_v3 = vmul.f32 0.70710677, %v2872_v26 }
 0x361   :  { %1946 = vrcp.f32 %v1129_v54  ;;  %v2896_v53 = vsel %vm1064_vm2, 1.0, %v3297_v20  ;;  %v2898_v1 = vmul.f32 0.5, %v973_v57  ;;  %v1100_v48 = vand.u32 2147483647, %v2880_v40 }
 0x362   :  { %v1336_v4 = vmul.f32 %v1320_v60, %v1096_v0  ;;  %v2904_v35 = vsel %vm1067_vm3, 1.0, %v3297_v20  ;;  %v1339_v33 = vmul.f32 %v1323_v31, %v1099_v5  ;;  %v1118_v16 = vmul.f32 0.3275911, %v1102_v47 }
 0x363   :  { %v2877_v37 = vpop.f32.mrb[8].mxu1  ;;  %1948 = vpow2.f32 %v1356_v30  ;;  %v1326_v59 = vsub.f32 0.0, %v1102_v47  ;;  %v1116_v58 = vmul.f32 0.3275911, %v1100_v48  ;;  %v1103_v32 = vand.u32 2147483647, %v2886_v3 }
 0x364   :  { %v2882_v19 = vpop.f32.mrb[9].mxu1  ;;  %v1337_v42 = vmul.f32 %v1321_v36, %v1097_v52  ;;  %v1134_v24 = vadd.f32 1.0, %v1118_v16  ;;  %v1324_v39 = vsub.f32 0.0, %v1100_v48  ;;  %v2914_v5 = vadd.f32 %v2850_v14, %v988_v50 }
 0x365   :  { %v2888_v18 = vpop.f32.mrb[10].mxu1  ;;  %v1132_v28 = vadd.f32 1.0, %v1116_v58  ;;  %v1119_v9 = vmul.f32 0.3275911, %v1103_v32  ;;  %v1352_v44 = vmul.f32 1.442695, %v1336_v4  ;;  %v1342_v52 = vmul.f32 %v1326_v59, %v1102_v47 }
 0x366   :  { %v2901_v23 = vpop.f32.mrb[11].mxu1  ;;  %vm1065_vm4 = vcmp.ge.f32.partialorder %v2856_v45, 0.0  ;;  %1950 = vrcp.f32 %v1134_v24  ;;  %v1358_v16 = vmul.f32 1.442695, %v1339_v33  ;;  %v1340_v58 = vmul.f32 %v1324_v39, %v1100_v48 }
 0x367   :  { %1952 = vrcp.f32 %v1132_v28  ;;  %v1135_v31 = vadd.f32 1.0, %v1119_v9  ;;  %v1354_v20 = vmul.f32 1.442695, %v1337_v42  ;;  %v1327_v51 = vsub.f32 0.0, %v1103_v32 }
 0x368   :  { %v2906_v46 = vpop.eup %1940  ;;  %v2931_v47 = vmul.f32 0.70710677, %v2914_v5  ;;  %v3323_v48 = vmov -1.0   ;;  %v1360_v43 = vmul.f32 1.442695, %v1340_v58  ;;  %v2951_v58 = vadd.f32 %v2877_v37, %v2850_v14 }
 0x369   :  { %v2909_v55 = vpop.eup %1942  ;;  %v1178_v57 = vmul.f32 1.0614054, %v2906_v46  ;;  %1954 = vrcp.f32 %v1135_v31  ;;  %v2939_v39 = vsel %vm1065_vm4, 1.0, %v3323_v48  ;;  %vm1070_vm5 = vcmp.ge.f32.partialorder %v2875_v62, 0.0 }
 0x36a   :  { %v1176_v0 = vmul.f32 1.0614054, %v2909_v55  ;;  %v2919_v54 = vpop.eup %1944  ;;  %1956 = vpow2.f32 %v1352_v44  ;;  %v2945_v31 = vand.u32 2147483647, %v2931_v47  ;;  %vm1071_vm6 = vcmp.ge.f32.partialorder %v2886_v3, 0.0 }
 0x36b   :  { %v1194_v61 = vadd.f32 -1.4531521, %v1178_v57  ;;  %v2917_v8 = vpop.f32.mrb[12].mxu1  ;;  %v1179_v50 = vmul.f32 1.0614054, %v2919_v54  ;;  %v2927_v57 = vpop.eup %1946  ;;  %1958 = vpow2.f32 %v1358_v16  ;;  %vm1068_vm7 = vcmp.ge.f32.partialorder %v2880_v40, 0.0 }
 0x36c   :  { %v1192_v60 = vadd.f32 -1.4531521, %v1176_v0  ;;  %v2921_v30 = vpop.f32.mrb[13].mxu1  ;;  %v1177_v9 = vmul.f32 1.0614054, %v2927_v57  ;;  %1960 = vpow2.f32 %v1354_v20  ;;  %vm1069_vm8 = vcmp.ge.f32.partialorder %v2931_v47, 0.0 }
 0x36d   :  { %v1210_v36 = vmul.f32 %v2906_v46, %v1194_v61  ;;  %v2925_v4 = vpop.f32.mrb[14].mxu1  ;;  %v1195_v28 = vadd.f32 -1.4531521, %v1179_v50  ;;  %v1364_v61 = vmul.f32 1.442695, %v1342_v52  ;;  %v1949_v41 = vpop.eup %1948  ;;  %v1343_v50 = vmul.f32 %v1327_v51, %v1103_v32 }
 0x36e   :  { %v1208_v24 = vmul.f32 %v2909_v55, %v1192_v60  ;;  %v2933_v59 = vpop.f32.mrb[15].mxu1  ;;  %v1193_v2 = vadd.f32 -1.4531521, %v1177_v9 }
 0x36f   :  { %v1226_v0 = vadd.f32 1.4214138, %v1210_v36  ;;  %v1211_v60 = vmul.f32 %v2919_v54, %v1195_v28  ;;  %1962 = vpow2.f32 %v1364_v61 }
 0x370   :  { %v1224_v33 = vadd.f32 1.4214138, %v1208_v24  ;;  %v1209_v45 = vmul.f32 %v2927_v57, %v1193_v2  ;;  %v2953_v28 = vpop.eup %1950  ;;  %1964 = vpow2.f32 %v1360_v43 }
 0x371   :  { %v1242_v42 = vmul.f32 %v2906_v46, %v1226_v0  ;;  %v1227_v24 = vadd.f32 1.4214138, %v1211_v60  ;;  %v1117_v0 = vmul.f32 0.3275911, %v2945_v31  ;;  %v2957_v9 = vpop.eup %1952  ;;  %v1182_v20 = vmul.f32 1.0614054, %v2953_v28 }
 0x372   :  { %v1240_v36 = vmul.f32 %v2909_v55, %v1224_v33  ;;  %v1225_v16 = vadd.f32 1.4214138, %v1209_v45  ;;  %v1366_v33 = vmul.f32 1.442695, %v1343_v50 }
 0x373   :  { %v1258_v44 = vadd.f32 -0.28449672, %v1242_v42  ;;  %v1243_v32 = vmul.f32 %v2919_v54, %v1227_v24  ;;  %v1133_v61 = vadd.f32 1.0, %v1117_v0  ;;  %v2964_v24 = vmul.f32 0.70710677, %v2951_v58  ;;  %v2966_v43 = vpop.eup %1954 }
 0x374   :  { %v1256_v52 = vadd.f32 -0.28449672, %v1240_v36  ;;  %v1241_v37 = vmul.f32 %v2927_v57, %v1225_v16  ;;  %v1180_v36 = vmul.f32 1.0614054, %v2957_v9 }
 0x375   :  { %v1274_v51 = vmul.f32 %v2906_v46, %v1258_v44  ;;  %v1259_v60 = vadd.f32 -0.28449672, %v1243_v32  ;;  %v1198_v44 = vadd.f32 -1.4531521, %v1182_v20  ;;  %1966 = vrcp.f32 %v1133_v61 }
 0x376   :  { %v1272_v2 = vmul.f32 %v2909_v55, %v1256_v52  ;;  %v1257_v50 = vadd.f32 -0.28449672, %v1241_v37  ;;  %v1196_v0 = vadd.f32 -1.4531521, %v1180_v36  ;;  %v1325_v20 = vsub.f32 0.0, %v2945_v31 }
 0x377   :  { %v1290_v42 = vadd.f32 0.2548296, %v1274_v51  ;;  %v1275_v52 = vmul.f32 %v2919_v54, %v1259_v60  ;;  %v1957_v51 = vpop.eup %1956  ;;  %v1214_v16 = vmul.f32 %v2953_v28, %v1198_v44  ;;  %v2977_v36 = vand.u32 2147483647, %v2964_v24 }
 0x378   :  { %v1288_v7 = vadd.f32 0.2548296, %v1272_v2  ;;  %v1183_v2 = vmul.f32 1.0614054, %v2966_v43  ;;  %v1273_v25 = vmul.f32 %v2927_v57, %v1257_v50  ;;  %v1212_v11 = vmul.f32 %v2957_v9, %v1196_v0 }
 0x379   :  { %v1306_v45 = vmul.f32 %v2906_v46, %v1290_v42  ;;  %v1291_v13 = vadd.f32 0.2548296, %v1275_v52  ;;  %v1959_v46 = vpop.eup %1958  ;;  %v1230_v60 = vadd.f32 1.4214138, %v1214_v16  ;;  %v1122_v50 = vmul.f32 0.3275911, %v2977_v36 }
 0x37a   :  { %v1304_v32 = vmul.f32 %v2909_v55, %v1288_v7  ;;  %v1199_v37 = vadd.f32 -1.4531521, %v1183_v2  ;;  %v1961_v7 = vpop.eup %1960  ;;  %v1289_v34 = vadd.f32 0.2548296, %v1273_v25  ;;  %v1228_v6 = vadd.f32 1.4214138, %v1212_v11 }
 0x37b   :  { %v1386_v61 = vmul.f32 %v1949_v41, %v1306_v45  ;;  %v1307_v44 = vmul.f32 %v2919_v54, %v1291_v13  ;;  %v1963_v49 = vpop.eup %1962  ;;  %v1246_v45 = vmul.f32 %v2953_v28, %v1230_v60  ;;  %1968 = vpow2.f32 %v1366_v33 }
 0x37c   :  { %v1384_v42 = vmul.f32 %v1957_v51, %v1304_v32  ;;  %v1215_v52 = vmul.f32 %v2966_v43, %v1199_v37  ;;  %v1965_v0 = vpop.eup %1964  ;;  %v1305_v16 = vmul.f32 %v2927_v57, %v1289_v34  ;;  %v1244_v2 = vmul.f32 %v2957_v9, %v1228_v6 }
 0x37d   :  { %v1402_v55 = vsub.f32 1.0, %v1386_v61  ;;  %v1387_v32 = vmul.f32 %v1959_v46, %v1307_v44  ;;  %v1262_v61 = vadd.f32 -0.28449672, %v1246_v45  ;;  %v1138_v25 = vadd.f32 1.0, %v1122_v50 }
 0x37e   :  { %v1400_v41 = vsub.f32 1.0, %v1384_v42  ;;  %v1231_v13 = vadd.f32 1.4214138, %v1215_v52  ;;  %v1385_v42 = vmul.f32 %v1961_v7, %v1305_v16  ;;  %v1260_v60 = vadd.f32 -0.28449672, %v1244_v2 }
 0x37f   :  { %v1418_v51 = vmul.f32 %v1402_v55, %v2892_v21  ;;  %v1403_v54 = vsub.f32 1.0, %v1387_v32  ;;  %v2987_v37 = vpop.eup %1966  ;;  %v1278_v63 = vmul.f32 %v2953_v28, %v1262_v61  ;;  %v1341_v46 = vmul.f32 %v1325_v20, %v2945_v31 }
 0x380   :  { %v1416_v11 = vmul.f32 %v1400_v41, %v2896_v53  ;;  %v1247_v21 = vmul.f32 %v2966_v43, %v1231_v13  ;;  %1970 = vrcp.f32 %v1138_v25  ;;  %v1401_v57 = vsub.f32 1.0, %v1385_v42 }
 0x381   :  { %v1434_v34 = vadd.f32 1.0, %v1418_v51  ;;  %v1419_v6 = vmul.f32 %v1403_v54, %v2904_v35  ;;  %v1276_v33 = vmul.f32 %v2957_v9, %v1260_v60  ;;  %v1294_v55 = vadd.f32 0.2548296, %v1278_v63 }
 0x382   :  { %v1263_v53 = vadd.f32 -0.28449672, %v1247_v21  ;;  %v1181_v7 = vmul.f32 1.0614054, %v2987_v37  ;;  %v2997_v44 = vadd.f32 %v2850_v14, %v2882_v19  ;;  %v1432_v41 = vadd.f32 1.0, %v1416_v11 }
 0x383   :  { %v1435_v45 = vadd.f32 1.0, %v1419_v6  ;;  %v1417_v52 = vmul.f32 %v1401_v57, %v2939_v39  ;;  %v1292_v31 = vadd.f32 0.2548296, %v1276_v33  ;;  %v1310_v35 = vmul.f32 %v2953_v28, %v1294_v55 }
 0x384   :  { %v1279_v20 = vmul.f32 %v2966_v43, %v1263_v53  ;;  %v1197_v50 = vadd.f32 -1.4531521, %v1181_v7  ;;  %v1450_v63 = vmul.f32 %v1434_v34, %v2859_v56  ;;  %v1362_v16 = vmul.f32 1.442695, %v1341_v46 }
 0x385   :  { %v1451_v51 = vmul.f32 %v1435_v45, %v2869_v15  ;;  %v1433_v32 = vadd.f32 1.0, %v1417_v52  ;;  %v1390_v19 = vmul.f32 %v1963_v49, %v1310_v35  ;;  %v3007_v39 = vmul.f32 0.70710677, %v2997_v44  ;;  %v1969_v54 = vpop.eup %1968 }
 0x386   :  { %v1295_v2 = vadd.f32 0.2548296, %v1279_v20  ;;  %v1213_v61 = vmul.f32 %v2987_v37, %v1197_v50  ;;  %v1448_v13 = vmul.f32 %v1432_v41, %v2861_v29  ;;  %v1308_v11 = vmul.f32 %v2957_v9, %v1292_v31 }
 0x387   :  { %v1465_v25 = vpack.c.bf16 %v1451_v51, %v1450_v63  ;;  %v1449_v28 = vmul.f32 %v1433_v32, %v2898_v1  ;;  %v1406_v56 = vsub.f32 1.0, %v1390_v19  ;;  %v1086_v49 = vsel %vm1070_vm5, 1.0, %v3323_v48 }
 0x388   :  { %v1311_v15 = vmul.f32 %v2966_v43, %v1295_v2  ;;  %v1229_v42 = vadd.f32 1.4214138, %v1213_v61  ;;  %1972 = vpow2.f32 %v1362_v16  ;;  %v1104_v9 = vand.u32 2147483647, %v3007_v39 }
 0x389   :  { %v1464_v60 = vpack.c.bf16 %v1449_v28, %v1448_v13  ;;  %v1422_v29 = vmul.f32 %v1406_v56, %v1086_v49  ;;  %v1388_v34 = vmul.f32 %v1965_v0, %v1308_v11  ;;  %v3024_v6 = vadd.f32 %v2888_v18, %v2850_v14 }
 0x38a   :  { %v3017_v21 = vpop.eup %1970  ;;  %v1391_v46 = vmul.f32 %v1969_v54, %v1311_v15  ;;  %v1245_v1 = vmul.f32 %v2987_v37, %v1229_v42  ;;  %v1120_v33 = vmul.f32 0.3275911, %v1104_v9  ;;  %v1038_v55 = vmul.f32 0.5, %v2864_v27 }
 0x38b   :  { %v1186_v43 = vmul.f32 1.0614054, %v3017_v21  ;;  %1835 = vmatprep.mubr.msk.bf16.mxu1 %vm60_vm0, %v1464_v60  ;;  %v1087_v0 = vsel %vm1071_vm6, 1.0, %v3323_v48  ;;  %v1438_v7 = vadd.f32 1.0, %v1422_v29  ;;  %v1404_v52 = vsub.f32 1.0, %v1388_v34 }
 0x38c   :  { %v1407_v62 = vsub.f32 1.0, %v1391_v46  ;;  %v1261_v57 = vadd.f32 -0.28449672, %v1245_v1  ;;  %1836 = vmatmul.mubr.msk.bf16.vlgmr.msra.gmra.mrb[16].mxu1 %vm60_vm0, %v1465_v25  ;;  %v1136_v45 = vadd.f32 1.0, %v1120_v33  ;;  %v1039_v31 = vmul.f32 0.5, %v2872_v26 }
 0x38d   :  { %v1202_v53 = vadd.f32 -1.4531521, %v1186_v43  ;;  %v3036_v35 = vmul.f32 0.70710677, %v3024_v6  ;;  %v3040_v27 = vadd.f32 %v2850_v14, %v2901_v23  ;;  %v1084_v50 = vsel %vm1068_vm7, 1.0, %v3323_v48 }
 0x38e   :  { %v1423_v41 = vmul.f32 %v1407_v62, %v1087_v0  ;;  %v1277_v18 = vmul.f32 %v2987_v37, %v1261_v57  ;;  %1974 = vrcp.f32 %v1136_v45  ;;  %v1454_v63 = vmul.f32 %v1438_v7, %v1038_v55 }
 0x38f   :  { %v1218_v3 = vmul.f32 %v3017_v21, %v1202_v53  ;;  %v1107_v26 = vand.u32 2147483647, %v3036_v35  ;;  %v1420_v19 = vmul.f32 %v1404_v52, %v1084_v50  ;;  %v3048_v23 = vmul.f32 0.70710677, %v3040_v27 }
 0x390   :  { %v1439_v40 = vadd.f32 1.0, %v1423_v41  ;;  %v1293_v20 = vadd.f32 0.2548296, %v1277_v18  ;;  %v3052_v2 = vadd.f32 %v2917_v8, %v2850_v14  ;;  %v1330_v56 = vsub.f32 0.0, %v2977_v36 }
 0x391   :  { %v1234_v25 = vadd.f32 1.4214138, %v1218_v3  ;;  %v1123_v28 = vmul.f32 0.3275911, %v1107_v26  ;;  %v1105_v11 = vand.u32 2147483647, %v3048_v23  ;;  %v3063_v46 = vadd.f32 %v2850_v14, %v2921_v30 }
 0x392   :  { %v1455_v51 = vmul.f32 %v1439_v40, %v1039_v31  ;;  %v1309_v32 = vmul.f32 %v2987_v37, %v1293_v20  ;;  %v1973_v16 = vpop.eup %1972  ;;  %v1085_v37 = vsel %vm1069_vm8, 1.0, %v3323_v48  ;;  %v1436_v47 = vadd.f32 1.0, %v1420_v19 }
 0x393   :  { %v1139_v15 = vadd.f32 1.0, %v1123_v28  ;;  %v1328_v42 = vsub.f32 0.0, %v1104_v9  ;;  %v1121_v60 = vmul.f32 0.3275911, %v1105_v11  ;;  %v3058_v49 = vmul.f32 0.70710677, %v3052_v2 }
 0x394   :  { %v1467_v61 = vpack.c.bf16 %v1455_v51, %v1454_v63  ;;  %v1389_v13 = vmul.f32 %v1973_v16, %v1309_v32  ;;  %v1250_v29 = vmul.f32 %v3017_v21, %v1234_v25  ;;  %v1036_v1 = vmul.f32 0.5, %v2867_v22 }
 0x395   :  { %1976 = vrcp.f32 %v1139_v15  ;;  %v1137_v34 = vadd.f32 1.0, %v1121_v60  ;;  %v1037_v62 = vmul.f32 0.5, %v2914_v5  ;;  %v1346_v33 = vmul.f32 %v1330_v56, %v2977_v36 }
 0x396   :  { %v1405_v54 = vsub.f32 1.0, %v1389_v13  ;;  %v3071_v55 = vand.u32 2147483647, %v3058_v49  ;;  %v1452_v0 = vmul.f32 %v1436_v47, %v1036_v1  ;;  %v1344_v7 = vmul.f32 %v1328_v42, %v1104_v9 }
 0x397   :  { %1978 = vrcp.f32 %v1137_v34  ;;  %v1266_v41 = vadd.f32 -0.28449672, %v1250_v29  ;;  %v3076_v18 = vmul.f32 0.70710677, %v3063_v46  ;;  %v3080_v5 = vadd.f32 %v2925_v4, %v2850_v14 }
 0x398   :  { %v1421_v8 = vmul.f32 %v1405_v54, %v1085_v37  ;;  %v3066_v43 = vpop.eup %1974  ;;  %v1126_v22 = vmul.f32 0.3275911, %v3071_v55  ;;  %v1372_v52 = vmul.f32 1.442695, %v1346_v33  ;;  %v1331_v31 = vsub.f32 0.0, %v1107_v26 }
 0x399   :  { %v1184_v53 = vmul.f32 1.0614054, %v3066_v43  ;;  %v3084_v9 = vand.u32 2147483647, %v3076_v18  ;;  %v1282_v3 = vmul.f32 %v3017_v21, %v1266_v41  ;;  %v1368_v50 = vmul.f32 1.442695, %v1344_v7 }
 0x39a   :  { %v1437_v57 = vadd.f32 1.0, %v1421_v8  ;;  %v1142_v40 = vadd.f32 1.0, %v1126_v22  ;;  %v3088_v63 = vmul.f32 0.70710677, %v3080_v5  ;;  %v1329_v51 = vsub.f32 0.0, %v1105_v11 }
 0x39b   :  { %v1200_v45 = vadd.f32 -1.4531521, %v1184_v53  ;;  %v1124_v32 = vmul.f32 0.3275911, %v3084_v9  ;;  %v3096_v19 = vmul.f32 0.5, %v2951_v58  ;;  %v1347_v13 = vmul.f32 %v1331_v31, %v1107_v26 }
 0x39c   :  { %v1453_v30 = vmul.f32 %v1437_v57, %v1037_v62  ;;  %1980 = vrcp.f32 %v1142_v40  ;;  %v3099_v25 = vand.u32 2147483647, %v3088_v63  ;;  %v3105_v56 = vadd.f32 %v2850_v14, %v2933_v59 }
 0x39d   :  { %v1216_v20 = vmul.f32 %v3066_v43, %v1200_v45  ;;  %1982 = vpow2.f32 %v1372_v52  ;;  %v1140_v54 = vadd.f32 1.0, %v1124_v32  ;;  %vm1074_vm9 = vcmp.ge.f32.partialorder %v2964_v24, 0.0 }
 0x39e   :  { %v1466_v36 = vpack.c.bf16 %v1453_v30, %v1452_v0  ;;  %1984 = vpow2.f32 %v1368_v50  ;;  %v1127_v58 = vmul.f32 0.3275911, %v3099_v25  ;;  %v1345_v42 = vmul.f32 %v1329_v51, %v1105_v11 }
 0x39f   :  { %v1232_v4 = vadd.f32 1.4214138, %v1216_v20  ;;  %v3093_v16 = vpop.eup %1976  ;;  %1986 = vrcp.f32 %v1140_v54  ;;  %vm1072_vm10 = vcmp.ge.f32.partialorder %v3007_v39, 0.0  ;;  %v1374_v60 = vmul.f32 1.442695, %v1347_v13 }
 0x3a0   :  { %1839 = vmatprep.mubr.msk.bf16.mxu1 %vm60_vm0, %v1466_v36  ;;  %v1187_v37 = vmul.f32 1.0614054, %v3093_v16  ;;  %v1143_v29 = vadd.f32 1.0, %v1127_v58  ;;  %v1334_v1 = vsub.f32 0.0, %v3071_v55  ;;  %v3117_v34 = vmul.f32 0.70710677, %v3105_v56 }
 0x3a1   :  { %1840 = vmatmul.mubr.msk.bf16.gmra.mrb[20].mxu1 %vm60_vm0, %v1467_v61  ;;  %v1248_v28 = vmul.f32 %v3066_v43, %v1232_v4  ;;  %v1298_v61 = vadd.f32 0.2548296, %v1282_v3  ;;  %v3109_v15 = vpop.eup %1978  ;;  %v1090_v11 = vsel %vm1074_vm9, 1.0, %v3323_v48  ;;  %v3124_v57 = vmul.f32 0.5, %v2997_v44 }
 0x3a2   :  { %v1203_v47 = vadd.f32 -1.4531521, %v1187_v37  ;;  %v1185_v8 = vmul.f32 1.0614054, %v3109_v15  ;;  %v1370_v7 = vmul.f32 1.442695, %v1345_v42  ;;  %1988 = vrcp.f32 %v1143_v29 }
 0x3a3   :  { %v1264_v26 = vadd.f32 -0.28449672, %v1248_v28  ;;  %v1314_v62 = vmul.f32 %v3017_v21, %v1298_v61  ;;  %v1088_v41 = vsel %vm1072_vm10, 1.0, %v3323_v48  ;;  %1990 = vpow2.f32 %v1374_v60 }
 0x3a4   :  { %v1219_v59 = vmul.f32 %v3093_v16, %v1203_v47  ;;  %v1201_v33 = vadd.f32 -1.4531521, %v1185_v8  ;;  %v3133_v22 = vand.u32 2147483647, %v3117_v34  ;;  %v3136_v44 = vmul.f32 0.5, %v3024_v6 }
 0x3a5   :  { %v1280_v14 = vmul.f32 %v3066_v43, %v1264_v26  ;;  %v1350_v36 = vmul.f32 %v1334_v1, %v3071_v55  ;;  %v3143_v39 = vmul.f32 0.5, %v3040_v27  ;;  %1992 = vpow2.f32 %v1370_v7 }
 0x3a6   :  { %v1235_v53 = vadd.f32 1.4214138, %v1219_v59  ;;  %v3126_v30 = vpop.eup %1980  ;;  %v1217_v24 = vmul.f32 %v3109_v15, %v1201_v33  ;;  %v1125_v20 = vmul.f32 0.3275911, %v3133_v22  ;;  %vm1075_vm11 = vcmp.ge.f32.partialorder %v3036_v35, 0.0 }
 0x3a7   :  { %v1296_v0 = vadd.f32 0.2548296, %v1280_v14  ;;  %v1190_v45 = vmul.f32 1.0614054, %v3126_v30  ;;  %v1983_v52 = vpop.eup %1982  ;;  %v1332_v55 = vsub.f32 0.0, %v3084_v9  ;;  %v1335_v37 = vsub.f32 0.0, %v3099_v25 }
 0x3a8   :  { %v1251_v21 = vmul.f32 %v3093_v16, %v1235_v53  ;;  %v1233_v40 = vadd.f32 1.4214138, %v1217_v24  ;;  %v1394_v3 = vmul.f32 %v1983_v52, %v1314_v62  ;;  %v1985_v4 = vpop.eup %1984  ;;  %v1141_v32 = vadd.f32 1.0, %v1125_v20 }
 0x3a9   :  { %v1312_v31 = vmul.f32 %v3066_v43, %v1296_v0  ;;  %v1206_v6 = vadd.f32 -1.4531521, %v1190_v45  ;;  %v3149_v13 = vpop.eup %1986  ;;  %v1380_v28 = vmul.f32 1.442695, %v1350_v36  ;;  %v1091_v26 = vsel %vm1075_vm11, 1.0, %v3323_v48 }
 0x3aa   :  { %v1267_v50 = vadd.f32 -0.28449672, %v1251_v21  ;;  %v1249_v51 = vmul.f32 %v3109_v15, %v1233_v40  ;;  %v1188_v58 = vmul.f32 1.0614054, %v3149_v13  ;;  %1994 = vrcp.f32 %v1141_v32 }
 0x3ab   :  { %v1222_v43 = vmul.f32 %v3126_v30, %v1206_v6  ;;  %v1392_v54 = vmul.f32 %v1985_v4, %v1312_v31  ;;  %v1410_v35 = vsub.f32 1.0, %v1394_v3  ;;  %vm1073_vm12 = vcmp.ge.f32.partialorder %v3048_v23, 0.0 }
 0x3ac   :  { %v1283_v27 = vmul.f32 %v3093_v16, %v1267_v50  ;;  %v1265_v61 = vadd.f32 -0.28449672, %v1249_v51  ;;  %v1204_v8 = vadd.f32 -1.4531521, %v1188_v58  ;;  %v1348_v29 = vmul.f32 %v1332_v55, %v3084_v9  ;;  %v3159_v14 = vpop.eup %1988 }
 0x3ad   :  { %v1238_v42 = vadd.f32 1.4214138, %v1222_v43  ;;  %1996 = vpow2.f32 %v1380_v28  ;;  %v1351_v62 = vmul.f32 %v1335_v37, %v3099_v25  ;;  %v1991_v33 = vpop.eup %1990  ;;  %v1408_v0 = vsub.f32 1.0, %v1392_v54 }
 0x3ae   :  { %v1299_v47 = vadd.f32 0.2548296, %v1283_v27  ;;  %v1281_v60 = vmul.f32 %v3109_v15, %v1265_v61  ;;  %v1220_v7 = vmul.f32 %v3149_v13, %v1204_v8  ;;  %v1191_v24 = vmul.f32 1.0614054, %v3159_v14 }
 0x3af   :  { %v1254_v1 = vmul.f32 %v3126_v30, %v1238_v42  ;;  %v1426_v21 = vmul.f32 %v1410_v35, %v1090_v11  ;;  %v1333_v9 = vsub.f32 0.0, %v3133_v22  ;;  %v1376_v31 = vmul.f32 1.442695, %v1348_v29  ;;  %v1993_v20 = vpop.eup %1992 }
 0x3b0   :  { %v1315_v59 = vmul.f32 %v3093_v16, %v1299_v47  ;;  %v1297_v53 = vadd.f32 0.2548296, %v1281_v60  ;;  %v1236_v16 = vadd.f32 1.4214138, %v1220_v7  ;;  %v1207_v40 = vadd.f32 -1.4531521, %v1191_v24 }
 0x3b1   :  { %v1270_v36 = vadd.f32 -0.28449672, %v1254_v1  ;;  %v1089_v25 = vsel %vm1073_vm12, 1.0, %v3323_v48  ;;  %v1382_v6 = vmul.f32 1.442695, %v1351_v62  ;;  %v1424_v4 = vmul.f32 %v1408_v0, %v1088_v41 }
 0x3b2   :  { %v1395_v45 = vmul.f32 %v1991_v33, %v1315_v59  ;;  %v1313_v52 = vmul.f32 %v3109_v15, %v1297_v53  ;;  %v1252_v51 = vmul.f32 %v3149_v13, %v1236_v16  ;;  %v1223_v55 = vmul.f32 %v3159_v14, %v1207_v40 }
 0x3b3   :  { %v1286_v50 = vmul.f32 %v3126_v30, %v1270_v36  ;;  %v1442_v32 = vadd.f32 1.0, %v1426_v21  ;;  %v1349_v43 = vmul.f32 %v1333_v9, %v3133_v22  ;;  %1998 = vpow2.f32 %v1376_v31 }
 0x3b4   :  { %v1411_v3 = vsub.f32 1.0, %v1395_v45  ;;  %v1393_v11 = vmul.f32 %v1993_v20, %v1313_v52  ;;  %v1995_v28 = vpop.eup %1994  ;;  %v1268_v54 = vadd.f32 -0.28449672, %v1252_v51  ;;  %v1239_v23 = vadd.f32 1.4214138, %v1223_v55 }
 0x3b5   :  { %v1302_v27 = vadd.f32 0.2548296, %v1286_v50  ;;  %2000 = vpow2.f32 %v1382_v6  ;;  %v1189_v41 = vmul.f32 1.0614054, %v1995_v28  ;;  %v1440_v35 = vadd.f32 1.0, %v1424_v4 }
 0x3b6   :  { %v1427_v15 = vmul.f32 %v1411_v3, %v1091_v26  ;;  %v1409_v37 = vsub.f32 1.0, %v1393_v11  ;;  %v1284_v42 = vmul.f32 %v3149_v13, %v1268_v54  ;;  %v1255_v60 = vmul.f32 %v3159_v14, %v1239_v23 }
 0x3b7   :  { %v1318_v58 = vmul.f32 %v3126_v30, %v1302_v27  ;;  %v1997_v26 = vpop.eup %1996  ;;  %v1458_v8 = vmul.f32 %v1442_v32, %v3096_v19  ;;  %v1205_v29 = vadd.f32 -1.4531521, %v1189_v41  ;;  %v1378_v59 = vmul.f32 1.442695, %v1349_v43 }
 0x3b8   :  { %v1443_v61 = vadd.f32 1.0, %v1427_v15  ;;  %v1425_v47 = vmul.f32 %v1409_v37, %v1089_v25  ;;  %v1300_v33 = vadd.f32 0.2548296, %v1284_v42  ;;  %v1271_v0 = vadd.f32 -0.28449672, %v1255_v60 }
 0x3b9   :  { %v1398_v62 = vmul.f32 %v1997_v26, %v1318_v58  ;;  %v1221_v53 = vmul.f32 %v1995_v28, %v1205_v29  ;;  %v1456_v7 = vmul.f32 %v1440_v35, %v3124_v57  ;;  %vm1078_vm13 = vcmp.ge.f32.partialorder %v3058_v49, 0.0 }
 0x3ba   :  { %v1459_v22 = vmul.f32 %v1443_v61, %v3136_v44  ;;  %v1441_v1 = vadd.f32 1.0, %v1425_v47  ;;  %v1287_v21 = vmul.f32 %v3159_v14, %v1271_v0  ;;  %v1316_v19 = vmul.f32 %v3149_v13, %v1300_v33 }
 0x3bb   :  { %v1237_v45 = vadd.f32 1.4214138, %v1221_v53  ;;  %v1414_v36 = vsub.f32 1.0, %v1398_v62  ;;  %2002 = vpow2.f32 %v1378_v59  ;;  %vm1079_vm14 = vcmp.ge.f32.partialorder %v3088_v63, 0.0 }
 0x3bc   :  { %v1469_v30 = vpack.c.bf16 %v1459_v22, %v1458_v8  ;;  %v1457_v24 = vmul.f32 %v1441_v1, %v3143_v39  ;;  %v1303_v9 = vadd.f32 0.2548296, %v1287_v21  ;;  %v1094_v39 = vsel %vm1078_vm13, 1.0, %v3323_v48 }
 0x3bd   :  { %v1253_v52 = vmul.f32 %v1995_v28, %v1237_v45  ;;  %v1999_v16 = vpop.eup %1998  ;;  %v1430_v49 = vmul.f32 %v1414_v36, %v1094_v39  ;;  %vm1076_vm15 = vcmp.ge.f32.partialorder %v3076_v18, 0.0  ;;  %v1046_v32 = vmul.f32 0.5, %v3052_v2  ;;  %v3326_v36 = vld [vmem:[#allocation5_spill] sm:$0xff] }
 0x3be   :  { %v1468_v44 = vpack.c.bf16 %v1457_v24, %v1456_v7  ;;  %v1319_v31 = vmul.f32 %v3159_v14, %v1303_v9  ;;  %v1396_v40 = vmul.f32 %v1999_v16, %v1316_v19  ;;  %v1095_v14 = vsel %vm1079_vm14, 1.0, %v3323_v48  ;;  %v3324_v7 = vld [vmem:[#allocation4_spill] sm:$0xff] }
 0x3bf   :  { %v2001_v57 = vpop.eup %2000  ;;  %v1269_v20 = vadd.f32 -0.28449672, %v1253_v52  ;;  %v1446_v4 = vadd.f32 1.0, %v1430_v49  ;;  %v1092_v15 = vsel %vm1076_vm15, 1.0, %v3323_v48  ;;  %v1047_v27 = vmul.f32 0.5, %v3080_v5  ;;  %v3327_v52 = vld [vmem:[#allocation3_spill] sm:$0xff] }
 0x3c0   :  { %1843 = vmatprep.mubr.msk.bf16.mxu1 %vm60_vm0, %v1468_v44  ;;  %v1399_v13 = vmul.f32 %v2001_v57, %v1319_v31  ;;  %v1412_v50 = vsub.f32 1.0, %v1396_v40  ;;  %vm1077_vm1 = vcmp.ge.f32.partialorder %v3117_v34, 0.0  ;;  %v1044_v35 = vmul.f32 0.5, %v3063_v46  ;;  %v1702_v34 = vld [vmem:[%s3295_s11] ss:$0 sm:$0xff]  ;;  %v3328_v49 = vld [vmem:[#allocation8_spill] sm:$0xff] }
 0x3c1   :  { %1844 = vmatmul.mubr.msk.bf16.gmra.mrb[24].mxu1 %vm60_vm0, %v1469_v30  ;;  %v1285_v3 = vmul.f32 %v1995_v28, %v1269_v20  ;;  %v1462_v18 = vmul.f32 %v1446_v4, %v1046_v32  ;;  %v1093_v58 = vsel %vm1077_vm1, 1.0, %v3323_v48  ;;  %v1045_v2 = vmul.f32 0.5, %v3105_v56  ;;  %v3330_v4 = vld [vmem:[#allocation9_spill] sm:$0xff] }
 0x3c2   :  { %v1415_v25 = vsub.f32 1.0, %v1399_v13  ;;  %v1428_v43 = vmul.f32 %v1412_v50, %v1092_v15  ;;  %v3329_v50 = vld [vmem:[#allocation6_spill] sm:$0xff] }
 0x3c3   :  { %v1301_v6 = vadd.f32 0.2548296, %v1285_v3 }
 0x3c4   :  { %v1431_v11 = vmul.f32 %v1415_v25, %v1095_v14  ;;  %v1444_v41 = vadd.f32 1.0, %v1428_v43 }
 0x3c5   :  { %v1317_v51 = vmul.f32 %v1995_v28, %v1301_v6  ;;  %v2003_v55 = vpop.eup %2002 }
 0x3c6   :  { %v1447_v63 = vadd.f32 1.0, %v1431_v11  ;;  %v1460_v42 = vmul.f32 %v1444_v41, %v1044_v35 }
 0x3c7   :  { %v1397_v37 = vmul.f32 %v2003_v55, %v1317_v51  ;;  %v3331_v51 = vld [vmem:[#allocation7_spill] sm:$0xff] }
 0x3c8   :  { %v1463_v54 = vmul.f32 %v1447_v63, %v1047_v27 }
 0x3c9   :  { %v1413_v23 = vsub.f32 1.0, %v1397_v37  ;;  %v3332_v37 = vld [vmem:[#allocation12_spill] sm:$0xff] }
 0x3ca   :  { %v1471_v61 = vpack.c.bf16 %v1463_v54, %v1462_v18 }
 0x3cb   :  { %v1429_v28 = vmul.f32 %v1413_v23, %v1093_v58 }
 0x3cd   :  { %v1445_v47 = vadd.f32 1.0, %v1429_v28  ;;  %v3334_v28 = vld [vmem:[#allocation13_spill] sm:$0xff] }
 0x3cf   :  { %v1461_v5 = vmul.f32 %v1445_v47, %v1045_v2  ;;  %v3335_v2 = vld [vmem:[#allocation11_spill] sm:$0xff] }
 0x3d1   :  { %v1470_v60 = vpack.c.bf16 %v1461_v5, %v1460_v42 }
 0x3d3   :  { %1847 = vmatprep.mubr.msk.bf16.mxu1 %vm60_vm0, %v1470_v60 }
 0x3d4   :  { %1848 = vmatmul.mubr.msk.bf16.gmra.mrb[28].mxu1 %vm60_vm0, %v1471_v61  ;;  %v3333_v61 = vld [vmem:[#allocation10_spill] sm:$0xff] }
 0x45f   :  { %v1837_v26 = vpop.f32.mrb[16].mxu1 }
 0x460   :  { %v1578_v48 = vadd.f32 %v1837_v26, %v1702_v34  ;;  %v1569_v8 = vpop.f32.mrb[17].mxu1 }
 0x461   :  { %v1570_v22 = vadd.f32 %v1702_v34, %v1569_v8  ;;  %v1838_v29 = vpop.f32.mrb[18].mxu1 }
 0x462   :  { %v1634_v46 = vadd.f32 %v1578_v48, %v2749_v38  ;;  %v1581_v56 = vadd.f32 %v1838_v29, %v1702_v34  ;;  %v1572_v59 = vpop.f32.mrb[19].mxu1 }
 0x463   :  { %v1632_v1 = vadd.f32 %v1570_v22, %v2737_v10  ;;  %v1573_v62 = vadd.f32 %v1702_v34, %v1572_v59 }
 0x464   :  { %1650 = vst.msk [vmem:[%s3296_s12 + $0x10] sm:$0xff] %vm60_vm0, %v1634_v46  ;;  %v1635_v33 = vadd.f32 %v1581_v56, %v2754_v17 }
 0x465   :  { %1648 = vst.msk [vmem:[%s3296_s12] sm:$0xff] %vm60_vm0, %v1632_v1  ;;  %v1633_v0 = vadd.f32 %v1573_v62, %v2742_v12  ;;  %v3325_v12 = vld [vmem:[#allocation2_spill] sm:$0xff] }
 0x466   :  { %1651 = vst.msk [vmem:[%s3296_s12 + $0x18] sm:$0xff] %vm60_vm0, %v1635_v33 }
 0x467   :  { %1649 = vst.msk [vmem:[%s3296_s12 + $0x8] sm:$0xff] %vm60_vm0, %v1633_v0 }
 0x474   :  { %v1841_v10 = vpop.f32.mrb[20].mxu1 }
 0x475   :  { %v1594_v38 = vadd.f32 %v1841_v10, %v1702_v34  ;;  %v1585_v17 = vpop.f32.mrb[21].mxu1 }
 0x476   :  { %v1586_v30 = vadd.f32 %v1702_v34, %v1585_v17  ;;  %v1842_v53 = vpop.f32.mrb[22].mxu1 }
 0x477   :  { %v1638_v24 = vadd.f32 %v1594_v38, %v3324_v7  ;;  %v1597_v21 = vadd.f32 %v1842_v53, %v1702_v34  ;;  %v1588_v19 = vpop.f32.mrb[23].mxu1 }
 0x478   :  { %v1636_v45 = vadd.f32 %v1586_v30, %v3325_v12  ;;  %v1589_v44 = vadd.f32 %v1702_v34, %v1588_v19 }
 0x479   :  { %1654 = vst.msk [vmem:[%s3296_s12 + $0x30] sm:$0xff] %vm60_vm0, %v1638_v24  ;;  %v1639_v9 = vadd.f32 %v1597_v21, %v3326_v36 }
 0x47a   :  { %1652 = vst.msk [vmem:[%s3296_s12 + $0x20] sm:$0xff] %vm60_vm0, %v1636_v45  ;;  %v1637_v16 = vadd.f32 %v1589_v44, %v3327_v52 }
 0x47b   :  { %1655 = vst.msk [vmem:[%s3296_s12 + $0x38] sm:$0xff] %vm60_vm0, %v1639_v9 }
 0x47c   :  { %1653 = vst.msk [vmem:[%s3296_s12 + $0x28] sm:$0xff] %vm60_vm0, %v1637_v16 }
 0x494   :  { %v1845_v31 = vpop.f32.mrb[24].mxu1 }
 0x495   :  { %v1610_v57 = vadd.f32 %v1845_v31, %v1702_v34  ;;  %v1601_v39 = vpop.f32.mrb[25].mxu1 }
 0x496   :  { %v1602_v40 = vadd.f32 %v1702_v34, %v1601_v39  ;;  %v1846_v20 = vpop.f32.mrb[26].mxu1 }
 0x497   :  { %v1642_v13 = vadd.f32 %v1610_v57, %v3328_v49  ;;  %v1613_v3 = vadd.f32 %v1846_v20, %v1702_v34  ;;  %v1604_v25 = vpop.f32.mrb[27].mxu1 }
 0x498   :  { %v1640_v14 = vadd.f32 %v1602_v40, %v3329_v50  ;;  %v1605_v6 = vadd.f32 %v1702_v34, %v1604_v25 }
 0x499   :  { %1658 = vst.msk [vmem:[%s3296_s12 + $0x50] sm:$0xff] %vm60_vm0, %v1642_v13  ;;  %v1643_v11 = vadd.f32 %v1613_v3, %v3330_v4 }
 0x49a   :  { %1656 = vst.msk [vmem:[%s3296_s12 + $0x40] sm:$0xff] %vm60_vm0, %v1640_v14  ;;  %v1641_v55 = vadd.f32 %v1605_v6, %v3331_v51 }
 0x49b   :  { %1659 = vst.msk [vmem:[%s3296_s12 + $0x58] sm:$0xff] %vm60_vm0, %v1643_v11 }
 0x49c   :  { %1657 = vst.msk [vmem:[%s3296_s12 + $0x48] sm:$0xff] %vm60_vm0, %v1641_v55 }
 0x4a7   :  { %v1849_v32 = vpop.f32.mrb[28].mxu1 }
 0x4a8   :  { %v1626_v15 = vadd.f32 %v1849_v32, %v1702_v34  ;;  %v1617_v27 = vpop.f32.mrb[29].mxu1 }
 0x4a9   :  { %v1618_v63 = vadd.f32 %v1702_v34, %v1617_v27  ;;  %v1850_v43 = vpop.f32.mrb[30].mxu1 }
 0x4aa   :  { %v1646_v18 = vadd.f32 %v1626_v15, %v3332_v37  ;;  %v1629_v54 = vadd.f32 %v1850_v43, %v1702_v34  ;;  %v1620_v23 = vpop.f32.mrb[31].mxu1 }
 0x4ab   :  { %v1644_v58 = vadd.f32 %v1618_v63, %v3333_v61  ;;  %v1621_v41 = vadd.f32 %v1702_v34, %v1620_v23 }
 0x4ac   :  { %1662 = vst.msk [vmem:[%s3296_s12 + $0x70] sm:$0xff] %vm60_vm0, %v1646_v18  ;;  %v1647_v35 = vadd.f32 %v1629_v54, %v3334_v28 }
 0x4ad   :  { %1660 = vst.msk [vmem:[%s3296_s12 + $0x60] sm:$0xff] %vm60_vm0, %v1644_v58  ;;  %v1645_v47 = vadd.f32 %v1621_v41, %v3335_v2 }
 0x4ae   :  { %1663 = vst.msk [vmem:[%s3296_s12 + $0x78] sm:$0xff] %vm60_vm0, %v1647_v35 }
 0x4af   :  { %1661 = vst.msk [vmem:[%s3296_s12 + $0x68] sm:$0xff] %vm60_vm0, %v1645_v47 }

</bundles_post_ra>
